<compile_context>
chip_gen: v6e
topology: v6e:2x2x1
jax: 0.10.0
libtpu: 0.0.40
codegen_flags: <defaults>
</compile_context>

<pallas_src>
import numpy as np
import jax
import jax.numpy as jnp
from jax.experimental import pallas as pl
from jax.experimental.pallas import tpu as pltpu

PAD_token = 0


def _round_up(x, m):
    return ((x + m - 1) // m) * m


def _compiler_params(sem, est_vmem_bytes):
    # Raise v5e's 16 MiB default scoped-VMEM limit when needed; cap at 64 MiB so the
    # same request is also valid on v7x (64 MiB physical per TensorCore).
    limit = int(max(32 << 20, min(2 * est_vmem_bytes, 64 << 20)))
    return pltpu.CompilerParams(dimension_semantics=sem, vmem_limit_bytes=limit)


# ---------------------------------------------------------------------------
# Forward pass (two pallas_calls: fused gates+recurrence -> projection+log_softmax)
# ---------------------------------------------------------------------------
def decoder_rnn_forward(params, hidden, target_input, lengths_np, *, tc=16):
    """
    params: dict of weights (see init_params)
    hidden: (1, B, H) float32   -- initial GRU hidden state
    target_input: (B, T) int32  -- token ids (PAD_token = 0 padding)
    lengths_np: numpy int array (B,) -- true sequence lengths (host-side, like .cpu().numpy())
    Returns (log_probs (B, T_out, V), hidden) with T_out = max(lengths); like the
    PyTorch forward(), the *input* hidden is returned (nn.GRU's final state is unused).
    """
    B, _T = target_input.shape
    H = hidden.shape[-1]
    V = params["w_out"].shape[-1]
    T_out = int(np.max(lengths_np))          # pad_packed_sequence trims to max length
    f32 = jnp.float32

    # ---- padded / tiled geometry -------------------------------------------
    B_p = _round_up(B, 8)                    # sublane-dense full-batch tile
    H_p = _round_up(H, 128)                  # lane-dense hidden
    V_p = _round_up(V, 128)                  # lane-dense vocab (unmasked stores)
    tc = max(1, min(tc, T_out))              # no more fully-masked steps than needed
    T_pad = _round_up(T_out, tc)
    n_tchunks = T_pad // tc
    CHUNK_ROWS = tc * B_p                    # rows of the per-chunk input-gate matmul

    ROWS = T_pad * B_p                       # (time, batch) rows of the projection
    ROW_TILE = min(512, ROWS)                # decoupled from tc*B_p; 512 at real shapes
    ROWS_P = _round_up(ROWS, ROW_TILE)
    n_rtiles = ROWS_P // ROW_TILE

    # ---- fuse + pad parameters (layout prep; one-time cost in real use) -----
    # NOTE: cast these to bfloat16 on v6e/v7x (matmuls keep preferred_element_type=
    # float32) to halve weight DMA/VMEM; kept f32 here to match the fp32 reference.
    def pad2(x, r, c):
        return jnp.pad(x, ((0, r - x.shape[0]), (0, c - x.shape[1])))

    w_ih_f = jnp.concatenate([pad2(params["w_ih"][g], H_p, H_p) for g in range(3)], axis=1)
    w_hh_f = jnp.concatenate([pad2(params["w_hh"][g], H_p, H_p) for g in range(3)], axis=1)
    b_ih_f = jnp.concatenate([pad2(params["b_ih"][g], 1, H_p) for g in range(3)], axis=1)
    b_hh_f = jnp.concatenate([pad2(params["b_hh"][g], 1, H_p) for g in range(3)], axis=1)
    w_out_p = pad2(params["w_out"], H_p, V_p)
    # Vocab-padding mask folded into the bias: padded w_out columns are 0, so a
    # -1e30 bias makes those logits vanish under softmax (no in-kernel iota/where).
    b_out_p = jnp.where(jnp.arange(V_p)[None, :] < V,
                        pad2(params["b_out"], 1, V_p), jnp.float32(-1e30))

    # ---- activations: embedding lookup (XLA gather), time-major rows --------
    # TODO(synk): the embedding gather stays in XLA; a Pallas version would need a
    # manual DMA gather driven by scalar-prefetched token ids.
    emb = params["embedding"][target_input[:, :T_out]]           # (B, T_out, H)
    emb_tm = jnp.transpose(emb, (1, 0, 2))                       # (T_out, B, H)
    emb_tm = jnp.pad(emb_tm, ((0, T_pad - T_out), (0, B_p - B), (0, H_p - H)))
    emb_rows = emb_tm.reshape(ROWS, H_p)                         # row r = t*B_p + b

    h0 = jnp.pad(hidden[0], ((0, B_p - B), (0, H_p - H)))        # (B_p, H_p)
    lens = jnp.pad(jnp.asarray(lengths_np, jnp.int32), (0, B_p - B)).reshape(B_p, 1)

    # =========================================================================
    # Kernel 1: fused GRU recurrence.  Per time chunk: one (tc*B_p, H_p)@(H_p, 3H_p)
    # MXU push for the input-side gates (kept in VMEM scratch -- no HBM gx
    # intermediate), then tc sequential h-side steps over the full batch.
    # =========================================================================
    def gru_kernel(x_ref, len_ref, h0_ref, wih_ref, bih_ref, whh_ref, bhh_ref,
                   y_ref, gx_ref, h_ref):
        c = pl.program_id(0)

        @pl.when(c == 0)
        def _():
            h_ref[...] = h0_ref[...]

        # Chunk-level input gates: M = tc*B_p keeps the MXU filled.
        gx_ref[...] = (jnp.dot(x_ref[...], wih_ref[...], preferred_element_type=f32)
                       + bih_ref[...])

        whh = whh_ref[...]                   # (H_p, 3H_p) fused (r, z, n)
        bhh = bhh_ref[...]                   # (1, 3H_p)
        lens_v = len_ref[...]                # (B_p, 1) int32
        base_t = c * tc

        def step(u, h):
            off = pl.multiple_of(u * B_p, B_p)
            gx_t = gx_ref[pl.ds(off, B_p), :]                    # (B_p, 3H_p)
            gh = jnp.dot(h, whh, preferred_element_type=f32) + bhh
            r = jax.nn.sigmoid(gx_t[:, :H_p] + gh[:, :H_p])
            z = jax.nn.sigmoid(gx_t[:, H_p:2 * H_p] + gh[:, H_p:2 * H_p])
            n = jnp.tanh(gx_t[:, 2 * H_p:] + r * gh[:, 2 * H_p:])
            h_new = (1.0 - z) * n + z * h
            # packed-sequence semantics: hidden only advances where t < length[b];
            # pad_packed_sequence zero-pads outputs past each sequence's length.
            m = (base_t + u < lens_v).astype(f32)                # (B_p, 1)
            y_ref[pl.ds(off, B_p), :] = m * h_new
            return m * h_new + (1.0 - m) * h

        # TODO(synk): at large H_p use partial unroll (e.g. unroll=4) to bound vreg
        # pressure from the unrolled gx_t/gh live ranges.
        h_ref[...] = jax.lax.fori_loop(0, tc, step, h_ref[...], unroll=True)

    est_rec = 4 * (2 * CHUNK_ROWS * H_p            # emb chunk (double-buffered)
                   + 2 * CHUNK_ROWS * H_p          # y chunk (double-buffered)
                   + 4 * H_p * 3 * H_p             # fused W_ih + W_hh (x2 buffers)
                   + CHUNK_ROWS * 3 * H_p          # gx scratch
                   + 3 * B_p * H_p + 8 * 3 * H_p + 2 * B_p)

    y_rows = pl.pallas_call(
        gru_kernel,
        out_shape=jax.ShapeDtypeStruct((ROWS, H_p), f32),
        grid_spec=pltpu.PrefetchScalarGridSpec(
            num_scalar_prefetch=0,
            grid=(n_tchunks,),
            in_specs=[
                pl.BlockSpec((CHUNK_ROWS, H_p), lambda c: (c, 0)),   # emb chunk
                pl.BlockSpec((B_p, 1), lambda c: (0, 0)),            # lengths
                pl.BlockSpec((B_p, H_p), lambda c: (0, 0)),          # h0
                pl.BlockSpec((H_p, 3 * H_p), lambda c: (0, 0)),      # W_ih fused
                pl.BlockSpec((1, 3 * H_p), lambda c: (0, 0)),        # b_ih fused
                pl.BlockSpec((H_p, 3 * H_p), lambda c: (0, 0)),      # W_hh fused
                pl.BlockSpec((1, 3 * H_p), lambda c: (0, 0)),        # b_hh fused
            ],
            out_specs=pl.BlockSpec((CHUNK_ROWS, H_p), lambda c: (c, 0)),
            scratch_shapes=[pltpu.VMEM((CHUNK_ROWS, 3 * H_p), f32),  # chunk input gates
                            pltpu.VMEM((B_p, H_p), f32)],            # carried hidden
        ),
        # Single sequential time axis; the whole batch rides in one tile so the
        # h-matmul M dim is as large as possible on single-TC v5e/v6e.
        # TODO(synk): on v7x add a leading size-2 'parallel' batch-tile axis so the
        # two TensorCores each run half of the recurrence (megacore split).
        compiler_params=_compiler_params(("arbitrary",), est_rec),
    )(emb_rows, lens, h0, w_ih_f, b_ih_f, w_hh_f, b_hh_f)

    # =========================================================================
    # Kernel 2: output projection + log_softmax, row-tiled over all (t, b) rows.
    # =========================================================================
    # TODO(synk): for very large vocabularies add a V-tile grid axis with a two-pass
    # log-softmax so W_out streams tile-by-tile instead of being fully VMEM-resident
    # (mandatory on v7x's 64 MiB VMEM at realistic H/V); bf16 weights/log-probs
    # further halve DMA on v5e.
    def proj_kernel(y_ref, w_ref, b_ref, o_ref):
        logits = (jnp.dot(y_ref[...], w_ref[...], preferred_element_type=f32)
                  + b_ref[...])
        lmax = jnp.max(logits, axis=-1, keepdims=True)
        shifted = logits - lmax
        lse = jnp.log(jnp.sum(jnp.exp(shifted), axis=-1, keepdims=True))
        o_ref[...] = shifted - lse

    if ROWS_P != ROWS:
        y_rows = jnp.pad(y_rows, ((0, ROWS_P - ROWS), (0, 0)))

    est_proj = 4 * (2 * ROW_TILE * H_p + 2 * H_p * V_p + 2 * V_p + 2 * ROW_TILE * V_p)

    logp_rows = pl.pallas_call(
        proj_kernel,
        out_shape=jax.ShapeDtypeStruct((ROWS_P, V_p), f32),
        grid_spec=pltpu.PrefetchScalarGridSpec(
            num_scalar_prefetch=0,
            grid=(n_rtiles,),
            in_specs=[
                pl.BlockSpec((ROW_TILE, H_p), lambda i: (i, 0)),
                pl.BlockSpec((H_p, V_p), lambda i: (0, 0)),
                pl.BlockSpec((1, V_p), lambda i: (0, 0)),
            ],
            out_specs=pl.BlockSpec((ROW_TILE, V_p), lambda i: (i, 0)),
        ),
        compiler_params=_compiler_params(("parallel",), est_proj),
    )(y_rows, w_out_p, b_out_p)

    logp = logp_rows[:ROWS].reshape(T_pad, B_p, V_p)
    log_probs = jnp.transpose(logp, (1, 0, 2))[:B, :T_out, :V]   # batch-first, unpadded
    return log_probs, hidden                                     # forward() returns the INPUT hidden


# ---------------------------------------------------------------------------
# Pure-JAX reference (for correctness check)
# ---------------------------------------------------------------------------
def decoder_rnn_reference(params, hidden, target_input, lengths_np):
    B, T = target_input.shape
    T_out = int(np.max(lengths_np))
    emb = params["embedding"][target_input][:, :T_out, :]        # (B, T_out, H)
    mask = (np.arange(T_out)[None, :] < lengths_np[:, None]).astype(np.float32)
    mask = jnp.asarray(mask)                                     # (B, T_out)

    h = hidden[0]
    outs = []
    for t in range(T_out):
        x = emb[:, t, :]
        m = mask[:, t][:, None]
        i_r = x @ params["w_ih"][0] + params["b_ih"][0]
        i_z = x @ params["w_ih"][1] + params["b_ih"][1]
        i_n = x @ params["w_ih"][2] + params["b_ih"][2]
        h_r = h @ params["w_hh"][0] + params["b_hh"][0]
        h_z = h @ params["w_hh"][1] + params["b_hh"][1]
        h_n = h @ params["w_hh"][2] + params["b_hh"][2]
        r = jax.nn.sigmoid(i_r + h_r)
        z = jax.nn.sigmoid(i_z + h_z)
        n = jnp.tanh(i_n + r * h_n)
        h_new = (1.0 - z) * n + z * h
        h = m * h_new + (1.0 - m) * h
        outs.append(m * h_new)
    out = jnp.stack(outs, axis=1)                                # (B, T_out, H)
    logits = out @ params["w_out"] + params["b_out"]
    return jax.nn.log_softmax(logits, axis=-1), hidden


# ---------------------------------------------------------------------------
# Deterministic parameter init (shapes follow DecoderRNN.__init__)
# ---------------------------------------------------------------------------
def init_params(key, hidden_size, output_size):
    ks = jax.random.split(key, 7)
    scale = 1.0 / np.sqrt(hidden_size)
    emb = jax.random.normal(ks[0], (output_size, hidden_size), jnp.float32) * 0.1
    emb = emb.at[PAD_token].set(0.0)                             # padding_idx=PAD_token
    params = {
        "embedding": emb,
        # GRU weights stored pre-transposed for x @ W; stacked gate order (r, z, n)
        "w_ih": jax.random.uniform(ks[1], (3, hidden_size, hidden_size), jnp.float32, -scale, scale),
        "w_hh": jax.random.uniform(ks[2], (3, hidden_size, hidden_size), jnp.float32, -scale, scale),
        "b_ih": jax.random.uniform(ks[3], (3, 1, hidden_size), jnp.float32, -scale, scale),
        "b_hh": jax.random.uniform(ks[4], (3, 1, hidden_size), jnp.float32, -scale, scale),
        # Linear out: (H, V) for h @ W, bias (1, V)
        "w_out": jax.random.uniform(ks[5], (hidden_size, output_size), jnp.float32, -scale, scale),
        "b_out": jax.random.uniform(ks[6], (1, output_size), jnp.float32, -scale, scale),
    }
    return params


if __name__ == "__main__":
    # Force full-f32 matmul precision in the XLA reference (TPU default can demote
    # f32 dots to bf16, which would break the fp32 comparison below).
    jax.config.update("jax_default_matmul_precision", "highest")

    B, T, H, V = 2, 8, 32, 64          # batch, max seq len, hidden_size, output_size

    key = jax.random.PRNGKey(0)
    kp, kh, kt = jax.random.split(key, 3)
    params = init_params(kp, H, V)

    hidden = jax.random.normal(kh, (1, B, H), jnp.float32)       # (num_layers=1, B, H)

    lengths_np = np.array([7, 5], dtype=np.int32)                # host-side, like lengths.cpu().numpy()
    tokens_np = np.array(
        jax.random.randint(kt, (B, T), 1, V), dtype=np.int32)    # non-pad tokens
    for b in range(B):                                           # pad beyond each length
        tokens_np[b, lengths_np[b]:] = PAD_token
    target_input = jnp.asarray(tokens_np)

    log_probs, hidden_out = decoder_rnn_forward(params, hidden, target_input, lengths_np)
    log_probs = jax.block_until_ready(log_probs)

    ref_log_probs, _ = decoder_rnn_reference(params, hidden, target_input, lengths_np)
    ref_log_probs = jax.block_until_ready(ref_log_probs)

    assert log_probs.shape == (B, int(lengths_np.max()), V)
    np.testing.assert_allclose(np.asarray(log_probs), np.asarray(ref_log_probs),
                               rtol=1e-4, atol=1e-4)
    print("KERNEL_OK")
</pallas_src>

<mosaic_0001>
module attributes {stable_mosaic.version = 11 : i64} {
  func.func @gru_kernel(%arg0: i32, %arg1: memref<56x128xf32, #tpu.memory_space<vmem>>, %arg2: memref<8x1xi32, #tpu.memory_space<vmem>>, %arg3: memref<8x128xf32, #tpu.memory_space<vmem>>, %arg4: memref<128x384xf32, #tpu.memory_space<vmem>>, %arg5: memref<1x384xf32, #tpu.memory_space<vmem>>, %arg6: memref<128x384xf32, #tpu.memory_space<vmem>>, %arg7: memref<1x384xf32, #tpu.memory_space<vmem>>, %arg8: memref<56x128xf32, #tpu.memory_space<vmem>>, %arg9: memref<56x384xf32, #tpu.memory_space<vmem>>, %arg10: memref<8x128xf32, #tpu.memory_space<vmem>>) attributes {dimension_semantics = [#tpu.dimension_semantics<arbitrary>], iteration_bounds = array<i64: 1>, scalar_prefetch = 0 : i64, scratch_operands = 2 : i64, tpu.core_type = #tpu.core_type<tc>, window_params = [{transform_indices = @transform_0, window_bounds = array<i64: 56, 128>}, {pipeline_mode = #tpu.pipeline_mode<synchronous>, transform_indices = @transform_1, window_bounds = array<i64: 8, 1>}, {pipeline_mode = #tpu.pipeline_mode<synchronous>, transform_indices = @transform_2, window_bounds = array<i64: 8, 128>}, {pipeline_mode = #tpu.pipeline_mode<synchronous>, transform_indices = @transform_3, window_bounds = array<i64: 128, 384>}, {pipeline_mode = #tpu.pipeline_mode<synchronous>, transform_indices = @transform_4, window_bounds = array<i64: 1, 384>}, {pipeline_mode = #tpu.pipeline_mode<synchronous>, transform_indices = @transform_5, window_bounds = array<i64: 128, 384>}, {pipeline_mode = #tpu.pipeline_mode<synchronous>, transform_indices = @transform_6, window_bounds = array<i64: 1, 384>}, {transform_indices = @transform_7, window_bounds = array<i64: 56, 128>}]} {
    %c0_i32 = arith.constant 0 : i32
    %0 = arith.cmpi eq, %arg0, %c0_i32 : i32
    %1 = arith.extui %0 : i1 to i32
    %c0_i32_0 = arith.constant 0 : i32
    %2 = arith.cmpi ne, %1, %c0_i32_0 : i32
    scf.if %2 {
      %c0_75 = arith.constant 0 : index
      %c0_76 = arith.constant 0 : index
      %359 = vector.load %arg3[%c0_75, %c0_76] : memref<8x128xf32, #tpu.memory_space<vmem>>, vector<8x128xf32>
      %c0_77 = arith.constant 0 : index
      %c0_78 = arith.constant 0 : index
      %360 = vector.load %arg10[%c0_77, %c0_78] : memref<8x128xf32, #tpu.memory_space<vmem>>, vector<8x128xf32>
      tpu.vector_store %arg10[%c0_77, %c0_78], %359 {strides = array<i32>} : memref<8x128xf32, #tpu.memory_space<vmem>>, vector<8x128xf32>,
    } else {
    }
    %c0 = arith.constant 0 : index
    %c0_1 = arith.constant 0 : index
    %3 = vector.load %arg1[%c0, %c0_1] : memref<56x128xf32, #tpu.memory_space<vmem>>, vector<56x128xf32>
    %c0_2 = arith.constant 0 : index
    %c0_3 = arith.constant 0 : index
    %4 = vector.load %arg4[%c0_2, %c0_3] : memref<128x384xf32, #tpu.memory_space<vmem>>, vector<128x384xf32>
    %cst = arith.constant dense<0.000000e+00> : vector<56x384xf32>
    %5 = tpu.matmul %3, %4, %cst {dimension_numbers = #tpu.dot_dimension_numbers<[1], [0], [0], [1], [0, 0, 1, 1], [], []>, precision = #tpu.contract_precision<fp32>} : vector<56x128xf32>, vector<128x384xf32>, vector<56x384xf32> -> vector<56x384xf32>
    %c0_4 = arith.constant 0 : index
    %c0_5 = arith.constant 0 : index
    %6 = vector.load %arg5[%c0_4, %c0_5] : memref<1x384xf32, #tpu.memory_space<vmem>>, vector<1x384xf32>
    %7 = vector.broadcast %6 : vector<1x384xf32> to vector<56x384xf32>
    %8 = arith.addf %5, %7 : vector<56x384xf32>
    %c0_6 = arith.constant 0 : index
    %c0_7 = arith.constant 0 : index
    %9 = vector.load %arg9[%c0_6, %c0_7] : memref<56x384xf32, #tpu.memory_space<vmem>>, vector<56x384xf32>
    tpu.vector_store %arg9[%c0_6, %c0_7], %8 {strides = array<i32>} : memref<56x384xf32, #tpu.memory_space<vmem>>, vector<56x384xf32>,
    %c0_8 = arith.constant 0 : index
    %c0_9 = arith.constant 0 : index
    %10 = vector.load %arg6[%c0_8, %c0_9] : memref<128x384xf32, #tpu.memory_space<vmem>>, vector<128x384xf32>
    %c0_10 = arith.constant 0 : index
    %c0_11 = arith.constant 0 : index
    %11 = vector.load %arg7[%c0_10, %c0_11] : memref<1x384xf32, #tpu.memory_space<vmem>>, vector<1x384xf32>
    %c0_12 = arith.constant 0 : index
    %c0_13 = arith.constant 0 : index
    %12 = vector.load %arg2[%c0_12, %c0_13] : memref<8x1xi32, #tpu.memory_space<vmem>>, vector<8x1xi32>
    %c7_i32 = arith.constant 7 : i32
    %13 = arith.muli %arg0, %c7_i32 : i32
    %c0_14 = arith.constant 0 : index
    %c0_15 = arith.constant 0 : index
    %14 = vector.load %arg10[%c0_14, %c0_15] : memref<8x128xf32, #tpu.memory_space<vmem>>, vector<8x128xf32>
    %c0_i32_16 = arith.constant 0 : i32
    %c8_i32 = arith.constant 8 : i32
    %15 = arith.muli %c0_i32_16, %c8_i32 : i32
    %16 = tpu.assume_multiple %15, 8 : i32
    %17 = arith.index_cast %16 : i32 to index
    %c0_17 = arith.constant 0 : index
    %18 = vector.load %arg9[%17, %c0_17] : memref<56x384xf32, #tpu.memory_space<vmem>>, vector<8x384xf32>
    %cst_18 = arith.constant dense<0.000000e+00> : vector<8x384xf32>
    %19 = tpu.matmul %14, %10, %cst_18 {dimension_numbers = #tpu.dot_dimension_numbers<[1], [0], [0], [1], [0, 0, 1, 1], [], []>, precision = #tpu.contract_precision<fp32>} : vector<8x128xf32>, vector<128x384xf32>, vector<8x384xf32> -> vector<8x384xf32>
    %20 = vector.broadcast %11 : vector<1x384xf32> to vector<8x384xf32>
    %21 = arith.addf %19, %20 : vector<8x384xf32>
    %22 = vector.extract_strided_slice %18 {offsets = [0, 0], sizes = [8, 128], strides = [1, 1]} : vector<8x384xf32> to vector<8x128xf32>
    %23 = vector.extract_strided_slice %21 {offsets = [0, 0], sizes = [8, 128], strides = [1, 1]} : vector<8x384xf32> to vector<8x128xf32>
    %24 = arith.addf %22, %23 : vector<8x128xf32>
    %25 = arith.negf %24 : vector<8x128xf32>
    %26 = math.exp %25 : vector<8x128xf32>
    %cst_19 = arith.constant 1.000000e+00 : f32
    %27 = vector.broadcast %cst_19 : f32 to vector<8x128xf32>
    %28 = arith.addf %27, %26 : vector<8x128xf32>
    %29 = arith.divf %27, %28 : vector<8x128xf32>
    %30 = vector.extract_strided_slice %18 {offsets = [0, 128], sizes = [8, 128], strides = [1, 1]} : vector<8x384xf32> to vector<8x128xf32>
    %31 = vector.extract_strided_slice %21 {offsets = [0, 128], sizes = [8, 128], strides = [1, 1]} : vector<8x384xf32> to vector<8x128xf32>
    %32 = arith.addf %30, %31 : vector<8x128xf32>
    %33 = arith.negf %32 : vector<8x128xf32>
    %34 = math.exp %33 : vector<8x128xf32>
    %cst_20 = arith.constant 1.000000e+00 : f32
    %35 = vector.broadcast %cst_20 : f32 to vector<8x128xf32>
    %36 = arith.addf %35, %34 : vector<8x128xf32>
    %37 = arith.divf %35, %36 : vector<8x128xf32>
    %38 = vector.extract_strided_slice %18 {offsets = [0, 256], sizes = [8, 128], strides = [1, 1]} : vector<8x384xf32> to vector<8x128xf32>
    %39 = vector.extract_strided_slice %21 {offsets = [0, 256], sizes = [8, 128], strides = [1, 1]} : vector<8x384xf32> to vector<8x128xf32>
    %40 = arith.mulf %29, %39 : vector<8x128xf32>
    %41 = arith.addf %38, %40 : vector<8x128xf32>
    %42 = math.tanh %41 : vector<8x128xf32>
    %cst_21 = arith.constant 1.000000e+00 : f32
    %43 = vector.broadcast %cst_21 : f32 to vector<8x128xf32>
    %44 = arith.subf %43, %37 : vector<8x128xf32>
    %45 = arith.mulf %44, %42 : vector<8x128xf32>
    %46 = arith.mulf %37, %14 : vector<8x128xf32>
    %47 = arith.addf %45, %46 : vector<8x128xf32>
    %48 = arith.addi %13, %c0_i32_16 : i32
    %49 = vector.broadcast %48 : i32 to vector<8x1xi32>
    %50 = arith.cmpi slt, %49, %12 : vector<8x1xi32>
    %51 = arith.extui %50 : vector<8x1xi1> to vector<8x1xi32>
    %52 = arith.sitofp %51 : vector<8x1xi32> to vector<8x1xf32>
    %53 = vector.broadcast %52 : vector<8x1xf32> to vector<8x128xf32>
    %54 = arith.mulf %53, %47 : vector<8x128xf32>
    %55 = arith.index_cast %16 : i32 to index
    %c0_22 = arith.constant 0 : index
    %56 = vector.load %arg8[%55, %c0_22] : memref<56x128xf32, #tpu.memory_space<vmem>>, vector<8x128xf32>
    tpu.vector_store %arg8[%55, %c0_22], %54 {strides = array<i32>} : memref<56x128xf32, #tpu.memory_space<vmem>>, vector<8x128xf32>,
    %57 = vector.broadcast %52 : vector<8x1xf32> to vector<8x128xf32>
    %58 = arith.mulf %57, %47 : vector<8x128xf32>
    %cst_23 = arith.constant 1.000000e+00 : f32
    %59 = vector.broadcast %cst_23 : f32 to vector<8x1xf32>
    %60 = arith.subf %59, %52 : vector<8x1xf32>
    %61 = vector.broadcast %60 : vector<8x1xf32> to vector<8x128xf32>
    %62 = arith.mulf %61, %14 : vector<8x128xf32>
    %63 = arith.addf %58, %62 : vector<8x128xf32>
    %c1_i32 = arith.constant 1 : i32
    %c8_i32_24 = arith.constant 8 : i32
    %64 = arith.muli %c1_i32, %c8_i32_24 : i32
    %65 = tpu.assume_multiple %64, 8 : i32
    %66 = arith.index_cast %65 : i32 to index
    %c0_25 = arith.constant 0 : index
    %67 = vector.load %arg9[%66, %c0_25] : memref<56x384xf32, #tpu.memory_space<vmem>>, vector<8x384xf32>
    %cst_26 = arith.constant dense<0.000000e+00> : vector<8x384xf32>
    %68 = tpu.matmul %63, %10, %cst_26 {dimension_numbers = #tpu.dot_dimension_numbers<[1], [0], [0], [1], [0, 0, 1, 1], [], []>, precision = #tpu.contract_precision<fp32>} : vector<8x128xf32>, vector<128x384xf32>, vector<8x384xf32> -> vector<8x384xf32>
    %69 = vector.broadcast %11 : vector<1x384xf32> to vector<8x384xf32>
    %70 = arith.addf %68, %69 : vector<8x384xf32>
    %71 = vector.extract_strided_slice %67 {offsets = [0, 0], sizes = [8, 128], strides = [1, 1]} : vector<8x384xf32> to vector<8x128xf32>
    %72 = vector.extract_strided_slice %70 {offsets = [0, 0], sizes = [8, 128], strides = [1, 1]} : vector<8x384xf32> to vector<8x128xf32>
    %73 = arith.addf %71, %72 : vector<8x128xf32>
    %74 = arith.negf %73 : vector<8x128xf32>
    %75 = math.exp %74 : vector<8x128xf32>
    %cst_27 = arith.constant 1.000000e+00 : f32
    %76 = vector.broadcast %cst_27 : f32 to vector<8x128xf32>
    %77 = arith.addf %76, %75 : vector<8x128xf32>
    %78 = arith.divf %76, %77 : vector<8x128xf32>
    %79 = vector.extract_strided_slice %67 {offsets = [0, 128], sizes = [8, 128], strides = [1, 1]} : vector<8x384xf32> to vector<8x128xf32>
    %80 = vector.extract_strided_slice %70 {offsets = [0, 128], sizes = [8, 128], strides = [1, 1]} : vector<8x384xf32> to vector<8x128xf32>
    %81 = arith.addf %79, %80 : vector<8x128xf32>
    %82 = arith.negf %81 : vector<8x128xf32>
    %83 = math.exp %82 : vector<8x128xf32>
    %cst_28 = arith.constant 1.000000e+00 : f32
    %84 = vector.broadcast %cst_28 : f32 to vector<8x128xf32>
    %85 = arith.addf %84, %83 : vector<8x128xf32>
    %86 = arith.divf %84, %85 : vector<8x128xf32>
    %87 = vector.extract_strided_slice %67 {offsets = [0, 256], sizes = [8, 128], strides = [1, 1]} : vector<8x384xf32> to vector<8x128xf32>
    %88 = vector.extract_strided_slice %70 {offsets = [0, 256], sizes = [8, 128], strides = [1, 1]} : vector<8x384xf32> to vector<8x128xf32>
    %89 = arith.mulf %78, %88 : vector<8x128xf32>
    %90 = arith.addf %87, %89 : vector<8x128xf32>
    %91 = math.tanh %90 : vector<8x128xf32>
    %cst_29 = arith.constant 1.000000e+00 : f32
    %92 = vector.broadcast %cst_29 : f32 to vector<8x128xf32>
    %93 = arith.subf %92, %86 : vector<8x128xf32>
    %94 = arith.mulf %93, %91 : vector<8x128xf32>
    %95 = arith.mulf %86, %63 : vector<8x128xf32>
    %96 = arith.addf %94, %95 : vector<8x128xf32>
    %97 = arith.addi %13, %c1_i32 : i32
    %98 = vector.broadcast %97 : i32 to vector<8x1xi32>
    %99 = arith.cmpi slt, %98, %12 : vector<8x1xi32>
    %100 = arith.extui %99 : vector<8x1xi1> to vector<8x1xi32>
    %101 = arith.sitofp %100 : vector<8x1xi32> to vector<8x1xf32>
    %102 = vector.broadcast %101 : vector<8x1xf32> to vector<8x128xf32>
    %103 = arith.mulf %102, %96 : vector<8x128xf32>
    %104 = arith.index_cast %65 : i32 to index
    %c0_30 = arith.constant 0 : index
    %105 = vector.load %arg8[%104, %c0_30] : memref<56x128xf32, #tpu.memory_space<vmem>>, vector<8x128xf32>
    tpu.vector_store %arg8[%104, %c0_30], %103 {strides = array<i32>} : memref<56x128xf32, #tpu.memory_space<vmem>>, vector<8x128xf32>,
    %106 = vector.broadcast %101 : vector<8x1xf32> to vector<8x128xf32>
    %107 = arith.mulf %106, %96 : vector<8x128xf32>
    %cst_31 = arith.constant 1.000000e+00 : f32
    %108 = vector.broadcast %cst_31 : f32 to vector<8x1xf32>
    %109 = arith.subf %108, %101 : vector<8x1xf32>
    %110 = vector.broadcast %109 : vector<8x1xf32> to vector<8x128xf32>
    %111 = arith.mulf %110, %63 : vector<8x128xf32>
    %112 = arith.addf %107, %111 : vector<8x128xf32>
    %c2_i32 = arith.constant 2 : i32
    %c8_i32_32 = arith.constant 8 : i32
    %113 = arith.muli %c2_i32, %c8_i32_32 : i32
    %114 = tpu.assume_multiple %113, 8 : i32
    %115 = arith.index_cast %114 : i32 to index
    %c0_33 = arith.constant 0 : index
    %116 = vector.load %arg9[%115, %c0_33] : memref<56x384xf32, #tpu.memory_space<vmem>>, vector<8x384xf32>
    %cst_34 = arith.constant dense<0.000000e+00> : vector<8x384xf32>
    %117 = tpu.matmul %112, %10, %cst_34 {dimension_numbers = #tpu.dot_dimension_numbers<[1], [0], [0], [1], [0, 0, 1, 1], [], []>, precision = #tpu.contract_precision<fp32>} : vector<8x128xf32>, vector<128x384xf32>, vector<8x384xf32> -> vector<8x384xf32>
    %118 = vector.broadcast %11 : vector<1x384xf32> to vector<8x384xf32>
    %119 = arith.addf %117, %118 : vector<8x384xf32>
    %120 = vector.extract_strided_slice %116 {offsets = [0, 0], sizes = [8, 128], strides = [1, 1]} : vector<8x384xf32> to vector<8x128xf32>
    %121 = vector.extract_strided_slice %119 {offsets = [0, 0], sizes = [8, 128], strides = [1, 1]} : vector<8x384xf32> to vector<8x128xf32>
    %122 = arith.addf %120, %121 : vector<8x128xf32>
    %123 = arith.negf %122 : vector<8x128xf32>
    %124 = math.exp %123 : vector<8x128xf32>
    %cst_35 = arith.constant 1.000000e+00 : f32
    %125 = vector.broadcast %cst_35 : f32 to vector<8x128xf32>
    %126 = arith.addf %125, %124 : vector<8x128xf32>
    %127 = arith.divf %125, %126 : vector<8x128xf32>
    %128 = vector.extract_strided_slice %116 {offsets = [0, 128], sizes = [8, 128], strides = [1, 1]} : vector<8x384xf32> to vector<8x128xf32>
    %129 = vector.extract_strided_slice %119 {offsets = [0, 128], sizes = [8, 128], strides = [1, 1]} : vector<8x384xf32> to vector<8x128xf32>
    %130 = arith.addf %128, %129 : vector<8x128xf32>
    %131 = arith.negf %130 : vector<8x128xf32>
    %132 = math.exp %131 : vector<8x128xf32>
    %cst_36 = arith.constant 1.000000e+00 : f32
    %133 = vector.broadcast %cst_36 : f32 to vector<8x128xf32>
    %134 = arith.addf %133, %132 : vector<8x128xf32>
    %135 = arith.divf %133, %134 : vector<8x128xf32>
    %136 = vector.extract_strided_slice %116 {offsets = [0, 256], sizes = [8, 128], strides = [1, 1]} : vector<8x384xf32> to vector<8x128xf32>
    %137 = vector.extract_strided_slice %119 {offsets = [0, 256], sizes = [8, 128], strides = [1, 1]} : vector<8x384xf32> to vector<8x128xf32>
    %138 = arith.mulf %127, %137 : vector<8x128xf32>
    %139 = arith.addf %136, %138 : vector<8x128xf32>
    %140 = math.tanh %139 : vector<8x128xf32>
    %cst_37 = arith.constant 1.000000e+00 : f32
    %141 = vector.broadcast %cst_37 : f32 to vector<8x128xf32>
    %142 = arith.subf %141, %135 : vector<8x128xf32>
    %143 = arith.mulf %142, %140 : vector<8x128xf32>
    %144 = arith.mulf %135, %112 : vector<8x128xf32>
    %145 = arith.addf %143, %144 : vector<8x128xf32>
    %146 = arith.addi %13, %c2_i32 : i32
    %147 = vector.broadcast %146 : i32 to vector<8x1xi32>
    %148 = arith.cmpi slt, %147, %12 : vector<8x1xi32>
    %149 = arith.extui %148 : vector<8x1xi1> to vector<8x1xi32>
    %150 = arith.sitofp %149 : vector<8x1xi32> to vector<8x1xf32>
    %151 = vector.broadcast %150 : vector<8x1xf32> to vector<8x128xf32>
    %152 = arith.mulf %151, %145 : vector<8x128xf32>
    %153 = arith.index_cast %114 : i32 to index
    %c0_38 = arith.constant 0 : index
    %154 = vector.load %arg8[%153, %c0_38] : memref<56x128xf32, #tpu.memory_space<vmem>>, vector<8x128xf32>
    tpu.vector_store %arg8[%153, %c0_38], %152 {strides = array<i32>} : memref<56x128xf32, #tpu.memory_space<vmem>>, vector<8x128xf32>,
    %155 = vector.broadcast %150 : vector<8x1xf32> to vector<8x128xf32>
    %156 = arith.mulf %155, %145 : vector<8x128xf32>
    %cst_39 = arith.constant 1.000000e+00 : f32
    %157 = vector.broadcast %cst_39 : f32 to vector<8x1xf32>
    %158 = arith.subf %157, %150 : vector<8x1xf32>
    %159 = vector.broadcast %158 : vector<8x1xf32> to vector<8x128xf32>
    %160 = arith.mulf %159, %112 : vector<8x128xf32>
    %161 = arith.addf %156, %160 : vector<8x128xf32>
    %c3_i32 = arith.constant 3 : i32
    %c8_i32_40 = arith.constant 8 : i32
    %162 = arith.muli %c3_i32, %c8_i32_40 : i32
    %163 = tpu.assume_multiple %162, 8 : i32
    %164 = arith.index_cast %163 : i32 to index
    %c0_41 = arith.constant 0 : index
    %165 = vector.load %arg9[%164, %c0_41] : memref<56x384xf32, #tpu.memory_space<vmem>>, vector<8x384xf32>
    %cst_42 = arith.constant dense<0.000000e+00> : vector<8x384xf32>
    %166 = tpu.matmul %161, %10, %cst_42 {dimension_numbers = #tpu.dot_dimension_numbers<[1], [0], [0], [1], [0, 0, 1, 1], [], []>, precision = #tpu.contract_precision<fp32>} : vector<8x128xf32>, vector<128x384xf32>, vector<8x384xf32> -> vector<8x384xf32>
    %167 = vector.broadcast %11 : vector<1x384xf32> to vector<8x384xf32>
    %168 = arith.addf %166, %167 : vector<8x384xf32>
    %169 = vector.extract_strided_slice %165 {offsets = [0, 0], sizes = [8, 128], strides = [1, 1]} : vector<8x384xf32> to vector<8x128xf32>
    %170 = vector.extract_strided_slice %168 {offsets = [0, 0], sizes = [8, 128], strides = [1, 1]} : vector<8x384xf32> to vector<8x128xf32>
    %171 = arith.addf %169, %170 : vector<8x128xf32>
    %172 = arith.negf %171 : vector<8x128xf32>
    %173 = math.exp %172 : vector<8x128xf32>
    %cst_43 = arith.constant 1.000000e+00 : f32
    %174 = vector.broadcast %cst_43 : f32 to vector<8x128xf32>
    %175 = arith.addf %174, %173 : vector<8x128xf32>
    %176 = arith.divf %174, %175 : vector<8x128xf32>
    %177 = vector.extract_strided_slice %165 {offsets = [0, 128], sizes = [8, 128], strides = [1, 1]} : vector<8x384xf32> to vector<8x128xf32>
    %178 = vector.extract_strided_slice %168 {offsets = [0, 128], sizes = [8, 128], strides = [1, 1]} : vector<8x384xf32> to vector<8x128xf32>
    %179 = arith.addf %177, %178 : vector<8x128xf32>
    %180 = arith.negf %179 : vector<8x128xf32>
    %181 = math.exp %180 : vector<8x128xf32>
    %cst_44 = arith.constant 1.000000e+00 : f32
    %182 = vector.broadcast %cst_44 : f32 to vector<8x128xf32>
    %183 = arith.addf %182, %181 : vector<8x128xf32>
    %184 = arith.divf %182, %183 : vector<8x128xf32>
    %185 = vector.extract_strided_slice %165 {offsets = [0, 256], sizes = [8, 128], strides = [1, 1]} : vector<8x384xf32> to vector<8x128xf32>
    %186 = vector.extract_strided_slice %168 {offsets = [0, 256], sizes = [8, 128], strides = [1, 1]} : vector<8x384xf32> to vector<8x128xf32>
    %187 = arith.mulf %176, %186 : vector<8x128xf32>
    %188 = arith.addf %185, %187 : vector<8x128xf32>
    %189 = math.tanh %188 : vector<8x128xf32>
    %cst_45 = arith.constant 1.000000e+00 : f32
    %190 = vector.broadcast %cst_45 : f32 to vector<8x128xf32>
    %191 = arith.subf %190, %184 : vector<8x128xf32>
    %192 = arith.mulf %191, %189 : vector<8x128xf32>
    %193 = arith.mulf %184, %161 : vector<8x128xf32>
    %194 = arith.addf %192, %193 : vector<8x128xf32>
    %195 = arith.addi %13, %c3_i32 : i32
    %196 = vector.broadcast %195 : i32 to vector<8x1xi32>
    %197 = arith.cmpi slt, %196, %12 : vector<8x1xi32>
    %198 = arith.extui %197 : vector<8x1xi1> to vector<8x1xi32>
    %199 = arith.sitofp %198 : vector<8x1xi32> to vector<8x1xf32>
    %200 = vector.broadcast %199 : vector<8x1xf32> to vector<8x128xf32>
    %201 = arith.mulf %200, %194 : vector<8x128xf32>
    %202 = arith.index_cast %163 : i32 to index
    %c0_46 = arith.constant 0 : index
    %203 = vector.load %arg8[%202, %c0_46] : memref<56x128xf32, #tpu.memory_space<vmem>>, vector<8x128xf32>
    tpu.vector_store %arg8[%202, %c0_46], %201 {strides = array<i32>} : memref<56x128xf32, #tpu.memory_space<vmem>>, vector<8x128xf32>,
    %204 = vector.broadcast %199 : vector<8x1xf32> to vector<8x128xf32>
    %205 = arith.mulf %204, %194 : vector<8x128xf32>
    %cst_47 = arith.constant 1.000000e+00 : f32
    %206 = vector.broadcast %cst_47 : f32 to vector<8x1xf32>
    %207 = arith.subf %206, %199 : vector<8x1xf32>
    %208 = vector.broadcast %207 : vector<8x1xf32> to vector<8x128xf32>
    %209 = arith.mulf %208, %161 : vector<8x128xf32>
    %210 = arith.addf %205, %209 : vector<8x128xf32>
    %c4_i32 = arith.constant 4 : i32
    %c8_i32_48 = arith.constant 8 : i32
    %211 = arith.muli %c4_i32, %c8_i32_48 : i32
    %212 = tpu.assume_multiple %211, 8 : i32
    %213 = arith.index_cast %212 : i32 to index
    %c0_49 = arith.constant 0 : index
    %214 = vector.load %arg9[%213, %c0_49] : memref<56x384xf32, #tpu.memory_space<vmem>>, vector<8x384xf32>
    %cst_50 = arith.constant dense<0.000000e+00> : vector<8x384xf32>
    %215 = tpu.matmul %210, %10, %cst_50 {dimension_numbers = #tpu.dot_dimension_numbers<[1], [0], [0], [1], [0, 0, 1, 1], [], []>, precision = #tpu.contract_precision<fp32>} : vector<8x128xf32>, vector<128x384xf32>, vector<8x384xf32> -> vector<8x384xf32>
    %216 = vector.broadcast %11 : vector<1x384xf32> to vector<8x384xf32>
    %217 = arith.addf %215, %216 : vector<8x384xf32>
    %218 = vector.extract_strided_slice %214 {offsets = [0, 0], sizes = [8, 128], strides = [1, 1]} : vector<8x384xf32> to vector<8x128xf32>
    %219 = vector.extract_strided_slice %217 {offsets = [0, 0], sizes = [8, 128], strides = [1, 1]} : vector<8x384xf32> to vector<8x128xf32>
    %220 = arith.addf %218, %219 : vector<8x128xf32>
    %221 = arith.negf %220 : vector<8x128xf32>
    %222 = math.exp %221 : vector<8x128xf32>
    %cst_51 = arith.constant 1.000000e+00 : f32
    %223 = vector.broadcast %cst_51 : f32 to vector<8x128xf32>
    %224 = arith.addf %223, %222 : vector<8x128xf32>
    %225 = arith.divf %223, %224 : vector<8x128xf32>
    %226 = vector.extract_strided_slice %214 {offsets = [0, 128], sizes = [8, 128], strides = [1, 1]} : vector<8x384xf32> to vector<8x128xf32>
    %227 = vector.extract_strided_slice %217 {offsets = [0, 128], sizes = [8, 128], strides = [1, 1]} : vector<8x384xf32> to vector<8x128xf32>
    %228 = arith.addf %226, %227 : vector<8x128xf32>
    %229 = arith.negf %228 : vector<8x128xf32>
    %230 = math.exp %229 : vector<8x128xf32>
    %cst_52 = arith.constant 1.000000e+00 : f32
    %231 = vector.broadcast %cst_52 : f32 to vector<8x128xf32>
    %232 = arith.addf %231, %230 : vector<8x128xf32>
    %233 = arith.divf %231, %232 : vector<8x128xf32>
    %234 = vector.extract_strided_slice %214 {offsets = [0, 256], sizes = [8, 128], strides = [1, 1]} : vector<8x384xf32> to vector<8x128xf32>
    %235 = vector.extract_strided_slice %217 {offsets = [0, 256], sizes = [8, 128], strides = [1, 1]} : vector<8x384xf32> to vector<8x128xf32>
    %236 = arith.mulf %225, %235 : vector<8x128xf32>
    %237 = arith.addf %234, %236 : vector<8x128xf32>
    %238 = math.tanh %237 : vector<8x128xf32>
    %cst_53 = arith.constant 1.000000e+00 : f32
    %239 = vector.broadcast %cst_53 : f32 to vector<8x128xf32>
    %240 = arith.subf %239, %233 : vector<8x128xf32>
    %241 = arith.mulf %240, %238 : vector<8x128xf32>
    %242 = arith.mulf %233, %210 : vector<8x128xf32>
    %243 = arith.addf %241, %242 : vector<8x128xf32>
    %244 = arith.addi %13, %c4_i32 : i32
    %245 = vector.broadcast %244 : i32 to vector<8x1xi32>
    %246 = arith.cmpi slt, %245, %12 : vector<8x1xi32>
    %247 = arith.extui %246 : vector<8x1xi1> to vector<8x1xi32>
    %248 = arith.sitofp %247 : vector<8x1xi32> to vector<8x1xf32>
    %249 = vector.broadcast %248 : vector<8x1xf32> to vector<8x128xf32>
    %250 = arith.mulf %249, %243 : vector<8x128xf32>
    %251 = arith.index_cast %212 : i32 to index
    %c0_54 = arith.constant 0 : index
    %252 = vector.load %arg8[%251, %c0_54] : memref<56x128xf32, #tpu.memory_space<vmem>>, vector<8x128xf32>
    tpu.vector_store %arg8[%251, %c0_54], %250 {strides = array<i32>} : memref<56x128xf32, #tpu.memory_space<vmem>>, vector<8x128xf32>,
    %253 = vector.broadcast %248 : vector<8x1xf32> to vector<8x128xf32>
    %254 = arith.mulf %253, %243 : vector<8x128xf32>
    %cst_55 = arith.constant 1.000000e+00 : f32
    %255 = vector.broadcast %cst_55 : f32 to vector<8x1xf32>
    %256 = arith.subf %255, %248 : vector<8x1xf32>
    %257 = vector.broadcast %256 : vector<8x1xf32> to vector<8x128xf32>
    %258 = arith.mulf %257, %210 : vector<8x128xf32>
    %259 = arith.addf %254, %258 : vector<8x128xf32>
    %c5_i32 = arith.constant 5 : i32
    %c8_i32_56 = arith.constant 8 : i32
    %260 = arith.muli %c5_i32, %c8_i32_56 : i32
    %261 = tpu.assume_multiple %260, 8 : i32
    %262 = arith.index_cast %261 : i32 to index
    %c0_57 = arith.constant 0 : index
    %263 = vector.load %arg9[%262, %c0_57] : memref<56x384xf32, #tpu.memory_space<vmem>>, vector<8x384xf32>
    %cst_58 = arith.constant dense<0.000000e+00> : vector<8x384xf32>
    %264 = tpu.matmul %259, %10, %cst_58 {dimension_numbers = #tpu.dot_dimension_numbers<[1], [0], [0], [1], [0, 0, 1, 1], [], []>, precision = #tpu.contract_precision<fp32>} : vector<8x128xf32>, vector<128x384xf32>, vector<8x384xf32> -> vector<8x384xf32>
    %265 = vector.broadcast %11 : vector<1x384xf32> to vector<8x384xf32>
    %266 = arith.addf %264, %265 : vector<8x384xf32>
    %267 = vector.extract_strided_slice %263 {offsets = [0, 0], sizes = [8, 128], strides = [1, 1]} : vector<8x384xf32> to vector<8x128xf32>
    %268 = vector.extract_strided_slice %266 {offsets = [0, 0], sizes = [8, 128], strides = [1, 1]} : vector<8x384xf32> to vector<8x128xf32>
    %269 = arith.addf %267, %268 : vector<8x128xf32>
    %270 = arith.negf %269 : vector<8x128xf32>
    %271 = math.exp %270 : vector<8x128xf32>
    %cst_59 = arith.constant 1.000000e+00 : f32
    %272 = vector.broadcast %cst_59 : f32 to vector<8x128xf32>
    %273 = arith.addf %272, %271 : vector<8x128xf32>
    %274 = arith.divf %272, %273 : vector<8x128xf32>
    %275 = vector.extract_strided_slice %263 {offsets = [0, 128], sizes = [8, 128], strides = [1, 1]} : vector<8x384xf32> to vector<8x128xf32>
    %276 = vector.extract_strided_slice %266 {offsets = [0, 128], sizes = [8, 128], strides = [1, 1]} : vector<8x384xf32> to vector<8x128xf32>
    %277 = arith.addf %275, %276 : vector<8x128xf32>
    %278 = arith.negf %277 : vector<8x128xf32>
    %279 = math.exp %278 : vector<8x128xf32>
    %cst_60 = arith.constant 1.000000e+00 : f32
    %280 = vector.broadcast %cst_60 : f32 to vector<8x128xf32>
    %281 = arith.addf %280, %279 : vector<8x128xf32>
    %282 = arith.divf %280, %281 : vector<8x128xf32>
    %283 = vector.extract_strided_slice %263 {offsets = [0, 256], sizes = [8, 128], strides = [1, 1]} : vector<8x384xf32> to vector<8x128xf32>
    %284 = vector.extract_strided_slice %266 {offsets = [0, 256], sizes = [8, 128], strides = [1, 1]} : vector<8x384xf32> to vector<8x128xf32>
    %285 = arith.mulf %274, %284 : vector<8x128xf32>
    %286 = arith.addf %283, %285 : vector<8x128xf32>
    %287 = math.tanh %286 : vector<8x128xf32>
    %cst_61 = arith.constant 1.000000e+00 : f32
    %288 = vector.broadcast %cst_61 : f32 to vector<8x128xf32>
    %289 = arith.subf %288, %282 : vector<8x128xf32>
    %290 = arith.mulf %289, %287 : vector<8x128xf32>
    %291 = arith.mulf %282, %259 : vector<8x128xf32>
    %292 = arith.addf %290, %291 : vector<8x128xf32>
    %293 = arith.addi %13, %c5_i32 : i32
    %294 = vector.broadcast %293 : i32 to vector<8x1xi32>
    %295 = arith.cmpi slt, %294, %12 : vector<8x1xi32>
    %296 = arith.extui %295 : vector<8x1xi1> to vector<8x1xi32>
    %297 = arith.sitofp %296 : vector<8x1xi32> to vector<8x1xf32>
    %298 = vector.broadcast %297 : vector<8x1xf32> to vector<8x128xf32>
    %299 = arith.mulf %298, %292 : vector<8x128xf32>
    %300 = arith.index_cast %261 : i32 to index
    %c0_62 = arith.constant 0 : index
    %301 = vector.load %arg8[%300, %c0_62] : memref<56x128xf32, #tpu.memory_space<vmem>>, vector<8x128xf32>
    tpu.vector_store %arg8[%300, %c0_62], %299 {strides = array<i32>} : memref<56x128xf32, #tpu.memory_space<vmem>>, vector<8x128xf32>,
    %302 = vector.broadcast %297 : vector<8x1xf32> to vector<8x128xf32>
    %303 = arith.mulf %302, %292 : vector<8x128xf32>
    %cst_63 = arith.constant 1.000000e+00 : f32
    %304 = vector.broadcast %cst_63 : f32 to vector<8x1xf32>
    %305 = arith.subf %304, %297 : vector<8x1xf32>
    %306 = vector.broadcast %305 : vector<8x1xf32> to vector<8x128xf32>
    %307 = arith.mulf %306, %259 : vector<8x128xf32>
    %308 = arith.addf %303, %307 : vector<8x128xf32>
    %c6_i32 = arith.constant 6 : i32
    %c8_i32_64 = arith.constant 8 : i32
    %309 = arith.muli %c6_i32, %c8_i32_64 : i32
    %310 = tpu.assume_multiple %309, 8 : i32
    %311 = arith.index_cast %310 : i32 to index
    %c0_65 = arith.constant 0 : index
    %312 = vector.load %arg9[%311, %c0_65] : memref<56x384xf32, #tpu.memory_space<vmem>>, vector<8x384xf32>
    %cst_66 = arith.constant dense<0.000000e+00> : vector<8x384xf32>
    %313 = tpu.matmul %308, %10, %cst_66 {dimension_numbers = #tpu.dot_dimension_numbers<[1], [0], [0], [1], [0, 0, 1, 1], [], []>, precision = #tpu.contract_precision<fp32>} : vector<8x128xf32>, vector<128x384xf32>, vector<8x384xf32> -> vector<8x384xf32>
    %314 = vector.broadcast %11 : vector<1x384xf32> to vector<8x384xf32>
    %315 = arith.addf %313, %314 : vector<8x384xf32>
    %316 = vector.extract_strided_slice %312 {offsets = [0, 0], sizes = [8, 128], strides = [1, 1]} : vector<8x384xf32> to vector<8x128xf32>
    %317 = vector.extract_strided_slice %315 {offsets = [0, 0], sizes = [8, 128], strides = [1, 1]} : vector<8x384xf32> to vector<8x128xf32>
    %318 = arith.addf %316, %317 : vector<8x128xf32>
    %319 = arith.negf %318 : vector<8x128xf32>
    %320 = math.exp %319 : vector<8x128xf32>
    %cst_67 = arith.constant 1.000000e+00 : f32
    %321 = vector.broadcast %cst_67 : f32 to vector<8x128xf32>
    %322 = arith.addf %321, %320 : vector<8x128xf32>
    %323 = arith.divf %321, %322 : vector<8x128xf32>
    %324 = vector.extract_strided_slice %312 {offsets = [0, 128], sizes = [8, 128], strides = [1, 1]} : vector<8x384xf32> to vector<8x128xf32>
    %325 = vector.extract_strided_slice %315 {offsets = [0, 128], sizes = [8, 128], strides = [1, 1]} : vector<8x384xf32> to vector<8x128xf32>
    %326 = arith.addf %324, %325 : vector<8x128xf32>
    %327 = arith.negf %326 : vector<8x128xf32>
    %328 = math.exp %327 : vector<8x128xf32>
    %cst_68 = arith.constant 1.000000e+00 : f32
    %329 = vector.broadcast %cst_68 : f32 to vector<8x128xf32>
    %330 = arith.addf %329, %328 : vector<8x128xf32>
    %331 = arith.divf %329, %330 : vector<8x128xf32>
    %332 = vector.extract_strided_slice %312 {offsets = [0, 256], sizes = [8, 128], strides = [1, 1]} : vector<8x384xf32> to vector<8x128xf32>
    %333 = vector.extract_strided_slice %315 {offsets = [0, 256], sizes = [8, 128], strides = [1, 1]} : vector<8x384xf32> to vector<8x128xf32>
    %334 = arith.mulf %323, %333 : vector<8x128xf32>
    %335 = arith.addf %332, %334 : vector<8x128xf32>
    %336 = math.tanh %335 : vector<8x128xf32>
    %cst_69 = arith.constant 1.000000e+00 : f32
    %337 = vector.broadcast %cst_69 : f32 to vector<8x128xf32>
    %338 = arith.subf %337, %331 : vector<8x128xf32>
    %339 = arith.mulf %338, %336 : vector<8x128xf32>
    %340 = arith.mulf %331, %308 : vector<8x128xf32>
    %341 = arith.addf %339, %340 : vector<8x128xf32>
    %342 = arith.addi %13, %c6_i32 : i32
    %343 = vector.broadcast %342 : i32 to vector<8x1xi32>
    %344 = arith.cmpi slt, %343, %12 : vector<8x1xi32>
    %345 = arith.extui %344 : vector<8x1xi1> to vector<8x1xi32>
    %346 = arith.sitofp %345 : vector<8x1xi32> to vector<8x1xf32>
    %347 = vector.broadcast %346 : vector<8x1xf32> to vector<8x128xf32>
    %348 = arith.mulf %347, %341 : vector<8x128xf32>
    %349 = arith.index_cast %310 : i32 to index
    %c0_70 = arith.constant 0 : index
    %350 = vector.load %arg8[%349, %c0_70] : memref<56x128xf32, #tpu.memory_space<vmem>>, vector<8x128xf32>
    tpu.vector_store %arg8[%349, %c0_70], %348 {strides = array<i32>} : memref<56x128xf32, #tpu.memory_space<vmem>>, vector<8x128xf32>,
    %351 = vector.broadcast %346 : vector<8x1xf32> to vector<8x128xf32>
    %352 = arith.mulf %351, %341 : vector<8x128xf32>
    %cst_71 = arith.constant 1.000000e+00 : f32
    %353 = vector.broadcast %cst_71 : f32 to vector<8x1xf32>
    %354 = arith.subf %353, %346 : vector<8x1xf32>
    %355 = vector.broadcast %354 : vector<8x1xf32> to vector<8x128xf32>
    %356 = arith.mulf %355, %308 : vector<8x128xf32>
    %357 = arith.addf %352, %356 : vector<8x128xf32>
    %c7_i32_72 = arith.constant 7 : i32
    %c0_73 = arith.constant 0 : index
    %c0_74 = arith.constant 0 : index
    %358 = vector.load %arg10[%c0_73, %c0_74] : memref<8x128xf32, #tpu.memory_space<vmem>>, vector<8x128xf32>
    tpu.vector_store %arg10[%c0_73, %c0_74], %357 {strides = array<i32>} : memref<8x128xf32, #tpu.memory_space<vmem>>, vector<8x128xf32>,
    return
  }
  func.func @transform_0(%arg0: i32) -> (i32, i32) {
    %c0_i32 = arith.constant 0 : i32
    %c0_i32_0 = arith.constant 0 : i32
    return %arg0, %c0_i32 : i32, i32
  }
  func.func @transform_1(%arg0: i32) -> (i32, i32) {
    %c0_i32 = arith.constant 0 : i32
    %c0_i32_0 = arith.constant 0 : i32
    %c0_i32_1 = arith.constant 0 : i32
    return %c0_i32, %c0_i32_0 : i32, i32
  }
  func.func @transform_2(%arg0: i32) -> (i32, i32) {
    %c0_i32 = arith.constant 0 : i32
    %c0_i32_0 = arith.constant 0 : i32
    %c0_i32_1 = arith.constant 0 : i32
    return %c0_i32, %c0_i32_0 : i32, i32
  }
  func.func @transform_3(%arg0: i32) -> (i32, i32) {
    %c0_i32 = arith.constant 0 : i32
    %c0_i32_0 = arith.constant 0 : i32
    %c0_i32_1 = arith.constant 0 : i32
    return %c0_i32, %c0_i32_0 : i32, i32
  }
  func.func @transform_4(%arg0: i32) -> (i32, i32) {
    %c0_i32 = arith.constant 0 : i32
    %c0_i32_0 = arith.constant 0 : i32
    %c0_i32_1 = arith.constant 0 : i32
    return %c0_i32, %c0_i32_0 : i32, i32
  }
  func.func @transform_5(%arg0: i32) -> (i32, i32) {
    %c0_i32 = arith.constant 0 : i32
    %c0_i32_0 = arith.constant 0 : i32
    %c0_i32_1 = arith.constant 0 : i32
    return %c0_i32, %c0_i32_0 : i32, i32
  }
  func.func @transform_6(%arg0: i32) -> (i32, i32) {
    %c0_i32 = arith.constant 0 : i32
    %c0_i32_0 = arith.constant 0 : i32
    %c0_i32_1 = arith.constant 0 : i32
    return %c0_i32, %c0_i32_0 : i32, i32
  }
  func.func @transform_7(%arg0: i32) -> (i32, i32) {
    %c0_i32 = arith.constant 0 : i32
    %c0_i32_0 = arith.constant 0 : i32
    return %arg0, %c0_i32 : i32, i32
  }
}

</mosaic_0001>

<bundles_post_ra>
// kernel: tpu_custom_call.1
= control target key start
LH: loop header
LB: loop body
LE: loop exit
PB: predicated region body
PF: predicated region fallthrough
CT: control target
= control target key end

     0   :  { %12 = vsyncpa [#allocation5], 0  ;;  %s21211_s0 = inlined_call_operand.hbm [shape: f32[56,128], index: 0, kind: input, shape index: {}]   ;;  %s21212_s1 = inlined_call_operand.vmem [shape: s32[8,1], index: 1, kind: input, shape index: {}]   ;;  %s21213_s2 = inlined_call_operand.vmem [shape: f32[8,128], index: 2, kind: input, shape index: {}]   ;;  %s21214_s3 = inlined_call_operand.hbm [shape: f32[128,384], index: 3, kind: input, shape index: {}]   ;;  %s21215_s4 = inlined_call_operand.vmem [shape: f32[1,384], index: 4, kind: input, shape index: {}]   ;;  %s21216_s5 = inlined_call_operand.hbm [shape: f32[128,384], index: 5, kind: input, shape index: {}]   ;;  %s21217_s6 = inlined_call_operand.vmem [shape: f32[1,384], index: 6, kind: input, shape index: {}]   ;;  %s21218_s7 = inlined_call_operand.hbm [shape: f32[56,128], index: 7, kind: output, shape index: {}]  }
   0x1   :  { %13 = vsyncpa [#allocation8], 0 }
   0x2   :  { %14 = vsyncpa [#allocation6], 0  ;;  %s15954_s24 = smov [#allocation7]  }
   0x3   :  { %s36_s25 = sshll.u32 %s15954_s24, 4  ;;  %s37_s25 = int_to_ptr.vmem [resolvable:$true] %s36_s25 }
   0x4   :  { %s15876_s26 = scalar_lea.vmem %s37_s25, 6144  ;;  %p15881_p1 = scmp.lt.s32.totalorder %s37_s25, %s37_s25 }
   0x5   :  { %p15877_p0 = scmp.ne.s32.totalorder %s37_s25, %s15876_s26  ;;  %p15882_p2 = scmp.lt.s32.totalorder %s15876_s26, %s15876_s26 }
   0x7   :  { %p15883_p3 = por %p15882_p2, %p15881_p1 }
   0x9   :  { %p15884_p4 = pnand %p15883_p3, %p15877_p0 }
   0xb   :  { %15887 = shalt.err (!%p15884_p4)
}
   0xc   :  { %s15955_s27 = smov 384   ;;  %s15956_s28 = smov 24  }
   0xd   :  { %42 = dma.hbm_to_vmem [thread:$0]  %s21214_s3, 6144, %s37_s25, [#allocation8], %s15955_s27, %s15955_s27, %s15956_s28  }
   0xe   :  { %s15957_s8 = smov [#allocation4]  }
   0xf   :  { %s20_s9 = sshll.u32 %s15957_s8, 4  ;;  %s21_s9 = int_to_ptr.vmem [resolvable:$true] %s20_s9 }
  0x10   :  { %s15896_s10 = scalar_lea.vmem %s21_s9, 896  ;;  %p15901_p6 = scmp.lt.s32.totalorder %s21_s9, %s21_s9 }
  0x11   :  { %p15897_p5 = scmp.ne.s32.totalorder %s21_s9, %s15896_s10  ;;  %p15902_p7 = scmp.lt.s32.totalorder %s15896_s10, %s15896_s10 }
  0x13   :  { %p15903_p8 = por %p15902_p7, %p15901_p6 }
  0x15   :  { %p15904_p9 = pnand %p15903_p8, %p15897_p5 }
  0x17   :  { %15907 = shalt.err (!%p15904_p9)
}
  0x18   :  { %s15958_s11 = smov 128   ;;  %s15959_s12 = smov 8  }
  0x19   :  { %26 = dma.hbm_to_vmem [thread:$0]  %s21211_s0, 896, %s21_s9, [#allocation5], %s15958_s11, %s15958_s11, %s15959_s12  }
  0x1a   :  { %s15960_s3 = smov [#allocation9]  }
  0x1b   :  { %s50_s15 = sshll.u32 %s15960_s3, 4  ;;  %s51_s15 = int_to_ptr.vmem [resolvable:$true] %s50_s15 }
  0x1c   :  { %s15916_s16 = scalar_lea.vmem %s51_s15, 6144  ;;  %p15921_p11 = scmp.lt.s32.totalorder %s51_s15, %s51_s15 }
  0x1d   :  { %p15917_p10 = scmp.ne.s32.totalorder %s51_s15, %s15916_s16  ;;  %p15922_p12 = scmp.lt.s32.totalorder %s15916_s16, %s15916_s16 }
  0x1f   :  { %p15923_p13 = por %p15922_p12, %p15921_p11 }
  0x21   :  { %p15924_p0 = pnand %p15923_p13, %p15917_p10 }
  0x23   :  { %15927 = shalt.err (!%p15924_p0)
}
  0x24   :  { %56 = dma.hbm_to_vmem [thread:$0]  %s21216_s5, 6144, %s51_s15, [#allocation8], %s15955_s27, %s15955_s27, %s15956_s28  }
  0x25   :  { %15948 = dma.done.wait [#allocation5], 896  }
  0x26   :  { %15949 = vsyncadd [#allocation5], 4294966400 }
  0x27   :  { %15950 = dma.done.wait [#allocation8], 12288  }
  0x28   :  { %15951 = vsyncadd [#allocation8], 4294955008  ;;  %v21233_v0 = vmov 0.0   ;;  %v127_v1 = vld [vmem:[#allocation7 + $0x170] sm:$0xff]  ;;  %v126_v2 = vld [vmem:[#allocation7 + $0x168] sm:$0xff]  ;;  %vm15962_vm0 = vmmov 0  }
  0x29   :  { %242 = vmatprep.mubr.f32.mxu0 %v21233_v0  ;;  %544 = vmatprep.mubr.f32.mxu1 %v21233_v0  ;;  %v124_v3 = vld [vmem:[#allocation7 + $0x158] sm:$0xff]  ;;  %v16019_v4 = vand.u32 4294901760, %v127_v1  ;;  %v16021_v5 = vand.u32 4294901760, %v126_v2  ;;  %v123_v7 = vld [vmem:[#allocation7 + $0x150] sm:$0xff]  ;;  %v121_v8 = vld [vmem:[#allocation7 + $0x140] sm:$0xff] }
  0x2a   :  { %v16023_v6 = vand.u32 4294901760, %v124_v3  ;;  %v120_v9 = vld [vmem:[#allocation7 + $0x138] sm:$0xff]  ;;  %v16025_v10 = vand.u32 4294901760, %v123_v7  ;;  %v16027_v11 = vand.u32 4294901760, %v121_v8  ;;  %v118_v13 = vld [vmem:[#allocation7 + $0x128] sm:$0xff]  ;;  %v117_v14 = vld [vmem:[#allocation7 + $0x120] sm:$0xff] }
  0x2b   :  { %v16029_v12 = vand.u32 4294901760, %v120_v9  ;;  %v115_v15 = vld [vmem:[#allocation7 + $0x110] sm:$0xff]  ;;  %147 = vmatprep.subr.mxu0 %v16019_v4  ;;  %v16032_v16 = vand.u32 4294901760, %v118_v13  ;;  %v16034_v17 = vand.u32 4294901760, %v117_v14  ;;  %v16039_v19 = vsub.f32 %v127_v1, %v16019_v4  ;;  %v16041_v20 = vld [vmem:[#allocation7 + $0x108] sm:$0xff]  ;;  %v16043_v21 = vld [vmem:[#allocation7 + $0xf8] sm:$0xff] }
  0x2c   :  { %v16036_v18 = vand.u32 4294901760, %v115_v15  ;;  %v16045_v22 = vld [vmem:[#allocation7 + $0xf0] sm:$0xff]  ;;  %149 = vmatpush1.msra.mxu0 %v16021_v5  ;;  %v16049_v23 = vand.u32 4294901760, %v16041_v20  ;;  %v16052_v24 = vsub.f32 %v126_v2, %v16021_v5  ;;  %v16055_v25 = vand.u32 4294901760, %v16043_v21  ;;  %v16060_v27 = vld [vmem:[#allocation7 + $0xe0] sm:$0xff]  ;;  %v16062_v28 = vld [vmem:[#allocation7 + $0xd8] sm:$0xff] }
  0x2d   :  { %21890 = vst [vmem:[#allocation14_spill] sm:$0xff] %v16039_v19  ;;  %v16058_v26 = vsub.f32 %v124_v3, %v16023_v6  ;;  %v16064_v29 = vld [vmem:[#allocation7 + $0xc8] sm:$0xff]  ;;  %151 = vmatprep.subr.mxu0 %v16023_v6  ;;  %v21231_v30 = vand.u32 4294901760, %v16039_v19  ;;  %v16069_v31 = vand.u32 4294901760, %v16045_v22  ;;  %v16072_v32 = vsub.f32 %v123_v7, %v16025_v10  ;;  %v16086_v38 = vld [vmem:[#allocation7 + $0xc0] sm:$0xff]  ;;  %v16110_v47 = vld [vmem:[#allocation7 + $0xb0] sm:$0xff] }
  0x2e   :  { %21891 = vst [vmem:[#allocation15_spill] sm:$0xff] %v16055_v25  ;;  %v16075_v33 = vand.u32 4294901760, %v16060_v27  ;;  %153 = vmatpush1.msra.mxu0 %v16025_v10  ;;  %v21230_v34 = vand.u32 4294901760, %v16052_v24  ;;  %v16081_v36 = vsub.f32 %v121_v8, %v16027_v11  ;;  %v16084_v37 = vand.u32 4294901760, %v16062_v28  ;;  %v16120_v52 = vld [vmem:[#allocation7 + $0xa8] sm:$0xff]  ;;  %v16127_v57 = vld [vmem:[#allocation7 + $0x98] sm:$0xff] }
  0x2f   :  { %21892 = vst [vmem:[#allocation16_spill] sm:$0xff] %v16069_v31  ;;  %v21228_v35 = vand.u32 4294901760, %v16058_v26  ;;  %155 = vmatprep.subr.mxu0 %v16027_v11  ;;  %v323_v39 = vsub.f32 %v16039_v19, %v21231_v30  ;;  %v21226_v40 = vand.u32 4294901760, %v16072_v32  ;;  %v16094_v41 = vsub.f32 %v120_v9, %v16029_v12  ;;  %v16139_v62 = vld [vmem:[#allocation7 + $0x90] sm:$0xff]  ;;  %v16151_v7 = vld [vmem:[#allocation7 + $0x80] sm:$0xff] }
  0x30   :  { %21893 = vst [vmem:[#allocation17_spill] sm:$0xff] %v16075_v33  ;;  %21894 = vst [vmem:[#allocation18_spill] sm:$0xff] %v16084_v37  ;;  %v16097_v42 = vand.u32 4294901760, %v16064_v29  ;;  %157 = vmatpush1.msra.mxu0 %v16029_v12  ;;  %v329_v43 = vsub.f32 %v16052_v24, %v21230_v34  ;;  %v21225_v45 = vand.u32 4294901760, %v16081_v36  ;;  %v16108_v46 = vsub.f32 %v118_v13, %v16032_v16  ;;  %v16252_v34 = vld [vmem:[#allocation7 + $0x30] sm:$0xff] }
  0x31   :  { %v335_v44 = vsub.f32 %v16058_v26, %v21228_v35  ;;  %159 = vmatprep.subr.mxu0 %v16032_v16  ;;  %v324_v48 = vand.u32 4294901760, %v323_v39  ;;  %v341_v49 = vsub.f32 %v16072_v32, %v21226_v40  ;;  %v21223_v50 = vand.u32 4294901760, %v16094_v41  ;;  %v16242_v35 = vld [vmem:[#allocation7 + $0x38] sm:$0xff] }
  0x32   :  { %21895 = vst [vmem:[#allocation19_spill] sm:$0xff] %v16097_v42  ;;  %v16118_v51 = vand.u32 4294901760, %v16086_v38  ;;  %161 = vmatpush1.msra.mxu0 %v16034_v17  ;;  %v330_v53 = vand.u32 4294901760, %v329_v43  ;;  %v347_v55 = vsub.f32 %v16081_v36, %v21225_v45  ;;  %v21221_v56 = vand.u32 4294901760, %v16108_v46  ;;  %v16229_v45 = vld [vmem:[#allocation7 + $0x48] sm:$0xff] }
  0x33   :  { %v336_v54 = vand.u32 4294901760, %v335_v44  ;;  %163 = vmatprep.subr.mxu0 %v16036_v18  ;;  %325 = vmatprep.subr.mxu1 %v324_v48  ;;  %v342_v58 = vand.u32 4294901760, %v341_v49  ;;  %v353_v59 = vsub.f32 %v16094_v41, %v21223_v50  ;;  %v16134_v60 = vsub.f32 %v117_v14, %v16034_v17 }
  0x34   :  { %21896 = vst [vmem:[#allocation20_spill] sm:$0xff] %v16118_v51  ;;  %v16137_v61 = vand.u32 4294901760, %v16110_v47  ;;  %165 = vmatpush1.msra.mxu0 %v16049_v23  ;;  %331 = vmatpush1.msra.mxu1 %v330_v53  ;;  %v348_v63 = vand.u32 4294901760, %v347_v55  ;;  %v359_v1 = vsub.f32 %v16108_v46, %v21221_v56  ;;  %v16146_v2 = vsub.f32 %v115_v15, %v16036_v18  ;;  %v16162_v15 = vld [vmem:[#allocation7 + $0x78] sm:$0xff] }
  0x35   :  { %v16149_v3 = vand.u32 4294901760, %v16120_v52  ;;  %167 = vmatprep.subr.mxu0 %v16055_v25  ;;  %337 = vmatprep.subr.mxu1 %v336_v54  ;;  %v354_v8 = vand.u32 4294901760, %v353_v59  ;;  %v21220_v9 = vand.u32 4294901760, %v16134_v60  ;;  %v16157_v13 = vsub.f32 %v16041_v20, %v16049_v23 }
  0x36   :  { %21897 = vst [vmem:[#allocation21_spill] sm:$0xff] %v16137_v61  ;;  %v16160_v14 = vand.u32 4294901760, %v16127_v57  ;;  %169 = vmatpush1.msra.mxu0 %v16069_v31  ;;  %343 = vmatpush1.msra.mxu1 %v342_v58  ;;  %v360_v39 = vand.u32 4294901760, %v359_v1  ;;  %v21219_v43 = vand.u32 4294901760, %v16146_v2  ;;  %v16168_v44 = vsub.f32 %v16043_v21, %v16055_v25  ;;  %v16185_v21 = vld [vmem:[#allocation7 + $0x68] sm:$0xff] }
  0x37   :  { %21898 = vst [vmem:[#allocation22_spill] sm:$0xff] %v16149_v3  ;;  %v16171_v48 = vand.u32 4294901760, %v16139_v62  ;;  %171 = vmatprep.subr.mxu0 %v16075_v33  ;;  %349 = vmatprep.subr.mxu1 %v348_v63  ;;  %v365_v20 = vsub.f32 %v16134_v60, %v21220_v9  ;;  %v21222_v49 = vand.u32 4294901760, %v16157_v13  ;;  %v16180_v53 = vsub.f32 %v16045_v22, %v16069_v31  ;;  %v16208_v9 = vld [vmem:[#allocation7 + $0x60] sm:$0xff] }
  0x38   :  { %21899 = vst [vmem:[#allocation23_spill] sm:$0xff] %v16160_v14  ;;  %v16183_v54 = vand.u32 4294901760, %v16151_v7  ;;  %173 = vmatpush1.msra.mxu0 %v16084_v37  ;;  %355 = vmatpush1.msra.mxu1 %v354_v8  ;;  %v371_v55 = vsub.f32 %v16146_v2, %v21219_v43  ;;  %v21224_v58 = vand.u32 4294901760, %v16168_v44  ;;  %v16194_v59 = vsub.f32 %v16060_v27, %v16075_v33  ;;  %v74_v33 = vld [vmem:[#allocation4] sm:$0xff] }
  0x39   :  { %21900 = vst [vmem:[#allocation24_spill] sm:$0xff] %v16171_v48  ;;  %v16197_v22 = vand.u32 4294901760, %v16162_v15  ;;  %175 = vmatprep.subr.mxu0 %v16097_v42  ;;  %361 = vmatprep.subr.mxu1 %v360_v39  ;;  %v366_v63 = vand.u32 4294901760, %v365_v20  ;;  %v377_v1 = vsub.f32 %v16157_v13, %v21222_v49  ;;  %v21227_v8 = vand.u32 4294901760, %v16180_v53  ;;  %v16218_v49 = vld [vmem:[#allocation7 + $0x50] sm:$0xff] }
  0x3a   :  { %21901 = vst [vmem:[#allocation25_spill] sm:$0xff] %v16183_v54  ;;  %v16206_v43 = vsub.f32 %v16062_v28, %v16084_v37  ;;  %177 = vmatpush1.msra.mxu0 %v16118_v51  ;;  %v372_v27 = vand.u32 4294901760, %v371_v55  ;;  %v383_v39 = vsub.f32 %v16168_v44, %v21224_v58  ;;  %v21229_v20 = vand.u32 4294901760, %v16194_v59 }
  0x3b   :  { %21902 = vst [vmem:[#allocation26_spill] sm:$0xff] %v16197_v22  ;;  %v16216_v56 = vand.u32 4294901760, %v16185_v21  ;;  %367 = vmatpush1.msra.mxu1 %v366_v63  ;;  %179 = vmatprep.subr.mxu0 %v16137_v61  ;;  %v378_v28 = vand.u32 4294901760, %v377_v1  ;;  %v389_v50 = vsub.f32 %v16180_v53, %v21227_v8  ;;  %v16227_v58 = vsub.f32 %v16064_v29, %v16097_v42 }
  0x3c   :  { %v21232_v55 = vand.u32 4294901760, %v16206_v43  ;;  %373 = vmatprep.subr.mxu1 %v372_v27  ;;  %181 = vmatpush1.msra.mxu0 %v16149_v3  ;;  %v384_v40 = vand.u32 4294901760, %v383_v39  ;;  %v395_v63 = vsub.f32 %v16194_v59, %v21229_v20  ;;  %v16236_v1 = vand.u32 4294901760, %v16208_v9 }
  0x3d   :  { %21903 = vst [vmem:[#allocation27_spill] sm:$0xff] %v16216_v56  ;;  %v16240_v8 = vsub.f32 %v16086_v38, %v16118_v51  ;;  %379 = vmatpush1.msra.mxu1 %v378_v28  ;;  %183 = vmatprep.subr.mxu0 %v16160_v14  ;;  %v390_v29 = vand.u32 4294901760, %v389_v50  ;;  %v21237_v39 = vand.u32 4294901760, %v16227_v58  ;;  %v16250_v20 = vand.u32 4294901760, %v16218_v49 }
  0x3e   :  { %v401_v27 = vsub.f32 %v16206_v43, %v21232_v55  ;;  %385 = vmatprep.subr.mxu1 %v384_v40  ;;  %185 = vmatpush1.msra.mxu0 %v16171_v48  ;;  %v396_v38 = vand.u32 4294901760, %v395_v63  ;;  %v16258_v50 = vsub.f32 %v16110_v47, %v16137_v61  ;;  %v16261_v30 = vand.u32 4294901760, %v16229_v45  ;;  %v16263_v55 = vld [vmem:[#allocation7 + $0x20] sm:$0xff] }
  0x3f   :  { %21904 = vst [vmem:[#allocation28_spill] sm:$0xff] %v16250_v20  ;;  %v21240_v28 = vand.u32 4294901760, %v16240_v8  ;;  %391 = vmatpush1.msra.mxu1 %v390_v29  ;;  %187 = vmatprep.subr.mxu0 %v16183_v54  ;;  %v407_v40 = vsub.f32 %v16227_v58, %v21237_v39  ;;  %v16271_v63 = vsub.f32 %v16120_v52, %v16149_v3  ;;  %v16274_v47 = vand.u32 4294901760, %v16242_v35  ;;  %v16288_v52 = vld [vmem:[#allocation7 + $0x18] sm:$0xff] }
  0x40   :  { %21905 = vst [vmem:[#allocation29_spill] sm:$0xff] %v16261_v30  ;;  %v402_v0 = vand.u32 4294901760, %v401_v27  ;;  %397 = vmatprep.subr.mxu1 %v396_v38  ;;  %189 = vmatpush1.msra.mxu0 %v16197_v22  ;;  %v16283_v61 = vsub.f32 %v16127_v57, %v16160_v14  ;;  %v16286_v39 = vand.u32 4294901760, %v16252_v34  ;;  %v16297_v27 = vand.u32 4294901760, %v16263_v55  ;;  %v16299_v57 = vld [vmem:[#allocation7 + $0x8] sm:$0xff] }
  0x41   :  { %21906 = vst [vmem:[#allocation30_spill] sm:$0xff] %v16274_v47  ;;  %v413_v29 = vsub.f32 %v16240_v8, %v21240_v28  ;;  %191 = vmatprep.subr.mxu0 %v16216_v56  ;;  %v408_v38 = vand.u32 4294901760, %v407_v40  ;;  %v16294_v28 = vsub.f32 %v16139_v62, %v16171_v48  ;;  %v21909_v51 = vand.u32 4294901760, %v16258_v50  ;;  %v16322_v40 = vld [vmem:[#allocation7] sm:$0xff] }
  0x42   :  { %21907 = vst [vmem:[#allocation31_spill] sm:$0xff] %v16286_v39  ;;  %403 = vmatpush1.msra.mxu1 %v402_v0  ;;  %21908 = vst [vmem:[#allocation32_spill] sm:$0xff] %v16297_v27  ;;  %193 = vmatpush1.msra.mxu0 %v16236_v1  ;;  %v16308_v3 = vsub.f32 %v16151_v7, %v16183_v54  ;;  %v21910_v62 = vand.u32 4294901760, %v16271_v63  ;;  %v16330_v42 = vand.u32 4294901760, %v16299_v57  ;;  %v16346_v31 = vand.u32 4294901760, %v16322_v40 }
  0x43   :  { %v414_v14 = vand.u32 4294901760, %v413_v29  ;;  %v419_v0 = vsub.f32 %v16258_v50, %v21909_v51  ;;  %409 = vmatprep.subr.mxu1 %v408_v38  ;;  %195 = vmatprep.subr.mxu0 %v16250_v20  ;;  %v16316_v29 = vand.u32 4294901760, %v16288_v52  ;;  %v16320_v51 = vsub.f32 %v16162_v15, %v16197_v22 }
  0x44   :  { %v425_v48 = vsub.f32 %v16271_v63, %v21910_v62  ;;  %197 = vmatpush1.msra.mxu0 %v16261_v30  ;;  %v21913_v38 = vand.u32 4294901760, %v16283_v61  ;;  %v21259_v62 = vand.u32 4294901760, %v16308_v3  ;;  %21914 = vst [vmem:[#allocation35_spill] sm:$0xff] %v16330_v42  ;;  %v21915_v15 = vand.u32 4294901760, %v16294_v28 }
  0x45   :  { %21911 = vst [vmem:[#allocation33_spill] sm:$0xff] %v16316_v29  ;;  %21912 = vst [vmem:[#allocation34_spill] sm:$0xff] %v16320_v51  ;;  %415 = vmatpush1.msra.mxu1 %v414_v14  ;;  %v420_v7 = vand.u32 4294901760, %v419_v0  ;;  %199 = vmatprep.subr.mxu0 %v16274_v47  ;;  %v16339_v0 = vsub.f32 %v16185_v21, %v16216_v56  ;;  %v21917_v21 = vand.u32 4294901760, %v16320_v51 }
  0x46   :  { %v431_v54 = vsub.f32 %v16283_v61, %v21913_v38  ;;  %v426_v37 = vand.u32 4294901760, %v425_v48  ;;  %v437_v22 = vsub.f32 %v16294_v28, %v21915_v15  ;;  %201 = vmatpush1.msra.mxu0 %v16286_v39  ;;  %v443_v48 = vsub.f32 %v16308_v3, %v21259_v62 }
  0x47   :  { %21916 = vst [vmem:[#allocation36_spill] sm:$0xff] %v16339_v0  ;;  %421 = vmatprep.subr.mxu1 %v420_v7  ;;  %v16350_v15 = vsub.f32 %v16208_v9, %v16236_v1  ;;  %203 = vmatprep.subr.mxu0 %v16297_v27  ;;  %v21262_v7 = vand.u32 4294901760, %v16339_v0  ;;  %v16359_v62 = vsub.f32 %v16218_v49, %v16250_v20 }
  0x48   :  { %v432_v38 = vand.u32 4294901760, %v431_v54  ;;  %427 = vmatpush1.msra.mxu1 %v426_v37  ;;  %v438_v14 = vand.u32 4294901760, %v437_v22  ;;  %v449_v54 = vsub.f32 %v16320_v51, %v21917_v21  ;;  %v444_v56 = vand.u32 4294901760, %v443_v48  ;;  %205 = vmatpush1.msra.mxu0 %v16316_v29 }
  0x49   :  { %v21265_v9 = vand.u32 4294901760, %v16350_v15  ;;  %v16363_v37 = vand.u32 4294901760, %v74_v33  ;;  %v16367_v22 = vsub.f32 %v16229_v45, %v16261_v30  ;;  %207 = vmatprep.subr.mxu0 %v16330_v42  ;;  %v455_v49 = vsub.f32 %v16339_v0, %v21262_v7 }
  0x4a   :  { %433 = vmatprep.subr.mxu1 %v432_v38  ;;  %v450_v21 = vand.u32 4294901760, %v449_v54  ;;  %v16376_v48 = vsub.f32 %v16242_v35, %v16274_v47  ;;  %209 = vmatpush1.msra.mxu0 %v16346_v31  ;;  %v16388_v7 = vsub.f32 %v16252_v34, %v16286_v39  ;;  %v21920_v35 = vand.u32 4294901760, %v16359_v62 }
  0x4b   :  { %21918 = vst [vmem:[#allocation37_spill] sm:$0xff] %v16363_v37  ;;  %439 = vmatpush1.msra.mxu1 %v438_v14  ;;  %v461_v45 = vsub.f32 %v16350_v15, %v21265_v9  ;;  %v16383_v14 = vsub.f32 %v74_v33, %v16363_v37  ;;  %v456_v38 = vand.u32 4294901760, %v455_v49  ;;  %596 = vmatprep.subr.mxu0 %v16039_v19  ;;  %v21922_v34 = vand.u32 4294901760, %v16367_v22 }
  0x4c   :  { %445 = vmatprep.subr.mxu1 %v444_v56  ;;  %v467_v56 = vsub.f32 %v16359_v62, %v21920_v35  ;;  %v21272_v47 = vand.u32 4294901760, %v16376_v48  ;;  %v16397_v33 = vsub.f32 %v16263_v55, %v16297_v27  ;;  %v21278_v49 = vand.u32 4294901760, %v16388_v7 }
  0x4d   :  { %21919 = vst [vmem:[#allocation38_spill] sm:$0xff] %v16383_v14  ;;  %451 = vmatpush1.msra.mxu1 %v450_v21  ;;  %v462_v9 = vand.u32 4294901760, %v461_v45  ;;  %v16400_v54 = vand.u32 4294901760, %v16383_v14  ;;  %v473_v21 = vsub.f32 %v16367_v22, %v21922_v34  ;;  %v16412_v55 = vsub.f32 %v16288_v52, %v16316_v29  ;;  %v75_v45 = vld [vmem:[#allocation4 + $0x8] sm:$0xff] }
  0x4e   :  { %457 = vmatprep.subr.mxu1 %v456_v38  ;;  %v468_v35 = vand.u32 4294901760, %v467_v56  ;;  %v479_v39 = vsub.f32 %v16376_v48, %v21272_v47  ;;  %v485_v38 = vsub.f32 %v16388_v7, %v21278_v49  ;;  %v16421_v56 = vsub.f32 %v16299_v57, %v16330_v42  ;;  %v76_v47 = vld [vmem:[#allocation4 + $0x10] sm:$0xff] }
  0x4f   :  { %21921 = vst [vmem:[#allocation39_spill] sm:$0xff] %v16400_v54  ;;  %21923 = vst [vmem:[#allocation40_spill] sm:$0xff] %v16412_v55  ;;  %463 = vmatpush1.msra.mxu1 %v462_v9  ;;  %v246_v27 = vsub.f32 %v16383_v14, %v16400_v54  ;;  %v474_v34 = vand.u32 4294901760, %v473_v21  ;;  %v21925_v52 = vand.u32 4294901760, %v16397_v33  ;;  %v21284_v9 = vand.u32 4294901760, %v16412_v55  ;;  %v77_v54 = vld [vmem:[#allocation4 + $0x18] sm:$0xff] }
  0x50   :  { %21924 = vst [vmem:[#allocation41_spill] sm:$0xff] %v16421_v56  ;;  %469 = vmatprep.subr.mxu1 %v468_v35  ;;  %v480_v30 = vand.u32 4294901760, %v479_v39  ;;  %v16429_v21 = vsub.f32 %v16322_v40, %v16346_v31  ;;  %v486_v49 = vand.u32 4294901760, %v485_v38  ;;  %v21283_v57 = vand.u32 4294901760, %v16421_v56 }
  0x51   :  { %v491_v29 = vsub.f32 %v16397_v33, %v21925_v52  ;;  %v16431_v19 = vand.u32 4294901760, %v246_v27  ;;  %475 = vmatpush1.msra.mxu1 %v474_v34  ;;  %v16434_v42 = vand.u32 4294901760, %v75_v45  ;;  %v497_v35 = vsub.f32 %v16412_v55, %v21284_v9 }
  0x52   :  { %21926 = vst [vmem:[#allocation42_spill] sm:$0xff] %v16429_v21  ;;  %481 = vmatprep.subr.mxu1 %v480_v30  ;;  %v21286_v52 = vand.u32 4294901760, %v16429_v21  ;;  %v16440_v20 = vand.u32 4294901760, %v76_v47  ;;  %v503_v27 = vsub.f32 %v16421_v56, %v21283_v57  ;;  %v16449_v30 = vand.u32 4294901760, %v77_v54 }
  0x53   :  { %21927 = vst [vmem:[#allocation43_spill] sm:$0xff] %v16431_v19  ;;  %21928 = vst [vmem:[#allocation44_spill] sm:$0xff] %v16434_v42  ;;  %v492_v39 = vand.u32 4294901760, %v491_v29  ;;  %248 = vmatmul.mubr.f32.vlgmr.msra.gmra.mxu0 %v16431_v19  ;;  %487 = vmatpush1.msra.mxu1 %v486_v49  ;;  %v16447_v40 = vsub.f32 %v75_v45, %v16434_v42  ;;  %v498_v29 = vand.u32 4294901760, %v497_v35  ;;  %v78_v49 = vld [vmem:[#allocation4 + $0x20] sm:$0xff]  ;;  %v21931_v9 = vmov 0.0  }
  0x54   :  { %21929 = vst [vmem:[#allocation45_spill] sm:$0xff] %v16440_v20  ;;  %21930 = vst [vmem:[#allocation46_spill] sm:$0xff] %v16449_v30  ;;  %599 = vmatpush1.msra.mxu0 %v16052_v24  ;;  %v509_v34 = vsub.f32 %v16429_v21, %v21286_v52  ;;  %v16456_v38 = vsub.f32 %v76_v47, %v16440_v20  ;;  %v504_v57 = vand.u32 4294901760, %v503_v27  ;;  %253 = vmatprep.mubr.f32.mxu0 %v21931_v9 }
  0x55   :  { %493 = vmatprep.subr.mxu1 %v492_v39  ;;  %602 = vmatprep.subr.mxu0 %v16058_v26  ;;  %v16461_v45 = vand.u32 4294901760, %v16447_v40  ;;  %v16464_v19 = vsub.f32 %v77_v54, %v16449_v30  ;;  %v16473_v27 = vand.u32 4294901760, %v78_v49 }
  0x56   :  { %605 = vmatpush1.msra.mxu0 %v16072_v32  ;;  %499 = vmatpush1.msra.mxu1 %v498_v29  ;;  %v510_v39 = vand.u32 4294901760, %v509_v34  ;;  %v16468_v35 = vand.u32 4294901760, %v16456_v38 }
  0x57   :  { %608 = vmatprep.subr.mxu0 %v16081_v36  ;;  %505 = vmatprep.subr.mxu1 %v504_v57  ;;  %v257_v47 = vsub.f32 %v16447_v40, %v16461_v45  ;;  %21933 = vst [vmem:[#allocation48_spill] sm:$0xff] %v16473_v27  ;;  %v16483_v34 = vand.u32 4294901760, %v16464_v19  ;;  %v79_v57 = vld [vmem:[#allocation4 + $0x28] sm:$0xff]  ;;  %v16492_v52 = vsub.f32 %v78_v49, %v16473_v27 }
  0x58   :  { %21932 = vst [vmem:[#allocation47_spill] sm:$0xff] %v16468_v35  ;;  %611 = vmatpush1.msra.mxu0 %v16094_v41  ;;  %511 = vmatpush1.msra.mxu1 %v510_v39  ;;  %v268_v54 = vsub.f32 %v16456_v38, %v16468_v35 }
  0x59   :  { %614 = vmatprep.subr.mxu0 %v16108_v46  ;;  %v16479_v29 = vand.u32 4294901760, %v257_v47  ;;  %546 = vmatmul.mubr.f32.vlgmr.msra.gmra.mxu1 %v16363_v37  ;;  %21935 = vst [vmem:[#allocation50_spill] sm:$0xff] %v16483_v34  ;;  %v279_v47 = vsub.f32 %v16464_v19, %v16483_v34  ;;  %v16500_v37 = vand.u32 4294901760, %v79_v57  ;;  %v16507_v49 = vand.u32 4294901760, %v16492_v52 }
  0x5a   :  { %617 = vmatpush1.msra.mxu0 %v16134_v60  ;;  %780 = vmatprep.subr.mxu1 %v16019_v4  ;;  %v16489_v39 = vand.u32 4294901760, %v268_v54  ;;  %v80_v54 = vld [vmem:[#allocation4 + $0x30] sm:$0xff] }
  0x5b   :  { %21934 = vst [vmem:[#allocation49_spill] sm:$0xff] %v16479_v29  ;;  %259 = vmatmul.mubr.f32.gmra.mxu0 %v16479_v29  ;;  %620 = vmatprep.subr.mxu0 %v16146_v2  ;;  %21937 = vst [vmem:[#allocation52_spill] sm:$0xff] %v16500_v37  ;;  %v16513_v29 = vand.u32 4294901760, %v279_v47  ;;  %v16516_v34 = vsub.f32 %v79_v57, %v16500_v37  ;;  %v16524_v35 = vand.u32 4294901760, %v80_v54 }
  0x5c   :  { %21936 = vst [vmem:[#allocation51_spill] sm:$0xff] %v16489_v39  ;;  %623 = vmatpush1.msra.mxu0 %v16157_v13  ;;  %782 = vmatpush1.msra.mxu1 %v16021_v5  ;;  %21938 = vst [vmem:[#allocation53_spill] sm:$0xff] %v16507_v49 }
  0x5d   :  { %626 = vmatprep.subr.mxu0 %v16168_v44  ;;  %784 = vmatprep.subr.mxu1 %v16023_v6  ;;  %21939 = vst [vmem:[#allocation54_spill] sm:$0xff] %v16513_v29  ;;  %21940 = vst [vmem:[#allocation55_spill] sm:$0xff] %v16524_v35  ;;  %v16531_v57 = vand.u32 4294901760, %v16516_v34 }
  0x5e   :  { %264 = vmatprep.mubr.f32.mxu0 %v21931_v9  ;;  %629 = vmatpush1.msra.mxu0 %v16180_v53 }
  0x5f   :  { %786 = vmatpush1.msra.mxu1 %v16025_v10  ;;  %270 = vmatmul.mubr.f32.gmra.mxu0 %v16489_v39  ;;  %v290_v39 = vsub.f32 %v16492_v52, %v16507_v49  ;;  %21941 = vst [vmem:[#allocation56_spill] sm:$0xff] %v16531_v57  ;;  %v21945_v49 = vld [vmem:[#allocation17_spill] sm:$0xff] }
  0x60   :  { %632 = vmatprep.subr.mxu0 %v16194_v59  ;;  %788 = vmatprep.subr.mxu1 %v16027_v11 }
  0x61   :  { %635 = vmatpush1.msra.mxu0 %v16206_v43  ;;  %790 = vmatpush1.msra.mxu1 %v16029_v12  ;;  %v16537_v47 = vand.u32 4294901760, %v290_v39  ;;  %v21943_v39 = vld [vmem:[#allocation16_spill] sm:$0xff] }
  0x62   :  { %551 = vmatprep.mubr.f32.mxu1 %v21931_v9  ;;  %638 = vmatprep.subr.mxu0 %v16227_v58 }
  0x63   :  { %792 = vmatprep.subr.mxu1 %v16032_v16  ;;  %275 = vmatprep.mubr.f32.mxu0 %v21931_v9  ;;  %21942 = vst [vmem:[#allocation57_spill] sm:$0xff] %v16537_v47 }
  0x64   :  { %553 = vmatmul.mubr.f32.gmra.mxu1 %v16434_v42  ;;  %641 = vmatpush1.msra.mxu0 %v16240_v8  ;;  %v16540_v42 = vsub.f32 %v80_v54, %v16524_v35 }
  0x65   :  { %794 = vmatpush1.msra.mxu1 %v16034_v17  ;;  %281 = vmatmul.mubr.f32.gmra.mxu0 %v16513_v29  ;;  %v301_v29 = vsub.f32 %v16516_v34, %v16531_v57 }
  0x66   :  { %644 = vmatprep.subr.mxu0 %v16258_v50  ;;  %796 = vmatprep.subr.mxu1 %v16036_v18  ;;  %v16553_v54 = vand.u32 4294901760, %v16540_v42 }
  0x67   :  { %647 = vmatpush1.msra.mxu0 %v16271_v63  ;;  %798 = vmatpush1.msra.mxu1 %v16049_v23  ;;  %v16559_v57 = vand.u32 4294901760, %v301_v29  ;;  %v21950_v29 = vld [vmem:[#allocation21_spill] sm:$0xff] }
  0x68   :  { %558 = vmatprep.mubr.f32.mxu1 %v21931_v9  ;;  %650 = vmatprep.subr.mxu0 %v16283_v61  ;;  %21944 = vst [vmem:[#allocation16_spill] sm:$0xff] %v16553_v54 }
  0x69   :  { %800 = vmatprep.subr.mxu1 %v16055_v25  ;;  %286 = vmatprep.mubr.f32.mxu0 %v21931_v9  ;;  %v21946_v25 = vld [vmem:[#allocation18_spill] sm:$0xff]  ;;  %21947 = vst [vmem:[#allocation17_spill] sm:$0xff] %v16559_v57 }
  0x6a   :  { %560 = vmatmul.mubr.f32.gmra.mxu1 %v16440_v20  ;;  %653 = vmatpush1.msra.mxu0 %v16294_v28  ;;  %v21948_v20 = vld [vmem:[#allocation19_spill] sm:$0xff] }
  0x6b   :  { %802 = vmatpush1.msra.mxu1 %v21943_v39  ;;  %292 = vmatmul.mubr.f32.gmra.mxu0 %v16537_v47  ;;  %v312_v47 = vsub.f32 %v16540_v42, %v16553_v54  ;;  %v21956_v54 = vld [vmem:[#allocation26_spill] sm:$0xff] }
  0x6c   :  { %656 = vmatprep.subr.mxu0 %v16308_v3  ;;  %804 = vmatprep.subr.mxu1 %v21945_v49 }
  0x6d   :  { %659 = vmatpush1.msra.mxu0 %v16320_v51  ;;  %806 = vmatpush1.msra.mxu1 %v21946_v25  ;;  %v21949_v51 = vld [vmem:[#allocation20_spill] sm:$0xff] }
  0x6e   :  { %565 = vmatprep.mubr.f32.mxu1 %v21931_v9  ;;  %662 = vmatprep.subr.mxu0 %v16339_v0  ;;  %v16575_v0 = vand.u32 4294901760, %v312_v47  ;;  %v21955_v47 = vld [vmem:[#allocation25_spill] sm:$0xff] }
  0x6f   :  { %808 = vmatprep.subr.mxu1 %v21948_v20  ;;  %297 = vmatprep.mubr.f32.mxu0 %v21931_v9  ;;  %v21951_v20 = vld [vmem:[#allocation22_spill] sm:$0xff] }
  0x70   :  { %567 = vmatmul.mubr.f32.gmra.mxu1 %v16449_v30  ;;  %665 = vmatpush1.msra.mxu0 %v16350_v15  ;;  %21952 = vst [vmem:[#allocation18_spill] sm:$0xff] %v16575_v0  ;;  %v21953_v30 = vld [vmem:[#allocation23_spill] sm:$0xff] }
  0x71   :  { %810 = vmatpush1.msra.mxu1 %v21949_v51  ;;  %303 = vmatmul.mubr.f32.gmra.mxu0 %v16559_v57  ;;  %v21954_v57 = vld [vmem:[#allocation24_spill] sm:$0xff] }
  0x72   :  { %668 = vmatprep.subr.mxu0 %v16359_v62  ;;  %812 = vmatprep.subr.mxu1 %v21950_v29 }
  0x73   :  { %671 = vmatpush1.msra.mxu0 %v16367_v22  ;;  %814 = vmatpush1.msra.mxu1 %v21951_v20 }
  0x74   :  { %572 = vmatprep.mubr.f32.mxu1 %v21931_v9  ;;  %674 = vmatprep.subr.mxu0 %v16376_v48 }
  0x75   :  { %816 = vmatprep.subr.mxu1 %v21953_v30  ;;  %308 = vmatprep.mubr.f32.mxu0 %v21931_v9  ;;  %v21957_v30 = vld [vmem:[#allocation27_spill] sm:$0xff] }
  0x76   :  { %574 = vmatmul.mubr.f32.gmra.mxu1 %v16473_v27  ;;  %677 = vmatpush1.msra.mxu0 %v16388_v7  ;;  %v21959_v27 = vld [vmem:[#allocation14_spill] sm:$0xff] }
  0x77   :  { %818 = vmatpush1.msra.mxu1 %v21954_v57  ;;  %314 = vmatmul.mubr.f32.gmra.mxu0 %v16575_v0  ;;  %v21958_v0 = vld [vmem:[#allocation28_spill] sm:$0xff] }
  0x78   :  { %680 = vmatprep.subr.mxu0 %v16397_v33  ;;  %820 = vmatprep.subr.mxu1 %v21955_v47 }
  0x79   :  { %683 = vmatpush1.msra.mxu0 %v16412_v55  ;;  %822 = vmatpush1.msra.mxu1 %v21956_v54  ;;  %v21960_v54 = vand.u32 4294901760, %v21959_v27  ;;  %v21961_v55 = vld [vmem:[#allocation29_spill] sm:$0xff]  ;;  %v21966_v27 = vand.u32 4294901760, %v16072_v32  ;;  %v21973_v32 = vand.u32 4294901760, %v16134_v60  ;;  %v21978_v60 = vand.u32 4294901760, %v16180_v53 }
  0x7a   :  { %579 = vmatprep.mubr.f32.mxu1 %v21931_v9  ;;  %686 = vmatprep.subr.mxu0 %v16421_v56  ;;  %v21962_v56 = vand.u32 4294901760, %v16052_v24  ;;  %v21968_v24 = vand.u32 4294901760, %v16081_v36  ;;  %v21974_v36 = vld [vmem:[#allocation39_spill] sm:$0xff] }
  0x7b   :  { %824 = vmatprep.subr.mxu1 %v21957_v30  ;;  %581 = vmatmul.mubr.f32.gmra.mxu1 %v16500_v37  ;;  %v21963_v37 = vld [vmem:[#allocation30_spill] sm:$0xff] }
  0x7c   :  { %689 = vmatpush1.msra.mxu0 %v16429_v21  ;;  %722 = vmatprep.mubr.f32.mxu0 %v21931_v9  ;;  %v21964_v21 = vand.u32 4294901760, %v16058_v26  ;;  %v21970_v26 = vand.u32 4294901760, %v16094_v41  ;;  %v21975_v41 = vand.u32 4294901760, %v16146_v2  ;;  %v21986_v2 = vand.u32 4294901760, %v16283_v61  ;;  %v21991_v61 = vld [vmem:[#allocation34_spill] sm:$0xff] }
  0x7d   :  { %826 = vmatpush1.msra.mxu1 %v16236_v1  ;;  %725 = vmatmul.mubr.f32.vlgmr.msra.gmra.mxu0 %v16383_v14  ;;  %v21965_v14 = vld [vmem:[#allocation31_spill] sm:$0xff] }
  0x7e   :  { %828 = vmatprep.subr.mxu1 %v21958_v0  ;;  %942 = vmatprep.subr.mxu0 %v21960_v54  ;;  %v21967_v54 = vld [vmem:[#allocation32_spill] sm:$0xff] }
  0x7f   :  { %830 = vmatpush1.msra.mxu1 %v21961_v55  ;;  %946 = vmatpush1.msra.mxu0 %v21962_v56  ;;  %v21969_v56 = vld [vmem:[#allocation33_spill] sm:$0xff] }
  0x80   :  { %586 = vmatprep.mubr.f32.mxu1 %v21931_v9  ;;  %832 = vmatprep.subr.mxu1 %v21963_v37 }
  0x81   :  { %950 = vmatprep.subr.mxu0 %v21964_v21  ;;  %588 = vmatmul.mubr.f32.gmra.mxu1 %v16524_v35  ;;  %v21971_v21 = vld [vmem:[#allocation35_spill] sm:$0xff]  ;;  %v21972_v35 = vand.u32 4294901760, %v16108_v46  ;;  %v21976_v46 = vand.u32 4294901760, %v16157_v13 }
  0x82   :  { %730 = vmatprep.mubr.f32.mxu0 %v21931_v9  ;;  %834 = vmatpush1.msra.mxu1 %v21965_v14  ;;  %v21987_v13 = vld [vmem:[#allocation15_spill] sm:$0xff] }
  0x83   :  { %954 = vmatpush1.msra.mxu0 %v21966_v27  ;;  %836 = vmatprep.subr.mxu1 %v21967_v54  ;;  %v22008_v27 = vld [vmem:[#allocation41_spill] sm:$0xff] }
  0x84   :  { %733 = vmatmul.mubr.f32.gmra.mxu0 %v16447_v40  ;;  %958 = vmatprep.subr.mxu0 %v21968_v24  ;;  %v22009_v24 = vand.u32 4294901760, %v22008_v27 }
  0x85   :  { %838 = vmatpush1.msra.mxu1 %v21969_v56  ;;  %962 = vmatpush1.msra.mxu0 %v21970_v26 }
  0x86   :  { %840 = vmatprep.subr.mxu1 %v21971_v21  ;;  %966 = vmatprep.subr.mxu0 %v21972_v35  ;;  %v21977_v35 = vand.u32 4294901760, %v16168_v44  ;;  %v21993_v44 = vld [vmem:[#allocation36_spill] sm:$0xff] }
  0x87   :  { %738 = vmatprep.mubr.f32.mxu0 %v21931_v9  ;;  %842 = vmatpush1.msra.mxu1 %v16346_v31  ;;  %v21994_v53 = vand.u32 4294901760, %v21993_v44 }
  0x88   :  { %875 = vmatprep.mubr.f32.mxu1 %v21931_v9  ;;  %970 = vmatpush1.msra.mxu0 %v21973_v32  ;;  %v119_v32 = vld [vmem:[#allocation7 + $0x130] sm:$0xff] }
  0x89   :  { %741 = vmatmul.mubr.f32.gmra.mxu0 %v16456_v38  ;;  %879 = vmatmul.mubr.f32.vlgmr.msra.gmra.mxu1 %v21974_v36 }
  0x8a   :  { %974 = vmatprep.subr.mxu0 %v21975_v41  ;;  %1150 = vmatprep.subr.mxu1 %v16019_v4  ;;  %v21979_v4 = vand.u32 4294901760, %v16194_v59  ;;  %v21996_v59 = vand.u32 4294901760, %v16350_v15  ;;  %v125_v15 = vld [vmem:[#allocation7 + $0x160] sm:$0xff]  ;;  %v22012_v41 = vld [vmem:[#allocation16_spill] sm:$0xff] }
  0x8b   :  { %978 = vmatpush1.msra.mxu0 %v21976_v46  ;;  %1152 = vmatpush1.msra.mxu1 %v16021_v5  ;;  %v21980_v5 = vand.u32 4294901760, %v16206_v43  ;;  %v21992_v43 = vand.u32 4294901760, %v21991_v61  ;;  %v22013_v46 = vld [vmem:[#allocation37_spill] sm:$0xff] }
  0x8c   :  { %982 = vmatprep.subr.mxu0 %v21977_v35  ;;  %1154 = vmatprep.subr.mxu1 %v16023_v6  ;;  %v21981_v6 = vand.u32 4294901760, %v16227_v58  ;;  %v21995_v58 = vld [vmem:[#allocation19_spill] sm:$0xff] }
  0x8d   :  { %746 = vmatprep.mubr.f32.mxu0 %v21931_v9  ;;  %884 = vmatprep.mubr.f32.mxu1 %v21931_v9 }
  0x8e   :  { %986 = vmatpush1.msra.mxu0 %v21978_v60  ;;  %1156 = vmatpush1.msra.mxu1 %v16025_v10  ;;  %v21982_v10 = vand.u32 4294901760, %v16240_v8  ;;  %v128_v8 = vld [vmem:[#allocation7 + $0x178] sm:$0xff] }
  0x8f   :  { %749 = vmatmul.mubr.f32.gmra.mxu0 %v16464_v19  ;;  %888 = vmatmul.mubr.f32.gmra.mxu1 %v16461_v45  ;;  %v116_v60 = vld [vmem:[#allocation7 + $0x118] sm:$0xff] }
  0x90   :  { %990 = vmatprep.subr.mxu0 %v21979_v4  ;;  %1158 = vmatprep.subr.mxu1 %v16027_v11  ;;  %v21983_v11 = vld [vmem:[#allocation47_spill] sm:$0xff] }
  0x91   :  { %994 = vmatpush1.msra.mxu0 %v21980_v5  ;;  %1160 = vmatpush1.msra.mxu1 %v16029_v12  ;;  %v21984_v12 = vand.u32 4294901760, %v16258_v50  ;;  %v22000_v50 = vand.u32 4294901760, %v16376_v48  ;;  %v113_v5 = vld [vmem:[#allocation7 + $0x100] sm:$0xff] }
  0x92   :  { %998 = vmatprep.subr.mxu0 %v21981_v6  ;;  %1162 = vmatprep.subr.mxu1 %v16032_v16  ;;  %v21985_v16 = vand.u32 4294901760, %v16271_v63  ;;  %v22001_v63 = vld [vmem:[#allocation23_spill] sm:$0xff]  ;;  %v22014_v6 = vld [vmem:[#allocation44_spill] sm:$0xff] }
  0x93   :  { %754 = vmatprep.mubr.f32.mxu0 %v21931_v9  ;;  %893 = vmatprep.mubr.f32.mxu1 %v21931_v9 }
  0x94   :  { %1002 = vmatpush1.msra.mxu0 %v21982_v10  ;;  %1164 = vmatpush1.msra.mxu1 %v16034_v17  ;;  %v21988_v17 = vand.u32 4294901760, %v16294_v28  ;;  %v21999_v28 = vand.u32 4294901760, %v16367_v22  ;;  %v22003_v22 = vand.u32 4294901760, %v16397_v33 }
  0x95   :  { %757 = vmatmul.mubr.f32.gmra.mxu0 %v16492_v52  ;;  %897 = vmatmul.mubr.f32.gmra.mxu1 %v21983_v11 }
  0x96   :  { %1006 = vmatprep.subr.mxu0 %v21984_v12  ;;  %1166 = vmatprep.subr.mxu1 %v16036_v18  ;;  %v21989_v18 = vld [vmem:[#allocation50_spill] sm:$0xff] }
  0x97   :  { %1010 = vmatpush1.msra.mxu0 %v21985_v16  ;;  %1168 = vmatpush1.msra.mxu1 %v16049_v23  ;;  %v21990_v23 = vand.u32 4294901760, %v16308_v3  ;;  %v21997_v3 = vld [vmem:[#allocation53_spill] sm:$0xff]  ;;  %v110_v16 = vld [vmem:[#allocation7 + $0xe8] sm:$0xff] }
  0x98   :  { %1014 = vmatprep.subr.mxu0 %v21986_v2  ;;  %1170 = vmatprep.subr.mxu1 %v21987_v13  ;;  %v22015_v13 = vld [vmem:[#allocation45_spill] sm:$0xff] }
  0x99   :  { %762 = vmatprep.mubr.f32.mxu0 %v21931_v9  ;;  %902 = vmatprep.mubr.f32.mxu1 %v21931_v9 }
  0x9a   :  { %1018 = vmatpush1.msra.mxu0 %v21988_v17  ;;  %1172 = vmatpush1.msra.mxu1 %v21943_v39  ;;  %v22007_v39 = vld [vmem:[#allocation26_spill] sm:$0xff]  ;;  %v16782_v17 = vand.u32 4294901760, %v110_v16 }
  0x9b   :  { %765 = vmatmul.mubr.f32.gmra.mxu0 %v16516_v34  ;;  %906 = vmatmul.mubr.f32.gmra.mxu1 %v21989_v18 }
  0x9c   :  { %1022 = vmatprep.subr.mxu0 %v21990_v23  ;;  %1174 = vmatprep.subr.mxu1 %v21945_v49  ;;  %v22004_v49 = vld [vmem:[#allocation56_spill] sm:$0xff]  ;;  %v107_v23 = vld [vmem:[#allocation7 + $0xd0] sm:$0xff] }
  0x9d   :  { %1026 = vmatpush1.msra.mxu0 %v21992_v43  ;;  %1176 = vmatpush1.msra.mxu1 %v21946_v25  ;;  %v21998_v25 = vand.u32 4294901760, %v16359_v62  ;;  %v16705_v62 = vand.u32 4294901760, %v128_v8 }
  0x9e   :  { %1030 = vmatprep.subr.mxu0 %v21994_v53  ;;  %1178 = vmatprep.subr.mxu1 %v21995_v58  ;;  %v16796_v53 = vand.u32 4294901760, %v107_v23 }
  0x9f   :  { %770 = vmatprep.mubr.f32.mxu0 %v21931_v9  ;;  %911 = vmatprep.mubr.f32.mxu1 %v21931_v9  ;;  %v16721_v33 = vsub.f32 %v128_v8, %v16705_v62 }
  0xa0   :  { %1034 = vmatpush1.msra.mxu0 %v21996_v59  ;;  %1180 = vmatpush1.msra.mxu1 %v21949_v51  ;;  %v22002_v51 = vand.u32 4294901760, %v16388_v7  ;;  %v122_v7 = vld [vmem:[#allocation7 + $0x148] sm:$0xff]  ;;  %v104_v59 = vld [vmem:[#allocation7 + $0xb8] sm:$0xff] }
  0xa1   :  { %773 = vmatmul.mubr.f32.gmra.mxu0 %v16540_v42  ;;  %915 = vmatmul.mubr.f32.gmra.mxu1 %v21997_v3  ;;  %v16728_v26 = vand.u32 4294901760, %v122_v7  ;;  %v1449_v35 = vand.u32 4294901760, %v16721_v33 }
  0xa2   :  { %1038 = vmatprep.subr.mxu0 %v21998_v25  ;;  %1182 = vmatprep.subr.mxu1 %v21950_v29  ;;  %v16715_v29 = vand.u32 4294901760, %v125_v15  ;;  %v16804_v25 = vsub.f32 %v110_v16, %v16782_v17 }
  0xa3   :  { %1042 = vmatpush1.msra.mxu0 %v21999_v28  ;;  %1184 = vmatpush1.msra.mxu1 %v21951_v20  ;;  %v22005_v20 = vld [vmem:[#allocation40_spill] sm:$0xff]  ;;  %v16745_v4 = vsub.f32 %v122_v7, %v16728_v26 }
  0xa4   :  { %1046 = vmatprep.subr.mxu0 %v22000_v50  ;;  %1186 = vmatprep.subr.mxu1 %v22001_v63  ;;  %v22006_v48 = vand.u32 4294901760, %v22005_v20  ;;  %v22016_v50 = vld [vmem:[#allocation46_spill] sm:$0xff]  ;;  %v16810_v63 = vand.u32 4294901760, %v104_v59 }
  0xa5   :  { %920 = vmatprep.mubr.f32.mxu1 %v21931_v9  ;;  %1050 = vmatpush1.msra.mxu0 %v22002_v51 }
  0xa6   :  { %1188 = vmatpush1.msra.mxu1 %v21954_v57  ;;  %1054 = vmatprep.subr.mxu0 %v22003_v22  ;;  %v22010_v57 = vld [vmem:[#allocation42_spill] sm:$0xff]  ;;  %v16818_v22 = vsub.f32 %v107_v23, %v16796_v53 }
  0xa7   :  { %924 = vmatmul.mubr.f32.gmra.mxu1 %v22004_v49  ;;  %1190 = vmatprep.subr.mxu1 %v21955_v47  ;;  %v22011_v47 = vand.u32 4294901760, %v22010_v57 }
  0xa8   :  { %1058 = vmatpush1.msra.mxu0 %v22006_v48  ;;  %1192 = vmatpush1.msra.mxu1 %v22007_v39  ;;  %v98_v48 = vld [vmem:[#allocation7 + $0x88] sm:$0xff]  ;;  %v21325_v39 = vand.u32 4294901760, %v16804_v25 }
  0xa9   :  { %1062 = vmatprep.subr.mxu0 %v22009_v24  ;;  %1194 = vmatprep.subr.mxu1 %v21957_v30  ;;  %v16733_v30 = vsub.f32 %v125_v15, %v16715_v29  ;;  %v101_v15 = vld [vmem:[#allocation7 + $0xa0] sm:$0xff]  ;;  %v16832_v24 = vsub.f32 %v104_v59, %v16810_v63 }
  0xaa   :  { %929 = vmatprep.mubr.f32.mxu1 %v21931_v9  ;;  %1066 = vmatpush1.msra.mxu0 %v22011_v47  ;;  %v16824_v7 = vand.u32 4294901760, %v101_v15  ;;  %v16835_v47 = vand.u32 4294901760, %v98_v48 }
  0xab   :  { %1099 = vmatprep.mubr.f32.mxu0 %v21931_v9  ;;  %1196 = vmatpush1.msra.mxu1 %v16236_v1  ;;  %v16740_v1 = vand.u32 4294901760, %v119_v32  ;;  %v21326_v23 = vand.u32 4294901760, %v16832_v24 }
  0xac   :  { %933 = vmatmul.mubr.f32.gmra.mxu1 %v22012_v41  ;;  %1101 = vmatmul.mubr.f32.vlgmr.msra.gmra.mxu0 %v22013_v46 }
  0xad   :  { %1198 = vmatprep.subr.mxu1 %v21958_v0  ;;  %13994 = vmatprep.subr.mxu0 %v21931_v9  ;;  %v21333_v0 = vand.u32 4294901760, %v16733_v30  ;;  %v16760_v10 = vsub.f32 %v119_v32, %v16740_v1  ;;  %v95_v32 = vld [vmem:[#allocation7 + $0x70] sm:$0xff] }
  0xae   :  { %1200 = vmatpush1.msra.mxu1 %v21961_v55  ;;  %13995 = vmatpush3.msra.mxu0 %v16705_v62  ;;  %v16752_v55 = vand.u32 4294901760, %v116_v60 }
  0xaf   :  { %1202 = vmatprep.subr.mxu1 %v21963_v37  ;;  %13996 = vmatprep.subr.mxu0 %v21931_v9  ;;  %v1450_v37 = vsub.f32 %v16721_v33, %v1449_v35  ;;  %v1457_v12 = vsub.f32 %v16733_v30, %v21333_v0 }
  0xb0   :  { %1106 = vmatprep.mubr.f32.mxu0 %v21931_v9  ;;  %1204 = vmatpush1.msra.mxu1 %v21965_v14  ;;  %v21332_v14 = vand.u32 4294901760, %v16745_v4 }
  0xb1   :  { %13997 = vmatpush3.msra.mxu0 %v16715_v29  ;;  %1206 = vmatprep.subr.mxu1 %v21967_v54  ;;  %v16767_v54 = vand.u32 4294901760, %v113_v5  ;;  %v1451_v2 = vand.u32 4294901760, %v1450_v37  ;;  %v1458_v43 = vand.u32 4294901760, %v1457_v12  ;;  %v22017_v37 = vld [vmem:[#allocation48_spill] sm:$0xff]  ;;  %v16846_v12 = vsub.f32 %v101_v15, %v16824_v7 }
  0xb2   :  { %1108 = vmatmul.mubr.f32.gmra.mxu0 %v22014_v6  ;;  %13998 = vmatprep.subr.mxu0 %v21931_v9 }
  0xb3   :  { %1208 = vmatpush1.msra.mxu1 %v21969_v56  ;;  %13999 = vmatpush3.msra.mxu0 %v16728_v26  ;;  %v16775_v56 = vsub.f32 %v116_v60, %v16752_v55  ;;  %v16790_v61 = vsub.f32 %v113_v5, %v16767_v54  ;;  %v21324_v60 = vand.u32 4294901760, %v16818_v22  ;;  %v1492_v5 = vsub.f32 %v16804_v25, %v21325_v39  ;;  %v83_v39 = vld [vmem:[#allocation7 + $0x10] sm:$0xff] }
  0xb4   :  { %1210 = vmatprep.subr.mxu1 %v21971_v21  ;;  %14000 = vmatprep.subr.mxu0 %v21931_v9  ;;  %v21330_v21 = vand.u32 4294901760, %v16760_v10  ;;  %v21329_v15 = vand.u32 4294901760, %v16846_v12 }
  0xb5   :  { %1113 = vmatprep.mubr.f32.mxu0 %v21931_v9  ;;  %1212 = vmatpush1.msra.mxu1 %v16346_v31  ;;  %v1464_v31 = vsub.f32 %v16745_v4, %v21332_v14  ;;  %v21328_v44 = vand.u32 4294901760, %v16775_v56  ;;  %v21327_v28 = vand.u32 4294901760, %v16790_v61  ;;  %v1493_v59 = vand.u32 4294901760, %v1492_v5 }
  0xb6   :  { %1245 = vmatprep.mubr.f32.mxu1 %v21931_v9  ;;  %14001 = vmatpush3.msra.mxu0 %v16740_v1  ;;  %v1471_v58 = vsub.f32 %v16760_v10, %v21330_v21  ;;  %v22019_v21 = vld [vmem:[#allocation55_spill] sm:$0xff] }
  0xb7   :  { %1115 = vmatmul.mubr.f32.gmra.mxu0 %v22015_v13  ;;  %1247 = vmatmul.mubr.f32.vlgmr.msra.gmra.mxu1 %v22013_v46  ;;  %v1465_v8 = vand.u32 4294901760, %v1464_v31  ;;  %v1478_v51 = vsub.f32 %v16775_v56, %v21328_v44  ;;  %v1485_v27 = vsub.f32 %v16790_v61, %v21327_v28  ;;  %v92_v31 = vld [vmem:[#allocation7 + $0x58] sm:$0xff] }
  0xb8   :  { %14002 = vmatprep.subr.mxu0 %v21931_v9  ;;  %14047 = vmatprep.subr.mxu1 %v21931_v9  ;;  %v1472_v20 = vand.u32 4294901760, %v1471_v58  ;;  %v1499_v58 = vsub.f32 %v16818_v22, %v21324_v60 }
  0xb9   :  { %14003 = vmatpush3.msra.mxu0 %v16752_v55  ;;  %14048 = vmatpush3.msra.mxu1 %v1451_v2  ;;  %v1479_v57 = vand.u32 4294901760, %v1478_v51  ;;  %v1486_v16 = vand.u32 4294901760, %v1485_v27  ;;  %v16849_v2 = vand.u32 4294901760, %v95_v32  ;;  %v16863_v51 = vand.u32 4294901760, %v92_v31 }
  0xba   :  { %14004 = vmatprep.subr.mxu0 %v21931_v9  ;;  %14049 = vmatprep.subr.mxu1 %v21931_v9  ;;  %v1506_v27 = vsub.f32 %v16832_v24, %v21326_v23  ;;  %v1500_v5 = vand.u32 4294901760, %v1499_v58  ;;  %v1513_v23 = vsub.f32 %v16846_v12, %v21329_v15  ;;  %v16900_v15 = vand.u32 4294901760, %v83_v39 }
  0xbb   :  { %1120 = vmatprep.mubr.f32.mxu0 %v21931_v9  ;;  %1252 = vmatprep.mubr.f32.mxu1 %v21931_v9 }
  0xbc   :  { %14005 = vmatpush3.msra.mxu0 %v16767_v54  ;;  %14050 = vmatpush3.msra.mxu1 %v1458_v43  ;;  %v16855_v43 = vsub.f32 %v98_v48, %v16835_v47  ;;  %v16869_v48 = vsub.f32 %v95_v32, %v16849_v2  ;;  %v16883_v32 = vsub.f32 %v92_v31, %v16863_v51  ;;  %v1507_v28 = vand.u32 4294901760, %v1506_v27 }
  0xbd   :  { %1122 = vmatmul.mubr.f32.gmra.mxu0 %v22016_v50  ;;  %1254 = vmatmul.mubr.f32.gmra.mxu1 %v22014_v6  ;;  %v1514_v27 = vand.u32 4294901760, %v1513_v23  ;;  %v16917_v0 = vsub.f32 %v83_v39, %v16900_v15 }
  0xbe   :  { %14006 = vmatprep.subr.mxu0 %v21931_v9  ;;  %14051 = vmatprep.subr.mxu1 %v21931_v9  ;;  %v21331_v60 = vand.u32 4294901760, %v16855_v43 }
  0xbf   :  { %14007 = vmatpush3.msra.mxu0 %v16782_v17  ;;  %14052 = vmatpush3.msra.mxu1 %v1465_v8  ;;  %v89_v8 = vld [vmem:[#allocation7 + $0x40] sm:$0xff] }
  0xc0   :  { %14008 = vmatprep.subr.mxu0 %v21931_v9  ;;  %14053 = vmatprep.subr.mxu1 %v21931_v9  ;;  %v1520_v31 = vsub.f32 %v16855_v43, %v21331_v60 }
  0xc1   :  { %1127 = vmatprep.mubr.f32.mxu0 %v21931_v9  ;;  %1259 = vmatprep.mubr.f32.mxu1 %v21931_v9 }
  0xc2   :  { %14009 = vmatpush3.msra.mxu0 %v16796_v53  ;;  %14054 = vmatpush3.msra.mxu1 %v1472_v20  ;;  %v22018_v20 = vld [vmem:[#allocation52_spill] sm:$0xff]  ;;  %v1521_v14 = vand.u32 4294901760, %v1520_v31 }
  0xc3   :  { %1129 = vmatmul.mubr.f32.gmra.mxu0 %v22017_v37  ;;  %1261 = vmatmul.mubr.f32.gmra.mxu1 %v22015_v13 }
  0xc4   :  { %14010 = vmatprep.subr.mxu0 %v21931_v9  ;;  %14055 = vmatprep.subr.mxu1 %v21931_v9 }
  0xc5   :  { %14011 = vmatpush3.msra.mxu0 %v16810_v63  ;;  %14056 = vmatpush3.msra.mxu1 %v1479_v57  ;;  %v86_v57 = vld [vmem:[#allocation7 + $0x28] sm:$0xff] }
  0xc6   :  { %14012 = vmatprep.subr.mxu0 %v21931_v9  ;;  %14057 = vmatprep.subr.mxu1 %v21931_v9  ;;  %v16888_v58 = vand.u32 4294901760, %v86_v57 }
  0xc7   :  { %1134 = vmatprep.mubr.f32.mxu0 %v21931_v9  ;;  %1266 = vmatprep.mubr.f32.mxu1 %v21931_v9 }
  0xc8   :  { %14013 = vmatpush3.msra.mxu0 %v16824_v7  ;;  %14058 = vmatpush3.msra.mxu1 %v1486_v16  ;;  %v16876_v16 = vand.u32 4294901760, %v89_v8 }
  0xc9   :  { %1136 = vmatmul.mubr.f32.gmra.mxu0 %v22018_v20  ;;  %1268 = vmatmul.mubr.f32.gmra.mxu1 %v22016_v50 }
  0xca   :  { %14014 = vmatprep.subr.mxu0 %v21931_v9  ;;  %14059 = vmatprep.subr.mxu1 %v21931_v9  ;;  %v16895_v44 = vsub.f32 %v89_v8, %v16876_v16  ;;  %v21334_v8 = vand.u32 4294901760, %v16883_v32 }
  0xcb   :  { %14015 = vmatpush3.msra.mxu0 %v16835_v47  ;;  %14060 = vmatpush3.msra.mxu1 %v1493_v59  ;;  %v1526_v59 = vand.u32 4294901760, %v16869_v48 }
  0xcc   :  { %14016 = vmatprep.subr.mxu0 %v21931_v9  ;;  %14061 = vmatprep.subr.mxu1 %v21931_v9  ;;  %v21335_v23 = vand.u32 4294901760, %v16895_v44 }
  0xcd   :  { %1141 = vmatprep.mubr.f32.mxu0 %v21931_v9  ;;  %1273 = vmatprep.mubr.f32.mxu1 %v21931_v9  ;;  %v1527_v60 = vsub.f32 %v16869_v48, %v1526_v59 }
  0xce   :  { %14017 = vmatpush3.msra.mxu0 %v16849_v2  ;;  %14062 = vmatpush3.msra.mxu1 %v1500_v5  ;;  %v16907_v5 = vsub.f32 %v86_v57, %v16888_v58  ;;  %v1541_v31 = vsub.f32 %v16895_v44, %v21335_v23 }
  0xcf   :  { %1143 = vmatmul.mubr.f32.gmra.mxu0 %v22019_v21  ;;  %1275 = vmatmul.mubr.f32.gmra.mxu1 %v22017_v37  ;;  %v1528_v39 = vand.u32 4294901760, %v1527_v60 }
  0xd0   :  { %14018 = vmatprep.subr.mxu0 %v21931_v9  ;;  %14063 = vmatprep.subr.mxu1 %v21931_v9  ;;  %v1547_v57 = vand.u32 4294901760, %v16907_v5 }
  0xd1   :  { %14019 = vmatpush3.msra.mxu0 %v16863_v51  ;;  %14064 = vmatpush3.msra.mxu1 %v1507_v28  ;;  %v1534_v28 = vsub.f32 %v16883_v32, %v21334_v8 }
  0xd2   :  { %14020 = vmatprep.subr.mxu0 %v21931_v9  ;;  %14065 = vmatprep.subr.mxu1 %v21931_v9  ;;  %v1548_v60 = vsub.f32 %v16907_v5, %v1547_v57 }
  0xd3   :  { %1280 = vmatprep.mubr.f32.mxu1 %v21931_v9  ;;  %14021 = vmatpush3.msra.mxu0 %v16876_v16  ;;  %v1535_v8 = vand.u32 4294901760, %v1534_v28  ;;  %v22020_v28 = vld [vmem:[#allocation43_spill] sm:$0xff] }
  0xd4   :  { %14066 = vmatpush3.msra.mxu1 %v1514_v27  ;;  %14022 = vmatprep.subr.mxu0 %v21931_v9  ;;  %v1554_v27 = vand.u32 4294901760, %v16917_v0 }
  0xd5   :  { %1282 = vmatmul.mubr.f32.gmra.mxu1 %v22018_v20  ;;  %14067 = vmatprep.subr.mxu1 %v21931_v9 }
  0xd6   :  { %14023 = vmatpush3.msra.mxu0 %v16888_v58  ;;  %14068 = vmatpush3.msra.mxu1 %v1521_v14  ;;  %v1542_v14 = vand.u32 4294901760, %v1541_v31  ;;  %v1555_v23 = vsub.f32 %v16917_v0, %v1554_v27 }
  0xd7   :  { %14024 = vmatprep.subr.mxu0 %v21931_v9  ;;  %14069 = vmatprep.subr.mxu1 %v21931_v9 }
  0xd8   :  { %1287 = vmatprep.mubr.f32.mxu1 %v21931_v9  ;;  %14025 = vmatpush3.msra.mxu0 %v16900_v15  ;;  %v1556_v31 = vand.u32 4294901760, %v1555_v23  ;;  %v22022_v23 = vld [vmem:[#allocation51_spill] sm:$0xff] }
  0xd9   :  { %14070 = vmatpush3.msra.mxu1 %v1528_v39  ;;  %14026 = vmatprep.mubr.msk.f32.mxu0 %vm15962_vm0, %v21931_v9  ;;  %v1549_v39 = vand.u32 4294901760, %v1548_v60  ;;  %v22023_v60 = vld [vmem:[#allocation54_spill] sm:$0xff] }
  0xda   :  { %1289 = vmatmul.mubr.f32.gmra.mxu1 %v22019_v21  ;;  %14071 = vmatprep.subr.mxu1 %v21931_v9 }
  0xdb   :  { %14100 = vmatprep.subr.mxu0 %v21931_v9  ;;  %14027 = vmatmul.mubr.f32.vlgmr.msra.gmra.mxu0 %v22020_v28  ;;  %v22025_v28 = vld [vmem:[#allocation17_spill] sm:$0xff] }
  0xdc   :  { %14072 = vmatpush3.msra.mxu1 %v1535_v8  ;;  %14101 = vmatpush3.msra.mxu0 %v16721_v33  ;;  %v22021_v8 = vld [vmem:[#allocation49_spill] sm:$0xff] }
  0xdd   :  { %14073 = vmatprep.subr.mxu1 %v21931_v9  ;;  %14102 = vmatprep.subr.mxu0 %v21931_v9 }
  0xde   :  { %14074 = vmatpush3.msra.mxu1 %v1542_v14  ;;  %14103 = vmatpush3.msra.mxu0 %v16733_v30  ;;  %v22024_v14 = vld [vmem:[#allocation57_spill] sm:$0xff] }
  0xdf   :  { %14075 = vmatprep.subr.mxu1 %v21931_v9  ;;  %14104 = vmatprep.subr.mxu0 %v21931_v9 }
  0xe0   :  { %14076 = vmatpush3.msra.mxu1 %v1549_v39  ;;  %14105 = vmatpush3.msra.mxu0 %v16745_v4  ;;  %v22026_v39 = vld [vmem:[#allocation18_spill] sm:$0xff] }
  0xe1   :  { %14077 = vmatprep.subr.mxu1 %v21931_v9  ;;  %14106 = vmatprep.subr.mxu0 %v21931_v9 }
  0xe2   :  { %14029 = vmatprep.mubr.msk.f32.mxu0 %vm15962_vm0, %v21931_v9  ;;  %14078 = vmatpush3.msra.mxu1 %v1556_v31  ;;  %v131_v31 = vlaneseq }
  0xe3   :  { %14079 = vmatprep.mubr.msk.f32.mxu1 %vm15962_vm0, %v21931_v9  ;;  %14107 = vmatpush3.msra.mxu0 %v16760_v10 }
  0xe4   :  { %14030 = vmatmul.mubr.f32.gmra.mxu0 %v22021_v8  ;;  %14080 = vmatmul.mubr.f32.vlgmr.msra.gmra.mxu1 %v22013_v46  ;;  %v22027_v8 = vld [vmem:[#allocation38_spill] sm:$0xff] }
  0xe5   :  { %14108 = vmatprep.subr.mxu0 %v21931_v9  ;;  %14153 = vmatprep.subr.mxu1 %v21931_v9 }
  0xe6   :  { %14109 = vmatpush3.msra.mxu0 %v16775_v56  ;;  %14154 = vmatpush3.msra.mxu1 %v16705_v62 }
  0xe7   :  { %14110 = vmatprep.subr.mxu0 %v21931_v9  ;;  %14155 = vmatprep.subr.mxu1 %v21931_v9 }
  0xe8   :  { %14032 = vmatprep.mubr.msk.f32.mxu0 %vm15962_vm0, %v21931_v9  ;;  %14111 = vmatpush3.msra.mxu0 %v16790_v61 }
  0xe9   :  { %14156 = vmatpush3.msra.mxu1 %v16715_v29  ;;  %14033 = vmatmul.mubr.f32.gmra.mxu0 %v22022_v23  ;;  %v17055_v23 = vshrl.u32 %v131_v31, 7  ;;  %v22038_v31 = vand.u32 4294901760, %v16832_v24 }
  0xea   :  { %14112 = vmatprep.subr.mxu0 %v21931_v9  ;;  %14157 = vmatprep.subr.mxu1 %v21931_v9 }
  0xeb   :  { %14113 = vmatpush3.msra.mxu0 %v16804_v25  ;;  %14158 = vmatpush3.msra.mxu1 %v16728_v26  ;;  %22028 = vst [vmem:[#allocation20_spill] sm:$0xff] %v17055_v23  ;;  %v21336_v33 = vsub.s32 0, %v17055_v23 }
  0xec   :  { %14082 = vmatprep.mubr.msk.f32.mxu1 %vm15962_vm0, %v21931_v9  ;;  %14114 = vmatprep.subr.mxu0 %v21931_v9 }
  0xed   :  { %14159 = vmatprep.subr.mxu1 %v21931_v9  ;;  %14035 = vmatprep.mubr.msk.f32.mxu0 %vm15962_vm0, %v21931_v9 }
  0xee   :  { %14083 = vmatmul.mubr.f32.gmra.mxu1 %v22014_v6  ;;  %14115 = vmatpush3.msra.mxu0 %v16818_v22 }
  0xef   :  { %14160 = vmatpush3.msra.mxu1 %v16740_v1  ;;  %14036 = vmatmul.mubr.f32.gmra.mxu0 %v22023_v60  ;;  %v22029_v60 = vand.u32 4294901760, %v16733_v30 }
  0xf0   :  { %14116 = vmatprep.subr.mxu0 %v21931_v9  ;;  %14161 = vmatprep.subr.mxu1 %v21931_v9 }
  0xf1   :  { %14117 = vmatpush3.msra.mxu0 %v16832_v24  ;;  %14162 = vmatpush3.msra.mxu1 %v16752_v55 }
  0xf2   :  { %14085 = vmatprep.mubr.msk.f32.mxu1 %vm15962_vm0, %v21931_v9  ;;  %14118 = vmatprep.subr.mxu0 %v21931_v9 }
  0xf3   :  { %14163 = vmatprep.subr.mxu1 %v21931_v9  ;;  %14038 = vmatprep.mubr.msk.f32.mxu0 %vm15962_vm0, %v21931_v9 }
  0xf4   :  { %14086 = vmatmul.mubr.f32.gmra.mxu1 %v22015_v13  ;;  %14119 = vmatpush3.msra.mxu0 %v16846_v12 }
  0xf5   :  { %14164 = vmatpush3.msra.mxu1 %v16767_v54  ;;  %14039 = vmatmul.mubr.f32.gmra.mxu0 %v22024_v14  ;;  %v129_v14 = vld [vmem:[%s21215_s4] sm:$0x7] }
  0xf6   :  { %14120 = vmatprep.subr.mxu0 %v21931_v9  ;;  %14165 = vmatprep.subr.mxu1 %v21931_v9  ;;  %v17085_v30 = vrot.slane %v129_v14, %v21336_v33 }
  0xf7   :  { %14121 = vmatpush3.msra.mxu0 %v16855_v43  ;;  %14166 = vmatpush3.msra.mxu1 %v16782_v17 }
  0xf8   :  { %14088 = vmatprep.mubr.msk.f32.mxu1 %vm15962_vm0, %v21931_v9  ;;  %14122 = vmatprep.subr.mxu0 %v21931_v9 }
  0xf9   :  { %14167 = vmatprep.subr.mxu1 %v21931_v9  ;;  %14041 = vmatprep.mubr.msk.f32.mxu0 %vm15962_vm0, %v21931_v9 }
  0xfa   :  { %14089 = vmatmul.mubr.f32.gmra.mxu1 %v22016_v50  ;;  %14123 = vmatpush3.msra.mxu0 %v16869_v48 }
  0xfb   :  { %14168 = vmatpush3.msra.mxu1 %v16796_v53  ;;  %14042 = vmatmul.mubr.f32.gmra.mxu0 %v22025_v28  ;;  %v22032_v28 = vand.u32 4294901760, %v16775_v56 }
  0xfc   :  { %14124 = vmatprep.subr.mxu0 %v21931_v9  ;;  %14169 = vmatprep.subr.mxu1 %v21931_v9 }
  0xfd   :  { %14125 = vmatpush3.msra.mxu0 %v16883_v32  ;;  %14170 = vmatpush3.msra.mxu1 %v16810_v63 }
  0xfe   :  { %14091 = vmatprep.mubr.msk.f32.mxu1 %vm15962_vm0, %v21931_v9  ;;  %14126 = vmatprep.subr.mxu0 %v21931_v9 }
  0xff   :  { %14171 = vmatprep.subr.mxu1 %v21931_v9  ;;  %14044 = vmatprep.mubr.msk.f32.mxu0 %vm15962_vm0, %v21931_v9 }
 0x100   :  { %14092 = vmatmul.mubr.f32.gmra.mxu1 %v22017_v37  ;;  %14127 = vmatpush3.msra.mxu0 %v16895_v44 }
 0x101   :  { %14172 = vmatpush3.msra.mxu1 %v16824_v7  ;;  %14045 = vmatmul.mubr.f32.gmra.mxu0 %v22026_v39  ;;  %v22035_v39 = vand.u32 4294901760, %v16804_v25 }
 0x102   :  { %14128 = vmatprep.subr.mxu0 %v21931_v9  ;;  %14173 = vmatprep.subr.mxu1 %v21931_v9 }
 0x103   :  { %14129 = vmatpush3.msra.mxu0 %v16907_v5  ;;  %14174 = vmatpush3.msra.mxu1 %v16835_v47  ;;  %v2251_v5 = vld [vmem:[#allocation9 + $0x120] sm:$0xff] }
 0x104   :  { %14094 = vmatprep.mubr.msk.f32.mxu1 %vm15962_vm0, %v21931_v9  ;;  %14130 = vmatprep.subr.mxu0 %v21931_v9 }
 0x105   :  { %14175 = vmatprep.subr.mxu1 %v21931_v9  ;;  %14095 = vmatmul.mubr.f32.gmra.mxu1 %v22018_v20 }
 0x106   :  { %14131 = vmatpush3.msra.mxu0 %v16917_v0  ;;  %14132 = vmatprep.mubr.msk.f32.mxu0 %vm15962_vm0, %v21931_v9  ;;  %v17245_v0 = vand.u32 4294901760, %v2251_v5 }
 0x107   :  { %14176 = vmatpush3.msra.mxu1 %v16849_v2  ;;  %14133 = vmatmul.mubr.f32.vlgmr.msra.gmra.mxu0 %v22027_v8 }
 0x108   :  { %14177 = vmatprep.subr.mxu1 %v21931_v9  ;;  %14206 = vmatprep.subr.mxu0 %v21931_v9  ;;  %22063 = vst [vmem:[#allocation56_spill] sm:$0xff] %v17245_v0 }
 0x109   :  { %14178 = vmatpush3.msra.mxu1 %v16863_v51  ;;  %14207 = vmatpush3.msra.mxu0 %v1449_v35  ;;  %v22030_v35 = vand.u32 4294901760, %v16745_v4 }
 0x10a   :  { %14097 = vmatprep.mubr.msk.f32.mxu1 %vm15962_vm0, %v21931_v9  ;;  %14179 = vmatprep.subr.mxu1 %v21931_v9 }
 0x10b   :  { %14208 = vmatprep.subr.mxu0 %v21931_v9  ;;  %14098 = vmatmul.mubr.f32.gmra.mxu1 %v22019_v21 }
 0x10c   :  { %14135 = vmatprep.mubr.msk.f32.mxu0 %vm15962_vm0, %v21931_v9  ;;  %14180 = vmatpush3.msra.mxu1 %v16876_v16 }
 0x10d   :  { %14209 = vmatpush3.msra.mxu0 %v22029_v60  ;;  %14181 = vmatprep.subr.mxu1 %v21931_v9 }
 0x10e   :  { %14136 = vmatmul.mubr.f32.gmra.mxu0 %v16447_v40  ;;  %14210 = vmatprep.subr.mxu0 %v21931_v9  ;;  %v22031_v40 = vand.u32 4294901760, %v16760_v10 }
 0x10f   :  { %14182 = vmatpush3.msra.mxu1 %v16888_v58  ;;  %14211 = vmatpush3.msra.mxu0 %v22030_v35 }
 0x110   :  { %14183 = vmatprep.subr.mxu1 %v21931_v9  ;;  %14212 = vmatprep.subr.mxu0 %v21931_v9 }
 0x111   :  { %14138 = vmatprep.mubr.msk.f32.mxu0 %vm15962_vm0, %v21931_v9  ;;  %14184 = vmatpush3.msra.mxu1 %v16900_v15 }
 0x112   :  { %14185 = vmatprep.mubr.msk.f32.mxu1 %vm15962_vm0, %v21931_v9  ;;  %14213 = vmatpush3.msra.mxu0 %v22031_v40 }
 0x113   :  { %14139 = vmatmul.mubr.f32.gmra.mxu0 %v16456_v38  ;;  %14186 = vmatmul.mubr.f32.vlgmr.msra.gmra.mxu1 %v21974_v36  ;;  %v249_v4 = vpop.f32.mrf.mxu0  ;;  %v22034_v36 = vand.u32 4294901760, %v16790_v61 }
 0x114   :  { %14214 = vmatprep.subr.mxu0 %v21931_v9  ;;  %14259 = vmatprep.subr.mxu1 %v21931_v9  ;;  %v250_v10 = vadd.f32 %v249_v4, %v17085_v30 }
 0x115   :  { %14215 = vmatpush3.msra.mxu0 %v22032_v28  ;;  %14260 = vmatpush3.msra.mxu1 %v16705_v62  ;;  %v17101_v38 = vpop.f32.mrf.mxu0 }
 0x116   :  { %14216 = vmatprep.subr.mxu0 %v21931_v9  ;;  %14261 = vmatprep.subr.mxu1 %v21931_v9  ;;  %22033 = vst [vmem:[#allocation21_spill] sm:$0xff] %v17101_v38 }
 0x117   :  { %14141 = vmatprep.mubr.msk.f32.mxu0 %vm15962_vm0, %v21931_v9  ;;  %14188 = vmatprep.mubr.msk.f32.mxu1 %vm15962_vm0, %v21931_v9 }
 0x118   :  { %14217 = vmatpush3.msra.mxu0 %v22034_v36  ;;  %14262 = vmatpush3.msra.mxu1 %v16715_v29  ;;  %v22037_v29 = vand.u32 4294901760, %v16818_v22 }
 0x119   :  { %14142 = vmatmul.mubr.f32.gmra.mxu0 %v16464_v19  ;;  %14189 = vmatmul.mubr.f32.gmra.mxu1 %v16461_v45  ;;  %v547_v62 = vpop.f32.mrf.mxu1 }
 0x11a   :  { %14218 = vmatprep.subr.mxu0 %v21931_v9  ;;  %14263 = vmatprep.subr.mxu1 %v21931_v9  ;;  %v17110_v56 = vadd.f32 %v547_v62, %v250_v10  ;;  %v2255_v10 = vld [vmem:[#allocation9 + $0x140] sm:$0xff]  ;;  %v2254_v62 = vld [vmem:[#allocation9 + $0x138] sm:$0xff] }
 0x11b   :  { %14219 = vmatpush3.msra.mxu0 %v22035_v39  ;;  %14264 = vmatpush3.msra.mxu1 %v16728_v26  ;;  %v260_v61 = vpop.f32.mrf.mxu0 }
 0x11c   :  { %14220 = vmatprep.subr.mxu0 %v21931_v9  ;;  %14265 = vmatprep.subr.mxu1 %v21931_v9  ;;  %v261_v19 = vadd.f32 %v260_v61, %v17085_v30 }
 0x11d   :  { %14144 = vmatprep.mubr.msk.f32.mxu0 %vm15962_vm0, %v21931_v9  ;;  %14191 = vmatprep.mubr.msk.f32.mxu1 %vm15962_vm0, %v21931_v9  ;;  %v17122_v45 = vpop.f32.mrf.mxu0 }
 0x11e   :  { %22036 = vst [vmem:[#allocation22_spill] sm:$0xff] %v17122_v45  ;;  %14221 = vmatpush3.msra.mxu0 %v22037_v29  ;;  %14266 = vmatpush3.msra.mxu1 %v16740_v1 }
 0x11f   :  { %14145 = vmatmul.mubr.f32.gmra.mxu0 %v16492_v52  ;;  %14192 = vmatmul.mubr.f32.gmra.mxu1 %v21983_v11  ;;  %v271_v26 = vpop.f32.mrf.mxu0  ;;  %v17139_v52 = vpop.f32.mrf.mxu1  ;;  %v22041_v11 = vand.u32 4294901760, %v16846_v12  ;;  %v22043_v12 = vand.u32 4294901760, %v16855_v43  ;;  %v2258_v43 = vld [vmem:[#allocation9 + $0x158] sm:$0xff] }
 0x120   :  { %14222 = vmatprep.subr.mxu0 %v21931_v9  ;;  %14267 = vmatprep.subr.mxu1 %v21931_v9  ;;  %v272_v25 = vadd.f32 %v271_v26, %v17085_v30  ;;  %22040 = vst [vmem:[#allocation25_spill] sm:$0xff] %v17139_v52  ;;  %v17191_v28 = vand.u32 4294901760, %v2258_v43  ;;  %v2237_v52 = vld [vmem:[#allocation9 + $0xb0] sm:$0xff] }
 0x121   :  { %14223 = vmatpush3.msra.mxu0 %v22038_v31  ;;  %14268 = vmatpush3.msra.mxu1 %v16752_v55  ;;  %v17135_v22 = vpop.f32.mrf.mxu0  ;;  %v2249_v31 = vld [vmem:[#allocation9 + $0x110] sm:$0xff] }
 0x122   :  { %22039 = vst [vmem:[#allocation24_spill] sm:$0xff] %v17135_v22  ;;  %14224 = vmatprep.subr.mxu0 %v21931_v9  ;;  %14269 = vmatprep.subr.mxu1 %v21931_v9  ;;  %22050 = vst [vmem:[#allocation32_spill] sm:$0xff] %v17191_v28 }
 0x123   :  { %14147 = vmatprep.mubr.msk.f32.mxu0 %vm15962_vm0, %v21931_v9  ;;  %14194 = vmatprep.mubr.msk.f32.mxu1 %vm15962_vm0, %v21931_v9 }
 0x124   :  { %14225 = vmatpush3.msra.mxu0 %v22041_v11  ;;  %14270 = vmatpush3.msra.mxu1 %v16767_v54  ;;  %v554_v1 = vpop.f32.mrf.mxu1 }
 0x125   :  { %14148 = vmatmul.mubr.f32.gmra.mxu0 %v16516_v34  ;;  %14195 = vmatmul.mubr.f32.gmra.mxu1 %v21989_v18  ;;  %v17150_v55 = vadd.f32 %v554_v1, %v261_v19  ;;  %v282_v24 = vpop.f32.mrf.mxu0  ;;  %v2261_v34 = vld [vmem:[#allocation9 + $0x170] sm:$0xff] }
 0x126   :  { %14226 = vmatprep.subr.mxu0 %v21931_v9  ;;  %14271 = vmatprep.subr.mxu1 %v21931_v9  ;;  %v283_v8 = vadd.f32 %v282_v24, %v17085_v30  ;;  %v17155_v60 = vpop.f32.mrf.mxu1 }
 0x127   :  { %22042 = vst [vmem:[#allocation27_spill] sm:$0xff] %v17155_v60  ;;  %14227 = vmatpush3.msra.mxu0 %v22043_v12  ;;  %14272 = vmatpush3.msra.mxu1 %v16782_v17  ;;  %v17160_v54 = vpop.f32.mrf.mxu0  ;;  %v2260_v17 = vld [vmem:[#allocation9 + $0x168] sm:$0xff] }
 0x128   :  { %22044 = vst [vmem:[#allocation28_spill] sm:$0xff] %v17160_v54  ;;  %14228 = vmatprep.subr.mxu0 %v21931_v9  ;;  %14273 = vmatprep.subr.mxu1 %v21931_v9  ;;  %v17189_v4 = vand.u32 4294901760, %v2260_v17 }
 0x129   :  { %14150 = vmatprep.mubr.msk.f32.mxu0 %vm15962_vm0, %v21931_v9  ;;  %14197 = vmatprep.mubr.msk.f32.mxu1 %vm15962_vm0, %v21931_v9 }
 0x12a   :  { %14229 = vmatpush3.msra.mxu0 %v1526_v59  ;;  %14274 = vmatpush3.msra.mxu1 %v16796_v53  ;;  %v561_v18 = vpop.f32.mrf.mxu1  ;;  %v22046_v53 = vand.u32 4294901760, %v16883_v32  ;;  %22049 = vst [vmem:[#allocation31_spill] sm:$0xff] %v17189_v4  ;;  %v22051_v32 = vand.u32 4294901760, %v16895_v44  ;;  %v17212_v19 = vsub.f32 %v2260_v17, %v17189_v4  ;;  %v2248_v17 = vld [vmem:[#allocation9 + $0x108] sm:$0xff] }
 0x12b   :  { %14151 = vmatmul.mubr.f32.gmra.mxu0 %v16540_v42  ;;  %14198 = vmatmul.mubr.f32.gmra.mxu1 %v21997_v3  ;;  %v17173_v35 = vadd.f32 %v561_v18, %v272_v25  ;;  %v293_v14 = vpop.f32.mrf.mxu0  ;;  %v17183_v42 = vand.u32 4294901760, %v2261_v34  ;;  %v2257_v3 = vld [vmem:[#allocation9 + $0x150] sm:$0xff]  ;;  %v17222_v25 = vand.u32 4294901760, %v2255_v10 }
 0x12c   :  { %14230 = vmatprep.subr.mxu0 %v21931_v9  ;;  %14275 = vmatprep.subr.mxu1 %v21931_v9  ;;  %v294_v48 = vadd.f32 %v293_v14, %v17085_v30  ;;  %v17178_v59 = vpop.f32.mrf.mxu1  ;;  %22054 = vst [vmem:[#allocation39_spill] sm:$0xff] %v17212_v19 }
 0x12d   :  { %22045 = vst [vmem:[#allocation14_spill] sm:$0xff] %v17178_v59  ;;  %14231 = vmatpush3.msra.mxu0 %v22046_v53  ;;  %14276 = vmatpush3.msra.mxu1 %v16810_v63  ;;  %22047 = vst [vmem:[#allocation29_spill] sm:$0xff] %v17183_v42  ;;  %v17185_v40 = vpop.f32.mrf.mxu0  ;;  %v17199_v63 = vand.u32 4294901760, %v2257_v3  ;;  %v17204_v39 = vsub.f32 %v2261_v34, %v17183_v42  ;;  %v17258_v34 = vsub.f32 %v2255_v10, %v17222_v25 }
 0x12e   :  { %22048 = vst [vmem:[#allocation30_spill] sm:$0xff] %v17185_v40  ;;  %14232 = vmatprep.subr.mxu0 %v21931_v9  ;;  %14277 = vmatprep.subr.mxu1 %v21931_v9  ;;  %22057 = vst [vmem:[#allocation50_spill] sm:$0xff] %v17222_v25 }
 0x12f   :  { %14200 = vmatprep.mubr.msk.f32.mxu1 %vm15962_vm0, %v21931_v9  ;;  %14233 = vmatpush3.msra.mxu0 %v22051_v32  ;;  %22052 = vst [vmem:[#allocation33_spill] sm:$0xff] %v17199_v63  ;;  %22053 = vst [vmem:[#allocation35_spill] sm:$0xff] %v17204_v39  ;;  %v17233_v11 = vsub.f32 %v2257_v3, %v17199_v63  ;;  %v17241_v24 = vand.u32 4294901760, %v17204_v39 }
 0x130   :  { %14278 = vmatpush3.msra.mxu1 %v16824_v7  ;;  %14234 = vmatprep.subr.mxu0 %v21931_v9  ;;  %v568_v36 = vpop.f32.mrf.mxu1  ;;  %v2252_v7 = vld [vmem:[#allocation9 + $0x128] sm:$0xff]  ;;  %22067 = vst [vmem:[#allocation42_spill] sm:$0xff] %v17258_v34 }
 0x131   :  { %14201 = vmatmul.mubr.f32.gmra.mxu1 %v22004_v49  ;;  %14279 = vmatprep.subr.mxu1 %v21931_v9  ;;  %v17206_v61 = vadd.f32 %v568_v36, %v283_v8  ;;  %v304_v44 = vpop.f32.mrf.mxu0  ;;  %v17215_v49 = vsub.f32 %v2258_v43, %v17191_v28  ;;  %22060 = vst [vmem:[#allocation19_spill] sm:$0xff] %v17233_v11  ;;  %v17238_v1 = vand.u32 4294901760, %v2252_v7  ;;  %22062 = vst [vmem:[#allocation23_spill] sm:$0xff] %v17241_v24  ;;  %v2246_v43 = vld [vmem:[#allocation9 + $0xf8] sm:$0xff] }
 0x132   :  { %14235 = vmatpush3.msra.mxu0 %v1547_v57  ;;  %14280 = vmatpush3.msra.mxu1 %v16835_v47  ;;  %v305_v29 = vadd.f32 %v304_v44, %v17085_v30  ;;  %v17218_v26 = vpop.f32.mrf.mxu1  ;;  %v17230_v47 = vand.u32 4294901760, %v2254_v62  ;;  %v17265_v14 = vand.u32 4294901760, %v17233_v11  ;;  %v2243_v44 = vld [vmem:[#allocation9 + $0xe0] sm:$0xff] }
 0x133   :  { %22055 = vst [vmem:[#allocation47_spill] sm:$0xff] %v17215_v49  ;;  %22056 = vst [vmem:[#allocation15_spill] sm:$0xff] %v17218_v26  ;;  %14236 = vmatprep.subr.mxu0 %v21931_v9  ;;  %14281 = vmatprep.subr.mxu1 %v21931_v9  ;;  %v17224_v57 = vpop.f32.mrf.mxu0  ;;  %v17251_v8 = vand.u32 4294901760, %v17215_v49  ;;  %v17280_v10 = vsub.f32 %v2252_v7, %v17238_v1  ;;  %v17296_v7 = vand.u32 4294901760, %v2248_v17 }
 0x134   :  { %22058 = vst [vmem:[#allocation34_spill] sm:$0xff] %v17224_v57  ;;  %14203 = vmatprep.mubr.msk.f32.mxu1 %vm15962_vm0, %v21931_v9  ;;  %14237 = vmatpush3.msra.mxu0 %v1554_v27  ;;  %22059 = vst [vmem:[#allocation36_spill] sm:$0xff] %v17230_v47  ;;  %v17248_v27 = vand.u32 4294901760, %v17212_v19  ;;  %v17268_v53 = vsub.f32 %v2254_v62, %v17230_v47  ;;  %v2418_v57 = vsub.f32 %v17233_v11, %v17265_v14 }
 0x135   :  { %14238 = vmatprep.mubr.msk.f32.mxu0 %vm15962_vm0, %v21931_v9  ;;  %14282 = vmatpush3.msra.mxu1 %v16849_v2  ;;  %22061 = vst [vmem:[#allocation53_spill] sm:$0xff] %v17238_v1  ;;  %22065 = vst [vmem:[#allocation26_spill] sm:$0xff] %v17251_v8  ;;  %v17255_v2 = vand.u32 4294901760, %v2249_v31  ;;  %v2412_v62 = vsub.f32 %v17215_v49, %v17251_v8  ;;  %v17322_v26 = vand.u32 4294901760, %v17280_v10 }
 0x136   :  { %14204 = vmatmul.mubr.f32.gmra.mxu1 %v22012_v41  ;;  %14239 = vmatmul.mubr.f32.vlgmr.msra.gmra.mxu0 %v22013_v46  ;;  %22064 = vst [vmem:[#allocation40_spill] sm:$0xff] %v17248_v27  ;;  %v575_v12 = vpop.f32.mrf.mxu1  ;;  %22068 = vst [vmem:[#allocation16_spill] sm:$0xff] %v17265_v14  ;;  %v17349_v23 = vsub.f32 %v2248_v17, %v17296_v7 }
 0x137   :  { %14283 = vmatprep.subr.mxu1 %v21931_v9  ;;  %2290 = vmatprep.subr.mxu0 %v17183_v42  ;;  %22066 = vst [vmem:[#allocation41_spill] sm:$0xff] %v17255_v2  ;;  %v17260_v41 = vadd.f32 %v575_v12, %v294_v48  ;;  %v315_v18 = vpop.f32.mrf.mxu0  ;;  %22069 = vst [vmem:[#allocation37_spill] sm:$0xff] %v17268_v53  ;;  %v2245_v48 = vld [vmem:[#allocation9 + $0xf0] sm:$0xff]  ;;  %v17292_v12 = vsub.f32 %v2251_v5, %v17245_v0 }
 0x138   :  { %14284 = vmatpush3.msra.mxu1 %v16863_v51  ;;  %2292 = vmatpush1.msra.mxu0 %v17189_v4  ;;  %v17271_v3 = vadd.f32 %v315_v18, %v17085_v30  ;;  %v17273_v32 = vpop.f32.mrf.mxu1  ;;  %v2400_v51 = vsub.f32 %v17204_v39, %v17241_v24  ;;  %22071 = vst [vmem:[#allocation45_spill] sm:$0xff] %v17280_v10  ;;  %22074 = vst [vmem:[#allocation52_spill] sm:$0xff] %v17296_v7  ;;  %v17298_v18 = vand.u32 4294901760, %v2246_v43 }
 0x139   :  { %22070 = vst [vmem:[#allocation44_spill] sm:$0xff] %v17273_v32  ;;  %14285 = vmatprep.subr.mxu1 %v21931_v9  ;;  %2294 = vmatprep.subr.mxu0 %v17191_v28  ;;  %v17282_v36 = vpop.f32.mrf.mxu0  ;;  %v2406_v30 = vsub.f32 %v17212_v19, %v17248_v27  ;;  %22073 = vst [vmem:[#allocation48_spill] sm:$0xff] %v17292_v12  ;;  %v17304_v33 = vsub.f32 %v2249_v31, %v17255_v2  ;;  %v17308_v5 = vand.u32 4294901760, %v2245_v48 }
 0x13a   :  { %22072 = vst [vmem:[#allocation46_spill] sm:$0xff] %v17282_v36  ;;  %14241 = vmatprep.mubr.msk.f32.mxu0 %vm15962_vm0, %v21931_v9  ;;  %14286 = vmatpush3.msra.mxu1 %v16876_v16  ;;  %22075 = vst [vmem:[#allocation55_spill] sm:$0xff] %v17298_v18  ;;  %v17301_v16 = vand.u32 4294901760, %v17258_v34  ;;  %v17313_v32 = vand.u32 4294901760, %v17268_v53  ;;  %v17319_v31 = vand.u32 4294901760, %v2243_v44  ;;  %v17328_v22 = vand.u32 4294901760, %v2400_v51 }
 0x13b   :  { %2296 = vmatpush1.msra.mxu0 %v17199_v63  ;;  %14287 = vmatprep.subr.mxu1 %v21931_v9  ;;  %22077 = vst [vmem:[#allocation49_spill] sm:$0xff] %v17304_v33  ;;  %v582_v36 = vpop.f32.mrf.mxu1  ;;  %22078 = vst [vmem:[#allocation51_spill] sm:$0xff] %v17308_v5  ;;  %v17333_v60 = vand.u32 4294901760, %v17292_v12  ;;  %v17346_v38 = vand.u32 4294901760, %v17304_v33 }
 0x13c   :  { %22076 = vst [vmem:[#allocation43_spill] sm:$0xff] %v17301_v16  ;;  %14242 = vmatmul.mubr.f32.gmra.mxu0 %v22014_v6  ;;  %2298 = vmatprep.subr.mxu0 %v17222_v25  ;;  %22079 = vst [vmem:[#allocation54_spill] sm:$0xff] %v17313_v32  ;;  %v17315_v40 = vadd.f32 %v582_v36, %v305_v29  ;;  %v17330_v29 = vand.u32 4294901760, %v2406_v30  ;;  %v2242_v36 = vld [vmem:[#allocation9 + $0xd8] sm:$0xff]  ;;  %v2424_v51 = vsub.f32 %v17258_v34, %v17301_v16  ;;  %v2239_v30 = vld [vmem:[#allocation9 + $0xc0] sm:$0xff] }
 0x13d   :  { %14288 = vmatpush3.msra.mxu1 %v16888_v58  ;;  %2300 = vmatpush1.msra.mxu0 %v17230_v47  ;;  %22080 = vst [vmem:[#allocation57_spill] sm:$0xff] %v17319_v31  ;;  %22081 = vst [vmem:[#allocation17_spill] sm:$0xff] %v17322_v26  ;;  %v726_v54 = vpop.f32.mrf.mxu0  ;;  %v17324_v59 = vpop.f32.mrf.mxu1  ;;  %v2240_v58 = vld [vmem:[#allocation9 + $0xc8] sm:$0xff]  ;;  %v17362_v16 = vsub.f32 %v2245_v48, %v17308_v5  ;;  %v17368_v17 = vand.u32 4294901760, %v2242_v36  ;;  %v17375_v8 = vsub.f32 %v2243_v44, %v17319_v31  ;;  %v2230_v25 = vld [vmem:[#allocation9 + $0x78] sm:$0xff] }
 0x13e   :  { %22082 = vst [vmem:[#allocation18_spill] sm:$0xff] %v17324_v59  ;;  %14289 = vmatprep.subr.mxu1 %v21931_v9  ;;  %2302 = vmatprep.subr.mxu0 %v17238_v1  ;;  %22083 = vst [vmem:[#allocation38_spill] sm:$0xff] %v17328_v22  ;;  %v17336_v45 = vadd.f32 %v726_v54, %v17110_v56  ;;  %v17341_v59 = vand.u32 4294901760, %v2412_v62  ;;  %v17354_v56 = vand.u32 4294901760, %v2418_v57  ;;  %v2236_v54 = vld [vmem:[#allocation9 + $0xa8] sm:$0xff]  ;;  %v17370_v57 = vand.u32 4294901760, %v2240_v58 }
 0x13f   :  { %22084 = vst [vmem:[#allocation58_spill] sm:$0xff] %v17330_v29  ;;  %22085 = vst [vmem:[#allocation59_spill] sm:$0xff] %v17333_v60  ;;  %14244 = vmatprep.mubr.msk.f32.mxu0 %vm15962_vm0, %v21931_v9  ;;  %14290 = vmatpush3.msra.mxu1 %v16900_v15  ;;  %v2430_v15 = vsub.f32 %v17268_v53, %v17313_v32  ;;  %v17359_v62 = vsub.f32 %v2246_v43, %v17298_v18  ;;  %v17364_v14 = vpop.f32.mrf.mxu0  ;;  %v17379_v48 = vand.u32 4294901760, %v2239_v30 }
 0x140   :  { %22086 = vst [vmem:[#allocation60_spill] sm:$0xff] %v17341_v59  ;;  %22087 = vst [vmem:[#allocation61_spill] sm:$0xff] %v17346_v38  ;;  %14291 = vmatprep.mubr.msk.f32.mxu1 %vm15962_vm0, %v21931_v9  ;;  %2304 = vmatpush1.msra.mxu0 %v17245_v0  ;;  %v2436_v32 = vsub.f32 %v17280_v10, %v17322_v26  ;;  %v2448_v44 = vsub.f32 %v17304_v33, %v17346_v38  ;;  %v17392_v26 = vand.u32 4294901760, %v2236_v54 }
 0x141   :  { %22088 = vst [vmem:[#allocation62_spill] sm:$0xff] %v17349_v23  ;;  %22089 = vst [vmem:[#allocation63_spill] sm:$0xff] %v17354_v56  ;;  %14245 = vmatmul.mubr.f32.gmra.mxu0 %v22015_v13  ;;  %14292 = vmatmul.mubr.f32.vlgmr.msra.gmra.mxu1 %v22013_v46  ;;  %v589_v43 = vpop.f32.mrf.mxu1  ;;  %v2442_v46 = vsub.f32 %v17292_v12, %v17333_v60  ;;  %v17399_v60 = vand.u32 4294901760, %v2424_v51  ;;  %v17404_v24 = vand.u32 4294901760, %v17359_v62  ;;  %v17414_v51 = vand.u32 4294901760, %v17375_v8 }
 0x142   :  { %22090 = vst [vmem:[#allocation64_spill] sm:$0xff] %v17359_v62  ;;  %22091 = vst [vmem:[#allocation65_spill] sm:$0xff] %v17362_v16  ;;  %2306 = vmatprep.subr.mxu0 %v17255_v2  ;;  %2402 = vmatprep.subr.mxu1 %v17328_v22  ;;  %v17386_v27 = vadd.f32 %v589_v43, %v17271_v3  ;;  %v17395_v22 = vand.u32 4294901760, %v17349_v23  ;;  %v17401_v3 = vand.u32 4294901760, %v2430_v15  ;;  %v2234_v43 = vld [vmem:[#allocation9 + $0x98] sm:$0xff]  ;;  %v17429_v1 = vand.u32 4294901760, %v2436_v32 }
 0x143   :  { %22092 = vst [vmem:[#allocation66_spill] sm:$0xff] %v17364_v14  ;;  %22093 = vst [vmem:[#allocation67_spill] sm:$0xff] %v17368_v17  ;;  %v17383_v14 = vand.u32 4294901760, %v2237_v52  ;;  %2308 = vmatpush1.msra.mxu0 %v17296_v7  ;;  %2408 = vmatpush1.msra.mxu1 %v17330_v29  ;;  %v17407_v29 = vand.u32 4294901760, %v17362_v16  ;;  %v17417_v15 = vsub.f32 %v2242_v36, %v17368_v17  ;;  %v17425_v0 = vpop.f32.mrf.mxu1  ;;  %v17431_v47 = vand.u32 4294901760, %v2442_v46 }
 0x144   :  { %22094 = vst [vmem:[#allocation68_spill] sm:$0xff] %v17370_v57  ;;  %22095 = vst [vmem:[#allocation69_spill] sm:$0xff] %v17375_v8  ;;  %2310 = vmatprep.subr.mxu0 %v17298_v18  ;;  %2414 = vmatprep.subr.mxu1 %v17341_v59  ;;  %v734_v38 = vpop.f32.mrf.mxu0  ;;  %v2233_v18 = vld [vmem:[#allocation9 + $0x90] sm:$0xff]  ;;  %v2231_v59 = vld [vmem:[#allocation9 + $0x80] sm:$0xff]  ;;  %v17420_v7 = vsub.f32 %v2240_v58, %v17370_v57  ;;  %v17434_v36 = vsub.f32 %v2239_v30, %v17379_v48  ;;  %v17447_v32 = vand.u32 4294901760, %v2234_v43 }
 0x145   :  { %22096 = vst [vmem:[#allocation70_spill] sm:$0xff] %v17379_v48  ;;  %22097 = vst [vmem:[#allocation71_spill] sm:$0xff] %v17383_v14  ;;  %14247 = vmatprep.mubr.msk.f32.mxu0 %vm15962_vm0, %v21931_v9  ;;  %14294 = vmatprep.mubr.msk.f32.mxu1 %vm15962_vm0, %v21931_v9  ;;  %v17423_v2 = vadd.f32 %v734_v38, %v17150_v55  ;;  %v17437_v58 = vsub.f32 %v2237_v52, %v17383_v14  ;;  %v17443_v38 = vand.u32 4294901760, %v2448_v44 }
 0x146   :  { %22098 = vst [vmem:[#allocation72_spill] sm:$0xff] %v17392_v26  ;;  %22099 = vst [vmem:[#allocation73_spill] sm:$0xff] %v17395_v22  ;;  %2312 = vmatpush1.msra.mxu0 %v17308_v5  ;;  %2420 = vmatpush1.msra.mxu1 %v17354_v56  ;;  %v17439_v63 = vpop.f32.mrf.mxu0  ;;  %v2454_v55 = vsub.f32 %v17349_v23, %v17395_v22  ;;  %v17450_v46 = vsub.f32 %v2236_v54, %v17392_v26  ;;  %v17456_v30 = vand.u32 4294901760, %v2233_v18 }
 0x147   :  { %22100 = vst [vmem:[#allocation74_spill] sm:$0xff] %v17399_v60  ;;  %22101 = vst [vmem:[#allocation75_spill] sm:$0xff] %v17401_v3  ;;  %14248 = vmatmul.mubr.f32.gmra.mxu0 %v22016_v50  ;;  %14295 = vmatmul.mubr.f32.gmra.mxu1 %v22014_v6  ;;  %v2460_v52 = vsub.f32 %v17359_v62, %v17404_v24  ;;  %v2466_v6 = vsub.f32 %v17362_v16, %v17407_v29  ;;  %v17460_v44 = vand.u32 4294901760, %v2231_v59 }
 0x148   :  { %22102 = vst [vmem:[#allocation76_spill] sm:$0xff] %v17404_v24  ;;  %22103 = vst [vmem:[#allocation77_spill] sm:$0xff] %v17407_v29  ;;  %2314 = vmatprep.subr.mxu0 %v17319_v31  ;;  %2426 = vmatprep.subr.mxu1 %v17399_v60  ;;  %v2472_v54 = vsub.f32 %v17375_v8, %v17414_v51  ;;  %v17472_v60 = vand.u32 4294901760, %v17420_v7  ;;  %v2228_v29 = vld [vmem:[#allocation9 + $0x68] sm:$0xff]  ;;  %v17498_v31 = vsub.f32 %v2234_v43, %v17447_v32 }
 0x149   :  { %22104 = vst [vmem:[#allocation78_spill] sm:$0xff] %v17414_v51  ;;  %22105 = vst [vmem:[#allocation79_spill] sm:$0xff] %v17417_v15  ;;  %2316 = vmatpush1.msra.mxu0 %v17368_v17  ;;  %2432 = vmatpush1.msra.mxu1 %v17401_v3  ;;  %v742_v56 = vpop.f32.mrf.mxu0  ;;  %v880_v24 = vpop.f32.mrf.mxu1  ;;  %v17477_v3 = vand.u32 4294901760, %v17434_v36  ;;  %v17480_v51 = vand.u32 4294901760, %v17437_v58  ;;  %v17512_v8 = vsub.f32 %v2231_v59, %v17460_v44  ;;  %v17516_v43 = vand.u32 4294901760, %v2466_v6 }
 0x14a   :  { %22106 = vst [vmem:[#allocation80_spill] sm:$0xff] %v17420_v7  ;;  %22107 = vst [vmem:[#allocation81_spill] sm:$0xff] %v17425_v0  ;;  %v17466_v0 = vand.u32 4294901760, %v2230_v25  ;;  %2318 = vmatprep.subr.mxu0 %v17370_v57  ;;  %2438 = vmatprep.subr.mxu1 %v17429_v1  ;;  %v17483_v22 = vadd.f32 %v742_v56, %v17173_v35  ;;  %v17486_v17 = vadd.f32 %v880_v24, %v17336_v45  ;;  %v2227_v24 = vld [vmem:[#allocation9 + $0x60] sm:$0xff]  ;;  %v2225_v56 = vld [vmem:[#allocation9 + $0x50] sm:$0xff] }
 0x14b   :  { %22108 = vst [vmem:[#allocation82_spill] sm:$0xff] %v17429_v1  ;;  %22109 = vst [vmem:[#allocation83_spill] sm:$0xff] %v17431_v47  ;;  %14250 = vmatprep.mubr.msk.f32.mxu0 %vm15962_vm0, %v21931_v9  ;;  %14297 = vmatprep.mubr.msk.f32.mxu1 %vm15962_vm0, %v21931_v9  ;;  %v17492_v1 = vand.u32 4294901760, %v2454_v55  ;;  %v17495_v57 = vand.u32 4294901760, %v17450_v46  ;;  %v17500_v5 = vpop.f32.mrf.mxu0  ;;  %v17502_v35 = vpop.f32.mrf.mxu1  ;;  %v17506_v45 = vand.u32 4294901760, %v2460_v52  ;;  %v17509_v55 = vsub.f32 %v2233_v18, %v17456_v30 }
 0x14c   :  { %22110 = vst [vmem:[#allocation84_spill] sm:$0xff] %v17434_v36  ;;  %22111 = vst [vmem:[#allocation85_spill] sm:$0xff] %v17437_v58  ;;  %2320 = vmatpush1.msra.mxu0 %v17379_v48  ;;  %2444 = vmatpush1.msra.mxu1 %v17431_v47  ;;  %v17523_v52 = vsub.f32 %v2230_v25, %v17466_v0  ;;  %v17527_v59 = vand.u32 4294901760, %v2472_v54  ;;  %v2484_v18 = vsub.f32 %v17420_v7, %v17472_v60  ;;  %v72_v25 = vld [vmem:[%s21213_s2] sm:$0xff] }
 0x14d   :  { %22112 = vst [vmem:[#allocation86_spill] sm:$0xff] %v17439_v63  ;;  %22113 = vst [vmem:[#allocation87_spill] sm:$0xff] %v17443_v38  ;;  %v17469_v63 = vand.u32 4294901760, %v17417_v15  ;;  %14251 = vmatmul.mubr.f32.gmra.mxu0 %v22017_v37  ;;  %14298 = vmatmul.mubr.f32.gmra.mxu1 %v22015_v13  ;;  %v2490_v13 = vsub.f32 %v17434_v36, %v17477_v3  ;;  %v2496_v6 = vsub.f32 %v17437_v58, %v17480_v51  ;;  %v2224_v47 = vld [vmem:[#allocation9 + $0x48] sm:$0xff] }
 0x14e   :  { %22114 = vst [vmem:[#allocation88_spill] sm:$0xff] %v17447_v32  ;;  %22115 = vst [vmem:[#allocation89_spill] sm:$0xff] %v17450_v46  ;;  %2322 = vmatprep.subr.mxu0 %v17383_v14  ;;  %2450 = vmatprep.subr.mxu1 %v17443_v38  ;;  %v17540_v38 = vand.u32 4294901760, %v2227_v24  ;;  %v17542_v54 = vand.u32 4294901760, %v2225_v56  ;;  %v17555_v14 = vand.u32 4294901760, %v17512_v8  ;;  %v17589_v7 = vand.u32 4294901760, %v2224_v47 }
 0x14f   :  { %22116 = vst [vmem:[#allocation90_spill] sm:$0xff] %v17456_v30  ;;  %22117 = vst [vmem:[#allocation91_spill] sm:$0xff] %v17460_v44  ;;  %2324 = vmatpush1.msra.mxu0 %v17392_v26  ;;  %2456 = vmatpush1.msra.mxu1 %v17492_v1  ;;  %v2222_v26 = vld [vmem:[#allocation9 + $0x38] sm:$0xff]  ;;  %v17587_v36 = vand.u32 4294901760, %v2496_v6 }
 0x150   :  { %22118 = vst [vmem:[#allocation92_spill] sm:$0xff] %v17466_v0  ;;  %22119 = vst [vmem:[#allocation93_spill] sm:$0xff] %v17469_v63  ;;  %2326 = vmatprep.subr.mxu0 %v17447_v32  ;;  %2462 = vmatprep.subr.mxu1 %v17506_v45  ;;  %v2221_v32 = vld [vmem:[#allocation9 + $0x30] sm:$0xff] }
 0x151   :  { %22120 = vst [vmem:[#allocation94_spill] sm:$0xff] %v17472_v60  ;;  %22121 = vst [vmem:[#allocation95_spill] sm:$0xff] %v17477_v3  ;;  %v2502_v60 = vsub.f32 %v17450_v46, %v17495_v57  ;;  %v17547_v3 = vand.u32 4294901760, %v17498_v31  ;;  %14253 = vmatprep.mubr.msk.f32.mxu0 %vm15962_vm0, %v21931_v9  ;;  %14300 = vmatprep.mubr.msk.f32.mxu1 %vm15962_vm0, %v21931_v9  ;;  %v17570_v46 = vand.u32 4294901760, %v17523_v52 }
 0x152   :  { %22122 = vst [vmem:[#allocation96_spill] sm:$0xff] %v17480_v51  ;;  %22123 = vst [vmem:[#allocation97_spill] sm:$0xff] %v17492_v1  ;;  %v750_v51 = vpop.f32.mrf.mxu0  ;;  %v17552_v1 = vand.u32 4294901760, %v17509_v55  ;;  %2328 = vmatpush1.msra.mxu0 %v17456_v30  ;;  %2468 = vmatpush1.msra.mxu1 %v17516_v43  ;;  %v2218_v30 = vld [vmem:[#allocation9 + $0x18] sm:$0xff] }
 0x153   :  { %22124 = vst [vmem:[#allocation98_spill] sm:$0xff] %v17495_v57  ;;  %22125 = vst [vmem:[#allocation99_spill] sm:$0xff] %v17498_v31  ;;  %v17558_v48 = vadd.f32 %v750_v51, %v17206_v61  ;;  %v17575_v61 = vand.u32 4294901760, %v72_v25  ;;  %14254 = vmatmul.mubr.f32.gmra.mxu0 %v22018_v20  ;;  %14301 = vmatmul.mubr.f32.gmra.mxu1 %v22016_v50  ;;  %v17605_v6 = vand.u32 4294901760, %v2502_v60 }
 0x154   :  { %22126 = vst [vmem:[#allocation100_spill] sm:$0xff] %v17500_v5  ;;  %22127 = vst [vmem:[#allocation101_spill] sm:$0xff] %v17502_v35  ;;  %v2478_v5 = vsub.f32 %v17417_v15, %v17469_v63  ;;  %v17520_v35 = vand.u32 4294901760, %v2228_v29  ;;  %v889_v63 = vpop.f32.mrf.mxu1  ;;  %v17577_v51 = vpop.f32.mrf.mxu0  ;;  %2330 = vmatprep.subr.mxu0 %v17460_v44  ;;  %2474 = vmatprep.subr.mxu1 %v17527_v59  ;;  %v2514_v50 = vsub.f32 %v17509_v55, %v17552_v1 }
 0x155   :  { %22128 = vst [vmem:[#allocation102_spill] sm:$0xff] %v17506_v45  ;;  %22129 = vst [vmem:[#allocation103_spill] sm:$0xff] %v17509_v55  ;;  %v17561_v57 = vadd.f32 %v889_v63, %v17423_v2  ;;  %v17583_v2 = vand.u32 4294901760, %v2484_v18  ;;  %v17598_v18 = vsub.f32 %v2227_v24, %v17540_v38  ;;  %2332 = vmatpush1.msra.mxu0 %v17466_v0  ;;  %14256 = vmatprep.mubr.msk.f32.mxu0 %vm15962_vm0, %v21931_v9 }
 0x156   :  { %22130 = vst [vmem:[#allocation104_spill] sm:$0xff] %v17512_v8  ;;  %22131 = vst [vmem:[#allocation105_spill] sm:$0xff] %v17516_v43  ;;  %v17567_v45 = vand.u32 4294901760, %v2478_v5  ;;  %v17573_v58 = vsub.f32 %v2228_v29, %v17520_v35  ;;  %v17579_v63 = vpop.f32.mrf.mxu1  ;;  %v17585_v5 = vand.u32 4294901760, %v2490_v13  ;;  %v2219_v29 = vld [vmem:[#allocation9 + $0x20] sm:$0xff]  ;;  %v17601_v13 = vsub.f32 %v2225_v56, %v17542_v54  ;;  %2334 = vmatprep.subr.mxu0 %v17520_v35 }
 0x157   :  { %22132 = vst [vmem:[#allocation106_spill] sm:$0xff] %v17520_v35  ;;  %22133 = vst [vmem:[#allocation107_spill] sm:$0xff] %v17523_v52  ;;  %v17607_v43 = vand.u32 4294901760, %v2221_v32  ;;  %v17615_v24 = vand.u32 4294901760, %v2219_v29  ;;  %v2526_v56 = vsub.f32 %v17523_v52, %v17570_v46  ;;  %v17623_v44 = vsub.f32 %v72_v25, %v17575_v61  ;;  %14303 = vmatprep.mubr.msk.f32.mxu1 %vm15962_vm0, %v21931_v9 }
 0x158   :  { %22134 = vst [vmem:[#allocation108_spill] sm:$0xff] %v17527_v59  ;;  %22135 = vst [vmem:[#allocation109_spill] sm:$0xff] %v17540_v38  ;;  %2480 = vmatpush1.msra.mxu1 %v17567_v45  ;;  %v17620_v60 = vand.u32 4294901760, %v17573_v58  ;;  %v2215_v59 = vld [vmem:[#allocation9] sm:$0xff]  ;;  %v898_v55 = vpop.f32.mrf.mxu1  ;;  %2336 = vmatpush1.msra.mxu0 %v17540_v38 }
 0x159   :  { %22136 = vst [vmem:[#allocation110_spill] sm:$0xff] %v17542_v54  ;;  %22137 = vst [vmem:[#allocation111_spill] sm:$0xff] %v17547_v3  ;;  %2486 = vmatprep.subr.mxu1 %v17583_v2  ;;  %v17636_v0 = vadd.f32 %v898_v55, %v17483_v22  ;;  %v17661_v35 = vand.u32 4294901760, %v2215_v59  ;;  %v17664_v52 = vsub.f32 %v2221_v32, %v17607_v43  ;;  %14257 = vmatmul.mubr.f32.gmra.mxu0 %v22019_v21 }
 0x15a   :  { %22138 = vst [vmem:[#allocation112_spill] sm:$0xff] %v17552_v1  ;;  %22139 = vst [vmem:[#allocation113_spill] sm:$0xff] %v17555_v14  ;;  %v758_v1 = vpop.f32.mrf.mxu0  ;;  %v17655_v22 = vpop.f32.mrf.mxu1  ;;  %2492 = vmatpush1.msra.mxu1 %v17585_v5  ;;  %2338 = vmatprep.subr.mxu0 %v17542_v54 }
 0x15b   :  { %22140 = vst [vmem:[#allocation114_spill] sm:$0xff] %v17567_v45  ;;  %22141 = vst [vmem:[#allocation115_spill] sm:$0xff] %v17570_v46  ;;  %v17630_v45 = vsub.f32 %v2224_v47, %v17589_v7  ;;  %v17633_v46 = vadd.f32 %v758_v1, %v17260_v41  ;;  %v17648_v47 = vand.u32 4294901760, %v17601_v13  ;;  %14304 = vmatmul.mubr.f32.gmra.mxu1 %v22017_v37  ;;  %2498 = vmatprep.subr.mxu1 %v17587_v36 }
 0x15c   :  { %22142 = vst [vmem:[#allocation116_spill] sm:$0xff] %v17573_v58  ;;  %22143 = vst [vmem:[#allocation117_spill] sm:$0xff] %v17577_v51  ;;  %v17593_v51 = vand.u32 4294901760, %v2222_v26  ;;  %v17653_v41 = vpop.f32.mrf.mxu0  ;;  %2340 = vmatpush1.msra.mxu0 %v17589_v7  ;;  %2504 = vmatpush1.msra.mxu1 %v17605_v6  ;;  %v907_v54 = vpop.f32.mrf.mxu1 }
 0x15d   :  { %22144 = vst [vmem:[#allocation118_spill] sm:$0xff] %v17579_v63  ;;  %22145 = vst [vmem:[#allocation119_spill] sm:$0xff] %v17583_v2  ;;  %v2508_v63 = vsub.f32 %v17498_v31, %v17547_v3  ;;  %v2520_v3 = vsub.f32 %v17512_v8, %v17555_v14  ;;  %v2216_v31 = vld [vmem:[#allocation9 + $0x8] sm:$0xff]  ;;  %v17627_v14 = vand.u32 4294901760, %v2218_v30  ;;  %v17645_v2 = vand.u32 4294901760, %v17598_v18  ;;  %14306 = vmatprep.mubr.msk.f32.mxu1 %vm15962_vm0, %v21931_v9 }
 0x15e   :  { %22146 = vst [vmem:[#allocation120_spill] sm:$0xff] %v17585_v5  ;;  %22147 = vst [vmem:[#allocation121_spill] sm:$0xff] %v17587_v36  ;;  %v17642_v25 = vand.u32 4294901760, %v2216_v31  ;;  %v17651_v1 = vsub.f32 %v2222_v26, %v17593_v51  ;;  %v17668_v26 = vand.u32 4294901760, %v2514_v50  ;;  %v17682_v5 = vand.u32 4294901760, %v2526_v56  ;;  %2342 = vmatprep.subr.mxu0 %v17593_v51  ;;  %2385 = vmatprep.mubr.f32.mxu0 %v21931_v9 }
 0x15f   :  { %22148 = vst [vmem:[#allocation122_spill] sm:$0xff] %v17589_v7  ;;  %22149 = vst [vmem:[#allocation123_spill] sm:$0xff] %v17593_v51  ;;  %v17659_v55 = vand.u32 4294901760, %v2508_v63  ;;  %v17676_v63 = vsub.f32 %v2219_v29, %v17615_v24  ;;  %v17680_v32 = vand.u32 4294901760, %v2520_v3  ;;  %v17685_v37 = vand.u32 4294901760, %v17630_v45  ;;  %2344 = vmatpush1.msra.mxu0 %v17607_v43  ;;  %v17726_v7 = vpop.f32.mrf.mxu1  ;;  %14307 = vmatmul.mubr.f32.gmra.mxu1 %v22018_v20 }
 0x160   :  { %22150 = vst [vmem:[#allocation124_spill] sm:$0xff] %v17598_v18  ;;  %22151 = vst [vmem:[#allocation125_spill] sm:$0xff] %v17601_v13  ;;  %v17688_v50 = vsub.f32 %v2218_v30, %v17627_v14  ;;  %v2538_v29 = vsub.f32 %v17598_v18, %v17645_v2  ;;  %v2544_v36 = vsub.f32 %v17601_v13, %v17648_v47  ;;  %v17697_v3 = vand.u32 4294901760, %v17651_v1 }
 0x161   :  { %22152 = vst [vmem:[#allocation126_spill] sm:$0xff] %v17605_v6  ;;  %22153 = vst [vmem:[#allocation127_spill] sm:$0xff] %v17607_v43  ;;  %v17700_v56 = vsub.f32 %v2216_v31, %v17642_v25  ;;  %2510 = vmatprep.subr.mxu1 %v17659_v55  ;;  %v17705_v30 = vand.u32 4294901760, %v17664_v52  ;;  %v17708_v6 = vsub.f32 %v2215_v59, %v17661_v35  ;;  %v17722_v51 = vand.u32 4294901760, %v17676_v63 }
 0x162   :  { %22154 = vst [vmem:[#allocation128_spill] sm:$0xff] %v17615_v24  ;;  %22155 = vst [vmem:[#allocation129_spill] sm:$0xff] %v17620_v60  ;;  %2516 = vmatpush1.msra.mxu1 %v17668_v26  ;;  %2346 = vmatprep.subr.mxu0 %v17615_v24 }
 0x163   :  { %22156 = vst [vmem:[#allocation130_spill] sm:$0xff] %v17627_v14  ;;  %22157 = vst [vmem:[#allocation131_spill] sm:$0xff] %v17630_v45  ;;  %2522 = vmatprep.subr.mxu1 %v17680_v32  ;;  %2348 = vmatpush1.msra.mxu0 %v17627_v14  ;;  %v17751_v20 = vand.u32 4294901760, %v17708_v6 }
 0x164   :  { %22158 = vst [vmem:[#allocation132_spill] sm:$0xff] %v17642_v25  ;;  %22159 = vst [vmem:[#allocation133_spill] sm:$0xff] %v17645_v2  ;;  %v17712_v2 = vadd.f32 %v907_v54, %v17558_v48  ;;  %v17733_v48 = vand.u32 4294901760, %v17688_v50  ;;  %v17737_v54 = vand.u32 4294901760, %v2538_v29  ;;  %2528 = vmatpush1.msra.mxu1 %v17682_v5  ;;  %2350 = vmatprep.subr.mxu0 %v17642_v25 }
 0x165   :  { %22160 = vst [vmem:[#allocation134_spill] sm:$0xff] %v17648_v47  ;;  %22161 = vst [vmem:[#allocation135_spill] sm:$0xff] %v17651_v1  ;;  %14309 = vmatprep.mubr.msk.f32.mxu1 %vm15962_vm0, %v21931_v9  ;;  %2352 = vmatpush1.msra.mxu0 %v17661_v35 }
 0x166   :  { %22162 = vst [vmem:[#allocation136_spill] sm:$0xff] %v17653_v41  ;;  %22163 = vst [vmem:[#allocation137_spill] sm:$0xff] %v17655_v22  ;;  %v2532_v41 = vsub.f32 %v17573_v58, %v17620_v60  ;;  %v17673_v22 = vand.u32 4294901760, %v17623_v44  ;;  %v766_v60 = vpop.f32.mrf.mxu0  ;;  %14310 = vmatmul.mubr.f32.gmra.mxu1 %v22019_v21  ;;  %2631 = vmatprep.subr.mxu0 %v17204_v39 }
 0x167   :  { %22164 = vst [vmem:[#allocation138_spill] sm:$0xff] %v17659_v55  ;;  %22165 = vst [vmem:[#allocation139_spill] sm:$0xff] %v17661_v35  ;;  %v767_v47 = vadd.f32 %v766_v60, %v17315_v40  ;;  %v2550_v40 = vsub.f32 %v17630_v45, %v17685_v37  ;;  %v2556_v60 = vsub.f32 %v17651_v1, %v17697_v3  ;;  %2621 = vmatprep.mubr.f32.mxu1 %v21931_v9 }
 0x168   :  { %22166 = vst [vmem:[#allocation140_spill] sm:$0xff] %v17664_v52  ;;  %22167 = vst [vmem:[#allocation141_spill] sm:$0xff] %v17668_v26  ;;  %v17717_v31 = vand.u32 4294901760, %v2532_v41  ;;  %v2389_v55 = vsub.f32 %v17623_v44, %v17673_v22  ;;  %v17724_v59 = vpop.f32.mrf.mxu0  ;;  %v17742_v41 = vand.u32 4294901760, %v17700_v56 }
 0x169   :  { %22168 = vst [vmem:[#allocation142_spill] sm:$0xff] %v17676_v63  ;;  %22169 = vst [vmem:[#allocation143_spill] sm:$0xff] %v17680_v32  ;;  %v2568_v32 = vsub.f32 %v17676_v63, %v17722_v51 }
 0x16a   :  { %22170 = vst [vmem:[#allocation144_spill] sm:$0xff] %v17682_v5  ;;  %22171 = vst [vmem:[#allocation145_spill] sm:$0xff] %v17685_v37  ;;  %2534 = vmatprep.subr.mxu1 %v17717_v31  ;;  %v17755_v29 = vand.u32 4294901760, %v2389_v55  ;;  %v774_v26 = vpop.f32.mrf.mxu0  ;;  %v2574_v5 = vsub.f32 %v17688_v50, %v17733_v48 }
 0x16b   :  { %22172 = vst [vmem:[#allocation146_spill] sm:$0xff] %v17688_v50  ;;  %22173 = vst [vmem:[#allocation147_spill] sm:$0xff] %v17697_v3  ;;  %v916_v3 = vpop.f32.mrf.mxu1  ;;  %2540 = vmatpush1.msra.mxu1 %v17737_v54 }
 0x16c   :  { %22174 = vst [vmem:[#allocation148_spill] sm:$0xff] %v17700_v56  ;;  %22175 = vst [vmem:[#allocation149_spill] sm:$0xff] %v17705_v30  ;;  %v17768_v55 = vadd.f32 %v916_v3, %v17633_v46  ;;  %2391 = vmatmul.mubr.f32.vlgmr.msra.gmra.mxu0 %v17755_v29  ;;  %v17786_v46 = vand.u32 4294901760, %v2568_v32 }
 0x16d   :  { %22176 = vst [vmem:[#allocation150_spill] sm:$0xff] %v17708_v6  ;;  %22177 = vst [vmem:[#allocation151_spill] sm:$0xff] %v17717_v31  ;;  %v17772_v31 = vand.u32 4294901760, %v2556_v60  ;;  %v17776_v37 = vpop.f32.mrf.mxu1  ;;  %2634 = vmatpush1.msra.mxu0 %v17212_v19  ;;  %2757 = vmatprep.mubr.f32.mxu0 %v21931_v9 }
 0x16e   :  { %22178 = vst [vmem:[#allocation152_spill] sm:$0xff] %v17722_v51  ;;  %22179 = vst [vmem:[#allocation153_spill] sm:$0xff] %v17724_v59  ;;  %v17746_v59 = vand.u32 4294901760, %v2544_v36  ;;  %v17762_v36 = vand.u32 4294901760, %v2550_v40  ;;  %v2580_v51 = vsub.f32 %v17700_v56, %v17742_v41  ;;  %2637 = vmatprep.subr.mxu0 %v17215_v49  ;;  %v22214_v49 = vld [vmem:[#allocation103_spill] sm:$0xff] }
 0x16f   :  { %22180 = vst [vmem:[#allocation154_spill] sm:$0xff] %v17726_v7  ;;  %22181 = vst [vmem:[#allocation155_spill] sm:$0xff] %v17733_v48  ;;  %v2562_v7 = vsub.f32 %v17664_v52, %v17705_v30  ;;  %v775_v30 = vadd.f32 %v774_v26, %v17386_v27  ;;  %v2586_v27 = vsub.f32 %v17708_v6, %v17751_v20  ;;  %v17790_v26 = vand.u32 4294901760, %v2574_v5 }
 0x170   :  { %22182 = vst [vmem:[#allocation156_spill] sm:$0xff] %v17737_v54  ;;  %22183 = vst [vmem:[#allocation157_spill] sm:$0xff] %v17742_v41  ;;  %2546 = vmatprep.subr.mxu1 %v17746_v59  ;;  %v17794_v21 = vand.u32 4294901760, %v2580_v51  ;;  %2640 = vmatpush1.msra.mxu0 %v17233_v11  ;;  %v17808_v51 = vpop.f32.mrf.mxu0  ;;  %v22212_v11 = vld [vmem:[#allocation55_spill] sm:$0xff]  ;;  %v2232_v54 = vld [vmem:[#allocation9 + $0x88] sm:$0xff] }
 0x171   :  { %22184 = vst [vmem:[#allocation158_spill] sm:$0xff] %v17746_v59  ;;  %22185 = vst [vmem:[#allocation159_spill] sm:$0xff] %v17751_v20  ;;  %v17780_v40 = vand.u32 4294901760, %v2562_v7  ;;  %2552 = vmatpush1.msra.mxu1 %v17762_v36  ;;  %v925_v7 = vpop.f32.mrf.mxu1  ;;  %v17798_v3 = vand.u32 4294901760, %v2586_v27  ;;  %2643 = vmatprep.subr.mxu0 %v17258_v34  ;;  %v22210_v34 = vld [vmem:[#allocation52_spill] sm:$0xff] }
 0x172   :  { %22186 = vst [vmem:[#allocation160_spill] sm:$0xff] %v17762_v36  ;;  %22187 = vst [vmem:[#allocation161_spill] sm:$0xff] %v17772_v31  ;;  %2558 = vmatprep.subr.mxu1 %v17772_v31  ;;  %v17800_v32 = vadd.f32 %v925_v7, %v767_v47  ;;  %2646 = vmatpush1.msra.mxu0 %v17268_v53  ;;  %v1102_v60 = vpop.f32.mrf.mxu0  ;;  %v22208_v53 = vld [vmem:[#allocation41_spill] sm:$0xff] }
 0x173   :  { %22188 = vst [vmem:[#allocation162_spill] sm:$0xff] %v17776_v37  ;;  %22189 = vst [vmem:[#allocation163_spill] sm:$0xff] %v17780_v40  ;;  %2564 = vmatpush1.msra.mxu1 %v17780_v40  ;;  %v17804_v5 = vpop.f32.mrf.mxu1  ;;  %2649 = vmatprep.subr.mxu0 %v17280_v10  ;;  %v1103_v7 = vadd.f32 %v1102_v60, %v17486_v17  ;;  %v22199_v17 = vld [vmem:[#allocation50_spill] sm:$0xff]  ;;  %v22207_v10 = vld [vmem:[#allocation85_spill] sm:$0xff] }
 0x174   :  { %22190 = vst [vmem:[#allocation164_spill] sm:$0xff] %v17786_v46  ;;  %22191 = vst [vmem:[#allocation165_spill] sm:$0xff] %v17790_v26  ;;  %2570 = vmatprep.subr.mxu1 %v17786_v46  ;;  %2652 = vmatpush1.msra.mxu0 %v17292_v12  ;;  %v22205_v12 = vld [vmem:[#allocation56_spill] sm:$0xff]  ;;  %v22282_v39 = vld [vmem:[#allocation149_spill] sm:$0xff] }
 0x175   :  { %22192 = vst [vmem:[#allocation166_spill] sm:$0xff] %v17794_v21  ;;  %22193 = vst [vmem:[#allocation167_spill] sm:$0xff] %v17798_v3  ;;  %2576 = vmatpush1.msra.mxu1 %v17790_v26  ;;  %v934_v47 = vpop.f32.mrf.mxu1  ;;  %2655 = vmatprep.subr.mxu0 %v17304_v33 }
 0x176   :  { %22194 = vst [vmem:[#allocation168_spill] sm:$0xff] %v17804_v5  ;;  %22195 = vst [vmem:[#allocation169_spill] sm:$0xff] %v17808_v51  ;;  %2582 = vmatprep.subr.mxu1 %v17794_v21  ;;  %v17816_v27 = vadd.f32 %v934_v47, %v775_v30  ;;  %v17821_v51 = vpop.f32.mrf.mxu0  ;;  %2658 = vmatpush1.msra.mxu0 %v17349_v23  ;;  %v22197_v30 = vld [vmem:[#allocation33_spill] sm:$0xff]  ;;  %v22200_v5 = vld [vmem:[#allocation36_spill] sm:$0xff] }
 0x177   :  { %2588 = vmatpush1.msra.mxu1 %v17798_v3  ;;  %22196 = vst [vmem:[#allocation170_spill] sm:$0xff] %v17821_v51  ;;  %2661 = vmatprep.subr.mxu0 %v17359_v62  ;;  %v22198_v47 = vld [vmem:[#allocation69_spill] sm:$0xff]  ;;  %v22201_v23 = vld [vmem:[#allocation80_spill] sm:$0xff]  ;;  %v22219_v51 = vld [vmem:[#allocation107_spill] sm:$0xff] }
 0x178   :  { %2623 = vmatmul.mubr.f32.vlgmr.msra.gmra.mxu1 %v17575_v61  ;;  %2767 = vmatprep.subr.mxu1 %v17183_v42  ;;  %v1109_v60 = vpop.f32.mrf.mxu0  ;;  %v22202_v62 = vld [vmem:[#allocation53_spill] sm:$0xff] }
 0x179   :  { %2769 = vmatpush1.msra.mxu1 %v17189_v4  ;;  %2664 = vmatpush1.msra.mxu0 %v17362_v16  ;;  %v1110_v37 = vadd.f32 %v1109_v60, %v17561_v57  ;;  %v22204_v16 = vld [vmem:[#allocation84_spill] sm:$0xff] }
 0x17a   :  { %2771 = vmatprep.subr.mxu1 %v17191_v28  ;;  %2667 = vmatprep.subr.mxu0 %v22198_v47  ;;  %v17836_v33 = vpop.f32.mrf.mxu0  ;;  %v17840_v47 = vpop.f32.mrf.mxu1 }
 0x17b   :  { %2773 = vmatpush1.msra.mxu1 %v22197_v30  ;;  %2670 = vmatpush1.msra.mxu0 %v17417_v15  ;;  %22203 = vst [vmem:[#allocation171_spill] sm:$0xff] %v17836_v33  ;;  %22206 = vst [vmem:[#allocation172_spill] sm:$0xff] %v17840_v47  ;;  %v22209_v15 = vld [vmem:[#allocation89_spill] sm:$0xff]  ;;  %v22215_v47 = vld [vmem:[#allocation51_spill] sm:$0xff] }
 0x17c   :  { %2775 = vmatprep.subr.mxu1 %v22199_v17  ;;  %2673 = vmatprep.subr.mxu0 %v22201_v23  ;;  %v1116_v57 = vpop.f32.mrf.mxu0  ;;  %v1248_v60 = vpop.f32.mrf.mxu1  ;;  %v22211_v23 = vld [vmem:[#allocation99_spill] sm:$0xff] }
 0x17d   :  { %2777 = vmatpush1.msra.mxu1 %v22200_v5  ;;  %2676 = vmatpush1.msra.mxu0 %v22204_v16  ;;  %v1117_v33 = vadd.f32 %v1116_v57, %v17636_v0  ;;  %v17849_v16 = vadd.f32 %v1248_v60, %v1103_v7  ;;  %v22221_v0 = vld [vmem:[#allocation68_spill] sm:$0xff]  ;;  %v22222_v7 = vld [vmem:[#allocation70_spill] sm:$0xff] }
 0x17e   :  { %2779 = vmatprep.subr.mxu1 %v22202_v62  ;;  %2679 = vmatprep.subr.mxu0 %v22207_v10  ;;  %v17853_v10 = vpop.f32.mrf.mxu0  ;;  %v17855_v19 = vpop.f32.mrf.mxu1 }
 0x17f   :  { %2781 = vmatpush1.msra.mxu1 %v22205_v12  ;;  %2682 = vmatpush1.msra.mxu0 %v22209_v15  ;;  %22213 = vst [vmem:[#allocation173_spill] sm:$0xff] %v17849_v16  ;;  %22216 = vst [vmem:[#allocation174_spill] sm:$0xff] %v17853_v10  ;;  %v22218_v15 = vld [vmem:[#allocation57_spill] sm:$0xff]  ;;  %v22223_v10 = vld [vmem:[#allocation71_spill] sm:$0xff] }
 0x180   :  { %2783 = vmatprep.subr.mxu1 %v22208_v53  ;;  %2685 = vmatprep.subr.mxu0 %v22211_v23  ;;  %22217 = vst [vmem:[#allocation175_spill] sm:$0xff] %v17855_v19  ;;  %v22220_v23 = vld [vmem:[#allocation67_spill] sm:$0xff]  ;;  %v1123_v57 = vpop.f32.mrf.mxu0  ;;  %v1255_v60 = vpop.f32.mrf.mxu1  ;;  %v22248_v16 = vld [vmem:[#allocation17_spill] sm:$0xff] }
 0x181   :  { %2785 = vmatpush1.msra.mxu1 %v22210_v34  ;;  %2688 = vmatpush1.msra.mxu0 %v22214_v49  ;;  %v17868_v49 = vadd.f32 %v1255_v60, %v1110_v37  ;;  %v22231_v37 = vld [vmem:[#allocation92_spill] sm:$0xff] }
 0x182   :  { %2787 = vmatprep.subr.mxu1 %v22212_v11  ;;  %2691 = vmatprep.subr.mxu0 %v17512_v8  ;;  %v1124_v8 = vadd.f32 %v1123_v57, %v17712_v2  ;;  %v17874_v19 = vpop.f32.mrf.mxu1  ;;  %v22230_v2 = vld [vmem:[#allocation91_spill] sm:$0xff] }
 0x183   :  { %2789 = vmatpush1.msra.mxu1 %v22215_v47  ;;  %2694 = vmatpush1.msra.mxu0 %v22219_v51  ;;  %22224 = vst [vmem:[#allocation176_spill] sm:$0xff] %v17868_v49  ;;  %v22225_v51 = vld [vmem:[#allocation72_spill] sm:$0xff]  ;;  %22227 = vst [vmem:[#allocation178_spill] sm:$0xff] %v17874_v19 }
 0x184   :  { %2791 = vmatprep.subr.mxu1 %v22218_v15  ;;  %2697 = vmatprep.subr.mxu0 %v17573_v58  ;;  %v17872_v58 = vpop.f32.mrf.mxu0  ;;  %v1262_v60 = vpop.f32.mrf.mxu1 }
 0x185   :  { %2793 = vmatpush1.msra.mxu1 %v22220_v23  ;;  %2700 = vmatpush1.msra.mxu0 %v17598_v18  ;;  %22226 = vst [vmem:[#allocation177_spill] sm:$0xff] %v17872_v58  ;;  %v22228_v18 = vld [vmem:[#allocation88_spill] sm:$0xff]  ;;  %v22232_v58 = vld [vmem:[#allocation106_spill] sm:$0xff]  ;;  %v17887_v49 = vadd.f32 %v1262_v60, %v1117_v33 }
 0x186   :  { %2795 = vmatprep.subr.mxu1 %v22221_v0  ;;  %2703 = vmatprep.subr.mxu0 %v17601_v13  ;;  %v22229_v13 = vld [vmem:[#allocation90_spill] sm:$0xff]  ;;  %v1130_v57 = vpop.f32.mrf.mxu0  ;;  %v22239_v33 = vld [vmem:[#allocation40_spill] sm:$0xff] }
 0x187   :  { %2797 = vmatpush1.msra.mxu1 %v22222_v7  ;;  %2706 = vmatpush1.msra.mxu0 %v17630_v45  ;;  %v1131_v19 = vadd.f32 %v1130_v57, %v17768_v55  ;;  %22233 = vst [vmem:[#allocation179_spill] sm:$0xff] %v17887_v49  ;;  %v22240_v55 = vld [vmem:[#allocation123_spill] sm:$0xff]  ;;  %v22241_v57 = vld [vmem:[#allocation26_spill] sm:$0xff] }
 0x188   :  { %2799 = vmatprep.subr.mxu1 %v22223_v10  ;;  %2709 = vmatprep.subr.mxu0 %v17651_v1  ;;  %v22238_v1 = vld [vmem:[#allocation122_spill] sm:$0xff] }
 0x189   :  { %2801 = vmatpush1.msra.mxu1 %v22225_v51  ;;  %2712 = vmatpush1.msra.mxu0 %v17664_v52  ;;  %v17893_v52 = vpop.f32.mrf.mxu1 }
 0x18a   :  { %2803 = vmatprep.subr.mxu1 %v22228_v18  ;;  %2715 = vmatprep.subr.mxu0 %v17676_v63  ;;  %v17891_v63 = vpop.f32.mrf.mxu0  ;;  %22235 = vst [vmem:[#allocation181_spill] sm:$0xff] %v17893_v52  ;;  %v22242_v52 = vld [vmem:[#allocation16_spill] sm:$0xff] }
 0x18b   :  { %2805 = vmatpush1.msra.mxu1 %v22229_v13  ;;  %2718 = vmatpush1.msra.mxu0 %v17688_v50  ;;  %22234 = vst [vmem:[#allocation180_spill] sm:$0xff] %v17891_v63  ;;  %v22236_v50 = vld [vmem:[#allocation110_spill] sm:$0xff]  ;;  %v1269_v63 = vpop.f32.mrf.mxu1 }
 0x18c   :  { %2807 = vmatprep.subr.mxu1 %v22230_v2  ;;  %2721 = vmatprep.subr.mxu0 %v17700_v56  ;;  %v22237_v56 = vld [vmem:[#allocation23_spill] sm:$0xff]  ;;  %v1137_v60 = vpop.f32.mrf.mxu0 }
 0x18d   :  { %2809 = vmatpush1.msra.mxu1 %v22231_v37  ;;  %2724 = vmatpush1.msra.mxu0 %v17708_v6  ;;  %v1138_v49 = vadd.f32 %v1137_v60, %v17800_v32  ;;  %v17906_v6 = vadd.f32 %v1269_v63, %v1124_v8  ;;  %v22249_v8 = vld [vmem:[#allocation59_spill] sm:$0xff]  ;;  %v22250_v60 = vld [vmem:[#allocation61_spill] sm:$0xff] }
 0x18e   :  { %2811 = vmatprep.subr.mxu1 %v22232_v58  ;;  %2760 = vmatmul.mubr.f32.vlgmr.msra.gmra.mxu0 %v17623_v44  ;;  %v17910_v45 = vpop.f32.mrf.mxu0 }
 0x18f   :  { %2813 = vmatpush1.msra.mxu1 %v17540_v38  ;;  %2875 = vmatprep.subr.mxu0 %v22237_v56  ;;  %22243 = vst [vmem:[#allocation182_spill] sm:$0xff] %v17906_v6  ;;  %v22244_v56 = vld [vmem:[#allocation43_spill] sm:$0xff]  ;;  %22245 = vst [vmem:[#allocation183_spill] sm:$0xff] %v17910_v45  ;;  %v22252_v6 = vld [vmem:[#allocation73_spill] sm:$0xff] }
 0x190   :  { %2815 = vmatprep.subr.mxu1 %v22236_v50  ;;  %2879 = vmatpush1.msra.mxu0 %v22239_v33  ;;  %v17912_v33 = vpop.f32.mrf.mxu1  ;;  %v1144_v63 = vpop.f32.mrf.mxu0 }
 0x191   :  { %2817 = vmatpush1.msra.mxu1 %v22238_v1  ;;  %2883 = vmatprep.subr.mxu0 %v22241_v57  ;;  %22246 = vst [vmem:[#allocation184_spill] sm:$0xff] %v17912_v33  ;;  %v22247_v57 = vld [vmem:[#allocation54_spill] sm:$0xff]  ;;  %v1145_v45 = vadd.f32 %v1144_v63, %v17816_v27 }
 0x192   :  { %2819 = vmatprep.subr.mxu1 %v22240_v55  ;;  %2887 = vmatpush1.msra.mxu0 %v22242_v52  ;;  %v1276_v32 = vpop.f32.mrf.mxu1  ;;  %v22258_v63 = vld [vmem:[#allocation94_spill] sm:$0xff]  ;;  %v22276_v52 = vld [vmem:[#allocation145_spill] sm:$0xff] }
 0x193   :  { %2821 = vmatpush1.msra.mxu1 %v17607_v43  ;;  %2891 = vmatprep.subr.mxu0 %v22244_v56  ;;  %v17925_v33 = vadd.f32 %v1276_v32, %v1131_v19  ;;  %v22257_v19 = vld [vmem:[#allocation93_spill] sm:$0xff]  ;;  %v22275_v56 = vld [vmem:[#allocation134_spill] sm:$0xff] }
 0x194   :  { %2823 = vmatprep.subr.mxu1 %v17615_v24  ;;  %2895 = vmatpush1.msra.mxu0 %v22247_v57  ;;  %v22254_v57 = vld [vmem:[#allocation76_spill] sm:$0xff] }
 0x195   :  { %2825 = vmatpush1.msra.mxu1 %v17627_v14  ;;  %2899 = vmatprep.subr.mxu0 %v22248_v16  ;;  %22251 = vst [vmem:[#allocation185_spill] sm:$0xff] %v17925_v33  ;;  %v17929_v16 = vpop.f32.mrf.mxu1 }
 0x196   :  { %2827 = vmatprep.subr.mxu1 %v17642_v25  ;;  %2862 = vmatprep.mubr.f32.mxu1 %v21931_v9  ;;  %22253 = vst [vmem:[#allocation186_spill] sm:$0xff] %v17929_v16  ;;  %v22260_v16 = vld [vmem:[#allocation95_spill] sm:$0xff] }
 0x197   :  { %2829 = vmatpush1.msra.mxu1 %v17661_v35  ;;  %2903 = vmatpush1.msra.mxu0 %v22249_v8  ;;  %v22255_v8 = vld [vmem:[#allocation77_spill] sm:$0xff]  ;;  %v1283_v27 = vpop.f32.mrf.mxu1 }
 0x198   :  { %2866 = vmatmul.mubr.f32.vlgmr.msra.gmra.mxu1 %v17673_v22  ;;  %2907 = vmatprep.subr.mxu0 %v22250_v60  ;;  %v22256_v60 = vld [vmem:[#allocation78_spill] sm:$0xff]  ;;  %v17941_v32 = vadd.f32 %v1283_v27, %v1138_v49  ;;  %v22266_v49 = vld [vmem:[#allocation111_spill] sm:$0xff] }
 0x199   :  { %3041 = vmatprep.subr.mxu1 %v17183_v42  ;;  %2911 = vmatpush1.msra.mxu0 %v22252_v6  ;;  %v17945_v33 = vpop.f32.mrf.mxu1 }
 0x19a   :  { %3043 = vmatpush1.msra.mxu1 %v17189_v4  ;;  %2915 = vmatprep.subr.mxu0 %v22254_v57  ;;  %22259 = vst [vmem:[#allocation187_spill] sm:$0xff] %v17941_v32  ;;  %22261 = vst [vmem:[#allocation188_spill] sm:$0xff] %v17945_v33  ;;  %v22267_v32 = vld [vmem:[#allocation112_spill] sm:$0xff]  ;;  %v2262_v33 = vld [vmem:[#allocation9 + $0x178] sm:$0xff] }
 0x19b   :  { %3045 = vmatprep.subr.mxu1 %v17191_v28  ;;  %2919 = vmatpush1.msra.mxu0 %v22255_v8  ;;  %v17951_v8 = vpop.f32.mrf.mxu0  ;;  %v1290_v27 = vpop.f32.mrf.mxu1  ;;  %v15865_v57 = vld [vmem:[%s21215_s4] sm:$0x7] }
 0x19c   :  { %3047 = vmatpush1.msra.mxu1 %v22197_v30  ;;  %2923 = vmatprep.subr.mxu0 %v22256_v60  ;;  %v22262_v60 = vld [vmem:[#allocation96_spill] sm:$0xff]  ;;  %22264 = vst [vmem:[#allocation189_spill] sm:$0xff] %v17951_v8  ;;  %v22270_v8 = vld [vmem:[#allocation115_spill] sm:$0xff] }
 0x19d   :  { %3049 = vmatprep.subr.mxu1 %v22199_v17  ;;  %2927 = vmatpush1.msra.mxu0 %v22257_v19  ;;  %v22263_v19 = vld [vmem:[#allocation98_spill] sm:$0xff] }
 0x19e   :  { %3051 = vmatpush1.msra.mxu1 %v22200_v5  ;;  %2931 = vmatprep.subr.mxu0 %v22258_v63  ;;  %v22265_v63 = vld [vmem:[#allocation20_spill] sm:$0xff] }
 0x19f   :  { %3053 = vmatprep.subr.mxu1 %v22202_v62  ;;  %2935 = vmatpush1.msra.mxu0 %v22260_v16  ;;  %v1382_v16 = vpop.f32.mrf.mxu0 }
 0x1a0   :  { %3055 = vmatpush1.msra.mxu1 %v22205_v12  ;;  %2939 = vmatprep.subr.mxu0 %v22262_v60  ;;  %v17958_v60 = vadd.f32 %v1290_v27, %v1145_v45  ;;  %v22272_v45 = vld [vmem:[#allocation129_spill] sm:$0xff]  ;;  %v17973_v27 = vand.u32 4294901760, %v2262_v33 }
 0x1a1   :  { %3057 = vmatprep.subr.mxu1 %v22208_v53  ;;  %2943 = vmatpush1.msra.mxu0 %v22263_v19  ;;  %v22269_v19 = vld [vmem:[#allocation113_spill] sm:$0xff]  ;;  %v14028_v6 = vpop.f32.mrf.mxu0 }
 0x1a2   :  { %3059 = vmatpush1.msra.mxu1 %v22210_v34  ;;  %2947 = vmatprep.subr.mxu0 %v22266_v49  ;;  %22268 = vst [vmem:[#allocation190_spill] sm:$0xff] %v17958_v60  ;;  %22273 = vst [vmem:[#allocation191_spill] sm:$0xff] %v17973_v27  ;;  %v2259_v60 = vld [vmem:[#allocation9 + $0x160] sm:$0xff] }
 0x1a3   :  { %3061 = vmatprep.subr.mxu1 %v22212_v11  ;;  %2951 = vmatpush1.msra.mxu0 %v22267_v32  ;;  %v22271_v32 = vsub.s32 2, %v22265_v63  ;;  %v17981_v6 = vand.u32 4294901760, %v2259_v60  ;;  %v17989_v63 = vsub.f32 %v2262_v33, %v17973_v27  ;;  %v2247_v33 = vld [vmem:[#allocation9 + $0x100] sm:$0xff] }
 0x1a4   :  { %3063 = vmatpush1.msra.mxu1 %v22215_v47  ;;  %2955 = vmatprep.subr.mxu0 %v22269_v19  ;;  %v22274_v19 = vld [vmem:[#allocation133_spill] sm:$0xff]  ;;  %v1392_v3 = vpop.f32.mrf.mxu0 }
 0x1a5   :  { %3065 = vmatprep.subr.mxu1 %v22218_v15  ;;  %2959 = vmatpush1.msra.mxu0 %v22270_v8  ;;  %v17969_v49 = vrot.slane %v15865_v57, %v22271_v32  ;;  %v2256_v8 = vld [vmem:[#allocation9 + $0x148] sm:$0xff]  ;;  %22277 = vst [vmem:[#allocation192_spill] sm:$0xff] %v17981_v6  ;;  %v2253_v57 = vld [vmem:[#allocation9 + $0x130] sm:$0xff]  ;;  %22280 = vst [vmem:[#allocation194_spill] sm:$0xff] %v17989_v63 }
 0x1a6   :  { %3067 = vmatpush1.msra.mxu1 %v22220_v23  ;;  %2963 = vmatprep.subr.mxu0 %v22272_v45  ;;  %v22278_v45 = vld [vmem:[#allocation147_spill] sm:$0xff] }
 0x1a7   :  { %3069 = vmatprep.subr.mxu1 %v22221_v0  ;;  %2967 = vmatpush1.msra.mxu0 %v22274_v19  ;;  %v1383_v32 = vadd.f32 %v1382_v16, %v17969_v49  ;;  %v17986_v19 = vand.u32 4294901760, %v2256_v8  ;;  %v17997_v16 = vand.u32 4294901760, %v2253_v57 }
 0x1a8   :  { %3071 = vmatpush1.msra.mxu1 %v22222_v7  ;;  %2971 = vmatprep.subr.mxu0 %v22275_v56  ;;  %v17991_v56 = vpop.f32.mrf.mxu1 }
 0x1a9   :  { %3073 = vmatprep.subr.mxu1 %v22223_v10  ;;  %2975 = vmatpush1.msra.mxu0 %v22276_v52  ;;  %22279 = vst [vmem:[#allocation193_spill] sm:$0xff] %v17986_v19  ;;  %22281 = vst [vmem:[#allocation195_spill] sm:$0xff] %v17991_v56  ;;  %v22283_v52 = vld [vmem:[#allocation152_spill] sm:$0xff]  ;;  %v18002_v56 = vsub.f32 %v2259_v60, %v17981_v6  ;;  %v18013_v46 = vsub.f32 %v2256_v8, %v17986_v19 }
 0x1aa   :  { %3075 = vmatpush1.msra.mxu1 %v22225_v51  ;;  %2979 = vmatprep.subr.mxu0 %v22278_v45  ;;  %22284 = vst [vmem:[#allocation196_spill] sm:$0xff] %v17997_v16  ;;  %v2250_v45 = vld [vmem:[#allocation9 + $0x118] sm:$0xff]  ;;  %v1593_v21 = vpop.f32.mrf.mxu1 }
 0x1ab   :  { %3077 = vmatprep.subr.mxu1 %v22228_v18  ;;  %2983 = vmatpush1.msra.mxu0 %v22282_v39  ;;  %22285 = vst [vmem:[#allocation197_spill] sm:$0xff] %v18002_v56  ;;  %v1393_v39 = vadd.f32 %v1392_v3, %v17969_v49  ;;  %v18005_v26 = vadd.f32 %v1593_v21, %v1383_v32  ;;  %22287 = vst [vmem:[#allocation199_spill] sm:$0xff] %v18013_v46  ;;  %v18017_v60 = vand.u32 4294901760, %v2250_v45  ;;  %v2244_v3 = vld [vmem:[#allocation9 + $0xe8] sm:$0xff] }
 0x1ac   :  { %3079 = vmatpush1.msra.mxu1 %v22229_v13  ;;  %2987 = vmatprep.subr.mxu0 %v22283_v52  ;;  %v18010_v52 = vand.u32 4294901760, %v17989_v63  ;;  %v14081_v40 = vpop.f32.mrf.mxu1  ;;  %v18021_v21 = vand.u32 4294901760, %v2247_v33  ;;  %v18024_v32 = vsub.f32 %v2253_v57, %v17997_v16  ;;  %v2241_v57 = vld [vmem:[#allocation9 + $0xd0] sm:$0xff] }
 0x1ad   :  { %3081 = vmatprep.subr.mxu1 %v22230_v2  ;;  %2991 = vmatpush1.msra.mxu0 %v17733_v48  ;;  %v14031_v48 = vpop.f32.mrf.mxu0  ;;  %22288 = vst [vmem:[#allocation200_spill] sm:$0xff] %v18017_v60 }
 0x1ae   :  { %3083 = vmatpush1.msra.mxu1 %v22231_v37  ;;  %2995 = vmatprep.subr.mxu0 %v17742_v41  ;;  %22286 = vst [vmem:[#allocation198_spill] sm:$0xff] %v18010_v52  ;;  %22289 = vst [vmem:[#allocation201_spill] sm:$0xff] %v18021_v21  ;;  %v18029_v48 = vand.u32 4294901760, %v18002_v56  ;;  %v3239_v8 = vsub.f32 %v17989_v63, %v18010_v52  ;;  %v18049_v31 = vand.u32 4294901760, %v18024_v32  ;;  %v1599_v36 = vpop.f32.mrf.mxu1 }
 0x1af   :  { %3085 = vmatprep.subr.mxu1 %v22232_v58  ;;  %2999 = vmatpush1.msra.mxu0 %v17751_v20  ;;  %22290 = vst [vmem:[#allocation202_spill] sm:$0xff] %v18024_v32  ;;  %v1402_v40 = vpop.f32.mrf.mxu0  ;;  %v18036_v20 = vand.u32 4294901760, %v18013_v46  ;;  %v2238_v58 = vld [vmem:[#allocation9 + $0xb8] sm:$0xff]  ;;  %v18076_v59 = vadd.f32 %v1599_v36, %v1393_v39 }
 0x1b0   :  { %3032 = vmatprep.mubr.f32.mxu0 %v21931_v9  ;;  %3087 = vmatpush1.msra.mxu1 %v17540_v38  ;;  %22291 = vst [vmem:[#allocation203_spill] sm:$0xff] %v18029_v48  ;;  %v1403_v41 = vadd.f32 %v1402_v40, %v17969_v49  ;;  %v18044_v38 = vsub.f32 %v2250_v45, %v18017_v60  ;;  %22295 = vst [vmem:[#allocation207_spill] sm:$0xff] %v18049_v31  ;;  %v14084_v18 = vpop.f32.mrf.mxu1 }
 0x1b1   :  { %3034 = vmatmul.mubr.f32.vlgmr.msra.gmra.mxu0 %v17575_v61  ;;  %3089 = vmatprep.subr.mxu1 %v22236_v50  ;;  %22292 = vst [vmem:[#allocation204_spill] sm:$0xff] %v18036_v20  ;;  %v18041_v50 = vand.u32 4294901760, %v2244_v3  ;;  %v18052_v40 = vsub.f32 %v2247_v33, %v18021_v21  ;;  %v3246_v45 = vsub.f32 %v18002_v56, %v18029_v48  ;;  %v2235_v33 = vld [vmem:[#allocation9 + $0xa0] sm:$0xff] }
 0x1b2   :  { %14312 = vmatprep.subr.mxu0 %v21931_v9  ;;  %3091 = vmatpush1.msra.mxu1 %v22238_v1  ;;  %22294 = vst [vmem:[#allocation206_spill] sm:$0xff] %v18044_v38  ;;  %v14034_v1 = vpop.f32.mrf.mxu0  ;;  %v18071_v37 = vand.u32 4294901760, %v18044_v38  ;;  %v18092_v36 = vand.u32 4294901760, %v2235_v33 }
 0x1b3   :  { %14313 = vmatpush3.msra.mxu0 %v17973_v27  ;;  %3093 = vmatprep.subr.mxu1 %v22240_v55  ;;  %22293 = vst [vmem:[#allocation205_spill] sm:$0xff] %v18041_v50  ;;  %22296 = vst [vmem:[#allocation208_spill] sm:$0xff] %v18052_v40  ;;  %v18058_v55 = vand.u32 4294901760, %v2241_v57  ;;  %v18062_v1 = vand.u32 4294901760, %v3239_v8  ;;  %v18083_v2 = vand.u32 4294901760, %v18052_v40  ;;  %v18090_v39 = vand.u32 4294901760, %v3246_v45 }
 0x1b4   :  { %14314 = vmatprep.subr.mxu0 %v21931_v9  ;;  %3095 = vmatpush1.msra.mxu1 %v17607_v43  ;;  %v3253_v43 = vsub.f32 %v18013_v46, %v18036_v20  ;;  %22300 = vst [vmem:[#allocation212_spill] sm:$0xff] %v18071_v37  ;;  %v1412_v8 = vpop.f32.mrf.mxu0  ;;  %22304 = vst [vmem:[#allocation216_spill] sm:$0xff] %v18092_v36  ;;  %v3267_v18 = vsub.f32 %v18044_v38, %v18071_v37  ;;  %v18105_v45 = vand.u32 4294901760, %v2232_v54  ;;  %v1605_v10 = vpop.f32.mrf.mxu1 }
 0x1b5   :  { %14315 = vmatpush3.msra.mxu0 %v17981_v6  ;;  %3097 = vmatprep.subr.mxu1 %v17615_v24  ;;  %22297 = vst [vmem:[#allocation209_spill] sm:$0xff] %v18058_v55  ;;  %22298 = vst [vmem:[#allocation210_spill] sm:$0xff] %v18062_v1  ;;  %v18068_v24 = vand.u32 4294901760, %v2238_v58  ;;  %v18086_v13 = vadd.f32 %v1412_v8, %v17969_v49  ;;  %v2229_v8 = vld [vmem:[#allocation9 + $0x70] sm:$0xff]  ;;  %v18127_v23 = vsub.f32 %v2235_v33, %v18092_v36 }
 0x1b6   :  { %14316 = vmatprep.subr.mxu0 %v21931_v9  ;;  %3099 = vmatpush1.msra.mxu1 %v17627_v14  ;;  %v18074_v14 = vsub.f32 %v2244_v3, %v18041_v50  ;;  %22302 = vst [vmem:[#allocation214_spill] sm:$0xff] %v18083_v2  ;;  %22303 = vst [vmem:[#allocation215_spill] sm:$0xff] %v18090_v39  ;;  %v18095_v3 = vsub.f32 %v2241_v57, %v18058_v55  ;;  %v18099_v51 = vand.u32 4294901760, %v3253_v43  ;;  %v14087_v11 = vpop.f32.mrf.mxu1 }
 0x1b7   :  { %14317 = vmatpush3.msra.mxu0 %v17986_v19  ;;  %3101 = vmatprep.subr.mxu1 %v17642_v25  ;;  %22299 = vst [vmem:[#allocation211_spill] sm:$0xff] %v18068_v24  ;;  %v3260_v25 = vsub.f32 %v18024_v32, %v18049_v31  ;;  %22307 = vst [vmem:[#allocation219_spill] sm:$0xff] %v18105_v45  ;;  %v18121_v7 = vand.u32 4294901760, %v2229_v8  ;;  %v18129_v15 = vadd.f32 %v1605_v10, %v1403_v41  ;;  %v2223_v41 = vld [vmem:[#allocation9 + $0x40] sm:$0xff] }
 0x1b8   :  { %14318 = vmatprep.subr.mxu0 %v21931_v9  ;;  %22301 = vst [vmem:[#allocation213_spill] sm:$0xff] %v18074_v14  ;;  %3103 = vmatpush1.msra.mxu1 %v17661_v35  ;;  %22305 = vst [vmem:[#allocation217_spill] sm:$0xff] %v18095_v3  ;;  %v14037_v35 = vpop.f32.mrf.mxu0  ;;  %v18108_v57 = vand.u32 4294901760, %v18074_v14  ;;  %v18124_v0 = vand.u32 4294901760, %v18095_v3  ;;  %v18144_v34 = vsub.f32 %v2232_v54, %v18105_v45  ;;  %v2220_v54 = vld [vmem:[#allocation9 + $0x28] sm:$0xff]  ;;  %v18164_v12 = vand.u32 4294901760, %v2223_v41 }
 0x1b9   :  { %3136 = vmatprep.mubr.f32.mxu1 %v21931_v9  ;;  %14319 = vmatpush3.msra.mxu0 %v17997_v16  ;;  %22306 = vst [vmem:[#allocation218_spill] sm:$0xff] %v18099_v51  ;;  %v18111_v35 = vsub.f32 %v2238_v58, %v18068_v24  ;;  %v18115_v43 = vand.u32 4294901760, %v3260_v25  ;;  %22311 = vst [vmem:[#allocation223_spill] sm:$0xff] %v18121_v7  ;;  %v2226_v58 = vld [vmem:[#allocation9 + $0x58] sm:$0xff]  ;;  %v18180_v28 = vand.u32 4294901760, %v2220_v54 }
 0x1ba   :  { %3138 = vmatmul.mubr.f32.vlgmr.msra.gmra.mxu1 %v17575_v61  ;;  %14320 = vmatprep.subr.mxu0 %v21931_v9  ;;  %22308 = vst [vmem:[#allocation220_spill] sm:$0xff] %v18108_v57  ;;  %22312 = vst [vmem:[#allocation224_spill] sm:$0xff] %v18124_v0  ;;  %v1422_v25 = vpop.f32.mrf.mxu0  ;;  %v3281_v33 = vsub.f32 %v18074_v14, %v18108_v57  ;;  %v18148_v11 = vand.u32 4294901760, %v2226_v58  ;;  %v1611_v62 = vpop.f32.mrf.mxu1  ;;  %v18173_v5 = vand.u32 4294901760, %v18144_v34 }
 0x1bb   :  { %14347 = vmatprep.subr.mxu1 %v21931_v9  ;;  %14321 = vmatpush3.msra.mxu0 %v18017_v60  ;;  %22309 = vst [vmem:[#allocation221_spill] sm:$0xff] %v18111_v35  ;;  %22310 = vst [vmem:[#allocation222_spill] sm:$0xff] %v18115_v43  ;;  %v1423_v47 = vadd.f32 %v1422_v25, %v17969_v49  ;;  %v18141_v10 = vand.u32 4294901760, %v18111_v35  ;;  %v3288_v25 = vsub.f32 %v18095_v3, %v18124_v0 }
 0x1bc   :  { %14348 = vmatpush3.msra.mxu1 %v18062_v1  ;;  %14322 = vmatprep.subr.mxu0 %v21931_v9  ;;  %v3274_v1 = vsub.f32 %v18052_v40, %v18083_v2  ;;  %22313 = vst [vmem:[#allocation225_spill] sm:$0xff] %v18127_v23  ;;  %22316 = vst [vmem:[#allocation228_spill] sm:$0xff] %v18144_v34  ;;  %v14040_v53 = vpop.f32.mrf.mxu0  ;;  %v18176_v17 = vadd.f32 %v1611_v62, %v18086_v13  ;;  %v14090_v4 = vpop.f32.mrf.mxu1 }
 0x1bd   :  { %14349 = vmatprep.subr.mxu1 %v21931_v9  ;;  %14323 = vmatpush3.msra.mxu0 %v18021_v21  ;;  %22315 = vst [vmem:[#allocation227_spill] sm:$0xff] %v18141_v10  ;;  %22317 = vst [vmem:[#allocation229_spill] sm:$0xff] %v18148_v11  ;;  %v18160_v53 = vsub.f32 %v2229_v8, %v18121_v7  ;;  %v2217_v8 = vld [vmem:[#allocation9 + $0x10] sm:$0xff]  ;;  %v18188_v42 = vand.u32 4294901760, %v3288_v25  ;;  %v18200_v4 = vsub.f32 %v2223_v41, %v18164_v12 }
 0x1be   :  { %14350 = vmatpush3.msra.mxu1 %v18090_v39  ;;  %14324 = vmatprep.subr.mxu0 %v21931_v9  ;;  %v18136_v39 = vand.u32 4294901760, %v3267_v18  ;;  %v18152_v18 = vand.u32 4294901760, %v3274_v1  ;;  %22321 = vst [vmem:[#allocation233_spill] sm:$0xff] %v18164_v12  ;;  %v18168_v1 = vand.u32 4294901760, %v3281_v33  ;;  %22323 = vst [vmem:[#allocation235_spill] sm:$0xff] %v18173_v5  ;;  %v1432_v30 = vpop.f32.mrf.mxu0  ;;  %v18183_v33 = vsub.f32 %v2226_v58, %v18148_v11 }
 0x1bf   :  { %14351 = vmatprep.subr.mxu1 %v21931_v9  ;;  %14325 = vmatpush3.msra.mxu0 %v18041_v50  ;;  %22320 = vst [vmem:[#allocation232_spill] sm:$0xff] %v18160_v53  ;;  %22324 = vst [vmem:[#allocation236_spill] sm:$0xff] %v18180_v28  ;;  %v18193_v13 = vand.u32 4294901760, %v18160_v53  ;;  %v18197_v58 = vand.u32 4294901760, %v2217_v8  ;;  %v3309_v25 = vsub.f32 %v18144_v34, %v18173_v5 }
 0x1c0   :  { %14352 = vmatpush3.msra.mxu1 %v18099_v51  ;;  %22314 = vst [vmem:[#allocation226_spill] sm:$0xff] %v18136_v39  ;;  %14326 = vmatprep.subr.mxu0 %v21931_v9  ;;  %22318 = vst [vmem:[#allocation230_spill] sm:$0xff] %v18152_v18  ;;  %v18157_v51 = vand.u32 4294901760, %v18127_v23  ;;  %v1617_v41 = vpop.f32.mrf.mxu1 }
 0x1c1   :  { %14353 = vmatprep.subr.mxu1 %v21931_v9  ;;  %14327 = vmatpush3.msra.mxu0 %v18058_v55  ;;  %22322 = vst [vmem:[#allocation234_spill] sm:$0xff] %v18168_v1  ;;  %22325 = vst [vmem:[#allocation237_spill] sm:$0xff] %v18183_v33  ;;  %v18222_v5 = vadd.f32 %v1617_v41, %v1423_v47  ;;  %v18230_v0 = vsub.f32 %v2217_v8, %v18197_v58  ;;  %v18235_v47 = vand.u32 4294901760, %v3309_v25 }
 0x1c2   :  { %14354 = vmatpush3.msra.mxu1 %v18115_v43  ;;  %22319 = vst [vmem:[#allocation231_spill] sm:$0xff] %v18157_v51  ;;  %14328 = vmatprep.subr.mxu0 %v21931_v9  ;;  %v3295_v43 = vsub.f32 %v18111_v35, %v18141_v10  ;;  %22326 = vst [vmem:[#allocation238_spill] sm:$0xff] %v18188_v42  ;;  %v3302_v62 = vsub.f32 %v18127_v23, %v18157_v51  ;;  %v14043_v10 = vpop.f32.mrf.mxu0 }
 0x1c3   :  { %14355 = vmatprep.subr.mxu1 %v21931_v9  ;;  %14329 = vmatpush3.msra.mxu0 %v18068_v24  ;;  %22327 = vst [vmem:[#allocation239_spill] sm:$0xff] %v18193_v13  ;;  %22328 = vst [vmem:[#allocation240_spill] sm:$0xff] %v18197_v58  ;;  %v18211_v10 = vand.u32 4294901760, %v18183_v33 }
 0x1c4   :  { %14356 = vmatpush3.msra.mxu1 %v18136_v39  ;;  %14330 = vmatprep.subr.mxu0 %v21931_v9  ;;  %v1433_v39 = vadd.f32 %v1432_v30, %v17969_v49  ;;  %22329 = vst [vmem:[#allocation241_spill] sm:$0xff] %v18200_v4  ;;  %v18204_v30 = vand.u32 4294901760, %v3295_v43  ;;  %v18218_v43 = vand.u32 4294901760, %v3302_v62  ;;  %v1442_v51 = vpop.f32.mrf.mxu0  ;;  %22335 = vst [vmem:[#allocation247_spill] sm:$0xff] %v18230_v0  ;;  %v14093_v62 = vpop.f32.mrf.mxu1 }
 0x1c5   :  { %14357 = vmatprep.subr.mxu1 %v21931_v9  ;;  %14331 = vmatpush3.msra.mxu0 %v18092_v36  ;;  %22331 = vst [vmem:[#allocation243_spill] sm:$0xff] %v18211_v10  ;;  %22336 = vst [vmem:[#allocation248_spill] sm:$0xff] %v18235_v47  ;;  %v18253_v62 = vand.u32 4294901760, %v18230_v0 }
 0x1c6   :  { %14358 = vmatpush3.msra.mxu1 %v18152_v18  ;;  %14332 = vmatprep.subr.mxu0 %v21931_v9  ;;  %22330 = vst [vmem:[#allocation242_spill] sm:$0xff] %v18204_v30  ;;  %v18214_v18 = vsub.f32 %v2220_v54, %v18180_v28  ;;  %22333 = vst [vmem:[#allocation245_spill] sm:$0xff] %v18218_v43  ;;  %v18227_v54 = vand.u32 4294901760, %v18200_v4  ;;  %v14046_v41 = vpop.f32.mrf.mxu0 }
 0x1c7   :  { %14359 = vmatprep.subr.mxu1 %v21931_v9  ;;  %14333 = vmatpush3.msra.mxu0 %v18105_v45  ;;  %22339 = vst [vmem:[#allocation251_spill] sm:$0xff] %v18253_v62 }
 0x1c8   :  { %14360 = vmatpush3.msra.mxu1 %v18168_v1  ;;  %14334 = vmatprep.subr.mxu0 %v21931_v9  ;;  %22332 = vst [vmem:[#allocation244_spill] sm:$0xff] %v18214_v18  ;;  %v3316_v1 = vsub.f32 %v18160_v53, %v18193_v13  ;;  %22334 = vst [vmem:[#allocation246_spill] sm:$0xff] %v18227_v54  ;;  %v3323_v13 = vsub.f32 %v18183_v33, %v18211_v10  ;;  %v18242_v8 = vand.u32 4294901760, %v18214_v18 }
 0x1c9   :  { %14361 = vmatprep.subr.mxu1 %v21931_v9  ;;  %14335 = vmatpush3.msra.mxu0 %v18121_v7  ;;  %v3330_v25 = vsub.f32 %v18200_v4, %v18227_v54 }
 0x1ca   :  { %14362 = vmatpush3.msra.mxu1 %v18188_v42  ;;  %14336 = vmatprep.subr.mxu0 %v21931_v9  ;;  %v1443_v42 = vadd.f32 %v1442_v51, %v17969_v49  ;;  %22337 = vst [vmem:[#allocation249_spill] sm:$0xff] %v18242_v8  ;;  %v18246_v51 = vand.u32 4294901760, %v3316_v1  ;;  %v1623_v49 = vpop.f32.mrf.mxu1  ;;  %v3337_v54 = vsub.f32 %v18214_v18, %v18242_v8 }
 0x1cb   :  { %14363 = vmatprep.subr.mxu1 %v21931_v9  ;;  %14337 = vmatpush3.msra.mxu0 %v18148_v11  ;;  %v18255_v41 = vadd.f32 %v1623_v49, %v1433_v39  ;;  %v18271_v49 = vand.u32 4294901760, %v3330_v25 }
 0x1cc   :  { %14364 = vmatpush3.msra.mxu1 %v18204_v30  ;;  %14338 = vmatprep.subr.mxu0 %v21931_v9  ;;  %22338 = vst [vmem:[#allocation250_spill] sm:$0xff] %v18246_v51  ;;  %v14096_v1 = vpop.f32.mrf.mxu1  ;;  %v18261_v30 = vand.u32 4294901760, %v3323_v13  ;;  %v3344_v13 = vsub.f32 %v18230_v0, %v18253_v62 }
 0x1cd   :  { %14365 = vmatprep.subr.mxu1 %v21931_v9  ;;  %14339 = vmatpush3.msra.mxu0 %v18164_v12  ;;  %22341 = vst [vmem:[#allocation253_spill] sm:$0xff] %v18271_v49 }
 0x1ce   :  { %14366 = vmatpush3.msra.mxu1 %v18218_v43  ;;  %14340 = vmatprep.subr.mxu0 %v21931_v9  ;;  %v1733_v43 = vpop.f32.mrf.mxu0  ;;  %22340 = vst [vmem:[#allocation252_spill] sm:$0xff] %v18261_v30 }
 0x1cf   :  { %14367 = vmatprep.subr.mxu1 %v21931_v9  ;;  %14341 = vmatpush3.msra.mxu0 %v18180_v28  ;;  %v1734_v10 = vadd.f32 %v1733_v43, %v18005_v26  ;;  %v1629_v26 = vpop.f32.mrf.mxu1  ;;  %v18279_v43 = vand.u32 4294901760, %v3337_v54 }
 0x1d0   :  { %14368 = vmatpush3.msra.mxu1 %v18235_v47  ;;  %14342 = vmatprep.subr.mxu0 %v21931_v9  ;;  %v14134_v39 = vpop.f32.mrf.mxu0  ;;  %v18281_v1 = vadd.f32 %v1629_v26, %v1443_v42 }
 0x1d1   :  { %14369 = vmatprep.subr.mxu1 %v21931_v9  ;;  %14343 = vmatpush3.msra.mxu0 %v18197_v58  ;;  %22342 = vst [vmem:[#allocation254_spill] sm:$0xff] %v18279_v43  ;;  %v14099_v25 = vpop.f32.mrf.mxu1  ;;  %v18287_v39 = vand.u32 4294901760, %v3344_v13 }
 0x1d2   :  { %14370 = vmatpush3.msra.mxu1 %v18246_v51  ;;  %14344 = vmatprep.mubr.msk.f32.mxu0 %vm15962_vm0, %v21931_v9 }
 0x1d3   :  { %14371 = vmatprep.subr.mxu1 %v21931_v9  ;;  %14382 = vmatprep.subr.mxu0 %v21931_v9  ;;  %22343 = vst [vmem:[#allocation255_spill] sm:$0xff] %v18287_v39 }
 0x1d4   :  { %14345 = vmatmul.mubr.f32.vlgmr.msra.gmra.mxu0 %v17755_v29  ;;  %14372 = vmatpush3.msra.mxu1 %v18261_v30  ;;  %v1740_v29 = vpop.f32.mrf.mxu0 }
 0x1d5   :  { %14383 = vmatpush3.msra.mxu0 %v17989_v63  ;;  %14373 = vmatprep.subr.mxu1 %v21931_v9  ;;  %v1741_v54 = vadd.f32 %v1740_v29, %v18076_v59  ;;  %v1864_v59 = vpop.f32.mrf.mxu1 }
 0x1d6   :  { %14384 = vmatprep.subr.mxu0 %v21931_v9  ;;  %14374 = vmatpush3.msra.mxu1 %v18271_v49  ;;  %v14137_v42 = vpop.f32.mrf.mxu0  ;;  %v18304_v25 = vadd.f32 %v1864_v59, %v1734_v10 }
 0x1d7   :  { %14385 = vmatpush3.msra.mxu0 %v18002_v56  ;;  %14375 = vmatprep.subr.mxu1 %v21931_v9  ;;  %v14187_v42 = vpop.f32.mrf.mxu1  ;;  %v22419_v56 = vld [vmem:[#allocation132_spill] sm:$0xff] }
 0x1d8   :  { %14386 = vmatprep.subr.mxu0 %v21931_v9  ;;  %14376 = vmatpush3.msra.mxu1 %v18279_v43  ;;  %v1747_v13 = vpop.f32.mrf.mxu0 }
 0x1d9   :  { %14387 = vmatpush3.msra.mxu0 %v18013_v46  ;;  %14377 = vmatprep.subr.mxu1 %v21931_v9  ;;  %v1748_v26 = vadd.f32 %v1747_v13, %v18129_v15  ;;  %v1872_v10 = vpop.f32.mrf.mxu1  ;;  %v22416_v46 = vld [vmem:[#allocation127_spill] sm:$0xff] }
 0x1da   :  { %14388 = vmatprep.subr.mxu0 %v21931_v9  ;;  %14378 = vmatpush3.msra.mxu1 %v18287_v39  ;;  %v14140_v29 = vpop.f32.mrf.mxu0  ;;  %v18319_v59 = vadd.f32 %v1872_v10, %v1741_v54 }
 0x1db   :  { %14379 = vmatprep.mubr.msk.f32.mxu1 %vm15962_vm0, %v21931_v9  ;;  %14389 = vmatpush3.msra.mxu0 %v18024_v32  ;;  %v14190_v42 = vpop.f32.mrf.mxu1  ;;  %v22414_v32 = vld [vmem:[#allocation123_spill] sm:$0xff] }
 0x1dc   :  { %14380 = vmatmul.mubr.f32.vlgmr.msra.gmra.mxu1 %v17575_v61  ;;  %14390 = vmatprep.subr.mxu0 %v21931_v9  ;;  %v1754_v15 = vpop.f32.mrf.mxu0 }
 0x1dd   :  { %14417 = vmatprep.subr.mxu1 %v21931_v9  ;;  %14391 = vmatpush3.msra.mxu0 %v18044_v38  ;;  %v1755_v13 = vadd.f32 %v1754_v15, %v18176_v17  ;;  %v22413_v38 = vld [vmem:[#allocation166_spill] sm:$0xff] }
 0x1de   :  { %14418 = vmatpush3.msra.mxu1 %v17973_v27  ;;  %14392 = vmatprep.subr.mxu0 %v21931_v9  ;;  %v14143_v29 = vpop.f32.mrf.mxu0 }
 0x1df   :  { %14419 = vmatprep.subr.mxu1 %v21931_v9  ;;  %14393 = vmatpush3.msra.mxu0 %v18052_v40  ;;  %v1880_v54 = vpop.f32.mrf.mxu1  ;;  %v22410_v40 = vld [vmem:[#allocation164_spill] sm:$0xff] }
 0x1e0   :  { %14420 = vmatpush3.msra.mxu1 %v17981_v6  ;;  %14394 = vmatprep.subr.mxu0 %v21931_v9  ;;  %v1761_v17 = vpop.f32.mrf.mxu0  ;;  %v18334_v10 = vadd.f32 %v1880_v54, %v1748_v26 }
 0x1e1   :  { %14421 = vmatprep.subr.mxu1 %v21931_v9  ;;  %14395 = vmatpush3.msra.mxu0 %v18074_v14  ;;  %v1762_v15 = vadd.f32 %v1761_v17, %v18222_v5  ;;  %v14193_v42 = vpop.f32.mrf.mxu1  ;;  %v22408_v14 = vld [vmem:[#allocation163_spill] sm:$0xff] }
 0x1e2   :  { %14422 = vmatpush3.msra.mxu1 %v17986_v19  ;;  %14396 = vmatprep.subr.mxu0 %v21931_v9  ;;  %v14146_v29 = vpop.f32.mrf.mxu0 }
 0x1e3   :  { %14423 = vmatprep.subr.mxu1 %v21931_v9  ;;  %14397 = vmatpush3.msra.mxu0 %v18095_v3  ;;  %v22406_v3 = vld [vmem:[#allocation161_spill] sm:$0xff] }
 0x1e4   :  { %14424 = vmatpush3.msra.mxu1 %v17997_v16  ;;  %14398 = vmatprep.subr.mxu0 %v21931_v9 }
 0x1e5   :  { %14425 = vmatprep.subr.mxu1 %v21931_v9  ;;  %14399 = vmatpush3.msra.mxu0 %v18111_v35  ;;  %v1768_v5 = vpop.f32.mrf.mxu0  ;;  %v1888_v26 = vpop.f32.mrf.mxu1  ;;  %v22404_v35 = vld [vmem:[#allocation160_spill] sm:$0xff] }
 0x1e6   :  { %14426 = vmatpush3.msra.mxu1 %v18017_v60  ;;  %14400 = vmatprep.subr.mxu0 %v21931_v9  ;;  %v1769_v17 = vadd.f32 %v1768_v5, %v18255_v41  ;;  %v18349_v54 = vadd.f32 %v1888_v26, %v1755_v13 }
 0x1e7   :  { %14427 = vmatprep.subr.mxu1 %v21931_v9  ;;  %14401 = vmatpush3.msra.mxu0 %v18127_v23  ;;  %v14149_v29 = vpop.f32.mrf.mxu0  ;;  %v14196_v42 = vpop.f32.mrf.mxu1  ;;  %v22402_v23 = vld [vmem:[#allocation158_spill] sm:$0xff] }
 0x1e8   :  { %14428 = vmatpush3.msra.mxu1 %v18021_v21  ;;  %14402 = vmatprep.subr.mxu0 %v21931_v9 }
 0x1e9   :  { %14429 = vmatprep.subr.mxu1 %v21931_v9  ;;  %14403 = vmatpush3.msra.mxu0 %v18144_v34  ;;  %v22398_v34 = vld [vmem:[#allocation151_spill] sm:$0xff] }
 0x1ea   :  { %14430 = vmatpush3.msra.mxu1 %v18041_v50  ;;  %14404 = vmatprep.subr.mxu0 %v21931_v9 }
 0x1eb   :  { %14431 = vmatprep.subr.mxu1 %v21931_v9  ;;  %14405 = vmatpush3.msra.mxu0 %v18160_v53  ;;  %v1775_v41 = vpop.f32.mrf.mxu0  ;;  %v1896_v13 = vpop.f32.mrf.mxu1  ;;  %v22396_v53 = vld [vmem:[#allocation144_spill] sm:$0xff] }
 0x1ec   :  { %14432 = vmatpush3.msra.mxu1 %v18058_v55  ;;  %14406 = vmatprep.subr.mxu0 %v21931_v9  ;;  %v1776_v5 = vadd.f32 %v1775_v41, %v18281_v1  ;;  %v18365_v26 = vadd.f32 %v1896_v13, %v1762_v15 }
 0x1ed   :  { %14433 = vmatprep.subr.mxu1 %v21931_v9  ;;  %14407 = vmatpush3.msra.mxu0 %v18183_v33  ;;  %v14199_v29 = vpop.f32.mrf.mxu1  ;;  %v14152_v42 = vpop.f32.mrf.mxu0  ;;  %v22388_v33 = vld [vmem:[#allocation68_spill] sm:$0xff] }
 0x1ee   :  { %14434 = vmatpush3.msra.mxu1 %v18068_v24  ;;  %14408 = vmatprep.subr.mxu0 %v21931_v9 }
 0x1ef   :  { %14435 = vmatprep.subr.mxu1 %v21931_v9  ;;  %14409 = vmatpush3.msra.mxu0 %v18200_v4  ;;  %v22386_v4 = vld [vmem:[#allocation67_spill] sm:$0xff] }
 0x1f0   :  { %14436 = vmatpush3.msra.mxu1 %v18092_v36  ;;  %14410 = vmatprep.subr.mxu0 %v21931_v9 }
 0x1f1   :  { %14437 = vmatprep.subr.mxu1 %v21931_v9  ;;  %14411 = vmatpush3.msra.mxu0 %v18214_v18  ;;  %v22383_v18 = vld [vmem:[#allocation119_spill] sm:$0xff] }
 0x1f2   :  { %14438 = vmatpush3.msra.mxu1 %v18105_v45  ;;  %14412 = vmatprep.subr.mxu0 %v21931_v9 }
 0x1f3   :  { %14439 = vmatprep.subr.mxu1 %v21931_v9  ;;  %14413 = vmatpush3.msra.mxu0 %v18230_v0 }
 0x1f4   :  { %14414 = vmatprep.mubr.msk.f32.mxu0 %vm15962_vm0, %v21931_v9  ;;  %14440 = vmatpush3.msra.mxu1 %v18121_v7 }
 0x1f5   :  { %14415 = vmatmul.mubr.f32.vlgmr.msra.gmra.mxu0 %v17623_v44  ;;  %14441 = vmatprep.subr.mxu1 %v21931_v9  ;;  %v1904_v44 = vpop.f32.mrf.mxu1 }
 0x1f6   :  { %14452 = vmatprep.subr.mxu0 %v21931_v9  ;;  %14442 = vmatpush3.msra.mxu1 %v18148_v11  ;;  %v18379_v1 = vadd.f32 %v1904_v44, %v1769_v17  ;;  %v2031_v41 = vpop.f32.mrf.mxu0 }
 0x1f7   :  { %14453 = vmatpush3.msra.mxu0 %v18010_v52  ;;  %14443 = vmatprep.subr.mxu1 %v21931_v9  ;;  %v14202_v15 = vpop.f32.mrf.mxu1  ;;  %v2032_v29 = vadd.f32 %v2031_v41, %v18304_v25  ;;  %v22346_v41 = vld [vmem:[#allocation231_spill] sm:$0xff]  ;;  %v22376_v52 = vld [vmem:[#allocation52_spill] sm:$0xff] }
 0x1f8   :  { %14454 = vmatprep.subr.mxu0 %v21931_v9  ;;  %14444 = vmatpush3.msra.mxu1 %v18164_v12  ;;  %v14240_v42 = vpop.f32.mrf.mxu0 }
 0x1f9   :  { %14455 = vmatpush3.msra.mxu0 %v18029_v48  ;;  %14445 = vmatprep.subr.mxu1 %v21931_v9  ;;  %v1912_v17 = vpop.f32.mrf.mxu1  ;;  %v22375_v48 = vld [vmem:[#allocation102_spill] sm:$0xff] }
 0x1fa   :  { %14456 = vmatprep.subr.mxu0 %v21931_v9  ;;  %14446 = vmatpush3.msra.mxu1 %v18180_v28  ;;  %v18392_v13 = vadd.f32 %v1912_v17, %v1776_v5  ;;  %v22344_v5 = vld [vmem:[#allocation224_spill] sm:$0xff]  ;;  %v22345_v17 = vld [vmem:[#allocation227_spill] sm:$0xff] }
 0x1fb   :  { %14457 = vmatpush3.msra.mxu0 %v18036_v20  ;;  %14447 = vmatprep.subr.mxu1 %v21931_v9  ;;  %v22374_v20 = vld [vmem:[#allocation97_spill] sm:$0xff] }
 0x1fc   :  { %14458 = vmatprep.subr.mxu0 %v21931_v9  ;;  %14448 = vmatpush3.msra.mxu1 %v18197_v58  ;;  %v2037_v25 = vpop.f32.mrf.mxu0 }
 0x1fd   :  { %14449 = vmatprep.mubr.msk.f32.mxu1 %vm15962_vm0, %v21931_v9  ;;  %14459 = vmatpush3.msra.mxu0 %v18049_v31  ;;  %v2038_v44 = vadd.f32 %v2037_v25, %v18319_v59  ;;  %v22373_v31 = vld [vmem:[#allocation41_spill] sm:$0xff] }
 0x1fe   :  { %14450 = vmatmul.mubr.f32.vlgmr.msra.gmra.mxu1 %v17673_v22  ;;  %14460 = vmatprep.subr.mxu0 %v21931_v9  ;;  %v14205_v22 = vpop.f32.mrf.mxu1  ;;  %v14243_v15 = vpop.f32.mrf.mxu0 }
 0x1ff   :  { %14487 = vmatprep.subr.mxu1 %v21931_v9  ;;  %14461 = vmatpush3.msra.mxu0 %v18071_v37  ;;  %v22347_v15 = vld [vmem:[#allocation235_spill] sm:$0xff]  ;;  %v22363_v37 = vld [vmem:[#allocation50_spill] sm:$0xff] }
 0x200   :  { %14488 = vmatpush3.msra.mxu1 %v17973_v27  ;;  %14462 = vmatprep.subr.mxu0 %v21931_v9 }
 0x201   :  { %14489 = vmatprep.subr.mxu1 %v21931_v9  ;;  %14463 = vmatpush3.msra.mxu0 %v18083_v2  ;;  %v2043_v42 = vpop.f32.mrf.mxu0  ;;  %v2154_v22 = vpop.f32.mrf.mxu1  ;;  %v22362_v2 = vld [vmem:[#allocation63_spill] sm:$0xff] }
 0x202   :  { %14490 = vmatpush3.msra.mxu1 %v17981_v6  ;;  %14464 = vmatprep.subr.mxu0 %v21931_v9  ;;  %v2044_v59 = vadd.f32 %v2043_v42, %v18334_v10  ;;  %v18419_v25 = vadd.f32 %v2154_v22, %v2032_v29  ;;  %v22349_v10 = vld [vmem:[#allocation243_spill] sm:$0xff]  ;;  %v18439_v22 = vld [vmem:[%s21212_s1] sm:$0xff] }
 0x203   :  { %14491 = vmatprep.subr.mxu1 %v21931_v9  ;;  %14465 = vmatpush3.msra.mxu0 %v18108_v57  ;;  %vm13116_vm1 = vcmp.gt.s32.totalorder %v18439_v22, 0  ;;  %vm13120_vm2 = vcmp.gt.s32.totalorder %v18439_v22, 1  ;;  %vm13124_vm3 = vcmp.gt.s32.totalorder %v18439_v22, 2  ;;  %v22355_v57 = vld [vmem:[#allocation31_spill] sm:$0xff]  ;;  %vm13128_vm4 = vcmp.gt.s32.totalorder %v18439_v22, 3 }
 0x204   :  { %14492 = vmatpush3.msra.mxu1 %v17986_v19  ;;  %14466 = vmatprep.subr.mxu0 %v21931_v9  ;;  %vm13132_vm5 = vcmp.gt.s32.totalorder %v18439_v22, 4  ;;  %vm13136_vm6 = vcmp.gt.s32.totalorder %v18439_v22, 5  ;;  %vm13140_vm7 = vcmp.gt.s32.totalorder %v18439_v22, 6  ;;  %v22384_v22 = vld [vmem:[#allocation57_spill] sm:$0xff] }
 0x205   :  { %14493 = vmatprep.subr.mxu1 %v21931_v9  ;;  %14467 = vmatpush3.msra.mxu0 %v22344_v5  ;;  %v14293_v5 = vpop.f32.mrf.mxu1  ;;  %v13141_v0 = vsel %vm13140_vm7, 1.0, %v21931_v9 }
 0x206   :  { %14494 = vmatpush3.msra.mxu1 %v17997_v16  ;;  %14468 = vmatprep.subr.mxu0 %v21931_v9 }
 0x207   :  { %14495 = vmatprep.subr.mxu1 %v21931_v9  ;;  %14469 = vmatpush3.msra.mxu0 %v22345_v17  ;;  %v14246_v17 = vpop.f32.mrf.mxu0  ;;  %v2160_v42 = vpop.f32.mrf.mxu1 }
 0x208   :  { %14496 = vmatpush3.msra.mxu1 %v18017_v60  ;;  %14470 = vmatprep.subr.mxu0 %v21931_v9  ;;  %v18434_v17 = vadd.f32 %v2160_v42, %v2038_v44 }
 0x209   :  { %14497 = vmatprep.subr.mxu1 %v21931_v9  ;;  %14471 = vmatpush3.msra.mxu0 %v22346_v41  ;;  %v22348_v41 = vld [vmem:[#allocation239_spill] sm:$0xff]  ;;  %v2049_v29 = vpop.f32.mrf.mxu0 }
 0x20a   :  { %14498 = vmatpush3.msra.mxu1 %v18021_v21  ;;  %14472 = vmatprep.subr.mxu0 %v21931_v9  ;;  %v2050_v5 = vadd.f32 %v2049_v29, %v18349_v54  ;;  %22350 = vst [vmem:[#allocation256_spill] sm:$0xff] %v18434_v17  ;;  %v13117_v29 = vsel %vm13116_vm1, 1.0, %v21931_v9 }
 0x20b   :  { %14499 = vmatprep.subr.mxu1 %v21931_v9  ;;  %14473 = vmatpush3.msra.mxu0 %v22347_v15  ;;  %v14296_v15 = vpop.f32.mrf.mxu1 }
 0x20c   :  { %14500 = vmatpush3.msra.mxu1 %v18041_v50  ;;  %14474 = vmatprep.subr.mxu0 %v21931_v9 }
 0x20d   :  { %14501 = vmatprep.subr.mxu1 %v21931_v9  ;;  %14475 = vmatpush3.msra.mxu0 %v22348_v41  ;;  %v22351_v41 = vld [vmem:[#allocation246_spill] sm:$0xff]  ;;  %v2166_v44 = vpop.f32.mrf.mxu1 }
 0x20e   :  { %14502 = vmatpush3.msra.mxu1 %v18058_v55  ;;  %14476 = vmatprep.subr.mxu0 %v21931_v9 }
 0x20f   :  { %14503 = vmatprep.subr.mxu1 %v21931_v9  ;;  %14477 = vmatpush3.msra.mxu0 %v22349_v10  ;;  %v14249_v10 = vpop.f32.mrf.mxu0  ;;  %v14299_v17 = vpop.f32.mrf.mxu1 }
 0x210   :  { %14504 = vmatpush3.msra.mxu1 %v18068_v24  ;;  %14478 = vmatprep.subr.mxu0 %v21931_v9  ;;  %v18457_v10 = vadd.f32 %v2166_v44, %v2044_v59 }
 0x211   :  { %14505 = vmatprep.subr.mxu1 %v21931_v9  ;;  %14479 = vmatpush3.msra.mxu0 %v22351_v41  ;;  %v2055_v54 = vpop.f32.mrf.mxu0  ;;  %v18477_v41 = vsel %vm13124_vm3, 1.0, %v21931_v9 }
 0x212   :  { %14506 = vmatpush3.msra.mxu1 %v18092_v36  ;;  %14480 = vmatprep.subr.mxu0 %v21931_v9  ;;  %v2056_v15 = vadd.f32 %v2055_v54, %v18365_v26  ;;  %22352 = vst [vmem:[#allocation257_spill] sm:$0xff] %v18457_v10  ;;  %v3817_v26 = vsub.f32 1.0, %v13117_v29  ;;  %v22354_v10 = vld [vmem:[#allocation29_spill] sm:$0xff] }
 0x213   :  { %14507 = vmatprep.subr.mxu1 %v21931_v9  ;;  %14481 = vmatpush3.msra.mxu0 %v18242_v8  ;;  %v14252_v42 = vpop.f32.mrf.mxu0  ;;  %v13121_v8 = vsel %vm13120_vm2, 1.0, %v21931_v9  ;;  %v2172_v54 = vpop.f32.mrf.mxu1 }
 0x214   :  { %14508 = vmatpush3.msra.mxu1 %v18105_v45  ;;  %14482 = vmatprep.subr.mxu0 %v21931_v9  ;;  %v5361_v17 = vsub.f32 1.0, %v13121_v8  ;;  %v18471_v42 = vadd.f32 %v2172_v54, %v2050_v5 }
 0x215   :  { %14509 = vmatprep.subr.mxu1 %v21931_v9  ;;  %14483 = vmatpush3.msra.mxu0 %v18253_v62  ;;  %v15963_v62 = vmov 0   ;;  %v2061_v59 = vpop.f32.mrf.mxu0 }
 0x216   :  { %14484 = vmatprep.mubr.msk.f32.mxu0 %vm15962_vm0, %v21931_v9  ;;  %14510 = vmatpush3.msra.mxu1 %v18121_v7  ;;  %v2062_v44 = vadd.f32 %v2061_v59, %v18379_v1  ;;  %22353 = vst [vmem:[#allocation258_spill] sm:$0xff] %v18471_v42  ;;  %v22357_v1 = vld [vmem:[#allocation32_spill] sm:$0xff] }
 0x217   :  { %14485 = vmatmul.mubr.f32.vlgmr.msra.gmra.mxu0 %v17575_v61  ;;  %14511 = vmatprep.subr.mxu1 %v21931_v9 }
 0x218   :  { %14519 = vmatprep.mubr.msk.f32.mxu1 %vm15962_vm0, %v21931_v9  ;;  %14512 = vmatpush3.msra.mxu1 %v18148_v11 }
 0x219   :  { %15793 = vset.pattern.permute.xlu0 %v15963_v62  ;;  %14513 = vmatprep.subr.mxu1 %v21931_v9 }
 0x21a   :  { %3812 = vperm.xlu0 %15793, %v13117_v29   ;;  %14514 = vmatpush3.msra.mxu1 %v18164_v12  ;;  %v14255_v29 = vpop.f32.mrf.mxu0 }
 0x21b   :  { %15794 = vset.pattern.permute.xlu1 %v15963_v62  ;;  %14515 = vmatprep.subr.mxu1 %v21931_v9  ;;  %v14302_v62 = vpop.f32.mrf.mxu1 }
 0x21c   :  { %5355 = vperm.xlu1 %15794, %v13121_v8   ;;  %14516 = vmatpush3.msra.mxu1 %v18180_v28  ;;  %v22356_v8 = vld [vmem:[#allocation38_spill] sm:$0xff]  ;;  %v2067_v5 = vpop.f32.mrf.mxu0  ;;  %v18490_v62 = vsel %vm13128_vm4, 1.0, %v21931_v9 }
 0x21d   :  { %3832 = vmatprep.subr.mxu0 %v22354_v10  ;;  %14517 = vmatprep.subr.mxu1 %v21931_v9  ;;  %v2178_v59 = vpop.f32.mrf.mxu1  ;;  %v2068_v54 = vadd.f32 %v2067_v5, %v18392_v13  ;;  %v22365_v13 = vld [vmem:[#allocation36_spill] sm:$0xff]  ;;  %v18502_v5 = vsel %vm13132_vm5, 1.0, %v21931_v9 }
 0x21e   :  { %3820 = vperm.xlu0 %15793, %v3817_v26   ;;  %14518 = vmatpush3.msra.mxu1 %v18197_v58  ;;  %v22358_v26 = vld [vmem:[#allocation58_spill] sm:$0xff]  ;;  %v18487_v29 = vadd.f32 %v2178_v59, %v2056_v15  ;;  %v22366_v15 = vld [vmem:[#allocation75_spill] sm:$0xff] }
 0x21f   :  { %3834 = vmatpush1.msra.mxu0 %v22355_v57  ;;  %14520 = vmatmul.mubr.f32.vlgmr.msra.gmra.mxu1 %v17575_v61  ;;  %v22360_v61 = vld [vmem:[#allocation60_spill] sm:$0xff]  ;;  %v14305_v42 = vpop.f32.mrf.mxu1  ;;  %v22367_v59 = vld [vmem:[#allocation82_spill] sm:$0xff] }
 0x220   :  { %5364 = vperm.xlu1 %15794, %v5361_v17   ;;  %3944 = vmatprep.subr.mxu1 %v22356_v8  ;;  %22359 = vst [vmem:[#allocation31_spill] sm:$0xff] %v18487_v29  ;;  %v22361_v17 = vld [vmem:[#allocation33_spill] sm:$0xff]  ;;  %v14258_v8 = vpop.f32.mrf.mxu0  ;;  %v22369_v29 = vld [vmem:[#allocation83_spill] sm:$0xff] }
 0x221   :  { %3836 = vmatprep.subr.mxu0 %v22357_v1  ;;  %3950 = vmatpush1.msra.mxu1 %v22358_v26  ;;  %v22364_v26 = vld [vmem:[#allocation74_spill] sm:$0xff]  ;;  %v22368_v42 = vld [vmem:[#allocation53_spill] sm:$0xff]  ;;  %v2184_v8 = vpop.f32.mrf.mxu1 }
 0x222   :  { %6899 = vperm.xlu0 %15793, %v18477_v41   ;;  %3956 = vmatprep.subr.mxu1 %v22360_v61  ;;  %v22372_v61 = vld [vmem:[#allocation87_spill] sm:$0xff] }
 0x223   :  { %3838 = vmatpush1.msra.mxu0 %v22361_v17  ;;  %3962 = vmatpush1.msra.mxu1 %v22362_v2  ;;  %v22370_v2 = vld [vmem:[#allocation56_spill] sm:$0xff] }
 0x224   :  { %3840 = vmatprep.subr.mxu0 %v22363_v37  ;;  %3968 = vmatprep.subr.mxu1 %v22364_v26  ;;  %v18509_v26 = vadd.f32 %v2184_v8, %v2062_v44  ;;  %v22377_v44 = vld [vmem:[#allocation105_spill] sm:$0xff]  ;;  %v22378_v8 = vld [vmem:[#allocation55_spill] sm:$0xff] }
 0x225   :  { %3842 = vmatpush1.msra.mxu0 %v22365_v13  ;;  %3974 = vmatpush1.msra.mxu1 %v22366_v15  ;;  %v14308_v15 = vpop.f32.mrf.mxu1 }
 0x226   :  { %8443 = vperm.xlu0 %15793, %v18490_v62   ;;  %3980 = vmatprep.subr.mxu1 %v22367_v59  ;;  %22371 = vst [vmem:[#allocation32_spill] sm:$0xff] %v18509_v26  ;;  %v18516_v59 = vsel %vm13136_vm6, 1.0, %v21931_v9  ;;  %v22380_v15 = vld [vmem:[#allocation51_spill] sm:$0xff] }
 0x227   :  { %3844 = vmatprep.subr.mxu0 %v22368_v42  ;;  %3986 = vmatpush1.msra.mxu1 %v22369_v29  ;;  %v2190_v26 = vpop.f32.mrf.mxu1  ;;  %v11537_v63 = vsub.f32 1.0, %v18516_v59 }
 0x228   :  { %3846 = vmatpush1.msra.mxu0 %v22370_v2  ;;  %3992 = vmatprep.subr.mxu1 %v22372_v61  ;;  %v22379_v61 = vld [vmem:[#allocation108_spill] sm:$0xff]  ;;  %v18525_v29 = vadd.f32 %v2190_v26, %v2068_v54  ;;  %v22389_v26 = vld [vmem:[#allocation126_spill] sm:$0xff] }
 0x229   :  { %3848 = vmatprep.subr.mxu0 %v22373_v31  ;;  %3998 = vmatpush1.msra.mxu1 %v22374_v20  ;;  %v22382_v20 = vld [vmem:[#allocation114_spill] sm:$0xff] }
 0x22a   :  { %9987 = vperm.xlu0 %15793, %v18502_v5   ;;  %4004 = vmatprep.subr.mxu1 %v22375_v48  ;;  %22381 = vst [vmem:[#allocation33_spill] sm:$0xff] %v18525_v29  ;;  %v14311_v48 = vpop.f32.mrf.mxu1  ;;  %v22390_v54 = vld [vmem:[#allocation138_spill] sm:$0xff]  ;;  %v22392_v29 = vld [vmem:[#allocation141_spill] sm:$0xff] }
 0x22b   :  { %3850 = vmatpush1.msra.mxu0 %v22376_v52  ;;  %4010 = vmatpush1.msra.mxu1 %v22377_v44  ;;  %v22385_v44 = vld [vmem:[#allocation120_spill] sm:$0xff]  ;;  %v22391_v48 = vld [vmem:[#allocation70_spill] sm:$0xff] }
 0x22c   :  { %3852 = vmatprep.subr.mxu0 %v22378_v8  ;;  %4016 = vmatprep.subr.mxu1 %v22379_v61  ;;  %v22387_v61 = vld [vmem:[#allocation121_spill] sm:$0xff]  ;;  %v2392_v58 = vpop.f32.mrf.mxu0 }
 0x22d   :  { %3854 = vmatpush1.msra.mxu0 %v22380_v15  ;;  %4022 = vmatpush1.msra.mxu1 %v22382_v20  ;;  %v22394_v20 = vld [vmem:[#allocation143_spill] sm:$0xff] }
 0x22e   :  { %11531 = vperm.xlu0 %15793, %v18516_v59   ;;  %4028 = vmatprep.subr.mxu1 %v22383_v18  ;;  %v22393_v18 = vld [vmem:[#allocation71_spill] sm:$0xff]  ;;  %v2394_v28 = vpop.f32.mrf.mxu0 }
 0x22f   :  { %3856 = vmatprep.subr.mxu0 %v22384_v22  ;;  %4034 = vmatpush1.msra.mxu1 %v22385_v44  ;;  %v22395_v44 = vld [vmem:[#allocation72_spill] sm:$0xff] }
 0x230   :  { %3858 = vmatpush1.msra.mxu0 %v22386_v4  ;;  %4040 = vmatprep.subr.mxu1 %v22387_v61  ;;  %v22397_v61 = vld [vmem:[#allocation88_spill] sm:$0xff] }
 0x231   :  { %3860 = vmatprep.subr.mxu0 %v22388_v33  ;;  %4046 = vmatpush1.msra.mxu1 %v22389_v26  ;;  %v22400_v26 = vld [vmem:[#allocation156_spill] sm:$0xff] }
 0x232   :  { %13075 = vperm.xlu0 %15793, %v13141_v0   ;;  %4052 = vmatprep.subr.mxu1 %v22390_v54  ;;  %v22399_v0 = vld [vmem:[#allocation90_spill] sm:$0xff]  ;;  %v22401_v54 = vld [vmem:[#allocation91_spill] sm:$0xff] }
 0x233   :  { %3862 = vmatpush1.msra.mxu0 %v22391_v48  ;;  %4058 = vmatpush1.msra.mxu1 %v22392_v29  ;;  %v22403_v29 = vld [vmem:[#allocation92_spill] sm:$0xff] }
 0x234   :  { %3864 = vmatprep.subr.mxu0 %v22393_v18  ;;  %4064 = vmatprep.subr.mxu1 %v22394_v20  ;;  %v22405_v20 = vld [vmem:[#allocation106_spill] sm:$0xff] }
 0x235   :  { %3866 = vmatpush1.msra.mxu0 %v22395_v44  ;;  %4070 = vmatpush1.msra.mxu1 %v22396_v53  ;;  %v22407_v53 = vld [vmem:[#allocation109_spill] sm:$0xff] }
 0x236   :  { %3868 = vmatprep.subr.mxu0 %v22397_v61  ;;  %4076 = vmatprep.subr.mxu1 %v22398_v34  ;;  %v22409_v34 = vld [vmem:[#allocation110_spill] sm:$0xff] }
 0x237   :  { %3870 = vmatpush1.msra.mxu0 %v22399_v0  ;;  %4082 = vmatpush1.msra.mxu1 %v22400_v26  ;;  %v22411_v26 = vld [vmem:[#allocation165_spill] sm:$0xff] }
 0x238   :  { %3872 = vmatprep.subr.mxu0 %v22401_v54  ;;  %4088 = vmatprep.subr.mxu1 %v22402_v23  ;;  %v22412_v23 = vld [vmem:[#allocation122_spill] sm:$0xff]  ;;  %v2624_v11 = vpop.f32.mrf.mxu1 }
 0x239   :  { %3874 = vmatpush1.msra.mxu0 %v22403_v29  ;;  %4094 = vmatpush1.msra.mxu1 %v22404_v35  ;;  %v6905_v35 = vsub.f32 1.0, %v18477_v41  ;;  %v22420_v41 = vld [vmem:[#allocation139_spill] sm:$0xff] }
 0x23a   :  { %3876 = vmatprep.subr.mxu0 %v22405_v20  ;;  %4100 = vmatprep.subr.mxu1 %v22406_v3  ;;  %v22415_v3 = vld [vmem:[#allocation167_spill] sm:$0xff] }
 0x23b   :  { %3878 = vmatpush1.msra.mxu0 %v22407_v53  ;;  %4106 = vmatpush1.msra.mxu1 %v22408_v14  ;;  %v22417_v14 = vld [vmem:[#allocation128_spill] sm:$0xff] }
 0x23c   :  { %3880 = vmatprep.subr.mxu0 %v22409_v34  ;;  %4112 = vmatprep.subr.mxu1 %v22410_v40  ;;  %v22418_v40 = vld [vmem:[#allocation130_spill] sm:$0xff] }
 0x23d   :  { %4163 = vmatprep.mubr.f32.mxu1 %v21931_v9  ;;  %4118 = vmatpush1.msra.mxu1 %v22411_v26  ;;  %v8449_v26 = vsub.f32 1.0, %v18490_v62  ;;  %v2626_v62 = vpop.f32.mrf.mxu1 }
 0x23e   :  { %3882 = vmatpush1.msra.mxu0 %v22412_v23  ;;  %4124 = vmatprep.subr.mxu1 %v22413_v38  ;;  %v22421_v38 = vld [vmem:[#allocation35_spill] sm:$0xff] }
 0x23f   :  { %3884 = vmatprep.subr.mxu0 %v22414_v32  ;;  %4130 = vmatpush1.msra.mxu1 %v22415_v3  ;;  %v9993_v3 = vsub.f32 1.0, %v18502_v5 }
 0x240   :  { %3886 = vmatpush1.msra.mxu0 %v22416_v46  ;;  %4309 = vmatprep.subr.mxu1 %v22354_v10  ;;  %v22430_v10 = vld [vmem:[#allocation66_spill] sm:$0xff] }
 0x241   :  { %3888 = vmatprep.subr.mxu0 %v22417_v14  ;;  %3927 = vmatprep.mubr.f32.mxu0 %v21931_v9 }
 0x242   :  { %3890 = vmatpush1.msra.mxu0 %v22418_v40  ;;  %6908 = vperm.xlu1 %15794, %v6905_v35  }
 0x243   :  { %3892 = vmatprep.subr.mxu0 %v22419_v56 }
 0x244   :  { %3894 = vmatpush1.msra.mxu0 %v22420_v41 }
 0x245   :  { %4173 = vmatprep.subr.mxu0 %v22421_v38 }
 0x246   :  { %8452 = vperm.xlu1 %15794, %v8449_v26  }
 0x24a   :  { %9996 = vperm.xlu1 %15794, %v9993_v3   ;;  %v22422_v3 = vld [vmem:[#allocation20_spill] sm:$0xff] }
 0x24b   :  { %v22423_v59 = vsub.s32 0, %v22422_v3  ;;  %v137_v50 = vsub.s32 1, %v22422_v3 }
 0x24e   :  { %11540 = vperm.xlu1 %15794, %v11537_v63   ;;  %v2761_v12 = vpop.f32.mrf.mxu0  ;;  %v2263_v63 = vld [vmem:[%s21217_s6] sm:$0x7] }
 0x24f   :  { %v18581_v24 = vrot.slane %v2263_v63, %v22423_v59  ;;  %v18585_v60 = vrot.slane %v2263_v63, %v137_v50 }
 0x250   :  { %v2763_v39 = vpop.f32.mrf.mxu0 }
 0x251   :  { %22424 = vst [vmem:[#allocation50_spill] sm:$0xff] %v18581_v24  ;;  %v2393_v51 = vadd.f32 %v2392_v58, %v18581_v24  ;;  %22425 = vst [vmem:[#allocation36_spill] sm:$0xff] %v18585_v60  ;;  %v2395_v59 = vadd.f32 %v2394_v28, %v18585_v60  ;;  %v22432_v28 = vld [vmem:[#allocation170_spill] sm:$0xff] }
 0x253   :  { %v2625_v55 = vadd.f32 %v2624_v11, %v2393_v51  ;;  %v22427_v11 = vld [vmem:[#allocation21_spill] sm:$0xff] }
 0x254   :  { %v22429_v51 = vld [vmem:[#allocation25_spill] sm:$0xff] }
 0x255   :  { %v2762_v47 = vadd.f32 %v2761_v12, %v2625_v55  ;;  %v22428_v55 = vld [vmem:[#allocation173_spill] sm:$0xff] }
 0x258   :  { %v2867_v43 = vpop.f32.mrf.mxu1 }
 0x259   :  { %v2868_v21 = vadd.f32 %v2867_v43, %v2762_v47  ;;  %v2627_v47 = vadd.f32 %v2626_v62, %v2395_v59 }
 0x25a   :  { %v2869_v45 = vpop.f32.mrf.mxu1 }
 0x271   :  { %v3035_v7 = vpop.f32.mrf.mxu0 }
 0x273   :  { %v3037_v35 = vpop.f32.mrf.mxu0 }
 0x27a   :  { %v3139_v36 = vpop.f32.mrf.mxu1 }
 0x27c   :  { %v3141_v30 = vpop.f32.mrf.mxu1 }
 0x294   :  { %v3231_v49 = vpop.f32.mrf.mxu0 }
 0x296   :  { %v14346_v38 = vpop.f32.mrf.mxu0 }
 0x297   :  { %v3036_v38 = vadd.f32 %v3035_v7, %v2868_v21  ;;  %v2764_v7 = vadd.f32 %v2763_v39, %v2627_v47 }
 0x299   :  { %v3140_v19 = vadd.f32 %v3139_v36, %v3036_v38  ;;  %v22431_v36 = vld [vmem:[#allocation101_spill] sm:$0xff] }
 0x29b   :  { %v3785_v58 = vadd.f32 %v3140_v19, %v22428_v55 }
 0x29c   :  { %v3382_v5 = vpop.f32.mrf.mxu1 }
 0x29d   :  { %v13114_v21 = vmul.f32 -1.442695, %v3785_v58 }
 0x29e   :  { %v14381_v26 = vpop.f32.mrf.mxu1 }
 0x29f   :  { %v15866_v26 = vld [vmem:[%s21215_s4] sm:$0x7]  ;;  %15795 = vpow2.f32 %v13114_v21 }
 0x2a0   :  { %v18590_v16 = vrot.slane %v15866_v26, %v137_v50  ;;  %v2870_v50 = vadd.f32 %v2869_v45, %v2764_v7 }
 0x2a2   :  { %22426 = vst [vmem:[#allocation53_spill] sm:$0xff] %v18590_v16  ;;  %v252_v12 = vadd.f32 %v22427_v11, %v18590_v16  ;;  %v3038_v56 = vadd.f32 %v3037_v35, %v2870_v50  ;;  %v22433_v11 = vld [vmem:[#allocation175_spill] sm:$0xff]  ;;  %v3813_v50 = vpop.permute.xlu0 %3812 }
 0x2a4   :  { %v550_v43 = vadd.f32 %v22429_v51, %v252_v12  ;;  %v3142_v60 = vadd.f32 %v3141_v30, %v3038_v56  ;;  %v22434_v12 = vsub.s32 2, %v22422_v3 }
 0x2a6   :  { %v729_v41 = vadd.f32 %v22430_v10, %v550_v43  ;;  %v18603_v55 = vrot.slane %v2263_v63, %v22434_v12  ;;  %v22435_v12 = vld [vmem:[#allocation39_spill] sm:$0xff] }
 0x2a8   :  { %v883_v38 = vadd.f32 %v22431_v36, %v729_v41  ;;  %v3232_v45 = vadd.f32 %v3231_v49, %v18603_v55 }
 0x2aa   :  { %v3383_v41 = vadd.f32 %v3382_v5, %v3232_v45  ;;  %v22436_v45 = vld [vmem:[#allocation47_spill] sm:$0xff] }
 0x2ac   :  { %v15796_v59 = vpop.eup %15795 }
 0x2ad   :  { %v3789_v39 = vadd.f32 1.0, %v15796_v59 }
 0x2b5   :  { %v3486_v6 = vpop.f32.mrf.mxu0 }
 0x2b6   :  { %v3487_v58 = vadd.f32 %v3486_v6, %v3383_v41  ;;  %v22438_v41 = vld [vmem:[#allocation42_spill] sm:$0xff] }
 0x2b7   :  { %v14416_v27 = vpop.f32.mrf.mxu0 }
 0x2b8   :  { %v1105_v27 = vadd.f32 %v22432_v28, %v883_v38  ;;  %v3821_v38 = vpop.permute.xlu0 %3820 }
 0x2ba   :  { %v1251_v16 = vadd.f32 %v22433_v11, %v1105_v27 }
 0x2bc   :  { %v3792_v19 = vadd.f32 %v3142_v60, %v1251_v16 }
 0x2be   :  { %v3575_v24 = vpop.f32.mrf.mxu1  ;;  %v13115_v62 = vmul.f32 -1.442695, %v3792_v19 }
 0x2bf   :  { %v3576_v56 = vadd.f32 %v3575_v24, %v3487_v58  ;;  %v15867_v24 = vld [vmem:[%s21213_s2] sm:$0xff]  ;;  %v22440_v58 = vld [vmem:[#allocation45_spill] sm:$0xff]  ;;  %s15964_s2 = smov [#allocation10]  }
 0x2c0   :  { %v14451_v26 = vpop.f32.mrf.mxu1  ;;  %15797 = vpow2.f32 %v13115_v62  ;;  %v3823_v28 = vmul.f32 %v15867_v24, %v3821_v38  ;;  %v22459_v38 = vld [vmem:[#allocation139_spill] sm:$0xff]  ;;  %s13095_s28 = sshll.u32 %s15964_s2, 4  ;;  %s13096_s28 = int_to_ptr.vmem [resolvable:$true] %s13095_s28 }
 0x2c1   :  { %15799 = vrcp.f32 %v3789_v39  ;;  %s15928_s29 = scalar_lea.vmem %s13096_s28, 896  ;;  %p15933_p2 = scmp.lt.s32.totalorder %s13096_s28, %s13096_s28 }
 0x2c2   :  { %p15929_p1 = scmp.ne.s32.totalorder %s13096_s28, %s15928_s29  ;;  %p15934_p3 = scmp.lt.s32.totalorder %s15928_s29, %s15928_s29 }
 0x2c4   :  { %p15935_p4 = por %p15934_p3, %p15933_p2 }
 0x2c6   :  { %p15936_p5 = pnand %p15935_p4, %p15929_p1 }
 0x2cd   :  { %v15798_v47 = vpop.eup %15797 }
 0x2ce   :  { %v3796_v30 = vadd.f32 1.0, %v15798_v47  ;;  %v15800_v43 = vpop.eup %15799  ;;  %v22441_v47 = vld [vmem:[#allocation48_spill] sm:$0xff] }
 0x2d0   :  { %15801 = vrcp.f32 %v3796_v30  ;;  %v22443_v30 = vld [vmem:[#allocation62_spill] sm:$0xff] }
 0x2d7   :  { %v3694_v10 = vpop.f32.mrf.mxu0 }
 0x2d8   :  { %v3695_v51 = vadd.f32 %v3694_v10, %v3576_v56  ;;  %v22437_v10 = vld [vmem:[#allocation19_spill] sm:$0xff]  ;;  %v22442_v56 = vld [vmem:[#allocation49_spill] sm:$0xff] }
 0x2d9   :  { %v14486_v35 = vpop.f32.mrf.mxu0 }
 0x2da   :  { %v22439_v35 = vld [vmem:[#allocation37_spill] sm:$0xff] }
 0x2dd   :  { %v15802_v3 = vpop.eup %15801 }
 0x2de   :  { %v3802_v49 = vsub.f32 1.0, %v15802_v3  ;;  %v3804_v6 = vmul.f32 %v15867_v24, %v15802_v3  ;;  %v22451_v3 = vld [vmem:[#allocation89_spill] sm:$0xff]  ;;  %v22456_v24 = vld [vmem:[#allocation116_spill] sm:$0xff] }
 0x2df   :  { %v3781_v16 = vpop.f32.mrf.mxu1 }
 0x2e0   :  { %v3782_v60 = vadd.f32 %v3781_v16, %v3695_v51  ;;  %v22444_v51 = vld [vmem:[#allocation64_spill] sm:$0xff]  ;;  %v22445_v16 = vld [vmem:[#allocation65_spill] sm:$0xff] }
 0x2e1   :  { %v14521_v7 = vpop.f32.mrf.mxu1 }
 0x2e2   :  { %v3799_v21 = vmul.f32 %v15800_v43, %v3782_v60  ;;  %v22446_v60 = vld [vmem:[#allocation69_spill] sm:$0xff]  ;;  %v22447_v43 = vld [vmem:[#allocation79_spill] sm:$0xff]  ;;  %v22448_v7 = vld [vmem:[#allocation80_spill] sm:$0xff] }
 0x2e4   :  { %v3800_v63 = vadd.f32 %v3799_v21, %v18419_v25  ;;  %v22449_v21 = vld [vmem:[#allocation84_spill] sm:$0xff] }
 0x2e6   :  { %15803 = vtanh.f32 %v3800_v63  ;;  %v22450_v63 = vld [vmem:[#allocation85_spill] sm:$0xff] }
 0x2f3   :  { %v15804_v26 = vpop.eup %15803 }
 0x2f4   :  { %v3803_v5 = vmul.f32 %v15804_v26, %v3802_v49  ;;  %v22453_v49 = vld [vmem:[#allocation103_spill] sm:$0xff]  ;;  %v22454_v26 = vld [vmem:[#allocation104_spill] sm:$0xff] }
 0x2f6   :  { %v3805_v36 = vadd.f32 %v3804_v6, %v3803_v5  ;;  %v22455_v5 = vld [vmem:[#allocation107_spill] sm:$0xff]  ;;  %v22457_v6 = vld [vmem:[#allocation132_spill] sm:$0xff] }
 0x2f8   :  { %v3815_v27 = vmul.f32 %v3813_v50, %v3805_v36  ;;  %v22452_v50 = vld [vmem:[#allocation99_spill] sm:$0xff]  ;;  %v22458_v36 = vld [vmem:[#allocation124_spill] sm:$0xff] }
 0x2fa   :  { %3816 = vst [vmem:[#allocation10] sm:$0xff] %v3815_v27  ;;  %v18610_v11 = vadd.f32 %v3823_v28, %v3815_v27  ;;  %v22460_v28 = vld [vmem:[#allocation125_spill] sm:$0xff] }
 0x2fb   :  { %v22461_v27 = vld [vmem:[#allocation29_spill] sm:$0xff] }
 0x2fc   :  { %v18613_v25 = vand.u32 4294901760, %v18610_v11 }
 0x2fe   :  { %4165 = vmatmul.mubr.f32.vlgmr.msra.gmra.mxu1 %v18613_v25  ;;  %v18618_v19 = vsub.f32 %v18610_v11, %v18613_v25 }
 0x2ff   :  { %4311 = vmatpush1.msra.mxu1 %v22355_v57  ;;  %4404 = vmatprep.mubr.f32.mxu1 %v21931_v9 }
 0x300   :  { %4313 = vmatprep.subr.mxu1 %v22357_v1  ;;  %v18624_v62 = vand.u32 4294901760, %v18618_v19 }
 0x301   :  { %4315 = vmatpush1.msra.mxu1 %v22361_v17 }
 0x302   :  { %4317 = vmatprep.subr.mxu1 %v22363_v37  ;;  %v3931_v59 = vsub.f32 %v18618_v19, %v18624_v62 }
 0x303   :  { %4319 = vmatpush1.msra.mxu1 %v22365_v13 }
 0x304   :  { %4321 = vmatprep.subr.mxu1 %v22368_v42  ;;  %v18632_v39 = vand.u32 4294901760, %v3931_v59  ;;  %v22462_v59 = vld [vmem:[#allocation131_spill] sm:$0xff] }
 0x305   :  { %4323 = vmatpush1.msra.mxu1 %v22370_v2 }
 0x306   :  { %4325 = vmatprep.subr.mxu1 %v22373_v31  ;;  %3933 = vmatmul.mubr.f32.vlgmr.msra.gmra.mxu0 %v18632_v39 }
 0x307   :  { %4176 = vmatpush1.msra.mxu0 %v22435_v12  ;;  %4327 = vmatpush1.msra.mxu1 %v22376_v52 }
 0x308   :  { %4179 = vmatprep.subr.mxu0 %v22436_v45  ;;  %4329 = vmatprep.subr.mxu1 %v22378_v8 }
 0x309   :  { %4182 = vmatpush1.msra.mxu0 %v22437_v10  ;;  %4331 = vmatpush1.msra.mxu1 %v22380_v15 }
 0x30a   :  { %4185 = vmatprep.subr.mxu0 %v22438_v41  ;;  %4333 = vmatprep.subr.mxu1 %v22384_v22 }
 0x30b   :  { %4188 = vmatpush1.msra.mxu0 %v22439_v35  ;;  %4335 = vmatpush1.msra.mxu1 %v22386_v4 }
 0x30c   :  { %4191 = vmatprep.subr.mxu0 %v22440_v58  ;;  %4337 = vmatprep.subr.mxu1 %v22388_v33 }
 0x30d   :  { %4194 = vmatpush1.msra.mxu0 %v22441_v47  ;;  %4339 = vmatpush1.msra.mxu1 %v22391_v48 }
 0x30e   :  { %4197 = vmatprep.subr.mxu0 %v22442_v56  ;;  %4341 = vmatprep.subr.mxu1 %v22393_v18  ;;  %v22534_v56 = vld [vmem:[#allocation197_spill] sm:$0xff] }
 0x30f   :  { %4200 = vmatpush1.msra.mxu0 %v22443_v30  ;;  %4343 = vmatpush1.msra.mxu1 %v22395_v44  ;;  %v22533_v30 = vld [vmem:[#allocation194_spill] sm:$0xff] }
 0x310   :  { %4203 = vmatprep.subr.mxu0 %v22444_v51  ;;  %4345 = vmatprep.subr.mxu1 %v22397_v61  ;;  %v22532_v51 = vld [vmem:[#allocation240_spill] sm:$0xff] }
 0x311   :  { %4206 = vmatpush1.msra.mxu0 %v22445_v16  ;;  %4347 = vmatpush1.msra.mxu1 %v22399_v0  ;;  %v22528_v16 = vld [vmem:[#allocation255_spill] sm:$0xff] }
 0x312   :  { %4209 = vmatprep.subr.mxu0 %v22446_v60  ;;  %4349 = vmatprep.subr.mxu1 %v22401_v54  ;;  %v22526_v60 = vld [vmem:[#allocation254_spill] sm:$0xff] }
 0x313   :  { %4212 = vmatpush1.msra.mxu0 %v22447_v43  ;;  %4351 = vmatpush1.msra.mxu1 %v22403_v29  ;;  %v22524_v43 = vld [vmem:[#allocation253_spill] sm:$0xff] }
 0x314   :  { %4215 = vmatprep.subr.mxu0 %v22448_v7  ;;  %4353 = vmatprep.subr.mxu1 %v22405_v20  ;;  %v22522_v7 = vld [vmem:[#allocation252_spill] sm:$0xff] }
 0x315   :  { %4218 = vmatpush1.msra.mxu0 %v22449_v21  ;;  %4355 = vmatpush1.msra.mxu1 %v22407_v53  ;;  %v22520_v21 = vld [vmem:[#allocation250_spill] sm:$0xff] }
 0x316   :  { %4221 = vmatprep.subr.mxu0 %v22450_v63  ;;  %4357 = vmatprep.subr.mxu1 %v22409_v34  ;;  %v22518_v63 = vld [vmem:[#allocation248_spill] sm:$0xff] }
 0x317   :  { %4224 = vmatpush1.msra.mxu0 %v22451_v3  ;;  %4359 = vmatpush1.msra.mxu1 %v22412_v23  ;;  %v22502_v3 = vld [vmem:[#allocation157_spill] sm:$0xff] }
 0x318   :  { %4227 = vmatprep.subr.mxu0 %v22452_v50  ;;  %4361 = vmatprep.subr.mxu1 %v22414_v32  ;;  %v22501_v50 = vld [vmem:[#allocation218_spill] sm:$0xff] }
 0x319   :  { %4230 = vmatpush1.msra.mxu0 %v22453_v49  ;;  %4363 = vmatpush1.msra.mxu1 %v22416_v46  ;;  %v22499_v49 = vld [vmem:[#allocation152_spill] sm:$0xff] }
 0x31a   :  { %4233 = vmatprep.subr.mxu0 %v22454_v26  ;;  %4365 = vmatprep.subr.mxu1 %v22417_v14  ;;  %v22467_v26 = vld [vmem:[#allocation148_spill] sm:$0xff] }
 0x31b   :  { %4236 = vmatpush1.msra.mxu0 %v22455_v5  ;;  %4367 = vmatpush1.msra.mxu1 %v22418_v40  ;;  %v22463_v5 = vld [vmem:[#allocation135_spill] sm:$0xff] }
 0x31c   :  { %4239 = vmatprep.subr.mxu0 %v22456_v24  ;;  %4369 = vmatprep.subr.mxu1 %v22457_v6  ;;  %v22464_v24 = vld [vmem:[#allocation140_spill] sm:$0xff] }
 0x31d   :  { %4242 = vmatpush1.msra.mxu0 %v22458_v36  ;;  %4371 = vmatpush1.msra.mxu1 %v22459_v38  ;;  %v22465_v36 = vld [vmem:[#allocation142_spill] sm:$0xff] }
 0x31e   :  { %4245 = vmatprep.subr.mxu0 %v22460_v28  ;;  %4408 = vmatmul.mubr.f32.vlgmr.msra.gmra.mxu1 %v18624_v62  ;;  %v22466_v28 = vld [vmem:[#allocation146_spill] sm:$0xff] }
 0x31f   :  { %4583 = vmatprep.subr.mxu1 %v22461_v27  ;;  %4248 = vmatpush1.msra.mxu0 %v22462_v59  ;;  %v22468_v59 = vld [vmem:[#allocation150_spill] sm:$0xff] }
 0x320   :  { %4585 = vmatpush1.msra.mxu1 %v22355_v57  ;;  %4251 = vmatprep.subr.mxu0 %v22463_v5  ;;  %v22474_v5 = vld [vmem:[#allocation54_spill] sm:$0xff] }
 0x321   :  { %4587 = vmatprep.subr.mxu1 %v22357_v1  ;;  %4254 = vmatpush1.msra.mxu0 %v22464_v24  ;;  %v22469_v24 = vld [vmem:[#allocation23_spill] sm:$0xff] }
 0x322   :  { %4589 = vmatpush1.msra.mxu1 %v22361_v17  ;;  %4257 = vmatprep.subr.mxu0 %v22465_v36  ;;  %v22470_v36 = vld [vmem:[#allocation40_spill] sm:$0xff] }
 0x323   :  { %4591 = vmatprep.subr.mxu1 %v22363_v37  ;;  %4260 = vmatpush1.msra.mxu0 %v22466_v28  ;;  %v22471_v28 = vld [vmem:[#allocation26_spill] sm:$0xff] }
 0x324   :  { %4593 = vmatpush1.msra.mxu1 %v22365_v13  ;;  %4263 = vmatprep.subr.mxu0 %v22467_v26  ;;  %v22472_v26 = vld [vmem:[#allocation16_spill] sm:$0xff] }
 0x325   :  { %4595 = vmatprep.subr.mxu1 %v22368_v42  ;;  %4266 = vmatpush1.msra.mxu0 %v22468_v59  ;;  %v22473_v59 = vld [vmem:[#allocation43_spill] sm:$0xff] }
 0x326   :  { %4299 = vmatprep.mubr.f32.mxu0 %v21931_v9  ;;  %4597 = vmatpush1.msra.mxu1 %v22370_v2 }
 0x327   :  { %4302 = vmatmul.mubr.f32.vlgmr.msra.gmra.mxu0 %v18618_v19  ;;  %4417 = vmatprep.subr.mxu0 %v22469_v24  ;;  %v22475_v24 = vld [vmem:[#allocation17_spill] sm:$0xff] }
 0x328   :  { %4599 = vmatprep.subr.mxu1 %v22373_v31  ;;  %4421 = vmatpush1.msra.mxu0 %v22470_v36  ;;  %v22476_v36 = vld [vmem:[#allocation59_spill] sm:$0xff] }
 0x329   :  { %4601 = vmatpush1.msra.mxu1 %v22376_v52  ;;  %4425 = vmatprep.subr.mxu0 %v22471_v28  ;;  %v22477_v28 = vld [vmem:[#allocation61_spill] sm:$0xff] }
 0x32a   :  { %4603 = vmatprep.subr.mxu1 %v22378_v8  ;;  %4429 = vmatpush1.msra.mxu0 %v22472_v26  ;;  %v22478_v26 = vld [vmem:[#allocation73_spill] sm:$0xff] }
 0x32b   :  { %4605 = vmatpush1.msra.mxu1 %v22380_v15  ;;  %4433 = vmatprep.subr.mxu0 %v22473_v59  ;;  %v22479_v59 = vld [vmem:[#allocation76_spill] sm:$0xff] }
 0x32c   :  { %4607 = vmatprep.subr.mxu1 %v22384_v22  ;;  %4437 = vmatpush1.msra.mxu0 %v22474_v5  ;;  %v22480_v5 = vld [vmem:[#allocation77_spill] sm:$0xff] }
 0x32d   :  { %4609 = vmatpush1.msra.mxu1 %v22386_v4  ;;  %4441 = vmatprep.subr.mxu0 %v22475_v24  ;;  %v22481_v24 = vld [vmem:[#allocation78_spill] sm:$0xff] }
 0x32e   :  { %4611 = vmatprep.subr.mxu1 %v22388_v33  ;;  %4445 = vmatpush1.msra.mxu0 %v22476_v36  ;;  %v22482_v36 = vld [vmem:[#allocation93_spill] sm:$0xff] }
 0x32f   :  { %4613 = vmatpush1.msra.mxu1 %v22391_v48  ;;  %4449 = vmatprep.subr.mxu0 %v22477_v28  ;;  %v22483_v28 = vld [vmem:[#allocation94_spill] sm:$0xff] }
 0x330   :  { %4615 = vmatprep.subr.mxu1 %v22393_v18  ;;  %4453 = vmatpush1.msra.mxu0 %v22478_v26  ;;  %v22484_v26 = vld [vmem:[#allocation95_spill] sm:$0xff] }
 0x331   :  { %4617 = vmatpush1.msra.mxu1 %v22395_v44  ;;  %4457 = vmatprep.subr.mxu0 %v22479_v59  ;;  %v22485_v59 = vld [vmem:[#allocation96_spill] sm:$0xff] }
 0x332   :  { %4619 = vmatprep.subr.mxu1 %v22397_v61  ;;  %4461 = vmatpush1.msra.mxu0 %v22480_v5  ;;  %v22486_v5 = vld [vmem:[#allocation98_spill] sm:$0xff] }
 0x333   :  { %4621 = vmatpush1.msra.mxu1 %v22399_v0  ;;  %4465 = vmatprep.subr.mxu0 %v22481_v24  ;;  %v22487_v24 = vld [vmem:[#allocation111_spill] sm:$0xff] }
 0x334   :  { %4623 = vmatprep.subr.mxu1 %v22401_v54  ;;  %4469 = vmatpush1.msra.mxu0 %v22482_v36  ;;  %v22488_v36 = vld [vmem:[#allocation112_spill] sm:$0xff] }
 0x335   :  { %4625 = vmatpush1.msra.mxu1 %v22403_v29  ;;  %4473 = vmatprep.subr.mxu0 %v22483_v28  ;;  %v22489_v28 = vld [vmem:[#allocation113_spill] sm:$0xff] }
 0x336   :  { %4627 = vmatprep.subr.mxu1 %v22405_v20  ;;  %4477 = vmatpush1.msra.mxu0 %v22484_v26  ;;  %v22490_v26 = vld [vmem:[#allocation115_spill] sm:$0xff] }
 0x337   :  { %4629 = vmatpush1.msra.mxu1 %v22407_v53  ;;  %4481 = vmatprep.subr.mxu0 %v22485_v59  ;;  %v22491_v59 = vld [vmem:[#allocation129_spill] sm:$0xff] }
 0x338   :  { %4631 = vmatprep.subr.mxu1 %v22409_v34  ;;  %4485 = vmatpush1.msra.mxu0 %v22486_v5  ;;  %v22492_v5 = vld [vmem:[#allocation133_spill] sm:$0xff] }
 0x339   :  { %4633 = vmatpush1.msra.mxu1 %v22412_v23  ;;  %4489 = vmatprep.subr.mxu0 %v22487_v24  ;;  %v22496_v24 = vld [vmem:[#allocation147_spill] sm:$0xff] }
 0x33a   :  { %4635 = vmatprep.subr.mxu1 %v22414_v32  ;;  %4493 = vmatpush1.msra.mxu0 %v22488_v36  ;;  %v22493_v36 = vld [vmem:[#allocation134_spill] sm:$0xff] }
 0x33b   :  { %4637 = vmatpush1.msra.mxu1 %v22416_v46  ;;  %4497 = vmatprep.subr.mxu0 %v22489_v28  ;;  %v22494_v28 = vld [vmem:[#allocation145_spill] sm:$0xff] }
 0x33c   :  { %4639 = vmatprep.subr.mxu1 %v22417_v14  ;;  %4501 = vmatpush1.msra.mxu0 %v22490_v26  ;;  %v22495_v26 = vld [vmem:[#allocation210_spill] sm:$0xff] }
 0x33d   :  { %4641 = vmatpush1.msra.mxu1 %v22418_v40  ;;  %4505 = vmatprep.subr.mxu0 %v22491_v59  ;;  %v22497_v59 = vld [vmem:[#allocation149_spill] sm:$0xff] }
 0x33e   :  { %4643 = vmatprep.subr.mxu1 %v22457_v6  ;;  %4509 = vmatpush1.msra.mxu0 %v22492_v5  ;;  %v22498_v5 = vld [vmem:[#allocation215_spill] sm:$0xff] }
 0x33f   :  { %4645 = vmatpush1.msra.mxu1 %v22459_v38  ;;  %4678 = vmatprep.mubr.f32.mxu1 %v21931_v9 }
 0x340   :  { %4513 = vmatprep.subr.mxu0 %v22493_v36  ;;  %4680 = vmatmul.mubr.f32.vlgmr.msra.gmra.mxu1 %v18613_v25  ;;  %v22500_v36 = vld [vmem:[#allocation155_spill] sm:$0xff] }
 0x341   :  { %14557 = vmatprep.subr.mxu1 %v21931_v9  ;;  %4517 = vmatpush1.msra.mxu0 %v22494_v28  ;;  %v22516_v28 = vld [vmem:[#allocation245_spill] sm:$0xff] }
 0x342   :  { %14558 = vmatpush3.msra.mxu1 %v22495_v26  ;;  %4521 = vmatprep.subr.mxu0 %v22496_v24  ;;  %v22503_v26 = vld [vmem:[#allocation159_spill] sm:$0xff]  ;;  %v22504_v24 = vld [vmem:[#allocation222_spill] sm:$0xff] }
 0x343   :  { %14559 = vmatprep.subr.mxu1 %v21931_v9  ;;  %4525 = vmatpush1.msra.mxu0 %v22497_v59  ;;  %v22514_v59 = vld [vmem:[#allocation242_spill] sm:$0xff] }
 0x344   :  { %14560 = vmatpush3.msra.mxu1 %v22498_v5  ;;  %4529 = vmatprep.subr.mxu0 %v22499_v49  ;;  %v22505_v49 = vld [vmem:[#allocation191_spill] sm:$0xff]  ;;  %v22512_v5 = vld [vmem:[#allocation238_spill] sm:$0xff] }
 0x345   :  { %14561 = vmatprep.subr.mxu1 %v21931_v9  ;;  %4533 = vmatpush1.msra.mxu0 %v22500_v36  ;;  %v22506_v36 = vld [vmem:[#allocation226_spill] sm:$0xff] }
 0x346   :  { %14562 = vmatpush3.msra.mxu1 %v22501_v50  ;;  %4537 = vmatprep.subr.mxu0 %v22502_v3  ;;  %v22507_v3 = vld [vmem:[#allocation192_spill] sm:$0xff]  ;;  %v22510_v50 = vld [vmem:[#allocation234_spill] sm:$0xff] }
 0x347   :  { %14563 = vmatprep.subr.mxu1 %v21931_v9  ;;  %4541 = vmatpush1.msra.mxu0 %v22503_v26  ;;  %v22508_v26 = vld [vmem:[#allocation230_spill] sm:$0xff] }
 0x348   :  { %4574 = vmatprep.mubr.f32.mxu0 %v21931_v9  ;;  %14564 = vmatpush3.msra.mxu1 %v22504_v24  ;;  %v22509_v24 = vld [vmem:[#allocation193_spill] sm:$0xff] }
 0x349   :  { %4576 = vmatmul.mubr.f32.vlgmr.msra.gmra.mxu0 %v18613_v25  ;;  %14522 = vmatprep.subr.mxu0 %v21931_v9 }
 0x34a   :  { %14565 = vmatprep.subr.mxu1 %v21931_v9  ;;  %14523 = vmatpush3.msra.mxu0 %v22505_v49 }
 0x34b   :  { %14566 = vmatpush3.msra.mxu1 %v22506_v36  ;;  %14524 = vmatprep.subr.mxu0 %v21931_v9  ;;  %v22511_v36 = vld [vmem:[#allocation196_spill] sm:$0xff] }
 0x34c   :  { %14567 = vmatprep.subr.mxu1 %v21931_v9  ;;  %14525 = vmatpush3.msra.mxu0 %v22507_v3 }
 0x34d   :  { %14568 = vmatpush3.msra.mxu1 %v22508_v26  ;;  %14526 = vmatprep.subr.mxu0 %v21931_v9  ;;  %v22513_v26 = vld [vmem:[#allocation200_spill] sm:$0xff] }
 0x34e   :  { %14569 = vmatprep.subr.mxu1 %v21931_v9  ;;  %14527 = vmatpush3.msra.mxu0 %v22509_v24 }
 0x34f   :  { %14570 = vmatpush3.msra.mxu1 %v22510_v50  ;;  %14528 = vmatprep.subr.mxu0 %v21931_v9  ;;  %v22515_v50 = vld [vmem:[#allocation201_spill] sm:$0xff] }
 0x350   :  { %14571 = vmatprep.subr.mxu1 %v21931_v9  ;;  %14529 = vmatpush3.msra.mxu0 %v22511_v36 }
 0x351   :  { %14572 = vmatpush3.msra.mxu1 %v22512_v5  ;;  %14530 = vmatprep.subr.mxu0 %v21931_v9  ;;  %v22517_v5 = vld [vmem:[#allocation205_spill] sm:$0xff] }
 0x352   :  { %14573 = vmatprep.subr.mxu1 %v21931_v9  ;;  %14531 = vmatpush3.msra.mxu0 %v22513_v26 }
 0x353   :  { %14574 = vmatpush3.msra.mxu1 %v22514_v59  ;;  %14532 = vmatprep.subr.mxu0 %v21931_v9  ;;  %v22519_v59 = vld [vmem:[#allocation209_spill] sm:$0xff] }
 0x354   :  { %14575 = vmatprep.subr.mxu1 %v21931_v9  ;;  %14533 = vmatpush3.msra.mxu0 %v22515_v50 }
 0x355   :  { %14576 = vmatpush3.msra.mxu1 %v22516_v28  ;;  %14534 = vmatprep.subr.mxu0 %v21931_v9  ;;  %v22521_v28 = vld [vmem:[#allocation211_spill] sm:$0xff] }
 0x356   :  { %14577 = vmatprep.subr.mxu1 %v21931_v9  ;;  %14535 = vmatpush3.msra.mxu0 %v22517_v5 }
 0x357   :  { %14578 = vmatpush3.msra.mxu1 %v22518_v63  ;;  %14536 = vmatprep.subr.mxu0 %v21931_v9  ;;  %v22523_v63 = vld [vmem:[#allocation216_spill] sm:$0xff] }
 0x358   :  { %14579 = vmatprep.subr.mxu1 %v21931_v9  ;;  %14537 = vmatpush3.msra.mxu0 %v22519_v59 }
 0x359   :  { %14580 = vmatpush3.msra.mxu1 %v22520_v21  ;;  %14538 = vmatprep.subr.mxu0 %v21931_v9  ;;  %v22525_v21 = vld [vmem:[#allocation219_spill] sm:$0xff] }
 0x35a   :  { %14581 = vmatprep.subr.mxu1 %v21931_v9  ;;  %14539 = vmatpush3.msra.mxu0 %v22521_v28 }
 0x35b   :  { %14582 = vmatpush3.msra.mxu1 %v22522_v7  ;;  %14540 = vmatprep.subr.mxu0 %v21931_v9  ;;  %v22527_v7 = vld [vmem:[#allocation223_spill] sm:$0xff] }
 0x35c   :  { %14583 = vmatprep.subr.mxu1 %v21931_v9  ;;  %14541 = vmatpush3.msra.mxu0 %v22523_v63 }
 0x35d   :  { %14584 = vmatpush3.msra.mxu1 %v22524_v43  ;;  %14542 = vmatprep.subr.mxu0 %v21931_v9  ;;  %v22529_v43 = vld [vmem:[#allocation229_spill] sm:$0xff] }
 0x35e   :  { %14585 = vmatprep.subr.mxu1 %v21931_v9  ;;  %14543 = vmatpush3.msra.mxu0 %v22525_v21 }
 0x35f   :  { %14586 = vmatpush3.msra.mxu1 %v22526_v60  ;;  %14544 = vmatprep.subr.mxu0 %v21931_v9  ;;  %v22530_v60 = vld [vmem:[#allocation233_spill] sm:$0xff] }
 0x360   :  { %14587 = vmatprep.subr.mxu1 %v21931_v9  ;;  %14545 = vmatpush3.msra.mxu0 %v22527_v7 }
 0x361   :  { %14588 = vmatpush3.msra.mxu1 %v22528_v16  ;;  %14589 = vmatprep.mubr.msk.f32.mxu1 %vm15962_vm0, %v21931_v9  ;;  %v22531_v16 = vld [vmem:[#allocation236_spill] sm:$0xff] }
 0x362   :  { %14546 = vmatprep.subr.mxu0 %v21931_v9  ;;  %14590 = vmatmul.mubr.f32.vlgmr.msra.gmra.mxu1 %v18613_v25 }
 0x363   :  { %14627 = vmatprep.subr.mxu1 %v21931_v9  ;;  %14547 = vmatpush3.msra.mxu0 %v22529_v43 }
 0x364   :  { %14628 = vmatpush3.msra.mxu1 %v22505_v49  ;;  %14548 = vmatprep.subr.mxu0 %v21931_v9 }
 0x365   :  { %14629 = vmatprep.subr.mxu1 %v21931_v9  ;;  %14549 = vmatpush3.msra.mxu0 %v22530_v60 }
 0x366   :  { %14630 = vmatpush3.msra.mxu1 %v22507_v3  ;;  %14550 = vmatprep.subr.mxu0 %v21931_v9 }
 0x367   :  { %14631 = vmatprep.subr.mxu1 %v21931_v9  ;;  %14551 = vmatpush3.msra.mxu0 %v22531_v16 }
 0x368   :  { %14632 = vmatpush3.msra.mxu1 %v22509_v24  ;;  %14552 = vmatprep.subr.mxu0 %v21931_v9 }
 0x369   :  { %14633 = vmatprep.subr.mxu1 %v21931_v9  ;;  %14553 = vmatpush3.msra.mxu0 %v22532_v51 }
 0x36a   :  { %14554 = vmatprep.mubr.msk.f32.mxu0 %vm15962_vm0, %v21931_v9  ;;  %14634 = vmatpush3.msra.mxu1 %v22511_v36 }
 0x36b   :  { %14555 = vmatmul.mubr.f32.vlgmr.msra.gmra.mxu0 %v18632_v39  ;;  %14592 = vmatprep.subr.mxu0 %v21931_v9  ;;  %v22535_v39 = vld [vmem:[#allocation199_spill] sm:$0xff] }
 0x36c   :  { %14635 = vmatprep.subr.mxu1 %v21931_v9  ;;  %14593 = vmatpush3.msra.mxu0 %v22533_v30  ;;  %v22536_v30 = vld [vmem:[#allocation202_spill] sm:$0xff] }
 0x36d   :  { %14636 = vmatpush3.msra.mxu1 %v22513_v26  ;;  %14594 = vmatprep.subr.mxu0 %v21931_v9 }
 0x36e   :  { %14637 = vmatprep.subr.mxu1 %v21931_v9  ;;  %14595 = vmatpush3.msra.mxu0 %v22534_v56  ;;  %v22537_v56 = vld [vmem:[#allocation206_spill] sm:$0xff] }
 0x36f   :  { %14638 = vmatpush3.msra.mxu1 %v22515_v50  ;;  %14596 = vmatprep.subr.mxu0 %v21931_v9 }
 0x370   :  { %14639 = vmatprep.subr.mxu1 %v21931_v9  ;;  %14597 = vmatpush3.msra.mxu0 %v22535_v39  ;;  %v22538_v39 = vld [vmem:[#allocation208_spill] sm:$0xff] }
 0x371   :  { %14640 = vmatpush3.msra.mxu1 %v22517_v5  ;;  %14598 = vmatprep.subr.mxu0 %v21931_v9 }
 0x372   :  { %14641 = vmatprep.subr.mxu1 %v21931_v9  ;;  %14599 = vmatpush3.msra.mxu0 %v22536_v30  ;;  %v22539_v30 = vld [vmem:[#allocation213_spill] sm:$0xff] }
 0x373   :  { %14642 = vmatpush3.msra.mxu1 %v22519_v59  ;;  %14600 = vmatprep.subr.mxu0 %v21931_v9 }
 0x374   :  { %14643 = vmatprep.subr.mxu1 %v21931_v9  ;;  %14601 = vmatpush3.msra.mxu0 %v22537_v56  ;;  %v22540_v56 = vld [vmem:[#allocation217_spill] sm:$0xff] }
 0x375   :  { %14644 = vmatpush3.msra.mxu1 %v22521_v28  ;;  %14602 = vmatprep.subr.mxu0 %v21931_v9 }
 0x376   :  { %14645 = vmatprep.subr.mxu1 %v21931_v9  ;;  %14603 = vmatpush3.msra.mxu0 %v22538_v39  ;;  %v22541_v39 = vld [vmem:[#allocation221_spill] sm:$0xff] }
 0x377   :  { %14646 = vmatpush3.msra.mxu1 %v22523_v63  ;;  %14604 = vmatprep.subr.mxu0 %v21931_v9 }
 0x378   :  { %14647 = vmatprep.subr.mxu1 %v21931_v9  ;;  %14605 = vmatpush3.msra.mxu0 %v22539_v30  ;;  %v22542_v30 = vld [vmem:[#allocation225_spill] sm:$0xff] }
 0x379   :  { %14648 = vmatpush3.msra.mxu1 %v22525_v21  ;;  %14606 = vmatprep.subr.mxu0 %v21931_v9 }
 0x37a   :  { %14649 = vmatprep.subr.mxu1 %v21931_v9  ;;  %14607 = vmatpush3.msra.mxu0 %v22540_v56  ;;  %v22543_v56 = vld [vmem:[#allocation228_spill] sm:$0xff] }
 0x37b   :  { %14650 = vmatpush3.msra.mxu1 %v22527_v7  ;;  %14608 = vmatprep.subr.mxu0 %v21931_v9 }
 0x37c   :  { %14651 = vmatprep.subr.mxu1 %v21931_v9  ;;  %14609 = vmatpush3.msra.mxu0 %v22541_v39  ;;  %v22544_v39 = vld [vmem:[#allocation232_spill] sm:$0xff] }
 0x37d   :  { %14652 = vmatpush3.msra.mxu1 %v22529_v43  ;;  %14610 = vmatprep.subr.mxu0 %v21931_v9 }
 0x37e   :  { %14653 = vmatprep.subr.mxu1 %v21931_v9  ;;  %14611 = vmatpush3.msra.mxu0 %v22542_v30  ;;  %v22547_v30 = vld [vmem:[#allocation244_spill] sm:$0xff] }
 0x37f   :  { %14654 = vmatpush3.msra.mxu1 %v22530_v60  ;;  %14612 = vmatprep.subr.mxu0 %v21931_v9 }
 0x380   :  { %14655 = vmatprep.subr.mxu1 %v21931_v9  ;;  %14613 = vmatpush3.msra.mxu0 %v22543_v56  ;;  %v22545_v56 = vld [vmem:[#allocation237_spill] sm:$0xff] }
 0x381   :  { %14656 = vmatpush3.msra.mxu1 %v22531_v16  ;;  %14614 = vmatprep.subr.mxu0 %v21931_v9 }
 0x382   :  { %14657 = vmatprep.subr.mxu1 %v21931_v9  ;;  %14615 = vmatpush3.msra.mxu0 %v22544_v39  ;;  %v22546_v39 = vld [vmem:[#allocation241_spill] sm:$0xff] }
 0x383   :  { %14658 = vmatpush3.msra.mxu1 %v22532_v51  ;;  %14659 = vmatprep.mubr.msk.f32.mxu1 %vm15962_vm0, %v21931_v9 }
 0x384   :  { %14616 = vmatprep.subr.mxu0 %v21931_v9  ;;  %14660 = vmatmul.mubr.f32.vlgmr.msra.gmra.mxu1 %v18624_v62  ;;  %v22548_v62 = vld [vmem:[#allocation247_spill] sm:$0xff] }
 0x385   :  { %14697 = vmatprep.subr.mxu1 %v21931_v9  ;;  %14617 = vmatpush3.msra.mxu0 %v22545_v56  ;;  %v22565_v56 = vld [vmem:[#allocation60_spill] sm:$0xff] }
 0x386   :  { %14698 = vmatpush3.msra.mxu1 %v22505_v49  ;;  %14618 = vmatprep.subr.mxu0 %v21931_v9 }
 0x387   :  { %14699 = vmatprep.subr.mxu1 %v21931_v9  ;;  %14619 = vmatpush3.msra.mxu0 %v22546_v39  ;;  %v22563_v39 = vld [vmem:[#allocation246_spill] sm:$0xff] }
 0x388   :  { %14700 = vmatpush3.msra.mxu1 %v22507_v3  ;;  %14620 = vmatprep.subr.mxu0 %v21931_v9 }
 0x389   :  { %14701 = vmatprep.subr.mxu1 %v21931_v9  ;;  %14621 = vmatpush3.msra.mxu0 %v22547_v30  ;;  %v22549_v30 = vld [vmem:[#allocation198_spill] sm:$0xff] }
 0x38a   :  { %14702 = vmatpush3.msra.mxu1 %v22509_v24  ;;  %14622 = vmatprep.subr.mxu0 %v21931_v9 }
 0x38b   :  { %14703 = vmatprep.subr.mxu1 %v21931_v9  ;;  %14623 = vmatpush3.msra.mxu0 %v22548_v62  ;;  %v22550_v62 = vld [vmem:[#allocation203_spill] sm:$0xff] }
 0x38c   :  { %14624 = vmatprep.mubr.msk.f32.mxu0 %vm15962_vm0, %v21931_v9  ;;  %14704 = vmatpush3.msra.mxu1 %v22511_v36 }
 0x38d   :  { %14625 = vmatmul.mubr.f32.vlgmr.msra.gmra.mxu0 %v18618_v19  ;;  %14662 = vmatprep.subr.mxu0 %v21931_v9  ;;  %v22551_v19 = vld [vmem:[#allocation204_spill] sm:$0xff] }
 0x38e   :  { %14705 = vmatprep.subr.mxu1 %v21931_v9  ;;  %14663 = vmatpush3.msra.mxu0 %v22549_v30  ;;  %v22552_v30 = vld [vmem:[#allocation207_spill] sm:$0xff] }
 0x38f   :  { %14706 = vmatpush3.msra.mxu1 %v22513_v26  ;;  %14664 = vmatprep.subr.mxu0 %v21931_v9  ;;  %v22598_v26 = vld [vmem:[#allocation50_spill] sm:$0xff] }
 0x390   :  { %14707 = vmatprep.subr.mxu1 %v21931_v9  ;;  %14665 = vmatpush3.msra.mxu0 %v22550_v62  ;;  %v22553_v62 = vld [vmem:[#allocation212_spill] sm:$0xff] }
 0x391   :  { %14708 = vmatpush3.msra.mxu1 %v22515_v50  ;;  %14666 = vmatprep.subr.mxu0 %v21931_v9 }
 0x392   :  { %14709 = vmatprep.subr.mxu1 %v21931_v9  ;;  %14667 = vmatpush3.msra.mxu0 %v22551_v19  ;;  %v22554_v19 = vld [vmem:[#allocation214_spill] sm:$0xff] }
 0x393   :  { %14710 = vmatpush3.msra.mxu1 %v22517_v5  ;;  %14668 = vmatprep.subr.mxu0 %v21931_v9 }
 0x394   :  { %14711 = vmatprep.subr.mxu1 %v21931_v9  ;;  %14669 = vmatpush3.msra.mxu0 %v22552_v30  ;;  %v22555_v30 = vld [vmem:[#allocation220_spill] sm:$0xff] }
 0x395   :  { %14712 = vmatpush3.msra.mxu1 %v22519_v59  ;;  %14670 = vmatprep.subr.mxu0 %v21931_v9 }
 0x396   :  { %14713 = vmatprep.subr.mxu1 %v21931_v9  ;;  %14671 = vmatpush3.msra.mxu0 %v22553_v62  ;;  %v22556_v62 = vld [vmem:[#allocation224_spill] sm:$0xff] }
 0x397   :  { %14714 = vmatpush3.msra.mxu1 %v22521_v28  ;;  %14672 = vmatprep.subr.mxu0 %v21931_v9 }
 0x398   :  { %14715 = vmatprep.subr.mxu1 %v21931_v9  ;;  %14673 = vmatpush3.msra.mxu0 %v22554_v19  ;;  %v22557_v19 = vld [vmem:[#allocation227_spill] sm:$0xff] }
 0x399   :  { %14716 = vmatpush3.msra.mxu1 %v22523_v63  ;;  %14674 = vmatprep.subr.mxu0 %v21931_v9 }
 0x39a   :  { %14717 = vmatprep.subr.mxu1 %v21931_v9  ;;  %14675 = vmatpush3.msra.mxu0 %v22555_v30  ;;  %v22558_v30 = vld [vmem:[#allocation231_spill] sm:$0xff] }
 0x39b   :  { %14718 = vmatpush3.msra.mxu1 %v22525_v21  ;;  %14676 = vmatprep.subr.mxu0 %v21931_v9 }
 0x39c   :  { %14719 = vmatprep.subr.mxu1 %v21931_v9  ;;  %14677 = vmatpush3.msra.mxu0 %v22556_v62  ;;  %v22559_v62 = vld [vmem:[#allocation235_spill] sm:$0xff] }
 0x39d   :  { %14720 = vmatpush3.msra.mxu1 %v22527_v7  ;;  %14678 = vmatprep.subr.mxu0 %v21931_v9 }
 0x39e   :  { %14721 = vmatprep.subr.mxu1 %v21931_v9  ;;  %14679 = vmatpush3.msra.mxu0 %v22557_v19  ;;  %v22560_v19 = vld [vmem:[#allocation239_spill] sm:$0xff] }
 0x39f   :  { %14722 = vmatpush3.msra.mxu1 %v22529_v43  ;;  %14680 = vmatprep.subr.mxu0 %v21931_v9  ;;  %v22570_v43 = vld [vmem:[#allocation75_spill] sm:$0xff] }
 0x3a0   :  { %14723 = vmatprep.subr.mxu1 %v21931_v9  ;;  %14681 = vmatpush3.msra.mxu0 %v22558_v30  ;;  %v22561_v30 = vld [vmem:[#allocation243_spill] sm:$0xff] }
 0x3a1   :  { %14724 = vmatpush3.msra.mxu1 %v22530_v60  ;;  %14682 = vmatprep.subr.mxu0 %v21931_v9  ;;  %v22569_v60 = vld [vmem:[#allocation251_spill] sm:$0xff] }
 0x3a2   :  { %14725 = vmatprep.subr.mxu1 %v21931_v9  ;;  %14683 = vmatpush3.msra.mxu0 %v22559_v62  ;;  %v22562_v62 = vld [vmem:[#allocation38_spill] sm:$0xff] }
 0x3a3   :  { %14726 = vmatpush3.msra.mxu1 %v22531_v16  ;;  %14684 = vmatprep.subr.mxu0 %v21931_v9  ;;  %v22567_v16 = vld [vmem:[#allocation63_spill] sm:$0xff] }
 0x3a4   :  { %14727 = vmatprep.subr.mxu1 %v21931_v9  ;;  %14685 = vmatpush3.msra.mxu0 %v22560_v19  ;;  %v22564_v19 = vld [vmem:[#allocation58_spill] sm:$0xff] }
 0x3a5   :  { %14728 = vmatpush3.msra.mxu1 %v22532_v51  ;;  %14729 = vmatprep.mubr.msk.f32.mxu1 %vm15962_vm0, %v21931_v9  ;;  %v22566_v51 = vld [vmem:[#allocation249_spill] sm:$0xff] }
 0x3a6   :  { %14686 = vmatprep.subr.mxu0 %v21931_v9  ;;  %14730 = vmatmul.mubr.f32.vlgmr.msra.gmra.mxu1 %v18613_v25 }
 0x3a7   :  { %14687 = vmatpush3.msra.mxu0 %v22561_v30  ;;  %14694 = vmatprep.mubr.msk.f32.mxu0 %vm15962_vm0, %v21931_v9  ;;  %v22568_v30 = vld [vmem:[#allocation74_spill] sm:$0xff] }
 0x3a8   :  { %14688 = vmatprep.subr.mxu0 %v21931_v9  ;;  %5488 = vmatprep.subr.mxu1 %v22562_v62 }
 0x3a9   :  { %14689 = vmatpush3.msra.mxu0 %v22563_v39  ;;  %5494 = vmatpush1.msra.mxu1 %v22564_v19  ;;  %v22571_v39 = vld [vmem:[#allocation82_spill] sm:$0xff]  ;;  %v22572_v19 = vld [vmem:[#allocation83_spill] sm:$0xff] }
 0x3aa   :  { %14690 = vmatprep.subr.mxu0 %v21931_v9  ;;  %5500 = vmatprep.subr.mxu1 %v22565_v56  ;;  %v22573_v56 = vld [vmem:[#allocation87_spill] sm:$0xff] }
 0x3ab   :  { %14691 = vmatpush3.msra.mxu0 %v22566_v51  ;;  %5506 = vmatpush1.msra.mxu1 %v22567_v16  ;;  %v22574_v16 = vld [vmem:[#allocation97_spill] sm:$0xff] }
 0x3ac   :  { %14692 = vmatprep.subr.mxu0 %v21931_v9  ;;  %5512 = vmatprep.subr.mxu1 %v22568_v30  ;;  %v22575_v30 = vld [vmem:[#allocation102_spill] sm:$0xff] }
 0x3ad   :  { %14693 = vmatpush3.msra.mxu0 %v22569_v60  ;;  %5518 = vmatpush1.msra.mxu1 %v22570_v43  ;;  %v22576_v43 = vld [vmem:[#allocation105_spill] sm:$0xff] }
 0x3ae   :  { %14695 = vmatmul.mubr.f32.vlgmr.msra.gmra.mxu0 %v18613_v25  ;;  %5524 = vmatprep.subr.mxu1 %v22571_v39  ;;  %v22577_v25 = vld [vmem:[#allocation108_spill] sm:$0xff] }
 0x3af   :  { %5530 = vmatpush1.msra.mxu1 %v22572_v19  ;;  %5376 = vmatprep.subr.mxu0 %v22461_v27  ;;  %v22578_v19 = vld [vmem:[#allocation114_spill] sm:$0xff] }
 0x3b0   :  { %5536 = vmatprep.subr.mxu1 %v22573_v56  ;;  %5378 = vmatpush1.msra.mxu0 %v22355_v57  ;;  %v22579_v56 = vld [vmem:[#allocation119_spill] sm:$0xff] }
 0x3b1   :  { %5542 = vmatpush1.msra.mxu1 %v22574_v16  ;;  %5380 = vmatprep.subr.mxu0 %v22357_v1  ;;  %v22580_v16 = vld [vmem:[#allocation120_spill] sm:$0xff] }
 0x3b2   :  { %5548 = vmatprep.subr.mxu1 %v22575_v30  ;;  %5382 = vmatpush1.msra.mxu0 %v22361_v17  ;;  %v22581_v30 = vld [vmem:[#allocation121_spill] sm:$0xff] }
 0x3b3   :  { %5554 = vmatpush1.msra.mxu1 %v22576_v43  ;;  %5384 = vmatprep.subr.mxu0 %v22363_v37  ;;  %v22582_v43 = vld [vmem:[#allocation126_spill] sm:$0xff] }
 0x3b4   :  { %5560 = vmatprep.subr.mxu1 %v22577_v25  ;;  %5386 = vmatpush1.msra.mxu0 %v22365_v13  ;;  %v22583_v25 = vld [vmem:[#allocation138_spill] sm:$0xff] }
 0x3b5   :  { %5566 = vmatpush1.msra.mxu1 %v22578_v19  ;;  %5388 = vmatprep.subr.mxu0 %v22368_v42  ;;  %v22584_v19 = vld [vmem:[#allocation141_spill] sm:$0xff] }
 0x3b6   :  { %5572 = vmatprep.subr.mxu1 %v22579_v56  ;;  %5390 = vmatpush1.msra.mxu0 %v22370_v2  ;;  %v22585_v56 = vld [vmem:[#allocation143_spill] sm:$0xff] }
 0x3b7   :  { %5578 = vmatpush1.msra.mxu1 %v22580_v16  ;;  %5392 = vmatprep.subr.mxu0 %v22373_v31  ;;  %v22586_v16 = vld [vmem:[#allocation144_spill] sm:$0xff] }
 0x3b8   :  { %5584 = vmatprep.subr.mxu1 %v22581_v30  ;;  %5394 = vmatpush1.msra.mxu0 %v22376_v52  ;;  %v22587_v30 = vld [vmem:[#allocation151_spill] sm:$0xff] }
 0x3b9   :  { %5590 = vmatpush1.msra.mxu1 %v22582_v43  ;;  %5396 = vmatprep.subr.mxu0 %v22378_v8  ;;  %v22588_v43 = vld [vmem:[#allocation156_spill] sm:$0xff] }
 0x3ba   :  { %5596 = vmatprep.subr.mxu1 %v22583_v25  ;;  %5398 = vmatpush1.msra.mxu0 %v22380_v15  ;;  %v22589_v25 = vld [vmem:[#allocation158_spill] sm:$0xff] }
 0x3bb   :  { %5602 = vmatpush1.msra.mxu1 %v22584_v19  ;;  %5400 = vmatprep.subr.mxu0 %v22384_v22  ;;  %v22590_v19 = vld [vmem:[#allocation160_spill] sm:$0xff] }
 0x3bc   :  { %5608 = vmatprep.subr.mxu1 %v22585_v56  ;;  %5402 = vmatpush1.msra.mxu0 %v22386_v4  ;;  %v22591_v56 = vld [vmem:[#allocation161_spill] sm:$0xff] }
 0x3bd   :  { %5614 = vmatpush1.msra.mxu1 %v22586_v16  ;;  %5404 = vmatprep.subr.mxu0 %v22388_v33  ;;  %v22592_v16 = vld [vmem:[#allocation163_spill] sm:$0xff] }
 0x3be   :  { %5620 = vmatprep.subr.mxu1 %v22587_v30  ;;  %5406 = vmatpush1.msra.mxu0 %v22391_v48  ;;  %v22593_v30 = vld [vmem:[#allocation164_spill] sm:$0xff] }
 0x3bf   :  { %5626 = vmatpush1.msra.mxu1 %v22588_v43  ;;  %5408 = vmatprep.subr.mxu0 %v22393_v18  ;;  %v22594_v43 = vld [vmem:[#allocation165_spill] sm:$0xff] }
 0x3c0   :  { %5632 = vmatprep.subr.mxu1 %v22589_v25  ;;  %5410 = vmatpush1.msra.mxu0 %v22395_v44  ;;  %v22595_v25 = vld [vmem:[#allocation166_spill] sm:$0xff] }
 0x3c1   :  { %5638 = vmatpush1.msra.mxu1 %v22590_v19  ;;  %5412 = vmatprep.subr.mxu0 %v22397_v61  ;;  %v22596_v19 = vld [vmem:[#allocation167_spill] sm:$0xff] }
 0x3c2   :  { %5644 = vmatprep.subr.mxu1 %v22591_v56  ;;  %5414 = vmatpush1.msra.mxu0 %v22399_v0 }
 0x3c3   :  { %5650 = vmatpush1.msra.mxu1 %v22592_v16  ;;  %5416 = vmatprep.subr.mxu0 %v22401_v54 }
 0x3c4   :  { %5656 = vmatprep.subr.mxu1 %v22593_v30  ;;  %5418 = vmatpush1.msra.mxu0 %v22403_v29  ;;  %v22603_v29 = vld [vmem:[#allocation27_spill] sm:$0xff] }
 0x3c5   :  { %5662 = vmatpush1.msra.mxu1 %v22594_v43  ;;  %5420 = vmatprep.subr.mxu0 %v22405_v20 }
 0x3c6   :  { %5668 = vmatprep.subr.mxu1 %v22595_v25  ;;  %5422 = vmatpush1.msra.mxu0 %v22407_v53  ;;  %v4166_v25 = vpop.f32.mrf.mxu1  ;;  %v3934_v16 = vpop.f32.mrf.mxu0  ;;  %v22602_v53 = vld [vmem:[#allocation176_spill] sm:$0xff] }
 0x3c7   :  { %5674 = vmatpush1.msra.mxu1 %v22596_v19  ;;  %5424 = vmatprep.subr.mxu0 %v22409_v34  ;;  %v22597_v19 = vld [vmem:[#allocation35_spill] sm:$0xff]  ;;  %v3935_v36 = vadd.f32 %v3934_v16, %v22598_v26 }
 0x3c8   :  { %5707 = vmatprep.mubr.f32.mxu1 %v21931_v9  ;;  %5853 = vmatprep.subr.mxu1 %v22461_v27  ;;  %v4168_v43 = vpop.f32.mrf.mxu1  ;;  %v3936_v60 = vpop.f32.mrf.mxu0  ;;  %v22599_v27 = vld [vmem:[#allocation36_spill] sm:$0xff] }
 0x3c9   :  { %5426 = vmatpush1.msra.mxu0 %v22412_v23  ;;  %5471 = vmatprep.mubr.f32.mxu0 %v21931_v9  ;;  %v4167_v24 = vadd.f32 %v4166_v25, %v3935_v36  ;;  %v22601_v23 = vld [vmem:[#allocation22_spill] sm:$0xff] }
 0x3ca   :  { %5428 = vmatprep.subr.mxu0 %v22414_v32  ;;  %v22600_v32 = vld [vmem:[#allocation53_spill] sm:$0xff] }
 0x3cb   :  { %5430 = vmatpush1.msra.mxu0 %v22416_v46  ;;  %v263_v34 = vadd.f32 %v22601_v23, %v22600_v32 }
 0x3cc   :  { %5432 = vmatprep.subr.mxu0 %v22417_v14 }
 0x3cd   :  { %5434 = vmatpush1.msra.mxu0 %v22418_v40 }
 0x3ce   :  { %5436 = vmatprep.subr.mxu0 %v22457_v6 }
 0x3cf   :  { %5438 = vmatpush1.msra.mxu0 %v22459_v38  ;;  %v3937_v38 = vadd.f32 %v3936_v60, %v22599_v27  ;;  %v22605_v60 = vld [vmem:[#allocation118_spill] sm:$0xff] }
 0x3d0   :  { %5717 = vmatprep.subr.mxu0 %v22597_v19 }
 0x3d1   :  { %v4169_v46 = vadd.f32 %v4168_v43, %v3937_v38  ;;  %v22607_v38 = vld [vmem:[#allocation178_spill] sm:$0xff] }
 0x3de   :  { %v4409_v30 = vpop.f32.mrf.mxu1 }
 0x3e0   :  { %v4411_v56 = vpop.f32.mrf.mxu1 }
 0x3e7   :  { %v4303_v51 = vpop.f32.mrf.mxu0 }
 0x3e8   :  { %v4304_v19 = vadd.f32 %v4303_v51, %v4167_v24  ;;  %v22604_v51 = vld [vmem:[#allocation86_spill] sm:$0xff] }
 0x3e9   :  { %v4305_v21 = vpop.f32.mrf.mxu0 }
 0x3ea   :  { %v4410_v3 = vadd.f32 %v4409_v30, %v4304_v19 }
 0x400   :  { %v4681_v39 = vpop.f32.mrf.mxu1 }
 0x402   :  { %v4683_v62 = vpop.f32.mrf.mxu1 }
 0x409   :  { %v4577_v28 = vpop.f32.mrf.mxu0 }
 0x40a   :  { %v4578_v49 = vadd.f32 %v4577_v28, %v4410_v3 }
 0x40b   :  { %v4579_v59 = vpop.f32.mrf.mxu0 }
 0x40c   :  { %v4682_v40 = vadd.f32 %v4681_v39, %v4578_v49 }
 0x40e   :  { %v5327_v20 = vadd.f32 %v4682_v40, %v22602_v53 }
 0x410   :  { %v13118_v54 = vmul.f32 -1.442695, %v5327_v20 }
 0x412   :  { %15805 = vpow2.f32 %v13118_v54 }
 0x41f   :  { %v15806_v40 = vpop.eup %15805 }
 0x422   :  { %v4924_v7 = vpop.f32.mrf.mxu1 }
 0x424   :  { %v14591_v63 = vpop.f32.mrf.mxu1 }
 0x425   :  { %v4306_v63 = vadd.f32 %v4305_v21, %v4169_v46 }
 0x427   :  { %v4412_v16 = vadd.f32 %v4411_v56, %v4306_v63 }
 0x429   :  { %v4580_v3 = vadd.f32 %v4579_v59, %v4412_v16 }
 0x42b   :  { %v4773_v5 = vpop.f32.mrf.mxu0  ;;  %v4684_v49 = vadd.f32 %v4683_v62, %v4580_v3 }
 0x42c   :  { %v4774_v20 = vadd.f32 %v4773_v5, %v18603_v55  ;;  %v5356_v5 = vpop.permute.xlu1 %5355 }
 0x42d   :  { %v14556_v50 = vpop.f32.mrf.mxu0 }
 0x42e   :  { %v557_v50 = vadd.f32 %v22603_v29, %v263_v34  ;;  %v5331_v34 = vadd.f32 1.0, %v15806_v40  ;;  %v4925_v29 = vadd.f32 %v4924_v7, %v4774_v20  ;;  %v22610_v20 = vld [vmem:[#allocation62_spill] sm:$0xff] }
 0x430   :  { %v737_v30 = vadd.f32 %v22604_v51, %v557_v50 }
 0x432   :  { %v892_v28 = vadd.f32 %v22605_v60, %v737_v30  ;;  %v22608_v30 = vld [vmem:[#allocation256_spill] sm:$0xff] }
 0x444   :  { %v5117_v6 = vpop.f32.mrf.mxu1 }
 0x446   :  { %v14661_v14 = vpop.f32.mrf.mxu1 }
 0x447   :  { %v22606_v14 = vld [vmem:[#allocation171_spill] sm:$0xff] }
 0x448   :  { %v1112_v43 = vadd.f32 %v22606_v14, %v892_v28  ;;  %v5365_v14 = vpop.permute.xlu1 %5364 }
 0x44a   :  { %v1258_v23 = vadd.f32 %v22607_v38, %v1112_v43  ;;  %v5367_v43 = vmul.f32 %v5365_v14, %v18610_v11  ;;  %v22632_v14 = vld [vmem:[#allocation130_spill] sm:$0xff] }
 0x44c   :  { %v5334_v46 = vadd.f32 %v4684_v49, %v1258_v23 }
 0x44d   :  { %v5028_v36 = vpop.f32.mrf.mxu0 }
 0x44e   :  { %v13119_v21 = vmul.f32 -1.442695, %v5334_v46  ;;  %v5029_v59 = vadd.f32 %v5028_v36, %v4925_v29  ;;  %v22612_v29 = vld [vmem:[#allocation65_spill] sm:$0xff] }
 0x44f   :  { %v14626_v24 = vpop.f32.mrf.mxu0 }
 0x450   :  { %15807 = vpow2.f32 %v13119_v21  ;;  %v5118_v19 = vadd.f32 %v5117_v6, %v5029_v59  ;;  %v22614_v59 = vld [vmem:[#allocation91_spill] sm:$0xff] }
 0x451   :  { %15809 = vrcp.f32 %v5331_v34  ;;  %v22609_v34 = vld [vmem:[#allocation49_spill] sm:$0xff] }
 0x45d   :  { %v15808_v39 = vpop.eup %15807 }
 0x45e   :  { %v5338_v25 = vadd.f32 1.0, %v15808_v39  ;;  %v15810_v16 = vpop.eup %15809  ;;  %v22615_v39 = vld [vmem:[#allocation79_spill] sm:$0xff] }
 0x460   :  { %15811 = vrcp.f32 %v5338_v25  ;;  %v22618_v25 = vld [vmem:[#allocation106_spill] sm:$0xff] }
 0x466   :  { %v5323_v53 = vpop.f32.mrf.mxu1 }
 0x468   :  { %v14731_v56 = vpop.f32.mrf.mxu1 }
 0x469   :  { %v22613_v56 = vld [vmem:[#allocation69_spill] sm:$0xff] }
 0x46d   :  { %v15812_v24 = vpop.eup %15811 }
 0x46e   :  { %v5236_v54 = vpop.f32.mrf.mxu0  ;;  %v5344_v60 = vsub.f32 1.0, %v15812_v24  ;;  %v5346_v36 = vmul.f32 %v15812_v24, %v18610_v11  ;;  %v22626_v24 = vld [vmem:[#allocation123_spill] sm:$0xff] }
 0x46f   :  { %v5237_v63 = vadd.f32 %v5236_v54, %v5118_v19  ;;  %v22616_v19 = vld [vmem:[#allocation92_spill] sm:$0xff] }
 0x470   :  { %v14696_v62 = vpop.f32.mrf.mxu0  ;;  %v22617_v54 = vld [vmem:[#allocation80_spill] sm:$0xff] }
 0x471   :  { %v5324_v50 = vadd.f32 %v5323_v53, %v5237_v63  ;;  %v22611_v53 = vld [vmem:[#allocation64_spill] sm:$0xff]  ;;  %v22620_v62 = vld [vmem:[#allocation109_spill] sm:$0xff] }
 0x472   :  { %v22619_v63 = vld [vmem:[#allocation84_spill] sm:$0xff] }
 0x473   :  { %v5341_v51 = vmul.f32 %v15810_v16, %v5324_v50  ;;  %v22621_v50 = vld [vmem:[#allocation85_spill] sm:$0xff]  ;;  %v22622_v16 = vld [vmem:[#allocation110_spill] sm:$0xff] }
 0x475   :  { %v5342_v3 = vadd.f32 %v5341_v51, %v22608_v30  ;;  %v22623_v51 = vld [vmem:[#allocation89_spill] sm:$0xff]  ;;  %v22624_v30 = vld [vmem:[#allocation122_spill] sm:$0xff] }
 0x477   :  { %15813 = vtanh.f32 %v5342_v3  ;;  %v22625_v3 = vld [vmem:[#allocation99_spill] sm:$0xff] }
 0x484   :  { %v15814_v28 = vpop.eup %15813 }
 0x485   :  { %v5345_v7 = vmul.f32 %v15814_v28, %v5344_v60  ;;  %v22628_v60 = vld [vmem:[#allocation127_spill] sm:$0xff]  ;;  %v22629_v28 = vld [vmem:[#allocation104_spill] sm:$0xff] }
 0x487   :  { %v5347_v6 = vadd.f32 %v5346_v36, %v5345_v7  ;;  %v22630_v7 = vld [vmem:[#allocation128_spill] sm:$0xff]  ;;  %v22631_v36 = vld [vmem:[#allocation107_spill] sm:$0xff] }
 0x489   :  { %v5358_v49 = vmul.f32 %v5356_v5, %v5347_v6  ;;  %v22627_v5 = vld [vmem:[#allocation103_spill] sm:$0xff]  ;;  %v22633_v6 = vld [vmem:[#allocation116_spill] sm:$0xff] }
 0x48b   :  { %5360 = vst [vmem:[#allocation10 + $0x8] sm:$0xff] %v5358_v49  ;;  %v19054_v38 = vadd.f32 %v5367_v43, %v5358_v49  ;;  %v22634_v43 = vld [vmem:[#allocation132_spill] sm:$0xff] }
 0x48c   :  { %v22635_v49 = vld [vmem:[#allocation124_spill] sm:$0xff] }
 0x48d   :  { %v19057_v23 = vand.u32 4294901760, %v19054_v38 }
 0x48f   :  { %5709 = vmatmul.mubr.f32.vlgmr.msra.gmra.mxu1 %v19057_v23  ;;  %v19062_v46 = vsub.f32 %v19054_v38, %v19057_v23 }
 0x490   :  { %5855 = vmatpush1.msra.mxu1 %v22355_v57  ;;  %5948 = vmatprep.mubr.f32.mxu1 %v21931_v9 }
 0x491   :  { %5857 = vmatprep.subr.mxu1 %v22357_v1  ;;  %v19068_v11 = vand.u32 4294901760, %v19062_v46 }
 0x492   :  { %5859 = vmatpush1.msra.mxu1 %v22361_v17 }
 0x493   :  { %5861 = vmatprep.subr.mxu1 %v22363_v37  ;;  %v5475_v21 = vsub.f32 %v19062_v46, %v19068_v11 }
 0x494   :  { %5863 = vmatpush1.msra.mxu1 %v22365_v13 }
 0x495   :  { %5865 = vmatprep.subr.mxu1 %v22368_v42  ;;  %v19076_v40 = vand.u32 4294901760, %v5475_v21  ;;  %v22636_v21 = vld [vmem:[#allocation139_spill] sm:$0xff] }
 0x496   :  { %5867 = vmatpush1.msra.mxu1 %v22370_v2 }
 0x497   :  { %5869 = vmatprep.subr.mxu1 %v22373_v31  ;;  %5477 = vmatmul.mubr.f32.vlgmr.msra.gmra.mxu0 %v19076_v40 }
 0x498   :  { %5720 = vmatpush1.msra.mxu0 %v22435_v12  ;;  %5871 = vmatpush1.msra.mxu1 %v22376_v52 }
 0x499   :  { %5723 = vmatprep.subr.mxu0 %v22436_v45  ;;  %5873 = vmatprep.subr.mxu1 %v22378_v8 }
 0x49a   :  { %5726 = vmatpush1.msra.mxu0 %v22437_v10  ;;  %5875 = vmatpush1.msra.mxu1 %v22380_v15 }
 0x49b   :  { %5729 = vmatprep.subr.mxu0 %v22438_v41  ;;  %5877 = vmatprep.subr.mxu1 %v22384_v22 }
 0x49c   :  { %5732 = vmatpush1.msra.mxu0 %v22439_v35  ;;  %5879 = vmatpush1.msra.mxu1 %v22386_v4  ;;  %v22711_v35 = vld [vmem:[#allocation197_spill] sm:$0xff] }
 0x49d   :  { %5735 = vmatprep.subr.mxu0 %v22440_v58  ;;  %5881 = vmatprep.subr.mxu1 %v22388_v33  ;;  %v22710_v58 = vld [vmem:[#allocation194_spill] sm:$0xff] }
 0x49e   :  { %5738 = vmatpush1.msra.mxu0 %v22441_v47  ;;  %5883 = vmatpush1.msra.mxu1 %v22391_v48  ;;  %v22709_v47 = vld [vmem:[#allocation240_spill] sm:$0xff] }
 0x49f   :  { %5741 = vmatprep.subr.mxu0 %v22609_v34  ;;  %5885 = vmatprep.subr.mxu1 %v22393_v18  ;;  %v22705_v34 = vld [vmem:[#allocation255_spill] sm:$0xff] }
 0x4a0   :  { %5744 = vmatpush1.msra.mxu0 %v22610_v20  ;;  %5887 = vmatpush1.msra.mxu1 %v22395_v44  ;;  %v22703_v20 = vld [vmem:[#allocation254_spill] sm:$0xff] }
 0x4a1   :  { %5747 = vmatprep.subr.mxu0 %v22611_v53  ;;  %5889 = vmatprep.subr.mxu1 %v22397_v61  ;;  %v22701_v53 = vld [vmem:[#allocation253_spill] sm:$0xff] }
 0x4a2   :  { %5750 = vmatpush1.msra.mxu0 %v22612_v29  ;;  %5891 = vmatpush1.msra.mxu1 %v22399_v0  ;;  %v22699_v29 = vld [vmem:[#allocation252_spill] sm:$0xff] }
 0x4a3   :  { %5753 = vmatprep.subr.mxu0 %v22613_v56  ;;  %5893 = vmatprep.subr.mxu1 %v22614_v59  ;;  %v22697_v56 = vld [vmem:[#allocation250_spill] sm:$0xff] }
 0x4a4   :  { %5756 = vmatpush1.msra.mxu0 %v22615_v39  ;;  %5895 = vmatpush1.msra.mxu1 %v22616_v19  ;;  %v22695_v39 = vld [vmem:[#allocation248_spill] sm:$0xff] }
 0x4a5   :  { %5759 = vmatprep.subr.mxu0 %v22617_v54  ;;  %5897 = vmatprep.subr.mxu1 %v22618_v25  ;;  %v22679_v54 = vld [vmem:[#allocation157_spill] sm:$0xff] }
 0x4a6   :  { %5762 = vmatpush1.msra.mxu0 %v22619_v63  ;;  %5899 = vmatpush1.msra.mxu1 %v22620_v62  ;;  %v22678_v63 = vld [vmem:[#allocation218_spill] sm:$0xff] }
 0x4a7   :  { %5765 = vmatprep.subr.mxu0 %v22621_v50  ;;  %5901 = vmatprep.subr.mxu1 %v22622_v16  ;;  %v22676_v50 = vld [vmem:[#allocation152_spill] sm:$0xff] }
 0x4a8   :  { %5768 = vmatpush1.msra.mxu0 %v22623_v51  ;;  %5903 = vmatpush1.msra.mxu1 %v22624_v30  ;;  %v22644_v51 = vld [vmem:[#allocation148_spill] sm:$0xff] }
 0x4a9   :  { %5771 = vmatprep.subr.mxu0 %v22625_v3  ;;  %5905 = vmatprep.subr.mxu1 %v22626_v24  ;;  %v22637_v3 = vld [vmem:[#allocation125_spill] sm:$0xff] }
 0x4aa   :  { %5774 = vmatpush1.msra.mxu0 %v22627_v5  ;;  %5907 = vmatpush1.msra.mxu1 %v22628_v60  ;;  %v22638_v5 = vld [vmem:[#allocation29_spill] sm:$0xff] }
 0x4ab   :  { %5777 = vmatprep.subr.mxu0 %v22629_v28  ;;  %5909 = vmatprep.subr.mxu1 %v22630_v7  ;;  %v22639_v28 = vld [vmem:[#allocation131_spill] sm:$0xff] }
 0x4ac   :  { %5780 = vmatpush1.msra.mxu0 %v22631_v36  ;;  %5911 = vmatpush1.msra.mxu1 %v22632_v14  ;;  %v22640_v36 = vld [vmem:[#allocation135_spill] sm:$0xff] }
 0x4ad   :  { %5783 = vmatprep.subr.mxu0 %v22633_v6  ;;  %5913 = vmatprep.subr.mxu1 %v22634_v43  ;;  %v22641_v6 = vld [vmem:[#allocation140_spill] sm:$0xff] }
 0x4ae   :  { %5786 = vmatpush1.msra.mxu0 %v22635_v49  ;;  %5915 = vmatpush1.msra.mxu1 %v22636_v21  ;;  %v22642_v49 = vld [vmem:[#allocation142_spill] sm:$0xff] }
 0x4af   :  { %5789 = vmatprep.subr.mxu0 %v22637_v3  ;;  %5952 = vmatmul.mubr.f32.vlgmr.msra.gmra.mxu1 %v19068_v11  ;;  %v22643_v3 = vld [vmem:[#allocation146_spill] sm:$0xff] }
 0x4b0   :  { %6127 = vmatprep.subr.mxu1 %v22638_v5  ;;  %5792 = vmatpush1.msra.mxu0 %v22639_v28  ;;  %v22645_v28 = vld [vmem:[#allocation150_spill] sm:$0xff] }
 0x4b1   :  { %6129 = vmatpush1.msra.mxu1 %v22355_v57  ;;  %5795 = vmatprep.subr.mxu0 %v22640_v36  ;;  %v22651_v36 = vld [vmem:[#allocation54_spill] sm:$0xff] }
 0x4b2   :  { %6131 = vmatprep.subr.mxu1 %v22357_v1  ;;  %5798 = vmatpush1.msra.mxu0 %v22641_v6  ;;  %v22646_v6 = vld [vmem:[#allocation23_spill] sm:$0xff] }
 0x4b3   :  { %6133 = vmatpush1.msra.mxu1 %v22361_v17  ;;  %5801 = vmatprep.subr.mxu0 %v22642_v49  ;;  %v22647_v49 = vld [vmem:[#allocation40_spill] sm:$0xff] }
 0x4b4   :  { %6135 = vmatprep.subr.mxu1 %v22363_v37  ;;  %5804 = vmatpush1.msra.mxu0 %v22643_v3  ;;  %v22648_v3 = vld [vmem:[#allocation26_spill] sm:$0xff] }
 0x4b5   :  { %6137 = vmatpush1.msra.mxu1 %v22365_v13  ;;  %5807 = vmatprep.subr.mxu0 %v22644_v51  ;;  %v22649_v51 = vld [vmem:[#allocation16_spill] sm:$0xff] }
 0x4b6   :  { %6139 = vmatprep.subr.mxu1 %v22368_v42  ;;  %5810 = vmatpush1.msra.mxu0 %v22645_v28  ;;  %v22650_v28 = vld [vmem:[#allocation43_spill] sm:$0xff] }
 0x4b7   :  { %5843 = vmatprep.mubr.f32.mxu0 %v21931_v9  ;;  %6141 = vmatpush1.msra.mxu1 %v22370_v2 }
 0x4b8   :  { %5846 = vmatmul.mubr.f32.vlgmr.msra.gmra.mxu0 %v19062_v46  ;;  %5961 = vmatprep.subr.mxu0 %v22646_v6  ;;  %v22652_v6 = vld [vmem:[#allocation17_spill] sm:$0xff] }
 0x4b9   :  { %6143 = vmatprep.subr.mxu1 %v22373_v31  ;;  %5965 = vmatpush1.msra.mxu0 %v22647_v49  ;;  %v22653_v49 = vld [vmem:[#allocation59_spill] sm:$0xff] }
 0x4ba   :  { %6145 = vmatpush1.msra.mxu1 %v22376_v52  ;;  %5969 = vmatprep.subr.mxu0 %v22648_v3  ;;  %v22654_v3 = vld [vmem:[#allocation61_spill] sm:$0xff] }
 0x4bb   :  { %6147 = vmatprep.subr.mxu1 %v22378_v8  ;;  %5973 = vmatpush1.msra.mxu0 %v22649_v51  ;;  %v22655_v51 = vld [vmem:[#allocation73_spill] sm:$0xff] }
 0x4bc   :  { %6149 = vmatpush1.msra.mxu1 %v22380_v15  ;;  %5977 = vmatprep.subr.mxu0 %v22650_v28  ;;  %v22656_v28 = vld [vmem:[#allocation76_spill] sm:$0xff] }
 0x4bd   :  { %6151 = vmatprep.subr.mxu1 %v22384_v22  ;;  %5981 = vmatpush1.msra.mxu0 %v22651_v36  ;;  %v22657_v36 = vld [vmem:[#allocation77_spill] sm:$0xff] }
 0x4be   :  { %6153 = vmatpush1.msra.mxu1 %v22386_v4  ;;  %5985 = vmatprep.subr.mxu0 %v22652_v6  ;;  %v22658_v6 = vld [vmem:[#allocation78_spill] sm:$0xff] }
 0x4bf   :  { %6155 = vmatprep.subr.mxu1 %v22388_v33  ;;  %5989 = vmatpush1.msra.mxu0 %v22653_v49  ;;  %v22659_v49 = vld [vmem:[#allocation93_spill] sm:$0xff] }
 0x4c0   :  { %6157 = vmatpush1.msra.mxu1 %v22391_v48  ;;  %5993 = vmatprep.subr.mxu0 %v22654_v3  ;;  %v22660_v3 = vld [vmem:[#allocation94_spill] sm:$0xff] }
 0x4c1   :  { %6159 = vmatprep.subr.mxu1 %v22393_v18  ;;  %5997 = vmatpush1.msra.mxu0 %v22655_v51  ;;  %v22661_v51 = vld [vmem:[#allocation95_spill] sm:$0xff] }
 0x4c2   :  { %6161 = vmatpush1.msra.mxu1 %v22395_v44  ;;  %6001 = vmatprep.subr.mxu0 %v22656_v28  ;;  %v22662_v28 = vld [vmem:[#allocation96_spill] sm:$0xff] }
 0x4c3   :  { %6163 = vmatprep.subr.mxu1 %v22397_v61  ;;  %6005 = vmatpush1.msra.mxu0 %v22657_v36  ;;  %v22663_v36 = vld [vmem:[#allocation98_spill] sm:$0xff] }
 0x4c4   :  { %6165 = vmatpush1.msra.mxu1 %v22399_v0  ;;  %6009 = vmatprep.subr.mxu0 %v22658_v6  ;;  %v22664_v6 = vld [vmem:[#allocation111_spill] sm:$0xff] }
 0x4c5   :  { %6167 = vmatprep.subr.mxu1 %v22614_v59  ;;  %6013 = vmatpush1.msra.mxu0 %v22659_v49  ;;  %v22665_v49 = vld [vmem:[#allocation112_spill] sm:$0xff] }
 0x4c6   :  { %6169 = vmatpush1.msra.mxu1 %v22616_v19  ;;  %6017 = vmatprep.subr.mxu0 %v22660_v3  ;;  %v22666_v3 = vld [vmem:[#allocation113_spill] sm:$0xff] }
 0x4c7   :  { %6171 = vmatprep.subr.mxu1 %v22618_v25  ;;  %6021 = vmatpush1.msra.mxu0 %v22661_v51  ;;  %v22667_v51 = vld [vmem:[#allocation115_spill] sm:$0xff] }
 0x4c8   :  { %6173 = vmatpush1.msra.mxu1 %v22620_v62  ;;  %6025 = vmatprep.subr.mxu0 %v22662_v28  ;;  %v22668_v28 = vld [vmem:[#allocation129_spill] sm:$0xff] }
 0x4c9   :  { %6175 = vmatprep.subr.mxu1 %v22622_v16  ;;  %6029 = vmatpush1.msra.mxu0 %v22663_v36  ;;  %v22669_v36 = vld [vmem:[#allocation133_spill] sm:$0xff] }
 0x4ca   :  { %6177 = vmatpush1.msra.mxu1 %v22624_v30  ;;  %6033 = vmatprep.subr.mxu0 %v22664_v6  ;;  %v22673_v6 = vld [vmem:[#allocation147_spill] sm:$0xff] }
 0x4cb   :  { %6179 = vmatprep.subr.mxu1 %v22626_v24  ;;  %6037 = vmatpush1.msra.mxu0 %v22665_v49  ;;  %v22670_v49 = vld [vmem:[#allocation134_spill] sm:$0xff] }
 0x4cc   :  { %6181 = vmatpush1.msra.mxu1 %v22628_v60  ;;  %6041 = vmatprep.subr.mxu0 %v22666_v3  ;;  %v22671_v3 = vld [vmem:[#allocation145_spill] sm:$0xff] }
 0x4cd   :  { %6183 = vmatprep.subr.mxu1 %v22630_v7  ;;  %6045 = vmatpush1.msra.mxu0 %v22667_v51  ;;  %v22672_v51 = vld [vmem:[#allocation210_spill] sm:$0xff] }
 0x4ce   :  { %6185 = vmatpush1.msra.mxu1 %v22632_v14  ;;  %6049 = vmatprep.subr.mxu0 %v22668_v28  ;;  %v22674_v28 = vld [vmem:[#allocation149_spill] sm:$0xff] }
 0x4cf   :  { %6187 = vmatprep.subr.mxu1 %v22634_v43  ;;  %6053 = vmatpush1.msra.mxu0 %v22669_v36  ;;  %v22675_v36 = vld [vmem:[#allocation215_spill] sm:$0xff] }
 0x4d0   :  { %6189 = vmatpush1.msra.mxu1 %v22636_v21  ;;  %6222 = vmatprep.mubr.f32.mxu1 %v21931_v9 }
 0x4d1   :  { %6057 = vmatprep.subr.mxu0 %v22670_v49  ;;  %6224 = vmatmul.mubr.f32.vlgmr.msra.gmra.mxu1 %v19057_v23  ;;  %v22677_v49 = vld [vmem:[#allocation155_spill] sm:$0xff] }
 0x4d2   :  { %14767 = vmatprep.subr.mxu1 %v21931_v9  ;;  %6061 = vmatpush1.msra.mxu0 %v22671_v3  ;;  %v22693_v3 = vld [vmem:[#allocation245_spill] sm:$0xff] }
 0x4d3   :  { %14768 = vmatpush3.msra.mxu1 %v22672_v51  ;;  %6065 = vmatprep.subr.mxu0 %v22673_v6  ;;  %v22680_v51 = vld [vmem:[#allocation159_spill] sm:$0xff]  ;;  %v22681_v6 = vld [vmem:[#allocation222_spill] sm:$0xff] }
 0x4d4   :  { %14769 = vmatprep.subr.mxu1 %v21931_v9  ;;  %6069 = vmatpush1.msra.mxu0 %v22674_v28  ;;  %v22691_v28 = vld [vmem:[#allocation242_spill] sm:$0xff] }
 0x4d5   :  { %14770 = vmatpush3.msra.mxu1 %v22675_v36  ;;  %6073 = vmatprep.subr.mxu0 %v22676_v50  ;;  %v22682_v50 = vld [vmem:[#allocation191_spill] sm:$0xff]  ;;  %v22689_v36 = vld [vmem:[#allocation238_spill] sm:$0xff] }
 0x4d6   :  { %14771 = vmatprep.subr.mxu1 %v21931_v9  ;;  %6077 = vmatpush1.msra.mxu0 %v22677_v49  ;;  %v22683_v49 = vld [vmem:[#allocation226_spill] sm:$0xff] }
 0x4d7   :  { %14772 = vmatpush3.msra.mxu1 %v22678_v63  ;;  %6081 = vmatprep.subr.mxu0 %v22679_v54  ;;  %v22684_v54 = vld [vmem:[#allocation192_spill] sm:$0xff]  ;;  %v22687_v63 = vld [vmem:[#allocation234_spill] sm:$0xff] }
 0x4d8   :  { %14773 = vmatprep.subr.mxu1 %v21931_v9  ;;  %6085 = vmatpush1.msra.mxu0 %v22680_v51  ;;  %v22685_v51 = vld [vmem:[#allocation230_spill] sm:$0xff] }
 0x4d9   :  { %6118 = vmatprep.mubr.f32.mxu0 %v21931_v9  ;;  %14774 = vmatpush3.msra.mxu1 %v22681_v6  ;;  %v22686_v6 = vld [vmem:[#allocation193_spill] sm:$0xff] }
 0x4da   :  { %6120 = vmatmul.mubr.f32.vlgmr.msra.gmra.mxu0 %v19057_v23  ;;  %14732 = vmatprep.subr.mxu0 %v21931_v9 }
 0x4db   :  { %14775 = vmatprep.subr.mxu1 %v21931_v9  ;;  %14733 = vmatpush3.msra.mxu0 %v22682_v50 }
 0x4dc   :  { %14776 = vmatpush3.msra.mxu1 %v22683_v49  ;;  %14734 = vmatprep.subr.mxu0 %v21931_v9  ;;  %v22688_v49 = vld [vmem:[#allocation196_spill] sm:$0xff] }
 0x4dd   :  { %14777 = vmatprep.subr.mxu1 %v21931_v9  ;;  %14735 = vmatpush3.msra.mxu0 %v22684_v54 }
 0x4de   :  { %14778 = vmatpush3.msra.mxu1 %v22685_v51  ;;  %14736 = vmatprep.subr.mxu0 %v21931_v9  ;;  %v22690_v51 = vld [vmem:[#allocation200_spill] sm:$0xff] }
 0x4df   :  { %14779 = vmatprep.subr.mxu1 %v21931_v9  ;;  %14737 = vmatpush3.msra.mxu0 %v22686_v6 }
 0x4e0   :  { %14780 = vmatpush3.msra.mxu1 %v22687_v63  ;;  %14738 = vmatprep.subr.mxu0 %v21931_v9  ;;  %v22692_v63 = vld [vmem:[#allocation201_spill] sm:$0xff] }
 0x4e1   :  { %14781 = vmatprep.subr.mxu1 %v21931_v9  ;;  %14739 = vmatpush3.msra.mxu0 %v22688_v49 }
 0x4e2   :  { %14782 = vmatpush3.msra.mxu1 %v22689_v36  ;;  %14740 = vmatprep.subr.mxu0 %v21931_v9  ;;  %v22694_v36 = vld [vmem:[#allocation205_spill] sm:$0xff] }
 0x4e3   :  { %14783 = vmatprep.subr.mxu1 %v21931_v9  ;;  %14741 = vmatpush3.msra.mxu0 %v22690_v51 }
 0x4e4   :  { %14784 = vmatpush3.msra.mxu1 %v22691_v28  ;;  %14742 = vmatprep.subr.mxu0 %v21931_v9  ;;  %v22696_v28 = vld [vmem:[#allocation209_spill] sm:$0xff] }
 0x4e5   :  { %14785 = vmatprep.subr.mxu1 %v21931_v9  ;;  %14743 = vmatpush3.msra.mxu0 %v22692_v63 }
 0x4e6   :  { %14786 = vmatpush3.msra.mxu1 %v22693_v3  ;;  %14744 = vmatprep.subr.mxu0 %v21931_v9  ;;  %v22698_v3 = vld [vmem:[#allocation211_spill] sm:$0xff] }
 0x4e7   :  { %14787 = vmatprep.subr.mxu1 %v21931_v9  ;;  %14745 = vmatpush3.msra.mxu0 %v22694_v36 }
 0x4e8   :  { %14788 = vmatpush3.msra.mxu1 %v22695_v39  ;;  %14746 = vmatprep.subr.mxu0 %v21931_v9  ;;  %v22700_v39 = vld [vmem:[#allocation216_spill] sm:$0xff] }
 0x4e9   :  { %14789 = vmatprep.subr.mxu1 %v21931_v9  ;;  %14747 = vmatpush3.msra.mxu0 %v22696_v28 }
 0x4ea   :  { %14790 = vmatpush3.msra.mxu1 %v22697_v56  ;;  %14748 = vmatprep.subr.mxu0 %v21931_v9  ;;  %v22702_v56 = vld [vmem:[#allocation219_spill] sm:$0xff] }
 0x4eb   :  { %14791 = vmatprep.subr.mxu1 %v21931_v9  ;;  %14749 = vmatpush3.msra.mxu0 %v22698_v3 }
 0x4ec   :  { %14792 = vmatpush3.msra.mxu1 %v22699_v29  ;;  %14750 = vmatprep.subr.mxu0 %v21931_v9  ;;  %v22704_v29 = vld [vmem:[#allocation223_spill] sm:$0xff] }
 0x4ed   :  { %14793 = vmatprep.subr.mxu1 %v21931_v9  ;;  %14751 = vmatpush3.msra.mxu0 %v22700_v39 }
 0x4ee   :  { %14794 = vmatpush3.msra.mxu1 %v22701_v53  ;;  %14752 = vmatprep.subr.mxu0 %v21931_v9  ;;  %v22706_v53 = vld [vmem:[#allocation229_spill] sm:$0xff] }
 0x4ef   :  { %14795 = vmatprep.subr.mxu1 %v21931_v9  ;;  %14753 = vmatpush3.msra.mxu0 %v22702_v56 }
 0x4f0   :  { %14796 = vmatpush3.msra.mxu1 %v22703_v20  ;;  %14754 = vmatprep.subr.mxu0 %v21931_v9  ;;  %v22707_v20 = vld [vmem:[#allocation233_spill] sm:$0xff] }
 0x4f1   :  { %14797 = vmatprep.subr.mxu1 %v21931_v9  ;;  %14755 = vmatpush3.msra.mxu0 %v22704_v29 }
 0x4f2   :  { %14798 = vmatpush3.msra.mxu1 %v22705_v34  ;;  %14799 = vmatprep.mubr.msk.f32.mxu1 %vm15962_vm0, %v21931_v9  ;;  %v22708_v34 = vld [vmem:[#allocation236_spill] sm:$0xff] }
 0x4f3   :  { %14756 = vmatprep.subr.mxu0 %v21931_v9  ;;  %14800 = vmatmul.mubr.f32.vlgmr.msra.gmra.mxu1 %v19057_v23 }
 0x4f4   :  { %14837 = vmatprep.subr.mxu1 %v21931_v9  ;;  %14757 = vmatpush3.msra.mxu0 %v22706_v53 }
 0x4f5   :  { %14838 = vmatpush3.msra.mxu1 %v22682_v50  ;;  %14758 = vmatprep.subr.mxu0 %v21931_v9 }
 0x4f6   :  { %14839 = vmatprep.subr.mxu1 %v21931_v9  ;;  %14759 = vmatpush3.msra.mxu0 %v22707_v20 }
 0x4f7   :  { %14840 = vmatpush3.msra.mxu1 %v22684_v54  ;;  %14760 = vmatprep.subr.mxu0 %v21931_v9 }
 0x4f8   :  { %14841 = vmatprep.subr.mxu1 %v21931_v9  ;;  %14761 = vmatpush3.msra.mxu0 %v22708_v34 }
 0x4f9   :  { %14842 = vmatpush3.msra.mxu1 %v22686_v6  ;;  %14762 = vmatprep.subr.mxu0 %v21931_v9 }
 0x4fa   :  { %14843 = vmatprep.subr.mxu1 %v21931_v9  ;;  %14763 = vmatpush3.msra.mxu0 %v22709_v47 }
 0x4fb   :  { %14764 = vmatprep.mubr.msk.f32.mxu0 %vm15962_vm0, %v21931_v9  ;;  %14844 = vmatpush3.msra.mxu1 %v22688_v49 }
 0x4fc   :  { %14765 = vmatmul.mubr.f32.vlgmr.msra.gmra.mxu0 %v19076_v40  ;;  %14802 = vmatprep.subr.mxu0 %v21931_v9  ;;  %v22712_v40 = vld [vmem:[#allocation199_spill] sm:$0xff] }
 0x4fd   :  { %14845 = vmatprep.subr.mxu1 %v21931_v9  ;;  %14803 = vmatpush3.msra.mxu0 %v22710_v58  ;;  %v22713_v58 = vld [vmem:[#allocation202_spill] sm:$0xff] }
 0x4fe   :  { %14846 = vmatpush3.msra.mxu1 %v22690_v51  ;;  %14804 = vmatprep.subr.mxu0 %v21931_v9 }
 0x4ff   :  { %14847 = vmatprep.subr.mxu1 %v21931_v9  ;;  %14805 = vmatpush3.msra.mxu0 %v22711_v35  ;;  %v22714_v35 = vld [vmem:[#allocation206_spill] sm:$0xff] }
 0x500   :  { %14848 = vmatpush3.msra.mxu1 %v22692_v63  ;;  %14806 = vmatprep.subr.mxu0 %v21931_v9 }
 0x501   :  { %14849 = vmatprep.subr.mxu1 %v21931_v9  ;;  %14807 = vmatpush3.msra.mxu0 %v22712_v40  ;;  %v22715_v40 = vld [vmem:[#allocation208_spill] sm:$0xff] }
 0x502   :  { %14850 = vmatpush3.msra.mxu1 %v22694_v36  ;;  %14808 = vmatprep.subr.mxu0 %v21931_v9 }
 0x503   :  { %14851 = vmatprep.subr.mxu1 %v21931_v9  ;;  %14809 = vmatpush3.msra.mxu0 %v22713_v58  ;;  %v22716_v58 = vld [vmem:[#allocation213_spill] sm:$0xff] }
 0x504   :  { %14852 = vmatpush3.msra.mxu1 %v22696_v28  ;;  %14810 = vmatprep.subr.mxu0 %v21931_v9 }
 0x505   :  { %14853 = vmatprep.subr.mxu1 %v21931_v9  ;;  %14811 = vmatpush3.msra.mxu0 %v22714_v35  ;;  %v22717_v35 = vld [vmem:[#allocation217_spill] sm:$0xff] }
 0x506   :  { %14854 = vmatpush3.msra.mxu1 %v22698_v3  ;;  %14812 = vmatprep.subr.mxu0 %v21931_v9 }
 0x507   :  { %14855 = vmatprep.subr.mxu1 %v21931_v9  ;;  %14813 = vmatpush3.msra.mxu0 %v22715_v40  ;;  %v22718_v40 = vld [vmem:[#allocation221_spill] sm:$0xff] }
 0x508   :  { %14856 = vmatpush3.msra.mxu1 %v22700_v39  ;;  %14814 = vmatprep.subr.mxu0 %v21931_v9 }
 0x509   :  { %14857 = vmatprep.subr.mxu1 %v21931_v9  ;;  %14815 = vmatpush3.msra.mxu0 %v22716_v58  ;;  %v22719_v58 = vld [vmem:[#allocation225_spill] sm:$0xff] }
 0x50a   :  { %14858 = vmatpush3.msra.mxu1 %v22702_v56  ;;  %14816 = vmatprep.subr.mxu0 %v21931_v9 }
 0x50b   :  { %14859 = vmatprep.subr.mxu1 %v21931_v9  ;;  %14817 = vmatpush3.msra.mxu0 %v22717_v35  ;;  %v22720_v35 = vld [vmem:[#allocation228_spill] sm:$0xff] }
 0x50c   :  { %14860 = vmatpush3.msra.mxu1 %v22704_v29  ;;  %14818 = vmatprep.subr.mxu0 %v21931_v9 }
 0x50d   :  { %14861 = vmatprep.subr.mxu1 %v21931_v9  ;;  %14819 = vmatpush3.msra.mxu0 %v22718_v40  ;;  %v22721_v40 = vld [vmem:[#allocation232_spill] sm:$0xff] }
 0x50e   :  { %14862 = vmatpush3.msra.mxu1 %v22706_v53  ;;  %14820 = vmatprep.subr.mxu0 %v21931_v9 }
 0x50f   :  { %14863 = vmatprep.subr.mxu1 %v21931_v9  ;;  %14821 = vmatpush3.msra.mxu0 %v22719_v58  ;;  %v22724_v58 = vld [vmem:[#allocation244_spill] sm:$0xff] }
 0x510   :  { %14864 = vmatpush3.msra.mxu1 %v22707_v20  ;;  %14822 = vmatprep.subr.mxu0 %v21931_v9 }
 0x511   :  { %14865 = vmatprep.subr.mxu1 %v21931_v9  ;;  %14823 = vmatpush3.msra.mxu0 %v22720_v35  ;;  %v22722_v35 = vld [vmem:[#allocation237_spill] sm:$0xff] }
 0x512   :  { %14866 = vmatpush3.msra.mxu1 %v22708_v34  ;;  %14824 = vmatprep.subr.mxu0 %v21931_v9 }
 0x513   :  { %14867 = vmatprep.subr.mxu1 %v21931_v9  ;;  %14825 = vmatpush3.msra.mxu0 %v22721_v40  ;;  %v22723_v40 = vld [vmem:[#allocation241_spill] sm:$0xff] }
 0x514   :  { %14868 = vmatpush3.msra.mxu1 %v22709_v47  ;;  %14869 = vmatprep.mubr.msk.f32.mxu1 %vm15962_vm0, %v21931_v9 }
 0x515   :  { %14826 = vmatprep.subr.mxu0 %v21931_v9  ;;  %14870 = vmatmul.mubr.f32.vlgmr.msra.gmra.mxu1 %v19068_v11  ;;  %v22725_v11 = vld [vmem:[#allocation247_spill] sm:$0xff] }
 0x516   :  { %14907 = vmatprep.subr.mxu1 %v21931_v9  ;;  %14827 = vmatpush3.msra.mxu0 %v22722_v35  ;;  %v22742_v35 = vld [vmem:[#allocation60_spill] sm:$0xff] }
 0x517   :  { %14908 = vmatpush3.msra.mxu1 %v22682_v50  ;;  %14828 = vmatprep.subr.mxu0 %v21931_v9 }
 0x518   :  { %14909 = vmatprep.subr.mxu1 %v21931_v9  ;;  %14829 = vmatpush3.msra.mxu0 %v22723_v40  ;;  %v22740_v40 = vld [vmem:[#allocation246_spill] sm:$0xff] }
 0x519   :  { %14910 = vmatpush3.msra.mxu1 %v22684_v54  ;;  %14830 = vmatprep.subr.mxu0 %v21931_v9 }
 0x51a   :  { %14911 = vmatprep.subr.mxu1 %v21931_v9  ;;  %14831 = vmatpush3.msra.mxu0 %v22724_v58  ;;  %v22726_v58 = vld [vmem:[#allocation198_spill] sm:$0xff] }
 0x51b   :  { %14912 = vmatpush3.msra.mxu1 %v22686_v6  ;;  %14832 = vmatprep.subr.mxu0 %v21931_v9 }
 0x51c   :  { %14913 = vmatprep.subr.mxu1 %v21931_v9  ;;  %14833 = vmatpush3.msra.mxu0 %v22725_v11  ;;  %v22727_v11 = vld [vmem:[#allocation203_spill] sm:$0xff] }
 0x51d   :  { %14834 = vmatprep.mubr.msk.f32.mxu0 %vm15962_vm0, %v21931_v9  ;;  %14914 = vmatpush3.msra.mxu1 %v22688_v49 }
 0x51e   :  { %14835 = vmatmul.mubr.f32.vlgmr.msra.gmra.mxu0 %v19062_v46  ;;  %14872 = vmatprep.subr.mxu0 %v21931_v9  ;;  %v22728_v46 = vld [vmem:[#allocation204_spill] sm:$0xff] }
 0x51f   :  { %14915 = vmatprep.subr.mxu1 %v21931_v9  ;;  %14873 = vmatpush3.msra.mxu0 %v22726_v58  ;;  %v22729_v58 = vld [vmem:[#allocation207_spill] sm:$0xff] }
 0x520   :  { %14916 = vmatpush3.msra.mxu1 %v22690_v51  ;;  %14874 = vmatprep.subr.mxu0 %v21931_v9 }
 0x521   :  { %14917 = vmatprep.subr.mxu1 %v21931_v9  ;;  %14875 = vmatpush3.msra.mxu0 %v22727_v11  ;;  %v22730_v11 = vld [vmem:[#allocation212_spill] sm:$0xff] }
 0x522   :  { %14918 = vmatpush3.msra.mxu1 %v22692_v63  ;;  %14876 = vmatprep.subr.mxu0 %v21931_v9 }
 0x523   :  { %14919 = vmatprep.subr.mxu1 %v21931_v9  ;;  %14877 = vmatpush3.msra.mxu0 %v22728_v46  ;;  %v22731_v46 = vld [vmem:[#allocation214_spill] sm:$0xff] }
 0x524   :  { %14920 = vmatpush3.msra.mxu1 %v22694_v36  ;;  %14878 = vmatprep.subr.mxu0 %v21931_v9 }
 0x525   :  { %14921 = vmatprep.subr.mxu1 %v21931_v9  ;;  %14879 = vmatpush3.msra.mxu0 %v22729_v58  ;;  %v22732_v58 = vld [vmem:[#allocation220_spill] sm:$0xff] }
 0x526   :  { %14922 = vmatpush3.msra.mxu1 %v22696_v28  ;;  %14880 = vmatprep.subr.mxu0 %v21931_v9 }
 0x527   :  { %14923 = vmatprep.subr.mxu1 %v21931_v9  ;;  %14881 = vmatpush3.msra.mxu0 %v22730_v11  ;;  %v22733_v11 = vld [vmem:[#allocation224_spill] sm:$0xff] }
 0x528   :  { %14924 = vmatpush3.msra.mxu1 %v22698_v3  ;;  %14882 = vmatprep.subr.mxu0 %v21931_v9 }
 0x529   :  { %14925 = vmatprep.subr.mxu1 %v21931_v9  ;;  %14883 = vmatpush3.msra.mxu0 %v22731_v46  ;;  %v22734_v46 = vld [vmem:[#allocation227_spill] sm:$0xff] }
 0x52a   :  { %14926 = vmatpush3.msra.mxu1 %v22700_v39  ;;  %14884 = vmatprep.subr.mxu0 %v21931_v9 }
 0x52b   :  { %14927 = vmatprep.subr.mxu1 %v21931_v9  ;;  %14885 = vmatpush3.msra.mxu0 %v22732_v58  ;;  %v22735_v58 = vld [vmem:[#allocation231_spill] sm:$0xff] }
 0x52c   :  { %14928 = vmatpush3.msra.mxu1 %v22702_v56  ;;  %14886 = vmatprep.subr.mxu0 %v21931_v9 }
 0x52d   :  { %14929 = vmatprep.subr.mxu1 %v21931_v9  ;;  %14887 = vmatpush3.msra.mxu0 %v22733_v11  ;;  %v22736_v11 = vld [vmem:[#allocation235_spill] sm:$0xff] }
 0x52e   :  { %14930 = vmatpush3.msra.mxu1 %v22704_v29  ;;  %14888 = vmatprep.subr.mxu0 %v21931_v9 }
 0x52f   :  { %14931 = vmatprep.subr.mxu1 %v21931_v9  ;;  %14889 = vmatpush3.msra.mxu0 %v22734_v46  ;;  %v22737_v46 = vld [vmem:[#allocation239_spill] sm:$0xff] }
 0x530   :  { %14932 = vmatpush3.msra.mxu1 %v22706_v53  ;;  %14890 = vmatprep.subr.mxu0 %v21931_v9  ;;  %v22747_v53 = vld [vmem:[#allocation75_spill] sm:$0xff] }
 0x531   :  { %14933 = vmatprep.subr.mxu1 %v21931_v9  ;;  %14891 = vmatpush3.msra.mxu0 %v22735_v58  ;;  %v22738_v58 = vld [vmem:[#allocation243_spill] sm:$0xff] }
 0x532   :  { %14934 = vmatpush3.msra.mxu1 %v22707_v20  ;;  %14892 = vmatprep.subr.mxu0 %v21931_v9  ;;  %v22746_v20 = vld [vmem:[#allocation251_spill] sm:$0xff] }
 0x533   :  { %14935 = vmatprep.subr.mxu1 %v21931_v9  ;;  %14893 = vmatpush3.msra.mxu0 %v22736_v11  ;;  %v22739_v11 = vld [vmem:[#allocation38_spill] sm:$0xff] }
 0x534   :  { %14936 = vmatpush3.msra.mxu1 %v22708_v34  ;;  %14894 = vmatprep.subr.mxu0 %v21931_v9  ;;  %v22744_v34 = vld [vmem:[#allocation63_spill] sm:$0xff] }
 0x535   :  { %14937 = vmatprep.subr.mxu1 %v21931_v9  ;;  %14895 = vmatpush3.msra.mxu0 %v22737_v46  ;;  %v22741_v46 = vld [vmem:[#allocation58_spill] sm:$0xff] }
 0x536   :  { %14938 = vmatpush3.msra.mxu1 %v22709_v47  ;;  %14939 = vmatprep.mubr.msk.f32.mxu1 %vm15962_vm0, %v21931_v9  ;;  %v22743_v47 = vld [vmem:[#allocation249_spill] sm:$0xff] }
 0x537   :  { %14896 = vmatprep.subr.mxu0 %v21931_v9  ;;  %14940 = vmatmul.mubr.f32.vlgmr.msra.gmra.mxu1 %v19057_v23 }
 0x538   :  { %14897 = vmatpush3.msra.mxu0 %v22738_v58  ;;  %14904 = vmatprep.mubr.msk.f32.mxu0 %vm15962_vm0, %v21931_v9  ;;  %v22745_v58 = vld [vmem:[#allocation74_spill] sm:$0xff] }
 0x539   :  { %14898 = vmatprep.subr.mxu0 %v21931_v9  ;;  %7032 = vmatprep.subr.mxu1 %v22739_v11 }
 0x53a   :  { %14899 = vmatpush3.msra.mxu0 %v22740_v40  ;;  %7038 = vmatpush1.msra.mxu1 %v22741_v46  ;;  %v22748_v40 = vld [vmem:[#allocation82_spill] sm:$0xff]  ;;  %v22749_v46 = vld [vmem:[#allocation83_spill] sm:$0xff] }
 0x53b   :  { %14900 = vmatprep.subr.mxu0 %v21931_v9  ;;  %7044 = vmatprep.subr.mxu1 %v22742_v35  ;;  %v22750_v35 = vld [vmem:[#allocation87_spill] sm:$0xff] }
 0x53c   :  { %14901 = vmatpush3.msra.mxu0 %v22743_v47  ;;  %7050 = vmatpush1.msra.mxu1 %v22744_v34  ;;  %v22751_v34 = vld [vmem:[#allocation97_spill] sm:$0xff] }
 0x53d   :  { %14902 = vmatprep.subr.mxu0 %v21931_v9  ;;  %7056 = vmatprep.subr.mxu1 %v22745_v58  ;;  %v22752_v58 = vld [vmem:[#allocation102_spill] sm:$0xff] }
 0x53e   :  { %14903 = vmatpush3.msra.mxu0 %v22746_v20  ;;  %7062 = vmatpush1.msra.mxu1 %v22747_v53  ;;  %v22753_v53 = vld [vmem:[#allocation105_spill] sm:$0xff] }
 0x53f   :  { %14905 = vmatmul.mubr.f32.vlgmr.msra.gmra.mxu0 %v19057_v23  ;;  %7068 = vmatprep.subr.mxu1 %v22748_v40  ;;  %v22754_v23 = vld [vmem:[#allocation108_spill] sm:$0xff] }
 0x540   :  { %7074 = vmatpush1.msra.mxu1 %v22749_v46  ;;  %6920 = vmatprep.subr.mxu0 %v22638_v5  ;;  %v22755_v46 = vld [vmem:[#allocation114_spill] sm:$0xff] }
 0x541   :  { %7080 = vmatprep.subr.mxu1 %v22750_v35  ;;  %6922 = vmatpush1.msra.mxu0 %v22355_v57  ;;  %v22756_v35 = vld [vmem:[#allocation119_spill] sm:$0xff] }
 0x542   :  { %7086 = vmatpush1.msra.mxu1 %v22751_v34  ;;  %6924 = vmatprep.subr.mxu0 %v22357_v1  ;;  %v22757_v34 = vld [vmem:[#allocation120_spill] sm:$0xff] }
 0x543   :  { %7092 = vmatprep.subr.mxu1 %v22752_v58  ;;  %6926 = vmatpush1.msra.mxu0 %v22361_v17  ;;  %v22758_v58 = vld [vmem:[#allocation121_spill] sm:$0xff] }
 0x544   :  { %7098 = vmatpush1.msra.mxu1 %v22753_v53  ;;  %6928 = vmatprep.subr.mxu0 %v22363_v37  ;;  %v22759_v53 = vld [vmem:[#allocation126_spill] sm:$0xff] }
 0x545   :  { %7104 = vmatprep.subr.mxu1 %v22754_v23  ;;  %6930 = vmatpush1.msra.mxu0 %v22365_v13  ;;  %v22760_v23 = vld [vmem:[#allocation138_spill] sm:$0xff] }
 0x546   :  { %7110 = vmatpush1.msra.mxu1 %v22755_v46  ;;  %6932 = vmatprep.subr.mxu0 %v22368_v42  ;;  %v22761_v46 = vld [vmem:[#allocation141_spill] sm:$0xff] }
 0x547   :  { %7116 = vmatprep.subr.mxu1 %v22756_v35  ;;  %6934 = vmatpush1.msra.mxu0 %v22370_v2  ;;  %v22762_v35 = vld [vmem:[#allocation143_spill] sm:$0xff] }
 0x548   :  { %7122 = vmatpush1.msra.mxu1 %v22757_v34  ;;  %6936 = vmatprep.subr.mxu0 %v22373_v31  ;;  %v22763_v34 = vld [vmem:[#allocation144_spill] sm:$0xff] }
 0x549   :  { %7128 = vmatprep.subr.mxu1 %v22758_v58  ;;  %6938 = vmatpush1.msra.mxu0 %v22376_v52  ;;  %v22764_v58 = vld [vmem:[#allocation151_spill] sm:$0xff] }
 0x54a   :  { %7134 = vmatpush1.msra.mxu1 %v22759_v53  ;;  %6940 = vmatprep.subr.mxu0 %v22378_v8  ;;  %v22765_v53 = vld [vmem:[#allocation156_spill] sm:$0xff] }
 0x54b   :  { %7140 = vmatprep.subr.mxu1 %v22760_v23  ;;  %6942 = vmatpush1.msra.mxu0 %v22380_v15  ;;  %v22766_v23 = vld [vmem:[#allocation158_spill] sm:$0xff] }
 0x54c   :  { %7146 = vmatpush1.msra.mxu1 %v22761_v46  ;;  %6944 = vmatprep.subr.mxu0 %v22384_v22  ;;  %v22767_v46 = vld [vmem:[#allocation160_spill] sm:$0xff] }
 0x54d   :  { %7152 = vmatprep.subr.mxu1 %v22762_v35  ;;  %6946 = vmatpush1.msra.mxu0 %v22386_v4  ;;  %v22768_v35 = vld [vmem:[#allocation161_spill] sm:$0xff] }
 0x54e   :  { %7158 = vmatpush1.msra.mxu1 %v22763_v34  ;;  %6948 = vmatprep.subr.mxu0 %v22388_v33  ;;  %v22769_v34 = vld [vmem:[#allocation163_spill] sm:$0xff] }
 0x54f   :  { %7164 = vmatprep.subr.mxu1 %v22764_v58  ;;  %6950 = vmatpush1.msra.mxu0 %v22391_v48  ;;  %v22770_v58 = vld [vmem:[#allocation164_spill] sm:$0xff] }
 0x550   :  { %7170 = vmatpush1.msra.mxu1 %v22765_v53  ;;  %6952 = vmatprep.subr.mxu0 %v22393_v18  ;;  %v22771_v53 = vld [vmem:[#allocation165_spill] sm:$0xff] }
 0x551   :  { %7176 = vmatprep.subr.mxu1 %v22766_v23  ;;  %6954 = vmatpush1.msra.mxu0 %v22395_v44  ;;  %v22772_v23 = vld [vmem:[#allocation166_spill] sm:$0xff] }
 0x552   :  { %7182 = vmatpush1.msra.mxu1 %v22767_v46  ;;  %6956 = vmatprep.subr.mxu0 %v22397_v61  ;;  %v22773_v46 = vld [vmem:[#allocation167_spill] sm:$0xff] }
 0x553   :  { %7188 = vmatprep.subr.mxu1 %v22768_v35  ;;  %6958 = vmatpush1.msra.mxu0 %v22399_v0 }
 0x554   :  { %7194 = vmatpush1.msra.mxu1 %v22769_v34  ;;  %6960 = vmatprep.subr.mxu0 %v22614_v59 }
 0x555   :  { %7200 = vmatprep.subr.mxu1 %v22770_v58  ;;  %6962 = vmatpush1.msra.mxu0 %v22616_v19 }
 0x556   :  { %7206 = vmatpush1.msra.mxu1 %v22771_v53  ;;  %6964 = vmatprep.subr.mxu0 %v22618_v25 }
 0x557   :  { %7212 = vmatprep.subr.mxu1 %v22772_v23  ;;  %6966 = vmatpush1.msra.mxu0 %v22620_v62  ;;  %v5710_v23 = vpop.f32.mrf.mxu1  ;;  %v5478_v34 = vpop.f32.mrf.mxu0 }
 0x558   :  { %7218 = vmatpush1.msra.mxu1 %v22773_v46  ;;  %6968 = vmatprep.subr.mxu0 %v22622_v16  ;;  %v22774_v46 = vld [vmem:[#allocation35_spill] sm:$0xff]  ;;  %v5479_v51 = vadd.f32 %v5478_v34, %v22598_v26  ;;  %v22777_v16 = vld [vmem:[#allocation14_spill] sm:$0xff] }
 0x559   :  { %7251 = vmatprep.mubr.f32.mxu1 %v21931_v9  ;;  %7397 = vmatprep.subr.mxu1 %v22638_v5  ;;  %v5712_v53 = vpop.f32.mrf.mxu1  ;;  %v5480_v20 = vpop.f32.mrf.mxu0 }
 0x55a   :  { %6970 = vmatpush1.msra.mxu0 %v22624_v30  ;;  %7015 = vmatprep.mubr.f32.mxu0 %v21931_v9  ;;  %v5711_v49 = vadd.f32 %v5710_v23, %v5479_v51  ;;  %v5481_v50 = vadd.f32 %v5480_v20, %v22599_v27  ;;  %v22779_v20 = vld [vmem:[#allocation137_spill] sm:$0xff] }
 0x55b   :  { %6972 = vmatprep.subr.mxu0 %v22626_v24  ;;  %v22776_v24 = vld [vmem:[#allocation179_spill] sm:$0xff] }
 0x55c   :  { %6974 = vmatpush1.msra.mxu0 %v22628_v60 }
 0x55d   :  { %6976 = vmatprep.subr.mxu0 %v22630_v7  ;;  %v22775_v7 = vld [vmem:[#allocation24_spill] sm:$0xff] }
 0x55e   :  { %6978 = vmatpush1.msra.mxu0 %v22632_v14  ;;  %v5713_v14 = vadd.f32 %v5712_v53, %v5481_v50  ;;  %v274_v60 = vadd.f32 %v22775_v7, %v22600_v32 }
 0x55f   :  { %6980 = vmatprep.subr.mxu0 %v22634_v43 }
 0x560   :  { %6982 = vmatpush1.msra.mxu0 %v22636_v21 }
 0x561   :  { %7261 = vmatprep.subr.mxu0 %v22774_v46 }
 0x56f   :  { %v5953_v58 = vpop.f32.mrf.mxu1 }
 0x571   :  { %v5955_v35 = vpop.f32.mrf.mxu1 }
 0x578   :  { %v5847_v47 = vpop.f32.mrf.mxu0 }
 0x579   :  { %v5848_v46 = vadd.f32 %v5847_v47, %v5711_v49  ;;  %v22778_v47 = vld [vmem:[#allocation100_spill] sm:$0xff] }
 0x57a   :  { %v5849_v56 = vpop.f32.mrf.mxu0 }
 0x57b   :  { %v5954_v6 = vadd.f32 %v5953_v58, %v5848_v46 }
 0x591   :  { %v6225_v40 = vpop.f32.mrf.mxu1 }
 0x593   :  { %v6227_v11 = vpop.f32.mrf.mxu1 }
 0x59a   :  { %v6121_v3 = vpop.f32.mrf.mxu0 }
 0x59b   :  { %v6122_v54 = vadd.f32 %v6121_v3, %v5954_v6 }
 0x59c   :  { %v6123_v28 = vpop.f32.mrf.mxu0 }
 0x59d   :  { %v6226_v21 = vadd.f32 %v6225_v40, %v6122_v54  ;;  %v22780_v54 = vld [vmem:[#allocation174_spill] sm:$0xff] }
 0x59f   :  { %v6871_v30 = vadd.f32 %v6226_v21, %v22776_v24 }
 0x5a1   :  { %v13122_v62 = vmul.f32 -1.442695, %v6871_v30 }
 0x5a3   :  { %15815 = vpow2.f32 %v13122_v62 }
 0x5b0   :  { %v15816_v24 = vpop.eup %15815 }
 0x5b3   :  { %v6468_v29 = vpop.f32.mrf.mxu1 }
 0x5b5   :  { %v14801_v39 = vpop.f32.mrf.mxu1 }
 0x5b6   :  { %v5850_v39 = vadd.f32 %v5849_v56, %v5713_v14 }
 0x5b8   :  { %v5956_v34 = vadd.f32 %v5955_v35, %v5850_v39 }
 0x5ba   :  { %v6124_v3 = vadd.f32 %v6123_v28, %v5956_v34 }
 0x5bc   :  { %v6317_v36 = vpop.f32.mrf.mxu0  ;;  %v6228_v50 = vadd.f32 %v6227_v11, %v6124_v3 }
 0x5bd   :  { %v6318_v35 = vadd.f32 %v6317_v36, %v18603_v55 }
 0x5be   :  { %v14766_v63 = vpop.f32.mrf.mxu0 }
 0x5bf   :  { %v564_v63 = vadd.f32 %v22777_v16, %v274_v60  ;;  %v6875_v16 = vadd.f32 1.0, %v15816_v24  ;;  %v6469_v60 = vadd.f32 %v6468_v29, %v6318_v35  ;;  %v22784_v35 = vld [vmem:[#allocation45_spill] sm:$0xff] }
 0x5c1   :  { %v745_v58 = vadd.f32 %v22778_v47, %v564_v63 }
 0x5c3   :  { %v901_v49 = vadd.f32 %v22779_v20, %v745_v58  ;;  %v22782_v58 = vld [vmem:[#allocation257_spill] sm:$0xff] }
 0x5c5   :  { %v1119_v53 = vadd.f32 %v22780_v54, %v901_v49  ;;  %v6900_v54 = vpop.permute.xlu0 %6899 }
 0x5d5   :  { %v6661_v5 = vpop.f32.mrf.mxu1 }
 0x5d7   :  { %v14871_v43 = vpop.f32.mrf.mxu1 }
 0x5d8   :  { %v22781_v43 = vld [vmem:[#allocation181_spill] sm:$0xff] }
 0x5d9   :  { %v1265_v7 = vadd.f32 %v22781_v43, %v1119_v53 }
 0x5db   :  { %v6878_v56 = vadd.f32 %v6228_v50, %v1265_v7 }
 0x5dd   :  { %v13123_v14 = vmul.f32 -1.442695, %v6878_v56 }
 0x5de   :  { %v6572_v51 = vpop.f32.mrf.mxu0 }
 0x5df   :  { %15817 = vpow2.f32 %v13123_v14  ;;  %v6573_v21 = vadd.f32 %v6572_v51, %v6469_v60  ;;  %v22786_v60 = vld [vmem:[#allocation49_spill] sm:$0xff] }
 0x5e0   :  { %v14836_v6 = vpop.f32.mrf.mxu0  ;;  %15819 = vrcp.f32 %v6875_v16  ;;  %v22783_v16 = vld [vmem:[#allocation37_spill] sm:$0xff] }
 0x5e1   :  { %v6662_v46 = vadd.f32 %v6661_v5, %v6573_v21  ;;  %v6909_v5 = vpop.permute.xlu1 %6908  ;;  %v22788_v21 = vld [vmem:[#allocation64_spill] sm:$0xff] }
 0x5e2   :  { %v6911_v53 = vmul.f32 %v6909_v5, %v19054_v38  ;;  %v22807_v5 = vld [vmem:[#allocation116_spill] sm:$0xff] }
 0x5ec   :  { %v15818_v40 = vpop.eup %15817 }
 0x5ed   :  { %v6882_v23 = vadd.f32 1.0, %v15818_v40  ;;  %v15820_v34 = vpop.eup %15819  ;;  %v22789_v40 = vld [vmem:[#allocation65_spill] sm:$0xff] }
 0x5ef   :  { %15821 = vrcp.f32 %v6882_v23  ;;  %v22792_v23 = vld [vmem:[#allocation80_spill] sm:$0xff] }
 0x5f7   :  { %v6867_v30 = vpop.f32.mrf.mxu1 }
 0x5f9   :  { %v14941_v28 = vpop.f32.mrf.mxu1 }
 0x5fa   :  { %v22787_v28 = vld [vmem:[#allocation62_spill] sm:$0xff] }
 0x5fc   :  { %v15822_v6 = vpop.eup %15821 }
 0x5fd   :  { %v6888_v36 = vsub.f32 1.0, %v15822_v6  ;;  %v6890_v29 = vmul.f32 %v15822_v6, %v19054_v38  ;;  %v22800_v6 = vld [vmem:[#allocation123_spill] sm:$0xff] }
 0x5ff   :  { %v6780_v62 = vpop.f32.mrf.mxu0 }
 0x600   :  { %v6781_v39 = vadd.f32 %v6780_v62, %v6662_v46  ;;  %v22790_v46 = vld [vmem:[#allocation69_spill] sm:$0xff]  ;;  %v22791_v62 = vld [vmem:[#allocation79_spill] sm:$0xff] }
 0x601   :  { %v14906_v11 = vpop.f32.mrf.mxu0 }
 0x602   :  { %v6868_v63 = vadd.f32 %v6867_v30, %v6781_v39  ;;  %v22785_v30 = vld [vmem:[#allocation48_spill] sm:$0xff]  ;;  %v22794_v11 = vld [vmem:[#allocation109_spill] sm:$0xff] }
 0x603   :  { %v22793_v39 = vld [vmem:[#allocation84_spill] sm:$0xff] }
 0x604   :  { %v6885_v47 = vmul.f32 %v15820_v34, %v6868_v63  ;;  %v22795_v63 = vld [vmem:[#allocation85_spill] sm:$0xff]  ;;  %v22796_v34 = vld [vmem:[#allocation110_spill] sm:$0xff] }
 0x606   :  { %v6886_v3 = vadd.f32 %v6885_v47, %v22782_v58  ;;  %v22797_v47 = vld [vmem:[#allocation89_spill] sm:$0xff]  ;;  %v22798_v58 = vld [vmem:[#allocation122_spill] sm:$0xff] }
 0x608   :  { %15823 = vtanh.f32 %v6886_v3  ;;  %v22799_v3 = vld [vmem:[#allocation99_spill] sm:$0xff] }
 0x615   :  { %v15824_v20 = vpop.eup %15823 }
 0x616   :  { %v6889_v49 = vmul.f32 %v15824_v20, %v6888_v36  ;;  %v22801_v36 = vld [vmem:[#allocation103_spill] sm:$0xff] }
 0x617   :  { %v22802_v20 = vld [vmem:[#allocation127_spill] sm:$0xff] }
 0x618   :  { %v6891_v51 = vadd.f32 %v6890_v29, %v6889_v49  ;;  %v22803_v29 = vld [vmem:[#allocation104_spill] sm:$0xff] }
 0x619   :  { %v22804_v49 = vld [vmem:[#allocation128_spill] sm:$0xff] }
 0x61a   :  { %v6902_v50 = vmul.f32 %v6900_v54, %v6891_v51  ;;  %v22805_v51 = vld [vmem:[#allocation107_spill] sm:$0xff]  ;;  %v22806_v54 = vld [vmem:[#allocation130_spill] sm:$0xff] }
 0x61c   :  { %v19498_v43 = vadd.f32 %v6911_v53, %v6902_v50  ;;  %6904 = vst [vmem:[#allocation10 + $0x10] sm:$0xff] %v6902_v50  ;;  %v22808_v53 = vld [vmem:[#allocation132_spill] sm:$0xff] }
 0x61d   :  { %v22809_v50 = vld [vmem:[#allocation124_spill] sm:$0xff] }
 0x61e   :  { %v19501_v7 = vand.u32 4294901760, %v19498_v43 }
 0x620   :  { %7253 = vmatmul.mubr.f32.vlgmr.msra.gmra.mxu1 %v19501_v7  ;;  %v19506_v56 = vsub.f32 %v19498_v43, %v19501_v7 }
 0x621   :  { %7399 = vmatpush1.msra.mxu1 %v22355_v57  ;;  %7492 = vmatprep.mubr.f32.mxu1 %v21931_v9 }
 0x622   :  { %7401 = vmatprep.subr.mxu1 %v22357_v1  ;;  %v19512_v38 = vand.u32 4294901760, %v19506_v56 }
 0x623   :  { %7403 = vmatpush1.msra.mxu1 %v22361_v17 }
 0x624   :  { %7405 = vmatprep.subr.mxu1 %v22363_v37  ;;  %v7019_v14 = vsub.f32 %v19506_v56, %v19512_v38 }
 0x625   :  { %7407 = vmatpush1.msra.mxu1 %v22365_v13 }
 0x626   :  { %7409 = vmatprep.subr.mxu1 %v22368_v42  ;;  %v19520_v24 = vand.u32 4294901760, %v7019_v14  ;;  %v22810_v14 = vld [vmem:[#allocation139_spill] sm:$0xff] }
 0x627   :  { %7411 = vmatpush1.msra.mxu1 %v22370_v2 }
 0x628   :  { %7413 = vmatprep.subr.mxu1 %v22373_v31  ;;  %7021 = vmatmul.mubr.f32.vlgmr.msra.gmra.mxu0 %v19520_v24 }
 0x629   :  { %7264 = vmatpush1.msra.mxu0 %v22435_v12  ;;  %7415 = vmatpush1.msra.mxu1 %v22376_v52 }
 0x62a   :  { %7267 = vmatprep.subr.mxu0 %v22436_v45  ;;  %7417 = vmatprep.subr.mxu1 %v22378_v8 }
 0x62b   :  { %7270 = vmatpush1.msra.mxu0 %v22437_v10  ;;  %7419 = vmatpush1.msra.mxu1 %v22380_v15 }
 0x62c   :  { %7273 = vmatprep.subr.mxu0 %v22438_v41  ;;  %7421 = vmatprep.subr.mxu1 %v22384_v22 }
 0x62d   :  { %7276 = vmatpush1.msra.mxu0 %v22783_v16  ;;  %7423 = vmatpush1.msra.mxu1 %v22386_v4  ;;  %v22885_v16 = vld [vmem:[#allocation197_spill] sm:$0xff] }
 0x62e   :  { %7279 = vmatprep.subr.mxu0 %v22784_v35  ;;  %7425 = vmatprep.subr.mxu1 %v22388_v33  ;;  %v22884_v35 = vld [vmem:[#allocation194_spill] sm:$0xff] }
 0x62f   :  { %7282 = vmatpush1.msra.mxu0 %v22785_v30  ;;  %7427 = vmatpush1.msra.mxu1 %v22391_v48  ;;  %v22883_v30 = vld [vmem:[#allocation240_spill] sm:$0xff] }
 0x630   :  { %7285 = vmatprep.subr.mxu0 %v22786_v60  ;;  %7429 = vmatprep.subr.mxu1 %v22393_v18  ;;  %v22879_v60 = vld [vmem:[#allocation255_spill] sm:$0xff] }
 0x631   :  { %7288 = vmatpush1.msra.mxu0 %v22787_v28  ;;  %7431 = vmatpush1.msra.mxu1 %v22395_v44  ;;  %v22877_v28 = vld [vmem:[#allocation254_spill] sm:$0xff] }
 0x632   :  { %7291 = vmatprep.subr.mxu0 %v22788_v21  ;;  %7433 = vmatprep.subr.mxu1 %v22397_v61  ;;  %v22875_v21 = vld [vmem:[#allocation253_spill] sm:$0xff] }
 0x633   :  { %7294 = vmatpush1.msra.mxu0 %v22789_v40  ;;  %7435 = vmatpush1.msra.mxu1 %v22399_v0  ;;  %v22873_v40 = vld [vmem:[#allocation252_spill] sm:$0xff] }
 0x634   :  { %7297 = vmatprep.subr.mxu0 %v22790_v46  ;;  %7437 = vmatprep.subr.mxu1 %v22614_v59  ;;  %v22871_v46 = vld [vmem:[#allocation250_spill] sm:$0xff] }
 0x635   :  { %7300 = vmatpush1.msra.mxu0 %v22791_v62  ;;  %7439 = vmatpush1.msra.mxu1 %v22616_v19  ;;  %v22869_v62 = vld [vmem:[#allocation248_spill] sm:$0xff] }
 0x636   :  { %7303 = vmatprep.subr.mxu0 %v22792_v23  ;;  %7441 = vmatprep.subr.mxu1 %v22618_v25  ;;  %v22853_v23 = vld [vmem:[#allocation157_spill] sm:$0xff] }
 0x637   :  { %7306 = vmatpush1.msra.mxu0 %v22793_v39  ;;  %7443 = vmatpush1.msra.mxu1 %v22794_v11  ;;  %v22852_v39 = vld [vmem:[#allocation218_spill] sm:$0xff] }
 0x638   :  { %7309 = vmatprep.subr.mxu0 %v22795_v63  ;;  %7445 = vmatprep.subr.mxu1 %v22796_v34  ;;  %v22850_v63 = vld [vmem:[#allocation152_spill] sm:$0xff] }
 0x639   :  { %7312 = vmatpush1.msra.mxu0 %v22797_v47  ;;  %7447 = vmatpush1.msra.mxu1 %v22798_v58  ;;  %v22818_v47 = vld [vmem:[#allocation148_spill] sm:$0xff] }
 0x63a   :  { %7315 = vmatprep.subr.mxu0 %v22799_v3  ;;  %7449 = vmatprep.subr.mxu1 %v22800_v6  ;;  %v22811_v3 = vld [vmem:[#allocation125_spill] sm:$0xff] }
 0x63b   :  { %7318 = vmatpush1.msra.mxu0 %v22801_v36  ;;  %7451 = vmatpush1.msra.mxu1 %v22802_v20  ;;  %v22812_v36 = vld [vmem:[#allocation29_spill] sm:$0xff] }
 0x63c   :  { %7321 = vmatprep.subr.mxu0 %v22803_v29  ;;  %7453 = vmatprep.subr.mxu1 %v22804_v49  ;;  %v22813_v29 = vld [vmem:[#allocation131_spill] sm:$0xff] }
 0x63d   :  { %7324 = vmatpush1.msra.mxu0 %v22805_v51  ;;  %7455 = vmatpush1.msra.mxu1 %v22806_v54  ;;  %v22814_v51 = vld [vmem:[#allocation135_spill] sm:$0xff] }
 0x63e   :  { %7327 = vmatprep.subr.mxu0 %v22807_v5  ;;  %7457 = vmatprep.subr.mxu1 %v22808_v53  ;;  %v22815_v5 = vld [vmem:[#allocation140_spill] sm:$0xff] }
 0x63f   :  { %7330 = vmatpush1.msra.mxu0 %v22809_v50  ;;  %7459 = vmatpush1.msra.mxu1 %v22810_v14  ;;  %v22816_v50 = vld [vmem:[#allocation142_spill] sm:$0xff] }
 0x640   :  { %7333 = vmatprep.subr.mxu0 %v22811_v3  ;;  %7496 = vmatmul.mubr.f32.vlgmr.msra.gmra.mxu1 %v19512_v38  ;;  %v22817_v3 = vld [vmem:[#allocation146_spill] sm:$0xff] }
 0x641   :  { %7671 = vmatprep.subr.mxu1 %v22812_v36  ;;  %7336 = vmatpush1.msra.mxu0 %v22813_v29  ;;  %v22819_v29 = vld [vmem:[#allocation150_spill] sm:$0xff] }
 0x642   :  { %7673 = vmatpush1.msra.mxu1 %v22355_v57  ;;  %7339 = vmatprep.subr.mxu0 %v22814_v51  ;;  %v22825_v51 = vld [vmem:[#allocation54_spill] sm:$0xff] }
 0x643   :  { %7675 = vmatprep.subr.mxu1 %v22357_v1  ;;  %7342 = vmatpush1.msra.mxu0 %v22815_v5  ;;  %v22820_v5 = vld [vmem:[#allocation23_spill] sm:$0xff] }
 0x644   :  { %7677 = vmatpush1.msra.mxu1 %v22361_v17  ;;  %7345 = vmatprep.subr.mxu0 %v22816_v50  ;;  %v22821_v50 = vld [vmem:[#allocation40_spill] sm:$0xff] }
 0x645   :  { %7679 = vmatprep.subr.mxu1 %v22363_v37  ;;  %7348 = vmatpush1.msra.mxu0 %v22817_v3  ;;  %v22822_v3 = vld [vmem:[#allocation26_spill] sm:$0xff] }
 0x646   :  { %7681 = vmatpush1.msra.mxu1 %v22365_v13  ;;  %7351 = vmatprep.subr.mxu0 %v22818_v47  ;;  %v22823_v47 = vld [vmem:[#allocation16_spill] sm:$0xff] }
 0x647   :  { %7683 = vmatprep.subr.mxu1 %v22368_v42  ;;  %7354 = vmatpush1.msra.mxu0 %v22819_v29  ;;  %v22824_v29 = vld [vmem:[#allocation43_spill] sm:$0xff] }
 0x648   :  { %7387 = vmatprep.mubr.f32.mxu0 %v21931_v9  ;;  %7685 = vmatpush1.msra.mxu1 %v22370_v2 }
 0x649   :  { %7390 = vmatmul.mubr.f32.vlgmr.msra.gmra.mxu0 %v19506_v56  ;;  %7505 = vmatprep.subr.mxu0 %v22820_v5  ;;  %v22826_v5 = vld [vmem:[#allocation17_spill] sm:$0xff] }
 0x64a   :  { %7687 = vmatprep.subr.mxu1 %v22373_v31  ;;  %7509 = vmatpush1.msra.mxu0 %v22821_v50  ;;  %v22827_v50 = vld [vmem:[#allocation59_spill] sm:$0xff] }
 0x64b   :  { %7689 = vmatpush1.msra.mxu1 %v22376_v52  ;;  %7513 = vmatprep.subr.mxu0 %v22822_v3  ;;  %v22828_v3 = vld [vmem:[#allocation61_spill] sm:$0xff] }
 0x64c   :  { %7691 = vmatprep.subr.mxu1 %v22378_v8  ;;  %7517 = vmatpush1.msra.mxu0 %v22823_v47  ;;  %v22829_v47 = vld [vmem:[#allocation73_spill] sm:$0xff] }
 0x64d   :  { %7693 = vmatpush1.msra.mxu1 %v22380_v15  ;;  %7521 = vmatprep.subr.mxu0 %v22824_v29  ;;  %v22830_v29 = vld [vmem:[#allocation76_spill] sm:$0xff] }
 0x64e   :  { %7695 = vmatprep.subr.mxu1 %v22384_v22  ;;  %7525 = vmatpush1.msra.mxu0 %v22825_v51  ;;  %v22831_v51 = vld [vmem:[#allocation77_spill] sm:$0xff] }
 0x64f   :  { %7697 = vmatpush1.msra.mxu1 %v22386_v4  ;;  %7529 = vmatprep.subr.mxu0 %v22826_v5  ;;  %v22832_v5 = vld [vmem:[#allocation78_spill] sm:$0xff] }
 0x650   :  { %7699 = vmatprep.subr.mxu1 %v22388_v33  ;;  %7533 = vmatpush1.msra.mxu0 %v22827_v50  ;;  %v22833_v50 = vld [vmem:[#allocation93_spill] sm:$0xff] }
 0x651   :  { %7701 = vmatpush1.msra.mxu1 %v22391_v48  ;;  %7537 = vmatprep.subr.mxu0 %v22828_v3  ;;  %v22834_v3 = vld [vmem:[#allocation94_spill] sm:$0xff] }
 0x652   :  { %7703 = vmatprep.subr.mxu1 %v22393_v18  ;;  %7541 = vmatpush1.msra.mxu0 %v22829_v47  ;;  %v22835_v47 = vld [vmem:[#allocation95_spill] sm:$0xff] }
 0x653   :  { %7705 = vmatpush1.msra.mxu1 %v22395_v44  ;;  %7545 = vmatprep.subr.mxu0 %v22830_v29  ;;  %v22836_v29 = vld [vmem:[#allocation96_spill] sm:$0xff] }
 0x654   :  { %7707 = vmatprep.subr.mxu1 %v22397_v61  ;;  %7549 = vmatpush1.msra.mxu0 %v22831_v51  ;;  %v22837_v51 = vld [vmem:[#allocation98_spill] sm:$0xff] }
 0x655   :  { %7709 = vmatpush1.msra.mxu1 %v22399_v0  ;;  %7553 = vmatprep.subr.mxu0 %v22832_v5  ;;  %v22838_v5 = vld [vmem:[#allocation111_spill] sm:$0xff] }
 0x656   :  { %7711 = vmatprep.subr.mxu1 %v22614_v59  ;;  %7557 = vmatpush1.msra.mxu0 %v22833_v50  ;;  %v22839_v50 = vld [vmem:[#allocation112_spill] sm:$0xff] }
 0x657   :  { %7713 = vmatpush1.msra.mxu1 %v22616_v19  ;;  %7561 = vmatprep.subr.mxu0 %v22834_v3  ;;  %v22840_v3 = vld [vmem:[#allocation113_spill] sm:$0xff] }
 0x658   :  { %7715 = vmatprep.subr.mxu1 %v22618_v25  ;;  %7565 = vmatpush1.msra.mxu0 %v22835_v47  ;;  %v22841_v47 = vld [vmem:[#allocation115_spill] sm:$0xff] }
 0x659   :  { %7717 = vmatpush1.msra.mxu1 %v22794_v11  ;;  %7569 = vmatprep.subr.mxu0 %v22836_v29  ;;  %v22842_v29 = vld [vmem:[#allocation129_spill] sm:$0xff] }
 0x65a   :  { %7719 = vmatprep.subr.mxu1 %v22796_v34  ;;  %7573 = vmatpush1.msra.mxu0 %v22837_v51  ;;  %v22843_v51 = vld [vmem:[#allocation133_spill] sm:$0xff] }
 0x65b   :  { %7721 = vmatpush1.msra.mxu1 %v22798_v58  ;;  %7577 = vmatprep.subr.mxu0 %v22838_v5  ;;  %v22847_v5 = vld [vmem:[#allocation147_spill] sm:$0xff] }
 0x65c   :  { %7723 = vmatprep.subr.mxu1 %v22800_v6  ;;  %7581 = vmatpush1.msra.mxu0 %v22839_v50  ;;  %v22844_v50 = vld [vmem:[#allocation134_spill] sm:$0xff] }
 0x65d   :  { %7725 = vmatpush1.msra.mxu1 %v22802_v20  ;;  %7585 = vmatprep.subr.mxu0 %v22840_v3  ;;  %v22845_v3 = vld [vmem:[#allocation145_spill] sm:$0xff] }
 0x65e   :  { %7727 = vmatprep.subr.mxu1 %v22804_v49  ;;  %7589 = vmatpush1.msra.mxu0 %v22841_v47  ;;  %v22846_v47 = vld [vmem:[#allocation210_spill] sm:$0xff] }
 0x65f   :  { %7729 = vmatpush1.msra.mxu1 %v22806_v54  ;;  %7593 = vmatprep.subr.mxu0 %v22842_v29  ;;  %v22848_v29 = vld [vmem:[#allocation149_spill] sm:$0xff] }
 0x660   :  { %7731 = vmatprep.subr.mxu1 %v22808_v53  ;;  %7597 = vmatpush1.msra.mxu0 %v22843_v51  ;;  %v22849_v51 = vld [vmem:[#allocation215_spill] sm:$0xff] }
 0x661   :  { %7733 = vmatpush1.msra.mxu1 %v22810_v14  ;;  %7766 = vmatprep.mubr.f32.mxu1 %v21931_v9 }
 0x662   :  { %7601 = vmatprep.subr.mxu0 %v22844_v50  ;;  %7768 = vmatmul.mubr.f32.vlgmr.msra.gmra.mxu1 %v19501_v7  ;;  %v22851_v50 = vld [vmem:[#allocation155_spill] sm:$0xff] }
 0x663   :  { %14977 = vmatprep.subr.mxu1 %v21931_v9  ;;  %7605 = vmatpush1.msra.mxu0 %v22845_v3  ;;  %v22867_v3 = vld [vmem:[#allocation245_spill] sm:$0xff] }
 0x664   :  { %14978 = vmatpush3.msra.mxu1 %v22846_v47  ;;  %7609 = vmatprep.subr.mxu0 %v22847_v5  ;;  %v22854_v47 = vld [vmem:[#allocation159_spill] sm:$0xff]  ;;  %v22855_v5 = vld [vmem:[#allocation222_spill] sm:$0xff] }
 0x665   :  { %14979 = vmatprep.subr.mxu1 %v21931_v9  ;;  %7613 = vmatpush1.msra.mxu0 %v22848_v29  ;;  %v22865_v29 = vld [vmem:[#allocation242_spill] sm:$0xff] }
 0x666   :  { %14980 = vmatpush3.msra.mxu1 %v22849_v51  ;;  %7617 = vmatprep.subr.mxu0 %v22850_v63  ;;  %v22856_v63 = vld [vmem:[#allocation191_spill] sm:$0xff]  ;;  %v22863_v51 = vld [vmem:[#allocation238_spill] sm:$0xff] }
 0x667   :  { %14981 = vmatprep.subr.mxu1 %v21931_v9  ;;  %7621 = vmatpush1.msra.mxu0 %v22851_v50  ;;  %v22857_v50 = vld [vmem:[#allocation226_spill] sm:$0xff] }
 0x668   :  { %14982 = vmatpush3.msra.mxu1 %v22852_v39  ;;  %7625 = vmatprep.subr.mxu0 %v22853_v23  ;;  %v22858_v23 = vld [vmem:[#allocation192_spill] sm:$0xff]  ;;  %v22861_v39 = vld [vmem:[#allocation234_spill] sm:$0xff] }
 0x669   :  { %14983 = vmatprep.subr.mxu1 %v21931_v9  ;;  %7629 = vmatpush1.msra.mxu0 %v22854_v47  ;;  %v22859_v47 = vld [vmem:[#allocation230_spill] sm:$0xff] }
 0x66a   :  { %7662 = vmatprep.mubr.f32.mxu0 %v21931_v9  ;;  %14984 = vmatpush3.msra.mxu1 %v22855_v5  ;;  %v22860_v5 = vld [vmem:[#allocation193_spill] sm:$0xff] }
 0x66b   :  { %7664 = vmatmul.mubr.f32.vlgmr.msra.gmra.mxu0 %v19501_v7  ;;  %14942 = vmatprep.subr.mxu0 %v21931_v9 }
 0x66c   :  { %14985 = vmatprep.subr.mxu1 %v21931_v9  ;;  %14943 = vmatpush3.msra.mxu0 %v22856_v63 }
 0x66d   :  { %14986 = vmatpush3.msra.mxu1 %v22857_v50  ;;  %14944 = vmatprep.subr.mxu0 %v21931_v9  ;;  %v22862_v50 = vld [vmem:[#allocation196_spill] sm:$0xff] }
 0x66e   :  { %14987 = vmatprep.subr.mxu1 %v21931_v9  ;;  %14945 = vmatpush3.msra.mxu0 %v22858_v23 }
 0x66f   :  { %14988 = vmatpush3.msra.mxu1 %v22859_v47  ;;  %14946 = vmatprep.subr.mxu0 %v21931_v9  ;;  %v22864_v47 = vld [vmem:[#allocation200_spill] sm:$0xff] }
 0x670   :  { %14989 = vmatprep.subr.mxu1 %v21931_v9  ;;  %14947 = vmatpush3.msra.mxu0 %v22860_v5 }
 0x671   :  { %14990 = vmatpush3.msra.mxu1 %v22861_v39  ;;  %14948 = vmatprep.subr.mxu0 %v21931_v9  ;;  %v22866_v39 = vld [vmem:[#allocation201_spill] sm:$0xff] }
 0x672   :  { %14991 = vmatprep.subr.mxu1 %v21931_v9  ;;  %14949 = vmatpush3.msra.mxu0 %v22862_v50 }
 0x673   :  { %14992 = vmatpush3.msra.mxu1 %v22863_v51  ;;  %14950 = vmatprep.subr.mxu0 %v21931_v9  ;;  %v22868_v51 = vld [vmem:[#allocation205_spill] sm:$0xff] }
 0x674   :  { %14993 = vmatprep.subr.mxu1 %v21931_v9  ;;  %14951 = vmatpush3.msra.mxu0 %v22864_v47 }
 0x675   :  { %14994 = vmatpush3.msra.mxu1 %v22865_v29  ;;  %14952 = vmatprep.subr.mxu0 %v21931_v9  ;;  %v22870_v29 = vld [vmem:[#allocation209_spill] sm:$0xff] }
 0x676   :  { %14995 = vmatprep.subr.mxu1 %v21931_v9  ;;  %14953 = vmatpush3.msra.mxu0 %v22866_v39 }
 0x677   :  { %14996 = vmatpush3.msra.mxu1 %v22867_v3  ;;  %14954 = vmatprep.subr.mxu0 %v21931_v9  ;;  %v22872_v3 = vld [vmem:[#allocation211_spill] sm:$0xff] }
 0x678   :  { %14997 = vmatprep.subr.mxu1 %v21931_v9  ;;  %14955 = vmatpush3.msra.mxu0 %v22868_v51 }
 0x679   :  { %14998 = vmatpush3.msra.mxu1 %v22869_v62  ;;  %14956 = vmatprep.subr.mxu0 %v21931_v9  ;;  %v22874_v62 = vld [vmem:[#allocation216_spill] sm:$0xff] }
 0x67a   :  { %14999 = vmatprep.subr.mxu1 %v21931_v9  ;;  %14957 = vmatpush3.msra.mxu0 %v22870_v29 }
 0x67b   :  { %15000 = vmatpush3.msra.mxu1 %v22871_v46  ;;  %14958 = vmatprep.subr.mxu0 %v21931_v9  ;;  %v22876_v46 = vld [vmem:[#allocation219_spill] sm:$0xff] }
 0x67c   :  { %15001 = vmatprep.subr.mxu1 %v21931_v9  ;;  %14959 = vmatpush3.msra.mxu0 %v22872_v3 }
 0x67d   :  { %15002 = vmatpush3.msra.mxu1 %v22873_v40  ;;  %14960 = vmatprep.subr.mxu0 %v21931_v9  ;;  %v22878_v40 = vld [vmem:[#allocation223_spill] sm:$0xff] }
 0x67e   :  { %15003 = vmatprep.subr.mxu1 %v21931_v9  ;;  %14961 = vmatpush3.msra.mxu0 %v22874_v62 }
 0x67f   :  { %15004 = vmatpush3.msra.mxu1 %v22875_v21  ;;  %14962 = vmatprep.subr.mxu0 %v21931_v9  ;;  %v22880_v21 = vld [vmem:[#allocation229_spill] sm:$0xff] }
 0x680   :  { %15005 = vmatprep.subr.mxu1 %v21931_v9  ;;  %14963 = vmatpush3.msra.mxu0 %v22876_v46 }
 0x681   :  { %15006 = vmatpush3.msra.mxu1 %v22877_v28  ;;  %14964 = vmatprep.subr.mxu0 %v21931_v9  ;;  %v22881_v28 = vld [vmem:[#allocation233_spill] sm:$0xff] }
 0x682   :  { %15007 = vmatprep.subr.mxu1 %v21931_v9  ;;  %14965 = vmatpush3.msra.mxu0 %v22878_v40 }
 0x683   :  { %15008 = vmatpush3.msra.mxu1 %v22879_v60  ;;  %15009 = vmatprep.mubr.msk.f32.mxu1 %vm15962_vm0, %v21931_v9  ;;  %v22882_v60 = vld [vmem:[#allocation236_spill] sm:$0xff] }
 0x684   :  { %14966 = vmatprep.subr.mxu0 %v21931_v9  ;;  %15010 = vmatmul.mubr.f32.vlgmr.msra.gmra.mxu1 %v19501_v7 }
 0x685   :  { %15047 = vmatprep.subr.mxu1 %v21931_v9  ;;  %14967 = vmatpush3.msra.mxu0 %v22880_v21 }
 0x686   :  { %15048 = vmatpush3.msra.mxu1 %v22856_v63  ;;  %14968 = vmatprep.subr.mxu0 %v21931_v9 }
 0x687   :  { %15049 = vmatprep.subr.mxu1 %v21931_v9  ;;  %14969 = vmatpush3.msra.mxu0 %v22881_v28 }
 0x688   :  { %15050 = vmatpush3.msra.mxu1 %v22858_v23  ;;  %14970 = vmatprep.subr.mxu0 %v21931_v9 }
 0x689   :  { %15051 = vmatprep.subr.mxu1 %v21931_v9  ;;  %14971 = vmatpush3.msra.mxu0 %v22882_v60 }
 0x68a   :  { %15052 = vmatpush3.msra.mxu1 %v22860_v5  ;;  %14972 = vmatprep.subr.mxu0 %v21931_v9 }
 0x68b   :  { %15053 = vmatprep.subr.mxu1 %v21931_v9  ;;  %14973 = vmatpush3.msra.mxu0 %v22883_v30 }
 0x68c   :  { %14974 = vmatprep.mubr.msk.f32.mxu0 %vm15962_vm0, %v21931_v9  ;;  %15054 = vmatpush3.msra.mxu1 %v22862_v50 }
 0x68d   :  { %14975 = vmatmul.mubr.f32.vlgmr.msra.gmra.mxu0 %v19520_v24  ;;  %15012 = vmatprep.subr.mxu0 %v21931_v9  ;;  %v22886_v24 = vld [vmem:[#allocation199_spill] sm:$0xff] }
 0x68e   :  { %15055 = vmatprep.subr.mxu1 %v21931_v9  ;;  %15013 = vmatpush3.msra.mxu0 %v22884_v35  ;;  %v22887_v35 = vld [vmem:[#allocation202_spill] sm:$0xff] }
 0x68f   :  { %15056 = vmatpush3.msra.mxu1 %v22864_v47  ;;  %15014 = vmatprep.subr.mxu0 %v21931_v9 }
 0x690   :  { %15057 = vmatprep.subr.mxu1 %v21931_v9  ;;  %15015 = vmatpush3.msra.mxu0 %v22885_v16  ;;  %v22888_v16 = vld [vmem:[#allocation206_spill] sm:$0xff] }
 0x691   :  { %15058 = vmatpush3.msra.mxu1 %v22866_v39  ;;  %15016 = vmatprep.subr.mxu0 %v21931_v9 }
 0x692   :  { %15059 = vmatprep.subr.mxu1 %v21931_v9  ;;  %15017 = vmatpush3.msra.mxu0 %v22886_v24  ;;  %v22889_v24 = vld [vmem:[#allocation208_spill] sm:$0xff] }
 0x693   :  { %15060 = vmatpush3.msra.mxu1 %v22868_v51  ;;  %15018 = vmatprep.subr.mxu0 %v21931_v9 }
 0x694   :  { %15061 = vmatprep.subr.mxu1 %v21931_v9  ;;  %15019 = vmatpush3.msra.mxu0 %v22887_v35  ;;  %v22890_v35 = vld [vmem:[#allocation213_spill] sm:$0xff] }
 0x695   :  { %15062 = vmatpush3.msra.mxu1 %v22870_v29  ;;  %15020 = vmatprep.subr.mxu0 %v21931_v9 }
 0x696   :  { %15063 = vmatprep.subr.mxu1 %v21931_v9  ;;  %15021 = vmatpush3.msra.mxu0 %v22888_v16  ;;  %v22891_v16 = vld [vmem:[#allocation217_spill] sm:$0xff] }
 0x697   :  { %15064 = vmatpush3.msra.mxu1 %v22872_v3  ;;  %15022 = vmatprep.subr.mxu0 %v21931_v9 }
 0x698   :  { %15065 = vmatprep.subr.mxu1 %v21931_v9  ;;  %15023 = vmatpush3.msra.mxu0 %v22889_v24  ;;  %v22892_v24 = vld [vmem:[#allocation221_spill] sm:$0xff] }
 0x699   :  { %15066 = vmatpush3.msra.mxu1 %v22874_v62  ;;  %15024 = vmatprep.subr.mxu0 %v21931_v9 }
 0x69a   :  { %15067 = vmatprep.subr.mxu1 %v21931_v9  ;;  %15025 = vmatpush3.msra.mxu0 %v22890_v35  ;;  %v22893_v35 = vld [vmem:[#allocation225_spill] sm:$0xff] }
 0x69b   :  { %15068 = vmatpush3.msra.mxu1 %v22876_v46  ;;  %15026 = vmatprep.subr.mxu0 %v21931_v9 }
 0x69c   :  { %15069 = vmatprep.subr.mxu1 %v21931_v9  ;;  %15027 = vmatpush3.msra.mxu0 %v22891_v16  ;;  %v22894_v16 = vld [vmem:[#allocation228_spill] sm:$0xff] }
 0x69d   :  { %15070 = vmatpush3.msra.mxu1 %v22878_v40  ;;  %15028 = vmatprep.subr.mxu0 %v21931_v9 }
 0x69e   :  { %15071 = vmatprep.subr.mxu1 %v21931_v9  ;;  %15029 = vmatpush3.msra.mxu0 %v22892_v24  ;;  %v22895_v24 = vld [vmem:[#allocation232_spill] sm:$0xff] }
 0x69f   :  { %15072 = vmatpush3.msra.mxu1 %v22880_v21  ;;  %15030 = vmatprep.subr.mxu0 %v21931_v9 }
 0x6a0   :  { %15073 = vmatprep.subr.mxu1 %v21931_v9  ;;  %15031 = vmatpush3.msra.mxu0 %v22893_v35  ;;  %v22898_v35 = vld [vmem:[#allocation244_spill] sm:$0xff] }
 0x6a1   :  { %15074 = vmatpush3.msra.mxu1 %v22881_v28  ;;  %15032 = vmatprep.subr.mxu0 %v21931_v9 }
 0x6a2   :  { %15075 = vmatprep.subr.mxu1 %v21931_v9  ;;  %15033 = vmatpush3.msra.mxu0 %v22894_v16  ;;  %v22896_v16 = vld [vmem:[#allocation237_spill] sm:$0xff] }
 0x6a3   :  { %15076 = vmatpush3.msra.mxu1 %v22882_v60  ;;  %15034 = vmatprep.subr.mxu0 %v21931_v9 }
 0x6a4   :  { %15077 = vmatprep.subr.mxu1 %v21931_v9  ;;  %15035 = vmatpush3.msra.mxu0 %v22895_v24  ;;  %v22897_v24 = vld [vmem:[#allocation241_spill] sm:$0xff] }
 0x6a5   :  { %15078 = vmatpush3.msra.mxu1 %v22883_v30  ;;  %15079 = vmatprep.mubr.msk.f32.mxu1 %vm15962_vm0, %v21931_v9 }
 0x6a6   :  { %15036 = vmatprep.subr.mxu0 %v21931_v9  ;;  %15080 = vmatmul.mubr.f32.vlgmr.msra.gmra.mxu1 %v19512_v38  ;;  %v22899_v38 = vld [vmem:[#allocation247_spill] sm:$0xff] }
 0x6a7   :  { %15117 = vmatprep.subr.mxu1 %v21931_v9  ;;  %15037 = vmatpush3.msra.mxu0 %v22896_v16  ;;  %v22916_v16 = vld [vmem:[#allocation60_spill] sm:$0xff] }
 0x6a8   :  { %15118 = vmatpush3.msra.mxu1 %v22856_v63  ;;  %15038 = vmatprep.subr.mxu0 %v21931_v9 }
 0x6a9   :  { %15119 = vmatprep.subr.mxu1 %v21931_v9  ;;  %15039 = vmatpush3.msra.mxu0 %v22897_v24  ;;  %v22914_v24 = vld [vmem:[#allocation246_spill] sm:$0xff] }
 0x6aa   :  { %15120 = vmatpush3.msra.mxu1 %v22858_v23  ;;  %15040 = vmatprep.subr.mxu0 %v21931_v9 }
 0x6ab   :  { %15121 = vmatprep.subr.mxu1 %v21931_v9  ;;  %15041 = vmatpush3.msra.mxu0 %v22898_v35  ;;  %v22900_v35 = vld [vmem:[#allocation198_spill] sm:$0xff] }
 0x6ac   :  { %15122 = vmatpush3.msra.mxu1 %v22860_v5  ;;  %15042 = vmatprep.subr.mxu0 %v21931_v9 }
 0x6ad   :  { %15123 = vmatprep.subr.mxu1 %v21931_v9  ;;  %15043 = vmatpush3.msra.mxu0 %v22899_v38  ;;  %v22901_v38 = vld [vmem:[#allocation203_spill] sm:$0xff] }
 0x6ae   :  { %15044 = vmatprep.mubr.msk.f32.mxu0 %vm15962_vm0, %v21931_v9  ;;  %15124 = vmatpush3.msra.mxu1 %v22862_v50 }
 0x6af   :  { %15045 = vmatmul.mubr.f32.vlgmr.msra.gmra.mxu0 %v19506_v56  ;;  %15082 = vmatprep.subr.mxu0 %v21931_v9  ;;  %v22902_v56 = vld [vmem:[#allocation204_spill] sm:$0xff] }
 0x6b0   :  { %15125 = vmatprep.subr.mxu1 %v21931_v9  ;;  %15083 = vmatpush3.msra.mxu0 %v22900_v35  ;;  %v22903_v35 = vld [vmem:[#allocation207_spill] sm:$0xff] }
 0x6b1   :  { %15126 = vmatpush3.msra.mxu1 %v22864_v47  ;;  %15084 = vmatprep.subr.mxu0 %v21931_v9 }
 0x6b2   :  { %15127 = vmatprep.subr.mxu1 %v21931_v9  ;;  %15085 = vmatpush3.msra.mxu0 %v22901_v38  ;;  %v22904_v38 = vld [vmem:[#allocation212_spill] sm:$0xff] }
 0x6b3   :  { %15128 = vmatpush3.msra.mxu1 %v22866_v39  ;;  %15086 = vmatprep.subr.mxu0 %v21931_v9 }
 0x6b4   :  { %15129 = vmatprep.subr.mxu1 %v21931_v9  ;;  %15087 = vmatpush3.msra.mxu0 %v22902_v56  ;;  %v22905_v56 = vld [vmem:[#allocation214_spill] sm:$0xff] }
 0x6b5   :  { %15130 = vmatpush3.msra.mxu1 %v22868_v51  ;;  %15088 = vmatprep.subr.mxu0 %v21931_v9 }
 0x6b6   :  { %15131 = vmatprep.subr.mxu1 %v21931_v9  ;;  %15089 = vmatpush3.msra.mxu0 %v22903_v35  ;;  %v22906_v35 = vld [vmem:[#allocation220_spill] sm:$0xff] }
 0x6b7   :  { %15132 = vmatpush3.msra.mxu1 %v22870_v29  ;;  %15090 = vmatprep.subr.mxu0 %v21931_v9 }
 0x6b8   :  { %15133 = vmatprep.subr.mxu1 %v21931_v9  ;;  %15091 = vmatpush3.msra.mxu0 %v22904_v38  ;;  %v22907_v38 = vld [vmem:[#allocation224_spill] sm:$0xff] }
 0x6b9   :  { %15134 = vmatpush3.msra.mxu1 %v22872_v3  ;;  %15092 = vmatprep.subr.mxu0 %v21931_v9 }
 0x6ba   :  { %15135 = vmatprep.subr.mxu1 %v21931_v9  ;;  %15093 = vmatpush3.msra.mxu0 %v22905_v56  ;;  %v22908_v56 = vld [vmem:[#allocation227_spill] sm:$0xff] }
 0x6bb   :  { %15136 = vmatpush3.msra.mxu1 %v22874_v62  ;;  %15094 = vmatprep.subr.mxu0 %v21931_v9 }
 0x6bc   :  { %15137 = vmatprep.subr.mxu1 %v21931_v9  ;;  %15095 = vmatpush3.msra.mxu0 %v22906_v35  ;;  %v22909_v35 = vld [vmem:[#allocation231_spill] sm:$0xff] }
 0x6bd   :  { %15138 = vmatpush3.msra.mxu1 %v22876_v46  ;;  %15096 = vmatprep.subr.mxu0 %v21931_v9 }
 0x6be   :  { %15139 = vmatprep.subr.mxu1 %v21931_v9  ;;  %15097 = vmatpush3.msra.mxu0 %v22907_v38  ;;  %v22910_v38 = vld [vmem:[#allocation235_spill] sm:$0xff] }
 0x6bf   :  { %15140 = vmatpush3.msra.mxu1 %v22878_v40  ;;  %15098 = vmatprep.subr.mxu0 %v21931_v9 }
 0x6c0   :  { %15141 = vmatprep.subr.mxu1 %v21931_v9  ;;  %15099 = vmatpush3.msra.mxu0 %v22908_v56  ;;  %v22911_v56 = vld [vmem:[#allocation239_spill] sm:$0xff] }
 0x6c1   :  { %15142 = vmatpush3.msra.mxu1 %v22880_v21  ;;  %15100 = vmatprep.subr.mxu0 %v21931_v9  ;;  %v22921_v21 = vld [vmem:[#allocation75_spill] sm:$0xff] }
 0x6c2   :  { %15143 = vmatprep.subr.mxu1 %v21931_v9  ;;  %15101 = vmatpush3.msra.mxu0 %v22909_v35  ;;  %v22912_v35 = vld [vmem:[#allocation243_spill] sm:$0xff] }
 0x6c3   :  { %15144 = vmatpush3.msra.mxu1 %v22881_v28  ;;  %15102 = vmatprep.subr.mxu0 %v21931_v9  ;;  %v22920_v28 = vld [vmem:[#allocation251_spill] sm:$0xff] }
 0x6c4   :  { %15145 = vmatprep.subr.mxu1 %v21931_v9  ;;  %15103 = vmatpush3.msra.mxu0 %v22910_v38  ;;  %v22913_v38 = vld [vmem:[#allocation38_spill] sm:$0xff] }
 0x6c5   :  { %15146 = vmatpush3.msra.mxu1 %v22882_v60  ;;  %15104 = vmatprep.subr.mxu0 %v21931_v9  ;;  %v22918_v60 = vld [vmem:[#allocation63_spill] sm:$0xff] }
 0x6c6   :  { %15147 = vmatprep.subr.mxu1 %v21931_v9  ;;  %15105 = vmatpush3.msra.mxu0 %v22911_v56  ;;  %v22915_v56 = vld [vmem:[#allocation58_spill] sm:$0xff] }
 0x6c7   :  { %15148 = vmatpush3.msra.mxu1 %v22883_v30  ;;  %15149 = vmatprep.mubr.msk.f32.mxu1 %vm15962_vm0, %v21931_v9  ;;  %v22917_v30 = vld [vmem:[#allocation249_spill] sm:$0xff] }
 0x6c8   :  { %15106 = vmatprep.subr.mxu0 %v21931_v9  ;;  %15150 = vmatmul.mubr.f32.vlgmr.msra.gmra.mxu1 %v19501_v7 }
 0x6c9   :  { %15107 = vmatpush3.msra.mxu0 %v22912_v35  ;;  %15114 = vmatprep.mubr.msk.f32.mxu0 %vm15962_vm0, %v21931_v9  ;;  %v22919_v35 = vld [vmem:[#allocation74_spill] sm:$0xff] }
 0x6ca   :  { %15108 = vmatprep.subr.mxu0 %v21931_v9  ;;  %8576 = vmatprep.subr.mxu1 %v22913_v38 }
 0x6cb   :  { %15109 = vmatpush3.msra.mxu0 %v22914_v24  ;;  %8582 = vmatpush1.msra.mxu1 %v22915_v56  ;;  %v22922_v24 = vld [vmem:[#allocation82_spill] sm:$0xff]  ;;  %v22923_v56 = vld [vmem:[#allocation83_spill] sm:$0xff] }
 0x6cc   :  { %15110 = vmatprep.subr.mxu0 %v21931_v9  ;;  %8588 = vmatprep.subr.mxu1 %v22916_v16  ;;  %v22924_v16 = vld [vmem:[#allocation87_spill] sm:$0xff] }
 0x6cd   :  { %15111 = vmatpush3.msra.mxu0 %v22917_v30  ;;  %8594 = vmatpush1.msra.mxu1 %v22918_v60  ;;  %v22925_v60 = vld [vmem:[#allocation97_spill] sm:$0xff] }
 0x6ce   :  { %15112 = vmatprep.subr.mxu0 %v21931_v9  ;;  %8600 = vmatprep.subr.mxu1 %v22919_v35  ;;  %v22926_v35 = vld [vmem:[#allocation102_spill] sm:$0xff] }
 0x6cf   :  { %15113 = vmatpush3.msra.mxu0 %v22920_v28  ;;  %8606 = vmatpush1.msra.mxu1 %v22921_v21  ;;  %v22927_v21 = vld [vmem:[#allocation105_spill] sm:$0xff] }
 0x6d0   :  { %15115 = vmatmul.mubr.f32.vlgmr.msra.gmra.mxu0 %v19501_v7  ;;  %8612 = vmatprep.subr.mxu1 %v22922_v24  ;;  %v22928_v7 = vld [vmem:[#allocation108_spill] sm:$0xff] }
 0x6d1   :  { %8618 = vmatpush1.msra.mxu1 %v22923_v56  ;;  %8464 = vmatprep.subr.mxu0 %v22812_v36  ;;  %v22929_v56 = vld [vmem:[#allocation114_spill] sm:$0xff] }
 0x6d2   :  { %8624 = vmatprep.subr.mxu1 %v22924_v16  ;;  %8466 = vmatpush1.msra.mxu0 %v22355_v57  ;;  %v22930_v16 = vld [vmem:[#allocation119_spill] sm:$0xff] }
 0x6d3   :  { %8630 = vmatpush1.msra.mxu1 %v22925_v60  ;;  %8468 = vmatprep.subr.mxu0 %v22357_v1  ;;  %v22931_v60 = vld [vmem:[#allocation120_spill] sm:$0xff] }
 0x6d4   :  { %8636 = vmatprep.subr.mxu1 %v22926_v35  ;;  %8470 = vmatpush1.msra.mxu0 %v22361_v17  ;;  %v22932_v35 = vld [vmem:[#allocation121_spill] sm:$0xff] }
 0x6d5   :  { %8642 = vmatpush1.msra.mxu1 %v22927_v21  ;;  %8472 = vmatprep.subr.mxu0 %v22363_v37  ;;  %v22933_v21 = vld [vmem:[#allocation126_spill] sm:$0xff] }
 0x6d6   :  { %8648 = vmatprep.subr.mxu1 %v22928_v7  ;;  %8474 = vmatpush1.msra.mxu0 %v22365_v13  ;;  %v22934_v7 = vld [vmem:[#allocation138_spill] sm:$0xff] }
 0x6d7   :  { %8654 = vmatpush1.msra.mxu1 %v22929_v56  ;;  %8476 = vmatprep.subr.mxu0 %v22368_v42  ;;  %v22935_v56 = vld [vmem:[#allocation141_spill] sm:$0xff] }
 0x6d8   :  { %8660 = vmatprep.subr.mxu1 %v22930_v16  ;;  %8478 = vmatpush1.msra.mxu0 %v22370_v2  ;;  %v22936_v16 = vld [vmem:[#allocation143_spill] sm:$0xff] }
 0x6d9   :  { %8666 = vmatpush1.msra.mxu1 %v22931_v60  ;;  %8480 = vmatprep.subr.mxu0 %v22373_v31  ;;  %v22937_v60 = vld [vmem:[#allocation144_spill] sm:$0xff] }
 0x6da   :  { %8672 = vmatprep.subr.mxu1 %v22932_v35  ;;  %8482 = vmatpush1.msra.mxu0 %v22376_v52  ;;  %v22938_v35 = vld [vmem:[#allocation151_spill] sm:$0xff] }
 0x6db   :  { %8678 = vmatpush1.msra.mxu1 %v22933_v21  ;;  %8484 = vmatprep.subr.mxu0 %v22378_v8  ;;  %v22939_v21 = vld [vmem:[#allocation156_spill] sm:$0xff] }
 0x6dc   :  { %8684 = vmatprep.subr.mxu1 %v22934_v7  ;;  %8486 = vmatpush1.msra.mxu0 %v22380_v15  ;;  %v22940_v7 = vld [vmem:[#allocation158_spill] sm:$0xff] }
 0x6dd   :  { %8690 = vmatpush1.msra.mxu1 %v22935_v56  ;;  %8488 = vmatprep.subr.mxu0 %v22384_v22  ;;  %v22941_v56 = vld [vmem:[#allocation160_spill] sm:$0xff] }
 0x6de   :  { %8696 = vmatprep.subr.mxu1 %v22936_v16  ;;  %8490 = vmatpush1.msra.mxu0 %v22386_v4  ;;  %v22942_v16 = vld [vmem:[#allocation161_spill] sm:$0xff] }
 0x6df   :  { %8702 = vmatpush1.msra.mxu1 %v22937_v60  ;;  %8492 = vmatprep.subr.mxu0 %v22388_v33  ;;  %v22943_v60 = vld [vmem:[#allocation163_spill] sm:$0xff] }
 0x6e0   :  { %8708 = vmatprep.subr.mxu1 %v22938_v35  ;;  %8494 = vmatpush1.msra.mxu0 %v22391_v48  ;;  %v22944_v35 = vld [vmem:[#allocation164_spill] sm:$0xff] }
 0x6e1   :  { %8714 = vmatpush1.msra.mxu1 %v22939_v21  ;;  %8496 = vmatprep.subr.mxu0 %v22393_v18  ;;  %v22945_v21 = vld [vmem:[#allocation165_spill] sm:$0xff] }
 0x6e2   :  { %8720 = vmatprep.subr.mxu1 %v22940_v7  ;;  %8498 = vmatpush1.msra.mxu0 %v22395_v44  ;;  %v22946_v7 = vld [vmem:[#allocation166_spill] sm:$0xff] }
 0x6e3   :  { %8726 = vmatpush1.msra.mxu1 %v22941_v56  ;;  %8500 = vmatprep.subr.mxu0 %v22397_v61  ;;  %v22947_v56 = vld [vmem:[#allocation167_spill] sm:$0xff] }
 0x6e4   :  { %8732 = vmatprep.subr.mxu1 %v22942_v16  ;;  %8502 = vmatpush1.msra.mxu0 %v22399_v0 }
 0x6e5   :  { %8738 = vmatpush1.msra.mxu1 %v22943_v60  ;;  %8504 = vmatprep.subr.mxu0 %v22614_v59 }
 0x6e6   :  { %8744 = vmatprep.subr.mxu1 %v22944_v35  ;;  %8506 = vmatpush1.msra.mxu0 %v22616_v19 }
 0x6e7   :  { %8750 = vmatpush1.msra.mxu1 %v22945_v21  ;;  %8508 = vmatprep.subr.mxu0 %v22618_v25 }
 0x6e8   :  { %8756 = vmatprep.subr.mxu1 %v22946_v7  ;;  %8510 = vmatpush1.msra.mxu0 %v22794_v11  ;;  %v7254_v7 = vpop.f32.mrf.mxu1  ;;  %v7022_v60 = vpop.f32.mrf.mxu0 }
 0x6e9   :  { %8762 = vmatpush1.msra.mxu1 %v22947_v56  ;;  %8512 = vmatprep.subr.mxu0 %v22796_v34  ;;  %v22948_v56 = vld [vmem:[#allocation35_spill] sm:$0xff]  ;;  %v7023_v47 = vadd.f32 %v7022_v60, %v22598_v26 }
 0x6ea   :  { %8795 = vmatprep.mubr.f32.mxu1 %v21931_v9  ;;  %8941 = vmatprep.subr.mxu1 %v22812_v36  ;;  %v7256_v21 = vpop.f32.mrf.mxu1  ;;  %v7024_v28 = vpop.f32.mrf.mxu0  ;;  %v22951_v34 = vld [vmem:[#allocation15_spill] sm:$0xff] }
 0x6eb   :  { %8514 = vmatpush1.msra.mxu0 %v22798_v58  ;;  %8559 = vmatprep.mubr.f32.mxu0 %v21931_v9  ;;  %v7255_v50 = vadd.f32 %v7254_v7, %v7023_v47  ;;  %v7025_v63 = vadd.f32 %v7024_v28, %v22599_v27  ;;  %v22953_v28 = vld [vmem:[#allocation154_spill] sm:$0xff] }
 0x6ec   :  { %8516 = vmatprep.subr.mxu0 %v22800_v6  ;;  %v22950_v6 = vld [vmem:[#allocation182_spill] sm:$0xff] }
 0x6ed   :  { %8518 = vmatpush1.msra.mxu0 %v22802_v20 }
 0x6ee   :  { %8520 = vmatprep.subr.mxu0 %v22804_v49  ;;  %v22949_v49 = vld [vmem:[#allocation28_spill] sm:$0xff] }
 0x6ef   :  { %8522 = vmatpush1.msra.mxu0 %v22806_v54  ;;  %v7257_v54 = vadd.f32 %v7256_v21, %v7025_v63  ;;  %v285_v20 = vadd.f32 %v22949_v49, %v22600_v32 }
 0x6f0   :  { %8524 = vmatprep.subr.mxu0 %v22808_v53 }
 0x6f1   :  { %8526 = vmatpush1.msra.mxu0 %v22810_v14 }
 0x6f2   :  { %8805 = vmatprep.subr.mxu0 %v22948_v56 }
 0x700   :  { %v7497_v35 = vpop.f32.mrf.mxu1 }
 0x702   :  { %v7499_v16 = vpop.f32.mrf.mxu1 }
 0x709   :  { %v7391_v30 = vpop.f32.mrf.mxu0 }
 0x70a   :  { %v7392_v56 = vadd.f32 %v7391_v30, %v7255_v50  ;;  %v22952_v30 = vld [vmem:[#allocation117_spill] sm:$0xff] }
 0x70b   :  { %v7393_v46 = vpop.f32.mrf.mxu0 }
 0x70c   :  { %v7498_v5 = vadd.f32 %v7497_v35, %v7392_v56 }
 0x722   :  { %v7769_v24 = vpop.f32.mrf.mxu1 }
 0x724   :  { %v7771_v38 = vpop.f32.mrf.mxu1 }
 0x72b   :  { %v7665_v3 = vpop.f32.mrf.mxu0 }
 0x72c   :  { %v7666_v23 = vadd.f32 %v7665_v3, %v7498_v5 }
 0x72d   :  { %v7667_v29 = vpop.f32.mrf.mxu0 }
 0x72e   :  { %v7770_v14 = vadd.f32 %v7769_v24, %v7666_v23  ;;  %v22954_v23 = vld [vmem:[#allocation177_spill] sm:$0xff] }
 0x730   :  { %v8415_v58 = vadd.f32 %v7770_v14, %v22950_v6 }
 0x732   :  { %v13126_v11 = vmul.f32 -1.442695, %v8415_v58 }
 0x734   :  { %15825 = vpow2.f32 %v13126_v11 }
 0x741   :  { %v15826_v6 = vpop.eup %15825 }
 0x744   :  { %v8012_v40 = vpop.f32.mrf.mxu1 }
 0x746   :  { %v15011_v62 = vpop.f32.mrf.mxu1 }
 0x747   :  { %v7394_v62 = vadd.f32 %v7393_v46, %v7257_v54 }
 0x749   :  { %v7500_v60 = vadd.f32 %v7499_v16, %v7394_v62 }
 0x74b   :  { %v7668_v3 = vadd.f32 %v7667_v29, %v7500_v60 }
 0x74d   :  { %v7861_v51 = vpop.f32.mrf.mxu0  ;;  %v7772_v63 = vadd.f32 %v7771_v38, %v7668_v3 }
 0x74e   :  { %v7862_v16 = vadd.f32 %v7861_v51, %v18603_v55 }
 0x74f   :  { %v14976_v39 = vpop.f32.mrf.mxu0 }
 0x750   :  { %v571_v39 = vadd.f32 %v22951_v34, %v285_v20  ;;  %v8419_v34 = vadd.f32 1.0, %v15826_v6  ;;  %v8013_v20 = vadd.f32 %v8012_v40, %v7862_v16  ;;  %v22958_v16 = vld [vmem:[#allocation45_spill] sm:$0xff] }
 0x752   :  { %v753_v35 = vadd.f32 %v22952_v30, %v571_v39 }
 0x754   :  { %v910_v50 = vadd.f32 %v22953_v28, %v753_v35  ;;  %v22956_v35 = vld [vmem:[#allocation258_spill] sm:$0xff] }
 0x756   :  { %v1126_v21 = vadd.f32 %v22954_v23, %v910_v50  ;;  %v8444_v23 = vpop.permute.xlu0 %8443 }
 0x766   :  { %v8205_v36 = vpop.f32.mrf.mxu1 }
 0x768   :  { %v15081_v53 = vpop.f32.mrf.mxu1 }
 0x769   :  { %v22955_v53 = vld [vmem:[#allocation184_spill] sm:$0xff] }
 0x76a   :  { %v1272_v49 = vadd.f32 %v22955_v53, %v1126_v21 }
 0x76c   :  { %v8422_v46 = vadd.f32 %v7772_v63, %v1272_v49 }
 0x76e   :  { %v13127_v54 = vmul.f32 -1.442695, %v8422_v46 }
 0x76f   :  { %v8116_v47 = vpop.f32.mrf.mxu0 }
 0x770   :  { %15827 = vpow2.f32 %v13127_v54  ;;  %v8117_v14 = vadd.f32 %v8116_v47, %v8013_v20  ;;  %v22960_v20 = vld [vmem:[#allocation49_spill] sm:$0xff] }
 0x771   :  { %v15046_v5 = vpop.f32.mrf.mxu0  ;;  %15829 = vrcp.f32 %v8419_v34  ;;  %v22957_v34 = vld [vmem:[#allocation37_spill] sm:$0xff] }
 0x772   :  { %v8206_v56 = vadd.f32 %v8205_v36, %v8117_v14  ;;  %v8453_v36 = vpop.permute.xlu1 %8452  ;;  %v22962_v14 = vld [vmem:[#allocation64_spill] sm:$0xff] }
 0x773   :  { %v8455_v63 = vmul.f32 %v8453_v36, %v19498_v43  ;;  %v22981_v36 = vld [vmem:[#allocation116_spill] sm:$0xff] }
 0x77d   :  { %v15828_v24 = vpop.eup %15827 }
 0x77e   :  { %v8426_v7 = vadd.f32 1.0, %v15828_v24  ;;  %v15830_v60 = vpop.eup %15829  ;;  %v22963_v24 = vld [vmem:[#allocation65_spill] sm:$0xff] }
 0x780   :  { %15831 = vrcp.f32 %v8426_v7  ;;  %v22966_v7 = vld [vmem:[#allocation80_spill] sm:$0xff] }
 0x788   :  { %v8411_v58 = vpop.f32.mrf.mxu1 }
 0x78a   :  { %v15151_v29 = vpop.f32.mrf.mxu1 }
 0x78b   :  { %v22961_v29 = vld [vmem:[#allocation62_spill] sm:$0xff] }
 0x78d   :  { %v15832_v5 = vpop.eup %15831 }
 0x78e   :  { %v8432_v51 = vsub.f32 1.0, %v15832_v5  ;;  %v8434_v40 = vmul.f32 %v15832_v5, %v19498_v43  ;;  %v22974_v5 = vld [vmem:[#allocation123_spill] sm:$0xff] }
 0x790   :  { %v8324_v11 = vpop.f32.mrf.mxu0 }
 0x791   :  { %v8325_v62 = vadd.f32 %v8324_v11, %v8206_v56  ;;  %v22964_v56 = vld [vmem:[#allocation69_spill] sm:$0xff]  ;;  %v22965_v11 = vld [vmem:[#allocation79_spill] sm:$0xff] }
 0x792   :  { %v15116_v38 = vpop.f32.mrf.mxu0 }
 0x793   :  { %v8412_v39 = vadd.f32 %v8411_v58, %v8325_v62  ;;  %v22959_v58 = vld [vmem:[#allocation48_spill] sm:$0xff]  ;;  %v22968_v38 = vld [vmem:[#allocation109_spill] sm:$0xff] }
 0x794   :  { %v22967_v62 = vld [vmem:[#allocation84_spill] sm:$0xff] }
 0x795   :  { %v8429_v30 = vmul.f32 %v15830_v60, %v8412_v39  ;;  %v22969_v39 = vld [vmem:[#allocation85_spill] sm:$0xff]  ;;  %v22970_v60 = vld [vmem:[#allocation110_spill] sm:$0xff] }
 0x797   :  { %v8430_v3 = vadd.f32 %v8429_v30, %v22956_v35  ;;  %v22971_v30 = vld [vmem:[#allocation89_spill] sm:$0xff]  ;;  %v22972_v35 = vld [vmem:[#allocation122_spill] sm:$0xff] }
 0x799   :  { %15833 = vtanh.f32 %v8430_v3  ;;  %v22973_v3 = vld [vmem:[#allocation99_spill] sm:$0xff] }
 0x7a6   :  { %v15834_v28 = vpop.eup %15833 }
 0x7a7   :  { %v8433_v50 = vmul.f32 %v15834_v28, %v8432_v51  ;;  %v22975_v51 = vld [vmem:[#allocation103_spill] sm:$0xff] }
 0x7a8   :  { %v22976_v28 = vld [vmem:[#allocation127_spill] sm:$0xff] }
 0x7a9   :  { %v8435_v47 = vadd.f32 %v8434_v40, %v8433_v50  ;;  %v22977_v40 = vld [vmem:[#allocation104_spill] sm:$0xff] }
 0x7aa   :  { %v22978_v50 = vld [vmem:[#allocation128_spill] sm:$0xff] }
 0x7ab   :  { %v8446_v21 = vmul.f32 %v8444_v23, %v8435_v47  ;;  %v22979_v47 = vld [vmem:[#allocation107_spill] sm:$0xff]  ;;  %v22980_v23 = vld [vmem:[#allocation130_spill] sm:$0xff] }
 0x7ad   :  { %v19942_v53 = vadd.f32 %v8455_v63, %v8446_v21  ;;  %8448 = vst [vmem:[#allocation10 + $0x18] sm:$0xff] %v8446_v21  ;;  %v22982_v21 = vld [vmem:[#allocation132_spill] sm:$0xff] }
 0x7ae   :  { %v22983_v63 = vld [vmem:[#allocation124_spill] sm:$0xff] }
 0x7af   :  { %v19945_v49 = vand.u32 4294901760, %v19942_v53 }
 0x7b1   :  { %8797 = vmatmul.mubr.f32.vlgmr.msra.gmra.mxu1 %v19945_v49  ;;  %v19950_v46 = vsub.f32 %v19942_v53, %v19945_v49 }
 0x7b2   :  { %8943 = vmatpush1.msra.mxu1 %v22355_v57  ;;  %9036 = vmatprep.mubr.f32.mxu1 %v21931_v9 }
 0x7b3   :  { %8945 = vmatprep.subr.mxu1 %v22357_v1  ;;  %v19956_v43 = vand.u32 4294901760, %v19950_v46 }
 0x7b4   :  { %8947 = vmatpush1.msra.mxu1 %v22361_v17 }
 0x7b5   :  { %8949 = vmatprep.subr.mxu1 %v22363_v37  ;;  %v8563_v54 = vsub.f32 %v19950_v46, %v19956_v43 }
 0x7b6   :  { %8951 = vmatpush1.msra.mxu1 %v22365_v13 }
 0x7b7   :  { %8953 = vmatprep.subr.mxu1 %v22368_v42  ;;  %v19964_v6 = vand.u32 4294901760, %v8563_v54  ;;  %v22984_v54 = vld [vmem:[#allocation139_spill] sm:$0xff] }
 0x7b8   :  { %8955 = vmatpush1.msra.mxu1 %v22370_v2 }
 0x7b9   :  { %8957 = vmatprep.subr.mxu1 %v22373_v31  ;;  %8565 = vmatmul.mubr.f32.vlgmr.msra.gmra.mxu0 %v19964_v6 }
 0x7ba   :  { %8808 = vmatpush1.msra.mxu0 %v22435_v12  ;;  %8959 = vmatpush1.msra.mxu1 %v22376_v52 }
 0x7bb   :  { %8811 = vmatprep.subr.mxu0 %v22436_v45  ;;  %8961 = vmatprep.subr.mxu1 %v22378_v8 }
 0x7bc   :  { %8814 = vmatpush1.msra.mxu0 %v22437_v10  ;;  %8963 = vmatpush1.msra.mxu1 %v22380_v15 }
 0x7bd   :  { %8817 = vmatprep.subr.mxu0 %v22438_v41  ;;  %8965 = vmatprep.subr.mxu1 %v22384_v22 }
 0x7be   :  { %8820 = vmatpush1.msra.mxu0 %v22957_v34  ;;  %8967 = vmatpush1.msra.mxu1 %v22386_v4  ;;  %v23059_v34 = vld [vmem:[#allocation197_spill] sm:$0xff] }
 0x7bf   :  { %8823 = vmatprep.subr.mxu0 %v22958_v16  ;;  %8969 = vmatprep.subr.mxu1 %v22388_v33  ;;  %v23058_v16 = vld [vmem:[#allocation194_spill] sm:$0xff] }
 0x7c0   :  { %8826 = vmatpush1.msra.mxu0 %v22959_v58  ;;  %8971 = vmatpush1.msra.mxu1 %v22391_v48  ;;  %v23057_v58 = vld [vmem:[#allocation240_spill] sm:$0xff] }
 0x7c1   :  { %8829 = vmatprep.subr.mxu0 %v22960_v20  ;;  %8973 = vmatprep.subr.mxu1 %v22393_v18  ;;  %v23053_v20 = vld [vmem:[#allocation255_spill] sm:$0xff] }
 0x7c2   :  { %8832 = vmatpush1.msra.mxu0 %v22961_v29  ;;  %8975 = vmatpush1.msra.mxu1 %v22395_v44  ;;  %v23051_v29 = vld [vmem:[#allocation254_spill] sm:$0xff] }
 0x7c3   :  { %8835 = vmatprep.subr.mxu0 %v22962_v14  ;;  %8977 = vmatprep.subr.mxu1 %v22397_v61  ;;  %v23049_v14 = vld [vmem:[#allocation253_spill] sm:$0xff] }
 0x7c4   :  { %8838 = vmatpush1.msra.mxu0 %v22963_v24  ;;  %8979 = vmatpush1.msra.mxu1 %v22399_v0  ;;  %v23047_v24 = vld [vmem:[#allocation252_spill] sm:$0xff] }
 0x7c5   :  { %8841 = vmatprep.subr.mxu0 %v22964_v56  ;;  %8981 = vmatprep.subr.mxu1 %v22614_v59  ;;  %v23045_v56 = vld [vmem:[#allocation250_spill] sm:$0xff] }
 0x7c6   :  { %8844 = vmatpush1.msra.mxu0 %v22965_v11  ;;  %8983 = vmatpush1.msra.mxu1 %v22616_v19  ;;  %v23043_v11 = vld [vmem:[#allocation248_spill] sm:$0xff] }
 0x7c7   :  { %8847 = vmatprep.subr.mxu0 %v22966_v7  ;;  %8985 = vmatprep.subr.mxu1 %v22618_v25  ;;  %v23027_v7 = vld [vmem:[#allocation157_spill] sm:$0xff] }
 0x7c8   :  { %8850 = vmatpush1.msra.mxu0 %v22967_v62  ;;  %8987 = vmatpush1.msra.mxu1 %v22968_v38  ;;  %v23026_v62 = vld [vmem:[#allocation218_spill] sm:$0xff] }
 0x7c9   :  { %8853 = vmatprep.subr.mxu0 %v22969_v39  ;;  %8989 = vmatprep.subr.mxu1 %v22970_v60  ;;  %v23024_v39 = vld [vmem:[#allocation152_spill] sm:$0xff] }
 0x7ca   :  { %8856 = vmatpush1.msra.mxu0 %v22971_v30  ;;  %8991 = vmatpush1.msra.mxu1 %v22972_v35  ;;  %v22992_v30 = vld [vmem:[#allocation148_spill] sm:$0xff] }
 0x7cb   :  { %8859 = vmatprep.subr.mxu0 %v22973_v3  ;;  %8993 = vmatprep.subr.mxu1 %v22974_v5  ;;  %v22985_v3 = vld [vmem:[#allocation125_spill] sm:$0xff] }
 0x7cc   :  { %8862 = vmatpush1.msra.mxu0 %v22975_v51  ;;  %8995 = vmatpush1.msra.mxu1 %v22976_v28  ;;  %v22986_v51 = vld [vmem:[#allocation29_spill] sm:$0xff] }
 0x7cd   :  { %8865 = vmatprep.subr.mxu0 %v22977_v40  ;;  %8997 = vmatprep.subr.mxu1 %v22978_v50  ;;  %v22987_v40 = vld [vmem:[#allocation131_spill] sm:$0xff] }
 0x7ce   :  { %8868 = vmatpush1.msra.mxu0 %v22979_v47  ;;  %8999 = vmatpush1.msra.mxu1 %v22980_v23  ;;  %v22988_v47 = vld [vmem:[#allocation135_spill] sm:$0xff] }
 0x7cf   :  { %8871 = vmatprep.subr.mxu0 %v22981_v36  ;;  %9001 = vmatprep.subr.mxu1 %v22982_v21  ;;  %v22989_v36 = vld [vmem:[#allocation140_spill] sm:$0xff] }
 0x7d0   :  { %8874 = vmatpush1.msra.mxu0 %v22983_v63  ;;  %9003 = vmatpush1.msra.mxu1 %v22984_v54  ;;  %v22990_v63 = vld [vmem:[#allocation142_spill] sm:$0xff] }
 0x7d1   :  { %8877 = vmatprep.subr.mxu0 %v22985_v3  ;;  %9040 = vmatmul.mubr.f32.vlgmr.msra.gmra.mxu1 %v19956_v43  ;;  %v22991_v3 = vld [vmem:[#allocation146_spill] sm:$0xff] }
 0x7d2   :  { %9215 = vmatprep.subr.mxu1 %v22986_v51  ;;  %8880 = vmatpush1.msra.mxu0 %v22987_v40  ;;  %v22993_v40 = vld [vmem:[#allocation150_spill] sm:$0xff] }
 0x7d3   :  { %9217 = vmatpush1.msra.mxu1 %v22355_v57  ;;  %8883 = vmatprep.subr.mxu0 %v22988_v47  ;;  %v22999_v47 = vld [vmem:[#allocation54_spill] sm:$0xff] }
 0x7d4   :  { %9219 = vmatprep.subr.mxu1 %v22357_v1  ;;  %8886 = vmatpush1.msra.mxu0 %v22989_v36  ;;  %v22994_v36 = vld [vmem:[#allocation23_spill] sm:$0xff] }
 0x7d5   :  { %9221 = vmatpush1.msra.mxu1 %v22361_v17  ;;  %8889 = vmatprep.subr.mxu0 %v22990_v63  ;;  %v22995_v63 = vld [vmem:[#allocation40_spill] sm:$0xff] }
 0x7d6   :  { %9223 = vmatprep.subr.mxu1 %v22363_v37  ;;  %8892 = vmatpush1.msra.mxu0 %v22991_v3  ;;  %v22996_v3 = vld [vmem:[#allocation26_spill] sm:$0xff] }
 0x7d7   :  { %9225 = vmatpush1.msra.mxu1 %v22365_v13  ;;  %8895 = vmatprep.subr.mxu0 %v22992_v30  ;;  %v22997_v30 = vld [vmem:[#allocation16_spill] sm:$0xff] }
 0x7d8   :  { %9227 = vmatprep.subr.mxu1 %v22368_v42  ;;  %8898 = vmatpush1.msra.mxu0 %v22993_v40  ;;  %v22998_v40 = vld [vmem:[#allocation43_spill] sm:$0xff] }
 0x7d9   :  { %8931 = vmatprep.mubr.f32.mxu0 %v21931_v9  ;;  %9229 = vmatpush1.msra.mxu1 %v22370_v2 }
 0x7da   :  { %8934 = vmatmul.mubr.f32.vlgmr.msra.gmra.mxu0 %v19950_v46  ;;  %9049 = vmatprep.subr.mxu0 %v22994_v36  ;;  %v23000_v36 = vld [vmem:[#allocation17_spill] sm:$0xff] }
 0x7db   :  { %9231 = vmatprep.subr.mxu1 %v22373_v31  ;;  %9053 = vmatpush1.msra.mxu0 %v22995_v63  ;;  %v23001_v63 = vld [vmem:[#allocation59_spill] sm:$0xff] }
 0x7dc   :  { %9233 = vmatpush1.msra.mxu1 %v22376_v52  ;;  %9057 = vmatprep.subr.mxu0 %v22996_v3  ;;  %v23002_v3 = vld [vmem:[#allocation61_spill] sm:$0xff] }
 0x7dd   :  { %9235 = vmatprep.subr.mxu1 %v22378_v8  ;;  %9061 = vmatpush1.msra.mxu0 %v22997_v30  ;;  %v23003_v30 = vld [vmem:[#allocation73_spill] sm:$0xff] }
 0x7de   :  { %9237 = vmatpush1.msra.mxu1 %v22380_v15  ;;  %9065 = vmatprep.subr.mxu0 %v22998_v40  ;;  %v23004_v40 = vld [vmem:[#allocation76_spill] sm:$0xff] }
 0x7df   :  { %9239 = vmatprep.subr.mxu1 %v22384_v22  ;;  %9069 = vmatpush1.msra.mxu0 %v22999_v47  ;;  %v23005_v47 = vld [vmem:[#allocation77_spill] sm:$0xff] }
 0x7e0   :  { %9241 = vmatpush1.msra.mxu1 %v22386_v4  ;;  %9073 = vmatprep.subr.mxu0 %v23000_v36  ;;  %v23006_v36 = vld [vmem:[#allocation78_spill] sm:$0xff] }
 0x7e1   :  { %9243 = vmatprep.subr.mxu1 %v22388_v33  ;;  %9077 = vmatpush1.msra.mxu0 %v23001_v63  ;;  %v23007_v63 = vld [vmem:[#allocation93_spill] sm:$0xff] }
 0x7e2   :  { %9245 = vmatpush1.msra.mxu1 %v22391_v48  ;;  %9081 = vmatprep.subr.mxu0 %v23002_v3  ;;  %v23008_v3 = vld [vmem:[#allocation94_spill] sm:$0xff] }
 0x7e3   :  { %9247 = vmatprep.subr.mxu1 %v22393_v18  ;;  %9085 = vmatpush1.msra.mxu0 %v23003_v30  ;;  %v23009_v30 = vld [vmem:[#allocation95_spill] sm:$0xff] }
 0x7e4   :  { %9249 = vmatpush1.msra.mxu1 %v22395_v44  ;;  %9089 = vmatprep.subr.mxu0 %v23004_v40  ;;  %v23010_v40 = vld [vmem:[#allocation96_spill] sm:$0xff] }
 0x7e5   :  { %9251 = vmatprep.subr.mxu1 %v22397_v61  ;;  %9093 = vmatpush1.msra.mxu0 %v23005_v47  ;;  %v23011_v47 = vld [vmem:[#allocation98_spill] sm:$0xff] }
 0x7e6   :  { %9253 = vmatpush1.msra.mxu1 %v22399_v0  ;;  %9097 = vmatprep.subr.mxu0 %v23006_v36  ;;  %v23012_v36 = vld [vmem:[#allocation111_spill] sm:$0xff] }
 0x7e7   :  { %9255 = vmatprep.subr.mxu1 %v22614_v59  ;;  %9101 = vmatpush1.msra.mxu0 %v23007_v63  ;;  %v23013_v63 = vld [vmem:[#allocation112_spill] sm:$0xff] }
 0x7e8   :  { %9257 = vmatpush1.msra.mxu1 %v22616_v19  ;;  %9105 = vmatprep.subr.mxu0 %v23008_v3  ;;  %v23014_v3 = vld [vmem:[#allocation113_spill] sm:$0xff] }
 0x7e9   :  { %9259 = vmatprep.subr.mxu1 %v22618_v25  ;;  %9109 = vmatpush1.msra.mxu0 %v23009_v30  ;;  %v23015_v30 = vld [vmem:[#allocation115_spill] sm:$0xff] }
 0x7ea   :  { %9261 = vmatpush1.msra.mxu1 %v22968_v38  ;;  %9113 = vmatprep.subr.mxu0 %v23010_v40  ;;  %v23016_v40 = vld [vmem:[#allocation129_spill] sm:$0xff] }
 0x7eb   :  { %9263 = vmatprep.subr.mxu1 %v22970_v60  ;;  %9117 = vmatpush1.msra.mxu0 %v23011_v47  ;;  %v23017_v47 = vld [vmem:[#allocation133_spill] sm:$0xff] }
 0x7ec   :  { %9265 = vmatpush1.msra.mxu1 %v22972_v35  ;;  %9121 = vmatprep.subr.mxu0 %v23012_v36  ;;  %v23021_v36 = vld [vmem:[#allocation147_spill] sm:$0xff] }
 0x7ed   :  { %9267 = vmatprep.subr.mxu1 %v22974_v5  ;;  %9125 = vmatpush1.msra.mxu0 %v23013_v63  ;;  %v23018_v63 = vld [vmem:[#allocation134_spill] sm:$0xff] }
 0x7ee   :  { %9269 = vmatpush1.msra.mxu1 %v22976_v28  ;;  %9129 = vmatprep.subr.mxu0 %v23014_v3  ;;  %v23019_v3 = vld [vmem:[#allocation145_spill] sm:$0xff] }
 0x7ef   :  { %9271 = vmatprep.subr.mxu1 %v22978_v50  ;;  %9133 = vmatpush1.msra.mxu0 %v23015_v30  ;;  %v23020_v30 = vld [vmem:[#allocation210_spill] sm:$0xff] }
 0x7f0   :  { %9273 = vmatpush1.msra.mxu1 %v22980_v23  ;;  %9137 = vmatprep.subr.mxu0 %v23016_v40  ;;  %v23022_v40 = vld [vmem:[#allocation149_spill] sm:$0xff] }
 0x7f1   :  { %9275 = vmatprep.subr.mxu1 %v22982_v21  ;;  %9141 = vmatpush1.msra.mxu0 %v23017_v47  ;;  %v23023_v47 = vld [vmem:[#allocation215_spill] sm:$0xff] }
 0x7f2   :  { %9277 = vmatpush1.msra.mxu1 %v22984_v54  ;;  %9310 = vmatprep.mubr.f32.mxu1 %v21931_v9 }
 0x7f3   :  { %9145 = vmatprep.subr.mxu0 %v23018_v63  ;;  %9312 = vmatmul.mubr.f32.vlgmr.msra.gmra.mxu1 %v19945_v49  ;;  %v23025_v63 = vld [vmem:[#allocation155_spill] sm:$0xff] }
 0x7f4   :  { %15187 = vmatprep.subr.mxu1 %v21931_v9  ;;  %9149 = vmatpush1.msra.mxu0 %v23019_v3  ;;  %v23041_v3 = vld [vmem:[#allocation245_spill] sm:$0xff] }
 0x7f5   :  { %15188 = vmatpush3.msra.mxu1 %v23020_v30  ;;  %9153 = vmatprep.subr.mxu0 %v23021_v36  ;;  %v23028_v30 = vld [vmem:[#allocation159_spill] sm:$0xff]  ;;  %v23029_v36 = vld [vmem:[#allocation222_spill] sm:$0xff] }
 0x7f6   :  { %15189 = vmatprep.subr.mxu1 %v21931_v9  ;;  %9157 = vmatpush1.msra.mxu0 %v23022_v40  ;;  %v23039_v40 = vld [vmem:[#allocation242_spill] sm:$0xff] }
 0x7f7   :  { %15190 = vmatpush3.msra.mxu1 %v23023_v47  ;;  %9161 = vmatprep.subr.mxu0 %v23024_v39  ;;  %v23030_v39 = vld [vmem:[#allocation191_spill] sm:$0xff]  ;;  %v23037_v47 = vld [vmem:[#allocation238_spill] sm:$0xff] }
 0x7f8   :  { %15191 = vmatprep.subr.mxu1 %v21931_v9  ;;  %9165 = vmatpush1.msra.mxu0 %v23025_v63  ;;  %v23031_v63 = vld [vmem:[#allocation226_spill] sm:$0xff] }
 0x7f9   :  { %15192 = vmatpush3.msra.mxu1 %v23026_v62  ;;  %9169 = vmatprep.subr.mxu0 %v23027_v7  ;;  %v23032_v7 = vld [vmem:[#allocation192_spill] sm:$0xff]  ;;  %v23035_v62 = vld [vmem:[#allocation234_spill] sm:$0xff] }
 0x7fa   :  { %15193 = vmatprep.subr.mxu1 %v21931_v9  ;;  %9173 = vmatpush1.msra.mxu0 %v23028_v30  ;;  %v23033_v30 = vld [vmem:[#allocation230_spill] sm:$0xff] }
 0x7fb   :  { %9206 = vmatprep.mubr.f32.mxu0 %v21931_v9  ;;  %15194 = vmatpush3.msra.mxu1 %v23029_v36  ;;  %v23034_v36 = vld [vmem:[#allocation193_spill] sm:$0xff] }
 0x7fc   :  { %9208 = vmatmul.mubr.f32.vlgmr.msra.gmra.mxu0 %v19945_v49  ;;  %15152 = vmatprep.subr.mxu0 %v21931_v9 }
 0x7fd   :  { %15195 = vmatprep.subr.mxu1 %v21931_v9  ;;  %15153 = vmatpush3.msra.mxu0 %v23030_v39 }
 0x7fe   :  { %15196 = vmatpush3.msra.mxu1 %v23031_v63  ;;  %15154 = vmatprep.subr.mxu0 %v21931_v9  ;;  %v23036_v63 = vld [vmem:[#allocation196_spill] sm:$0xff] }
 0x7ff   :  { %15197 = vmatprep.subr.mxu1 %v21931_v9  ;;  %15155 = vmatpush3.msra.mxu0 %v23032_v7 }
 0x800   :  { %15198 = vmatpush3.msra.mxu1 %v23033_v30  ;;  %15156 = vmatprep.subr.mxu0 %v21931_v9  ;;  %v23038_v30 = vld [vmem:[#allocation200_spill] sm:$0xff] }
 0x801   :  { %15199 = vmatprep.subr.mxu1 %v21931_v9  ;;  %15157 = vmatpush3.msra.mxu0 %v23034_v36 }
 0x802   :  { %15200 = vmatpush3.msra.mxu1 %v23035_v62  ;;  %15158 = vmatprep.subr.mxu0 %v21931_v9  ;;  %v23040_v62 = vld [vmem:[#allocation201_spill] sm:$0xff] }
 0x803   :  { %15201 = vmatprep.subr.mxu1 %v21931_v9  ;;  %15159 = vmatpush3.msra.mxu0 %v23036_v63 }
 0x804   :  { %15202 = vmatpush3.msra.mxu1 %v23037_v47  ;;  %15160 = vmatprep.subr.mxu0 %v21931_v9  ;;  %v23042_v47 = vld [vmem:[#allocation205_spill] sm:$0xff] }
 0x805   :  { %15203 = vmatprep.subr.mxu1 %v21931_v9  ;;  %15161 = vmatpush3.msra.mxu0 %v23038_v30 }
 0x806   :  { %15204 = vmatpush3.msra.mxu1 %v23039_v40  ;;  %15162 = vmatprep.subr.mxu0 %v21931_v9  ;;  %v23044_v40 = vld [vmem:[#allocation209_spill] sm:$0xff] }
 0x807   :  { %15205 = vmatprep.subr.mxu1 %v21931_v9  ;;  %15163 = vmatpush3.msra.mxu0 %v23040_v62 }
 0x808   :  { %15206 = vmatpush3.msra.mxu1 %v23041_v3  ;;  %15164 = vmatprep.subr.mxu0 %v21931_v9  ;;  %v23046_v3 = vld [vmem:[#allocation211_spill] sm:$0xff] }
 0x809   :  { %15207 = vmatprep.subr.mxu1 %v21931_v9  ;;  %15165 = vmatpush3.msra.mxu0 %v23042_v47 }
 0x80a   :  { %15208 = vmatpush3.msra.mxu1 %v23043_v11  ;;  %15166 = vmatprep.subr.mxu0 %v21931_v9  ;;  %v23048_v11 = vld [vmem:[#allocation216_spill] sm:$0xff] }
 0x80b   :  { %15209 = vmatprep.subr.mxu1 %v21931_v9  ;;  %15167 = vmatpush3.msra.mxu0 %v23044_v40 }
 0x80c   :  { %15210 = vmatpush3.msra.mxu1 %v23045_v56  ;;  %15168 = vmatprep.subr.mxu0 %v21931_v9  ;;  %v23050_v56 = vld [vmem:[#allocation219_spill] sm:$0xff] }
 0x80d   :  { %15211 = vmatprep.subr.mxu1 %v21931_v9  ;;  %15169 = vmatpush3.msra.mxu0 %v23046_v3 }
 0x80e   :  { %15212 = vmatpush3.msra.mxu1 %v23047_v24  ;;  %15170 = vmatprep.subr.mxu0 %v21931_v9  ;;  %v23052_v24 = vld [vmem:[#allocation223_spill] sm:$0xff] }
 0x80f   :  { %15213 = vmatprep.subr.mxu1 %v21931_v9  ;;  %15171 = vmatpush3.msra.mxu0 %v23048_v11 }
 0x810   :  { %15214 = vmatpush3.msra.mxu1 %v23049_v14  ;;  %15172 = vmatprep.subr.mxu0 %v21931_v9  ;;  %v23054_v14 = vld [vmem:[#allocation229_spill] sm:$0xff] }
 0x811   :  { %15215 = vmatprep.subr.mxu1 %v21931_v9  ;;  %15173 = vmatpush3.msra.mxu0 %v23050_v56 }
 0x812   :  { %15216 = vmatpush3.msra.mxu1 %v23051_v29  ;;  %15174 = vmatprep.subr.mxu0 %v21931_v9  ;;  %v23055_v29 = vld [vmem:[#allocation233_spill] sm:$0xff] }
 0x813   :  { %15217 = vmatprep.subr.mxu1 %v21931_v9  ;;  %15175 = vmatpush3.msra.mxu0 %v23052_v24 }
 0x814   :  { %15218 = vmatpush3.msra.mxu1 %v23053_v20  ;;  %15219 = vmatprep.mubr.msk.f32.mxu1 %vm15962_vm0, %v21931_v9  ;;  %v23056_v20 = vld [vmem:[#allocation236_spill] sm:$0xff] }
 0x815   :  { %15176 = vmatprep.subr.mxu0 %v21931_v9  ;;  %15220 = vmatmul.mubr.f32.vlgmr.msra.gmra.mxu1 %v19945_v49 }
 0x816   :  { %15257 = vmatprep.subr.mxu1 %v21931_v9  ;;  %15177 = vmatpush3.msra.mxu0 %v23054_v14 }
 0x817   :  { %15258 = vmatpush3.msra.mxu1 %v23030_v39  ;;  %15178 = vmatprep.subr.mxu0 %v21931_v9 }
 0x818   :  { %15259 = vmatprep.subr.mxu1 %v21931_v9  ;;  %15179 = vmatpush3.msra.mxu0 %v23055_v29 }
 0x819   :  { %15260 = vmatpush3.msra.mxu1 %v23032_v7  ;;  %15180 = vmatprep.subr.mxu0 %v21931_v9 }
 0x81a   :  { %15261 = vmatprep.subr.mxu1 %v21931_v9  ;;  %15181 = vmatpush3.msra.mxu0 %v23056_v20 }
 0x81b   :  { %15262 = vmatpush3.msra.mxu1 %v23034_v36  ;;  %15182 = vmatprep.subr.mxu0 %v21931_v9 }
 0x81c   :  { %15263 = vmatprep.subr.mxu1 %v21931_v9  ;;  %15183 = vmatpush3.msra.mxu0 %v23057_v58 }
 0x81d   :  { %15184 = vmatprep.mubr.msk.f32.mxu0 %vm15962_vm0, %v21931_v9  ;;  %15264 = vmatpush3.msra.mxu1 %v23036_v63 }
 0x81e   :  { %15185 = vmatmul.mubr.f32.vlgmr.msra.gmra.mxu0 %v19964_v6  ;;  %15222 = vmatprep.subr.mxu0 %v21931_v9  ;;  %v23060_v6 = vld [vmem:[#allocation199_spill] sm:$0xff] }
 0x81f   :  { %15265 = vmatprep.subr.mxu1 %v21931_v9  ;;  %15223 = vmatpush3.msra.mxu0 %v23058_v16  ;;  %v23061_v16 = vld [vmem:[#allocation202_spill] sm:$0xff] }
 0x820   :  { %15266 = vmatpush3.msra.mxu1 %v23038_v30  ;;  %15224 = vmatprep.subr.mxu0 %v21931_v9 }
 0x821   :  { %15267 = vmatprep.subr.mxu1 %v21931_v9  ;;  %15225 = vmatpush3.msra.mxu0 %v23059_v34  ;;  %v23062_v34 = vld [vmem:[#allocation206_spill] sm:$0xff] }
 0x822   :  { %15268 = vmatpush3.msra.mxu1 %v23040_v62  ;;  %15226 = vmatprep.subr.mxu0 %v21931_v9 }
 0x823   :  { %15269 = vmatprep.subr.mxu1 %v21931_v9  ;;  %15227 = vmatpush3.msra.mxu0 %v23060_v6  ;;  %v23063_v6 = vld [vmem:[#allocation208_spill] sm:$0xff] }
 0x824   :  { %15270 = vmatpush3.msra.mxu1 %v23042_v47  ;;  %15228 = vmatprep.subr.mxu0 %v21931_v9 }
 0x825   :  { %15271 = vmatprep.subr.mxu1 %v21931_v9  ;;  %15229 = vmatpush3.msra.mxu0 %v23061_v16  ;;  %v23064_v16 = vld [vmem:[#allocation213_spill] sm:$0xff] }
 0x826   :  { %15272 = vmatpush3.msra.mxu1 %v23044_v40  ;;  %15230 = vmatprep.subr.mxu0 %v21931_v9 }
 0x827   :  { %15273 = vmatprep.subr.mxu1 %v21931_v9  ;;  %15231 = vmatpush3.msra.mxu0 %v23062_v34  ;;  %v23065_v34 = vld [vmem:[#allocation217_spill] sm:$0xff] }
 0x828   :  { %15274 = vmatpush3.msra.mxu1 %v23046_v3  ;;  %15232 = vmatprep.subr.mxu0 %v21931_v9 }
 0x829   :  { %15275 = vmatprep.subr.mxu1 %v21931_v9  ;;  %15233 = vmatpush3.msra.mxu0 %v23063_v6  ;;  %v23066_v6 = vld [vmem:[#allocation221_spill] sm:$0xff] }
 0x82a   :  { %15276 = vmatpush3.msra.mxu1 %v23048_v11  ;;  %15234 = vmatprep.subr.mxu0 %v21931_v9 }
 0x82b   :  { %15277 = vmatprep.subr.mxu1 %v21931_v9  ;;  %15235 = vmatpush3.msra.mxu0 %v23064_v16  ;;  %v23067_v16 = vld [vmem:[#allocation225_spill] sm:$0xff] }
 0x82c   :  { %15278 = vmatpush3.msra.mxu1 %v23050_v56  ;;  %15236 = vmatprep.subr.mxu0 %v21931_v9 }
 0x82d   :  { %15279 = vmatprep.subr.mxu1 %v21931_v9  ;;  %15237 = vmatpush3.msra.mxu0 %v23065_v34  ;;  %v23068_v34 = vld [vmem:[#allocation228_spill] sm:$0xff] }
 0x82e   :  { %15280 = vmatpush3.msra.mxu1 %v23052_v24  ;;  %15238 = vmatprep.subr.mxu0 %v21931_v9 }
 0x82f   :  { %15281 = vmatprep.subr.mxu1 %v21931_v9  ;;  %15239 = vmatpush3.msra.mxu0 %v23066_v6  ;;  %v23069_v6 = vld [vmem:[#allocation232_spill] sm:$0xff] }
 0x830   :  { %15282 = vmatpush3.msra.mxu1 %v23054_v14  ;;  %15240 = vmatprep.subr.mxu0 %v21931_v9 }
 0x831   :  { %15283 = vmatprep.subr.mxu1 %v21931_v9  ;;  %15241 = vmatpush3.msra.mxu0 %v23067_v16  ;;  %v23072_v16 = vld [vmem:[#allocation244_spill] sm:$0xff] }
 0x832   :  { %15284 = vmatpush3.msra.mxu1 %v23055_v29  ;;  %15242 = vmatprep.subr.mxu0 %v21931_v9 }
 0x833   :  { %15285 = vmatprep.subr.mxu1 %v21931_v9  ;;  %15243 = vmatpush3.msra.mxu0 %v23068_v34  ;;  %v23070_v34 = vld [vmem:[#allocation237_spill] sm:$0xff] }
 0x834   :  { %15286 = vmatpush3.msra.mxu1 %v23056_v20  ;;  %15244 = vmatprep.subr.mxu0 %v21931_v9 }
 0x835   :  { %15287 = vmatprep.subr.mxu1 %v21931_v9  ;;  %15245 = vmatpush3.msra.mxu0 %v23069_v6  ;;  %v23071_v6 = vld [vmem:[#allocation241_spill] sm:$0xff] }
 0x836   :  { %15288 = vmatpush3.msra.mxu1 %v23057_v58  ;;  %15289 = vmatprep.mubr.msk.f32.mxu1 %vm15962_vm0, %v21931_v9 }
 0x837   :  { %15246 = vmatprep.subr.mxu0 %v21931_v9  ;;  %15290 = vmatmul.mubr.f32.vlgmr.msra.gmra.mxu1 %v19956_v43  ;;  %v23073_v43 = vld [vmem:[#allocation247_spill] sm:$0xff] }
 0x838   :  { %15327 = vmatprep.subr.mxu1 %v21931_v9  ;;  %15247 = vmatpush3.msra.mxu0 %v23070_v34  ;;  %v23090_v34 = vld [vmem:[#allocation60_spill] sm:$0xff] }
 0x839   :  { %15328 = vmatpush3.msra.mxu1 %v23030_v39  ;;  %15248 = vmatprep.subr.mxu0 %v21931_v9 }
 0x83a   :  { %15329 = vmatprep.subr.mxu1 %v21931_v9  ;;  %15249 = vmatpush3.msra.mxu0 %v23071_v6  ;;  %v23088_v6 = vld [vmem:[#allocation246_spill] sm:$0xff] }
 0x83b   :  { %15330 = vmatpush3.msra.mxu1 %v23032_v7  ;;  %15250 = vmatprep.subr.mxu0 %v21931_v9 }
 0x83c   :  { %15331 = vmatprep.subr.mxu1 %v21931_v9  ;;  %15251 = vmatpush3.msra.mxu0 %v23072_v16  ;;  %v23074_v16 = vld [vmem:[#allocation198_spill] sm:$0xff] }
 0x83d   :  { %15332 = vmatpush3.msra.mxu1 %v23034_v36  ;;  %15252 = vmatprep.subr.mxu0 %v21931_v9 }
 0x83e   :  { %15333 = vmatprep.subr.mxu1 %v21931_v9  ;;  %15253 = vmatpush3.msra.mxu0 %v23073_v43  ;;  %v23075_v43 = vld [vmem:[#allocation203_spill] sm:$0xff] }
 0x83f   :  { %15254 = vmatprep.mubr.msk.f32.mxu0 %vm15962_vm0, %v21931_v9  ;;  %15334 = vmatpush3.msra.mxu1 %v23036_v63 }
 0x840   :  { %15255 = vmatmul.mubr.f32.vlgmr.msra.gmra.mxu0 %v19950_v46  ;;  %15292 = vmatprep.subr.mxu0 %v21931_v9  ;;  %v23076_v46 = vld [vmem:[#allocation204_spill] sm:$0xff] }
 0x841   :  { %15335 = vmatprep.subr.mxu1 %v21931_v9  ;;  %15293 = vmatpush3.msra.mxu0 %v23074_v16  ;;  %v23077_v16 = vld [vmem:[#allocation207_spill] sm:$0xff] }
 0x842   :  { %15336 = vmatpush3.msra.mxu1 %v23038_v30  ;;  %15294 = vmatprep.subr.mxu0 %v21931_v9 }
 0x843   :  { %15337 = vmatprep.subr.mxu1 %v21931_v9  ;;  %15295 = vmatpush3.msra.mxu0 %v23075_v43  ;;  %v23078_v43 = vld [vmem:[#allocation212_spill] sm:$0xff] }
 0x844   :  { %15338 = vmatpush3.msra.mxu1 %v23040_v62  ;;  %15296 = vmatprep.subr.mxu0 %v21931_v9 }
 0x845   :  { %15339 = vmatprep.subr.mxu1 %v21931_v9  ;;  %15297 = vmatpush3.msra.mxu0 %v23076_v46  ;;  %v23079_v46 = vld [vmem:[#allocation214_spill] sm:$0xff] }
 0x846   :  { %15340 = vmatpush3.msra.mxu1 %v23042_v47  ;;  %15298 = vmatprep.subr.mxu0 %v21931_v9 }
 0x847   :  { %15341 = vmatprep.subr.mxu1 %v21931_v9  ;;  %15299 = vmatpush3.msra.mxu0 %v23077_v16  ;;  %v23080_v16 = vld [vmem:[#allocation220_spill] sm:$0xff] }
 0x848   :  { %15342 = vmatpush3.msra.mxu1 %v23044_v40  ;;  %15300 = vmatprep.subr.mxu0 %v21931_v9 }
 0x849   :  { %15343 = vmatprep.subr.mxu1 %v21931_v9  ;;  %15301 = vmatpush3.msra.mxu0 %v23078_v43  ;;  %v23081_v43 = vld [vmem:[#allocation224_spill] sm:$0xff] }
 0x84a   :  { %15344 = vmatpush3.msra.mxu1 %v23046_v3  ;;  %15302 = vmatprep.subr.mxu0 %v21931_v9 }
 0x84b   :  { %15345 = vmatprep.subr.mxu1 %v21931_v9  ;;  %15303 = vmatpush3.msra.mxu0 %v23079_v46  ;;  %v23082_v46 = vld [vmem:[#allocation227_spill] sm:$0xff] }
 0x84c   :  { %15346 = vmatpush3.msra.mxu1 %v23048_v11  ;;  %15304 = vmatprep.subr.mxu0 %v21931_v9 }
 0x84d   :  { %15347 = vmatprep.subr.mxu1 %v21931_v9  ;;  %15305 = vmatpush3.msra.mxu0 %v23080_v16  ;;  %v23083_v16 = vld [vmem:[#allocation231_spill] sm:$0xff] }
 0x84e   :  { %15348 = vmatpush3.msra.mxu1 %v23050_v56  ;;  %15306 = vmatprep.subr.mxu0 %v21931_v9 }
 0x84f   :  { %15349 = vmatprep.subr.mxu1 %v21931_v9  ;;  %15307 = vmatpush3.msra.mxu0 %v23081_v43  ;;  %v23084_v43 = vld [vmem:[#allocation235_spill] sm:$0xff] }
 0x850   :  { %15350 = vmatpush3.msra.mxu1 %v23052_v24  ;;  %15308 = vmatprep.subr.mxu0 %v21931_v9 }
 0x851   :  { %15351 = vmatprep.subr.mxu1 %v21931_v9  ;;  %15309 = vmatpush3.msra.mxu0 %v23082_v46  ;;  %v23085_v46 = vld [vmem:[#allocation239_spill] sm:$0xff] }
 0x852   :  { %15352 = vmatpush3.msra.mxu1 %v23054_v14  ;;  %15310 = vmatprep.subr.mxu0 %v21931_v9  ;;  %v23095_v14 = vld [vmem:[#allocation75_spill] sm:$0xff] }
 0x853   :  { %15353 = vmatprep.subr.mxu1 %v21931_v9  ;;  %15311 = vmatpush3.msra.mxu0 %v23083_v16  ;;  %v23086_v16 = vld [vmem:[#allocation243_spill] sm:$0xff] }
 0x854   :  { %15354 = vmatpush3.msra.mxu1 %v23055_v29  ;;  %15312 = vmatprep.subr.mxu0 %v21931_v9  ;;  %v23094_v29 = vld [vmem:[#allocation251_spill] sm:$0xff] }
 0x855   :  { %15355 = vmatprep.subr.mxu1 %v21931_v9  ;;  %15313 = vmatpush3.msra.mxu0 %v23084_v43  ;;  %v23087_v43 = vld [vmem:[#allocation38_spill] sm:$0xff] }
 0x856   :  { %15356 = vmatpush3.msra.mxu1 %v23056_v20  ;;  %15314 = vmatprep.subr.mxu0 %v21931_v9  ;;  %v23092_v20 = vld [vmem:[#allocation63_spill] sm:$0xff] }
 0x857   :  { %15357 = vmatprep.subr.mxu1 %v21931_v9  ;;  %15315 = vmatpush3.msra.mxu0 %v23085_v46  ;;  %v23089_v46 = vld [vmem:[#allocation58_spill] sm:$0xff] }
 0x858   :  { %15358 = vmatpush3.msra.mxu1 %v23057_v58  ;;  %15359 = vmatprep.mubr.msk.f32.mxu1 %vm15962_vm0, %v21931_v9  ;;  %v23091_v58 = vld [vmem:[#allocation249_spill] sm:$0xff] }
 0x859   :  { %15316 = vmatprep.subr.mxu0 %v21931_v9  ;;  %15360 = vmatmul.mubr.f32.vlgmr.msra.gmra.mxu1 %v19945_v49 }
 0x85a   :  { %15317 = vmatpush3.msra.mxu0 %v23086_v16  ;;  %15324 = vmatprep.mubr.msk.f32.mxu0 %vm15962_vm0, %v21931_v9  ;;  %v23093_v16 = vld [vmem:[#allocation74_spill] sm:$0xff] }
 0x85b   :  { %15318 = vmatprep.subr.mxu0 %v21931_v9  ;;  %10120 = vmatprep.subr.mxu1 %v23087_v43 }
 0x85c   :  { %15319 = vmatpush3.msra.mxu0 %v23088_v6  ;;  %10126 = vmatpush1.msra.mxu1 %v23089_v46  ;;  %v23096_v6 = vld [vmem:[#allocation82_spill] sm:$0xff]  ;;  %v23097_v46 = vld [vmem:[#allocation83_spill] sm:$0xff] }
 0x85d   :  { %15320 = vmatprep.subr.mxu0 %v21931_v9  ;;  %10132 = vmatprep.subr.mxu1 %v23090_v34  ;;  %v23098_v34 = vld [vmem:[#allocation87_spill] sm:$0xff] }
 0x85e   :  { %15321 = vmatpush3.msra.mxu0 %v23091_v58  ;;  %10138 = vmatpush1.msra.mxu1 %v23092_v20  ;;  %v23099_v20 = vld [vmem:[#allocation97_spill] sm:$0xff] }
 0x85f   :  { %15322 = vmatprep.subr.mxu0 %v21931_v9  ;;  %10144 = vmatprep.subr.mxu1 %v23093_v16  ;;  %v23100_v16 = vld [vmem:[#allocation102_spill] sm:$0xff] }
 0x860   :  { %15323 = vmatpush3.msra.mxu0 %v23094_v29  ;;  %10150 = vmatpush1.msra.mxu1 %v23095_v14  ;;  %v23101_v14 = vld [vmem:[#allocation105_spill] sm:$0xff] }
 0x861   :  { %15325 = vmatmul.mubr.f32.vlgmr.msra.gmra.mxu0 %v19945_v49  ;;  %10156 = vmatprep.subr.mxu1 %v23096_v6  ;;  %v23102_v49 = vld [vmem:[#allocation108_spill] sm:$0xff] }
 0x862   :  { %10162 = vmatpush1.msra.mxu1 %v23097_v46  ;;  %10008 = vmatprep.subr.mxu0 %v22986_v51  ;;  %v23103_v46 = vld [vmem:[#allocation114_spill] sm:$0xff] }
 0x863   :  { %10168 = vmatprep.subr.mxu1 %v23098_v34  ;;  %10010 = vmatpush1.msra.mxu0 %v22355_v57  ;;  %v23104_v34 = vld [vmem:[#allocation119_spill] sm:$0xff] }
 0x864   :  { %10174 = vmatpush1.msra.mxu1 %v23099_v20  ;;  %10012 = vmatprep.subr.mxu0 %v22357_v1  ;;  %v23105_v20 = vld [vmem:[#allocation120_spill] sm:$0xff] }
 0x865   :  { %10180 = vmatprep.subr.mxu1 %v23100_v16  ;;  %10014 = vmatpush1.msra.mxu0 %v22361_v17  ;;  %v23106_v16 = vld [vmem:[#allocation121_spill] sm:$0xff] }
 0x866   :  { %10186 = vmatpush1.msra.mxu1 %v23101_v14  ;;  %10016 = vmatprep.subr.mxu0 %v22363_v37  ;;  %v23107_v14 = vld [vmem:[#allocation126_spill] sm:$0xff] }
 0x867   :  { %10192 = vmatprep.subr.mxu1 %v23102_v49  ;;  %10018 = vmatpush1.msra.mxu0 %v22365_v13  ;;  %v23108_v49 = vld [vmem:[#allocation138_spill] sm:$0xff] }
 0x868   :  { %10198 = vmatpush1.msra.mxu1 %v23103_v46  ;;  %10020 = vmatprep.subr.mxu0 %v22368_v42  ;;  %v23109_v46 = vld [vmem:[#allocation141_spill] sm:$0xff] }
 0x869   :  { %10204 = vmatprep.subr.mxu1 %v23104_v34  ;;  %10022 = vmatpush1.msra.mxu0 %v22370_v2  ;;  %v23110_v34 = vld [vmem:[#allocation143_spill] sm:$0xff] }
 0x86a   :  { %10210 = vmatpush1.msra.mxu1 %v23105_v20  ;;  %10024 = vmatprep.subr.mxu0 %v22373_v31  ;;  %v23111_v20 = vld [vmem:[#allocation144_spill] sm:$0xff] }
 0x86b   :  { %10216 = vmatprep.subr.mxu1 %v23106_v16  ;;  %10026 = vmatpush1.msra.mxu0 %v22376_v52  ;;  %v23112_v16 = vld [vmem:[#allocation151_spill] sm:$0xff] }
 0x86c   :  { %10222 = vmatpush1.msra.mxu1 %v23107_v14  ;;  %10028 = vmatprep.subr.mxu0 %v22378_v8  ;;  %v23113_v14 = vld [vmem:[#allocation156_spill] sm:$0xff] }
 0x86d   :  { %10228 = vmatprep.subr.mxu1 %v23108_v49  ;;  %10030 = vmatpush1.msra.mxu0 %v22380_v15  ;;  %v23114_v49 = vld [vmem:[#allocation158_spill] sm:$0xff] }
 0x86e   :  { %10234 = vmatpush1.msra.mxu1 %v23109_v46  ;;  %10032 = vmatprep.subr.mxu0 %v22384_v22  ;;  %v23115_v46 = vld [vmem:[#allocation160_spill] sm:$0xff] }
 0x86f   :  { %10240 = vmatprep.subr.mxu1 %v23110_v34  ;;  %10034 = vmatpush1.msra.mxu0 %v22386_v4  ;;  %v23116_v34 = vld [vmem:[#allocation161_spill] sm:$0xff] }
 0x870   :  { %10246 = vmatpush1.msra.mxu1 %v23111_v20  ;;  %10036 = vmatprep.subr.mxu0 %v22388_v33  ;;  %v23117_v20 = vld [vmem:[#allocation163_spill] sm:$0xff] }
 0x871   :  { %10252 = vmatprep.subr.mxu1 %v23112_v16  ;;  %10038 = vmatpush1.msra.mxu0 %v22391_v48  ;;  %v23118_v16 = vld [vmem:[#allocation164_spill] sm:$0xff] }
 0x872   :  { %10258 = vmatpush1.msra.mxu1 %v23113_v14  ;;  %10040 = vmatprep.subr.mxu0 %v22393_v18  ;;  %v23119_v14 = vld [vmem:[#allocation165_spill] sm:$0xff] }
 0x873   :  { %10264 = vmatprep.subr.mxu1 %v23114_v49  ;;  %10042 = vmatpush1.msra.mxu0 %v22395_v44  ;;  %v23120_v49 = vld [vmem:[#allocation166_spill] sm:$0xff] }
 0x874   :  { %10270 = vmatpush1.msra.mxu1 %v23115_v46  ;;  %10044 = vmatprep.subr.mxu0 %v22397_v61  ;;  %v23121_v46 = vld [vmem:[#allocation167_spill] sm:$0xff] }
 0x875   :  { %10276 = vmatprep.subr.mxu1 %v23116_v34  ;;  %10046 = vmatpush1.msra.mxu0 %v22399_v0 }
 0x876   :  { %10282 = vmatpush1.msra.mxu1 %v23117_v20  ;;  %10048 = vmatprep.subr.mxu0 %v22614_v59 }
 0x877   :  { %10288 = vmatprep.subr.mxu1 %v23118_v16  ;;  %10050 = vmatpush1.msra.mxu0 %v22616_v19 }
 0x878   :  { %10294 = vmatpush1.msra.mxu1 %v23119_v14  ;;  %10052 = vmatprep.subr.mxu0 %v22618_v25 }
 0x879   :  { %10300 = vmatprep.subr.mxu1 %v23120_v49  ;;  %10054 = vmatpush1.msra.mxu0 %v22968_v38  ;;  %v8798_v49 = vpop.f32.mrf.mxu1  ;;  %v8566_v20 = vpop.f32.mrf.mxu0 }
 0x87a   :  { %10306 = vmatpush1.msra.mxu1 %v23121_v46  ;;  %10056 = vmatprep.subr.mxu0 %v22970_v60  ;;  %v23122_v46 = vld [vmem:[#allocation35_spill] sm:$0xff]  ;;  %v8567_v30 = vadd.f32 %v8566_v20, %v22598_v26  ;;  %v23125_v60 = vld [vmem:[#allocation44_spill] sm:$0xff] }
 0x87b   :  { %10339 = vmatprep.mubr.f32.mxu1 %v21931_v9  ;;  %10485 = vmatprep.subr.mxu1 %v22986_v51  ;;  %v8800_v14 = vpop.f32.mrf.mxu1  ;;  %v8568_v29 = vpop.f32.mrf.mxu0 }
 0x87c   :  { %10058 = vmatpush1.msra.mxu0 %v22972_v35  ;;  %10103 = vmatprep.mubr.f32.mxu0 %v21931_v9  ;;  %v8799_v63 = vadd.f32 %v8798_v49, %v8567_v30  ;;  %v8569_v39 = vadd.f32 %v8568_v29, %v22599_v27  ;;  %v23127_v29 = vld [vmem:[#allocation162_spill] sm:$0xff] }
 0x87d   :  { %10060 = vmatprep.subr.mxu0 %v22974_v5  ;;  %v23124_v5 = vld [vmem:[#allocation185_spill] sm:$0xff] }
 0x87e   :  { %10062 = vmatpush1.msra.mxu0 %v22976_v28 }
 0x87f   :  { %10064 = vmatprep.subr.mxu0 %v22978_v50  ;;  %v23123_v50 = vld [vmem:[#allocation30_spill] sm:$0xff] }
 0x880   :  { %10066 = vmatpush1.msra.mxu0 %v22980_v23  ;;  %v8801_v23 = vadd.f32 %v8800_v14, %v8569_v39  ;;  %v296_v28 = vadd.f32 %v23123_v50, %v22600_v32 }
 0x881   :  { %10068 = vmatprep.subr.mxu0 %v22982_v21 }
 0x882   :  { %10070 = vmatpush1.msra.mxu0 %v22984_v54 }
 0x883   :  { %10349 = vmatprep.subr.mxu0 %v23122_v46 }
 0x891   :  { %v9041_v16 = vpop.f32.mrf.mxu1 }
 0x893   :  { %v9043_v34 = vpop.f32.mrf.mxu1 }
 0x89a   :  { %v8935_v58 = vpop.f32.mrf.mxu0 }
 0x89b   :  { %v8936_v46 = vadd.f32 %v8935_v58, %v8799_v63  ;;  %v23126_v58 = vld [vmem:[#allocation136_spill] sm:$0xff] }
 0x89c   :  { %v8937_v56 = vpop.f32.mrf.mxu0 }
 0x89d   :  { %v9042_v36 = vadd.f32 %v9041_v16, %v8936_v46 }
 0x8b3   :  { %v9313_v6 = vpop.f32.mrf.mxu1 }
 0x8b5   :  { %v9315_v43 = vpop.f32.mrf.mxu1 }
 0x8bc   :  { %v9209_v3 = vpop.f32.mrf.mxu0 }
 0x8bd   :  { %v9210_v7 = vadd.f32 %v9209_v3, %v9042_v36 }
 0x8be   :  { %v9211_v40 = vpop.f32.mrf.mxu0 }
 0x8bf   :  { %v9314_v54 = vadd.f32 %v9313_v6, %v9210_v7  ;;  %v23128_v7 = vld [vmem:[#allocation180_spill] sm:$0xff] }
 0x8c1   :  { %v9959_v35 = vadd.f32 %v9314_v54, %v23124_v5 }
 0x8c3   :  { %v13130_v38 = vmul.f32 -1.442695, %v9959_v35 }
 0x8c5   :  { %15835 = vpow2.f32 %v13130_v38 }
 0x8d2   :  { %v15836_v5 = vpop.eup %15835 }
 0x8d5   :  { %v9556_v24 = vpop.f32.mrf.mxu1 }
 0x8d7   :  { %v15221_v11 = vpop.f32.mrf.mxu1 }
 0x8d8   :  { %v8938_v11 = vadd.f32 %v8937_v56, %v8801_v23 }
 0x8da   :  { %v9044_v20 = vadd.f32 %v9043_v34, %v8938_v11 }
 0x8dc   :  { %v9212_v3 = vadd.f32 %v9211_v40, %v9044_v20 }
 0x8de   :  { %v9405_v47 = vpop.f32.mrf.mxu0  ;;  %v9316_v39 = vadd.f32 %v9315_v43, %v9212_v3 }
 0x8df   :  { %v9406_v34 = vadd.f32 %v9405_v47, %v18603_v55 }
 0x8e0   :  { %v15186_v62 = vpop.f32.mrf.mxu0 }
 0x8e1   :  { %v578_v62 = vadd.f32 %v23125_v60, %v296_v28  ;;  %v9963_v60 = vadd.f32 1.0, %v15836_v5  ;;  %v9557_v28 = vadd.f32 %v9556_v24, %v9406_v34  ;;  %v23132_v34 = vld [vmem:[#allocation45_spill] sm:$0xff] }
 0x8e3   :  { %v761_v16 = vadd.f32 %v23126_v58, %v578_v62 }
 0x8e5   :  { %v919_v63 = vadd.f32 %v23127_v29, %v761_v16  ;;  %v23130_v16 = vld [vmem:[#allocation31_spill] sm:$0xff] }
 0x8e7   :  { %v1133_v14 = vadd.f32 %v23128_v7, %v919_v63  ;;  %v9988_v7 = vpop.permute.xlu0 %9987 }
 0x8f7   :  { %v9749_v51 = vpop.f32.mrf.mxu1 }
 0x8f9   :  { %v15291_v21 = vpop.f32.mrf.mxu1 }
 0x8fa   :  { %v23129_v21 = vld [vmem:[#allocation186_spill] sm:$0xff] }
 0x8fb   :  { %v1279_v50 = vadd.f32 %v23129_v21, %v1133_v14 }
 0x8fd   :  { %v9966_v56 = vadd.f32 %v9316_v39, %v1279_v50 }
 0x8ff   :  { %v13131_v23 = vmul.f32 -1.442695, %v9966_v56 }
 0x900   :  { %v9660_v30 = vpop.f32.mrf.mxu0 }
 0x901   :  { %15837 = vpow2.f32 %v13131_v23  ;;  %v9661_v54 = vadd.f32 %v9660_v30, %v9557_v28  ;;  %v23134_v28 = vld [vmem:[#allocation49_spill] sm:$0xff] }
 0x902   :  { %v15256_v36 = vpop.f32.mrf.mxu0  ;;  %15839 = vrcp.f32 %v9963_v60  ;;  %v23131_v60 = vld [vmem:[#allocation37_spill] sm:$0xff] }
 0x903   :  { %v9750_v46 = vadd.f32 %v9749_v51, %v9661_v54  ;;  %v9997_v51 = vpop.permute.xlu1 %9996  ;;  %v23136_v54 = vld [vmem:[#allocation64_spill] sm:$0xff] }
 0x904   :  { %v9999_v39 = vmul.f32 %v9997_v51, %v19942_v53  ;;  %v23155_v51 = vld [vmem:[#allocation116_spill] sm:$0xff] }
 0x90e   :  { %v15838_v6 = vpop.eup %15837 }
 0x90f   :  { %v9970_v49 = vadd.f32 1.0, %v15838_v6  ;;  %v15840_v20 = vpop.eup %15839  ;;  %v23137_v6 = vld [vmem:[#allocation65_spill] sm:$0xff] }
 0x911   :  { %15841 = vrcp.f32 %v9970_v49  ;;  %v23140_v49 = vld [vmem:[#allocation80_spill] sm:$0xff] }
 0x919   :  { %v9955_v35 = vpop.f32.mrf.mxu1 }
 0x91b   :  { %v15361_v40 = vpop.f32.mrf.mxu1 }
 0x91c   :  { %v23135_v40 = vld [vmem:[#allocation62_spill] sm:$0xff] }
 0x91e   :  { %v15842_v36 = vpop.eup %15841 }
 0x91f   :  { %v9976_v47 = vsub.f32 1.0, %v15842_v36  ;;  %v9978_v24 = vmul.f32 %v15842_v36, %v19942_v53  ;;  %v23148_v36 = vld [vmem:[#allocation123_spill] sm:$0xff] }
 0x921   :  { %v9868_v38 = vpop.f32.mrf.mxu0 }
 0x922   :  { %v9869_v11 = vadd.f32 %v9868_v38, %v9750_v46  ;;  %v23138_v46 = vld [vmem:[#allocation69_spill] sm:$0xff]  ;;  %v23139_v38 = vld [vmem:[#allocation79_spill] sm:$0xff] }
 0x923   :  { %v15326_v43 = vpop.f32.mrf.mxu0 }
 0x924   :  { %v9956_v62 = vadd.f32 %v9955_v35, %v9869_v11  ;;  %v23133_v35 = vld [vmem:[#allocation48_spill] sm:$0xff]  ;;  %v23142_v43 = vld [vmem:[#allocation109_spill] sm:$0xff] }
 0x925   :  { %v23141_v11 = vld [vmem:[#allocation84_spill] sm:$0xff] }
 0x926   :  { %v9973_v58 = vmul.f32 %v15840_v20, %v9956_v62  ;;  %v23143_v62 = vld [vmem:[#allocation85_spill] sm:$0xff]  ;;  %v23144_v20 = vld [vmem:[#allocation110_spill] sm:$0xff] }
 0x928   :  { %v9974_v3 = vadd.f32 %v9973_v58, %v23130_v16  ;;  %v23145_v58 = vld [vmem:[#allocation89_spill] sm:$0xff]  ;;  %v23146_v16 = vld [vmem:[#allocation122_spill] sm:$0xff] }
 0x92a   :  { %15843 = vtanh.f32 %v9974_v3  ;;  %v23147_v3 = vld [vmem:[#allocation99_spill] sm:$0xff] }
 0x937   :  { %v15844_v29 = vpop.eup %15843 }
 0x938   :  { %v9977_v63 = vmul.f32 %v15844_v29, %v9976_v47  ;;  %v23149_v47 = vld [vmem:[#allocation103_spill] sm:$0xff] }
 0x939   :  { %v23150_v29 = vld [vmem:[#allocation127_spill] sm:$0xff] }
 0x93a   :  { %v9979_v30 = vadd.f32 %v9978_v24, %v9977_v63  ;;  %v23151_v24 = vld [vmem:[#allocation104_spill] sm:$0xff] }
 0x93b   :  { %v23152_v63 = vld [vmem:[#allocation128_spill] sm:$0xff] }
 0x93c   :  { %v9990_v14 = vmul.f32 %v9988_v7, %v9979_v30  ;;  %v23153_v30 = vld [vmem:[#allocation107_spill] sm:$0xff]  ;;  %v23154_v7 = vld [vmem:[#allocation130_spill] sm:$0xff] }
 0x93e   :  { %v20386_v21 = vadd.f32 %v9999_v39, %v9990_v14  ;;  %9992 = vst [vmem:[#allocation10 + $0x20] sm:$0xff] %v9990_v14  ;;  %v23156_v14 = vld [vmem:[#allocation132_spill] sm:$0xff] }
 0x93f   :  { %v23157_v39 = vld [vmem:[#allocation124_spill] sm:$0xff] }
 0x940   :  { %v20389_v50 = vand.u32 4294901760, %v20386_v21 }
 0x942   :  { %10341 = vmatmul.mubr.f32.vlgmr.msra.gmra.mxu1 %v20389_v50  ;;  %v20394_v56 = vsub.f32 %v20386_v21, %v20389_v50 }
 0x943   :  { %10487 = vmatpush1.msra.mxu1 %v22355_v57  ;;  %10580 = vmatprep.mubr.f32.mxu1 %v21931_v9 }
 0x944   :  { %10489 = vmatprep.subr.mxu1 %v22357_v1  ;;  %v20400_v53 = vand.u32 4294901760, %v20394_v56 }
 0x945   :  { %10491 = vmatpush1.msra.mxu1 %v22361_v17 }
 0x946   :  { %10493 = vmatprep.subr.mxu1 %v22363_v37  ;;  %v10107_v23 = vsub.f32 %v20394_v56, %v20400_v53 }
 0x947   :  { %10495 = vmatpush1.msra.mxu1 %v22365_v13 }
 0x948   :  { %10497 = vmatprep.subr.mxu1 %v22368_v42  ;;  %v20408_v5 = vand.u32 4294901760, %v10107_v23  ;;  %v23158_v23 = vld [vmem:[#allocation139_spill] sm:$0xff] }
 0x949   :  { %10499 = vmatpush1.msra.mxu1 %v22370_v2 }
 0x94a   :  { %10501 = vmatprep.subr.mxu1 %v22373_v31  ;;  %10109 = vmatmul.mubr.f32.vlgmr.msra.gmra.mxu0 %v20408_v5 }
 0x94b   :  { %10352 = vmatpush1.msra.mxu0 %v22435_v12  ;;  %10503 = vmatpush1.msra.mxu1 %v22376_v52 }
 0x94c   :  { %10355 = vmatprep.subr.mxu0 %v22436_v45  ;;  %10505 = vmatprep.subr.mxu1 %v22378_v8 }
 0x94d   :  { %10358 = vmatpush1.msra.mxu0 %v22437_v10  ;;  %10507 = vmatpush1.msra.mxu1 %v22380_v15 }
 0x94e   :  { %10361 = vmatprep.subr.mxu0 %v22438_v41  ;;  %10509 = vmatprep.subr.mxu1 %v22384_v22 }
 0x94f   :  { %10364 = vmatpush1.msra.mxu0 %v23131_v60  ;;  %10511 = vmatpush1.msra.mxu1 %v22386_v4  ;;  %v23233_v60 = vld [vmem:[#allocation197_spill] sm:$0xff] }
 0x950   :  { %10367 = vmatprep.subr.mxu0 %v23132_v34  ;;  %10513 = vmatprep.subr.mxu1 %v22388_v33  ;;  %v23232_v34 = vld [vmem:[#allocation194_spill] sm:$0xff] }
 0x951   :  { %10370 = vmatpush1.msra.mxu0 %v23133_v35  ;;  %10515 = vmatpush1.msra.mxu1 %v22391_v48  ;;  %v23231_v35 = vld [vmem:[#allocation240_spill] sm:$0xff] }
 0x952   :  { %10373 = vmatprep.subr.mxu0 %v23134_v28  ;;  %10517 = vmatprep.subr.mxu1 %v22393_v18  ;;  %v23227_v28 = vld [vmem:[#allocation255_spill] sm:$0xff] }
 0x953   :  { %10376 = vmatpush1.msra.mxu0 %v23135_v40  ;;  %10519 = vmatpush1.msra.mxu1 %v22395_v44  ;;  %v23225_v40 = vld [vmem:[#allocation254_spill] sm:$0xff] }
 0x954   :  { %10379 = vmatprep.subr.mxu0 %v23136_v54  ;;  %10521 = vmatprep.subr.mxu1 %v22397_v61  ;;  %v23223_v54 = vld [vmem:[#allocation253_spill] sm:$0xff] }
 0x955   :  { %10382 = vmatpush1.msra.mxu0 %v23137_v6  ;;  %10523 = vmatpush1.msra.mxu1 %v22399_v0  ;;  %v23221_v6 = vld [vmem:[#allocation252_spill] sm:$0xff] }
 0x956   :  { %10385 = vmatprep.subr.mxu0 %v23138_v46  ;;  %10525 = vmatprep.subr.mxu1 %v22614_v59  ;;  %v23219_v46 = vld [vmem:[#allocation250_spill] sm:$0xff] }
 0x957   :  { %10388 = vmatpush1.msra.mxu0 %v23139_v38  ;;  %10527 = vmatpush1.msra.mxu1 %v22616_v19  ;;  %v23217_v38 = vld [vmem:[#allocation248_spill] sm:$0xff] }
 0x958   :  { %10391 = vmatprep.subr.mxu0 %v23140_v49  ;;  %10529 = vmatprep.subr.mxu1 %v22618_v25  ;;  %v23201_v49 = vld [vmem:[#allocation157_spill] sm:$0xff] }
 0x959   :  { %10394 = vmatpush1.msra.mxu0 %v23141_v11  ;;  %10531 = vmatpush1.msra.mxu1 %v23142_v43  ;;  %v23200_v11 = vld [vmem:[#allocation218_spill] sm:$0xff] }
 0x95a   :  { %10397 = vmatprep.subr.mxu0 %v23143_v62  ;;  %10533 = vmatprep.subr.mxu1 %v23144_v20  ;;  %v23198_v62 = vld [vmem:[#allocation152_spill] sm:$0xff] }
 0x95b   :  { %10400 = vmatpush1.msra.mxu0 %v23145_v58  ;;  %10535 = vmatpush1.msra.mxu1 %v23146_v16  ;;  %v23166_v58 = vld [vmem:[#allocation148_spill] sm:$0xff] }
 0x95c   :  { %10403 = vmatprep.subr.mxu0 %v23147_v3  ;;  %10537 = vmatprep.subr.mxu1 %v23148_v36  ;;  %v23159_v3 = vld [vmem:[#allocation125_spill] sm:$0xff] }
 0x95d   :  { %10406 = vmatpush1.msra.mxu0 %v23149_v47  ;;  %10539 = vmatpush1.msra.mxu1 %v23150_v29  ;;  %v23160_v47 = vld [vmem:[#allocation29_spill] sm:$0xff] }
 0x95e   :  { %10409 = vmatprep.subr.mxu0 %v23151_v24  ;;  %10541 = vmatprep.subr.mxu1 %v23152_v63  ;;  %v23161_v24 = vld [vmem:[#allocation131_spill] sm:$0xff] }
 0x95f   :  { %10412 = vmatpush1.msra.mxu0 %v23153_v30  ;;  %10543 = vmatpush1.msra.mxu1 %v23154_v7  ;;  %v23162_v30 = vld [vmem:[#allocation135_spill] sm:$0xff] }
 0x960   :  { %10415 = vmatprep.subr.mxu0 %v23155_v51  ;;  %10545 = vmatprep.subr.mxu1 %v23156_v14  ;;  %v23163_v51 = vld [vmem:[#allocation140_spill] sm:$0xff] }
 0x961   :  { %10418 = vmatpush1.msra.mxu0 %v23157_v39  ;;  %10547 = vmatpush1.msra.mxu1 %v23158_v23  ;;  %v23164_v39 = vld [vmem:[#allocation142_spill] sm:$0xff] }
 0x962   :  { %10421 = vmatprep.subr.mxu0 %v23159_v3  ;;  %10584 = vmatmul.mubr.f32.vlgmr.msra.gmra.mxu1 %v20400_v53  ;;  %v23165_v3 = vld [vmem:[#allocation146_spill] sm:$0xff] }
 0x963   :  { %10759 = vmatprep.subr.mxu1 %v23160_v47  ;;  %10424 = vmatpush1.msra.mxu0 %v23161_v24  ;;  %v23167_v24 = vld [vmem:[#allocation150_spill] sm:$0xff] }
 0x964   :  { %10761 = vmatpush1.msra.mxu1 %v22355_v57  ;;  %10427 = vmatprep.subr.mxu0 %v23162_v30  ;;  %v23173_v30 = vld [vmem:[#allocation54_spill] sm:$0xff] }
 0x965   :  { %10763 = vmatprep.subr.mxu1 %v22357_v1  ;;  %10430 = vmatpush1.msra.mxu0 %v23163_v51  ;;  %v23168_v51 = vld [vmem:[#allocation23_spill] sm:$0xff] }
 0x966   :  { %10765 = vmatpush1.msra.mxu1 %v22361_v17  ;;  %10433 = vmatprep.subr.mxu0 %v23164_v39  ;;  %v23169_v39 = vld [vmem:[#allocation40_spill] sm:$0xff] }
 0x967   :  { %10767 = vmatprep.subr.mxu1 %v22363_v37  ;;  %10436 = vmatpush1.msra.mxu0 %v23165_v3  ;;  %v23170_v3 = vld [vmem:[#allocation26_spill] sm:$0xff] }
 0x968   :  { %10769 = vmatpush1.msra.mxu1 %v22365_v13  ;;  %10439 = vmatprep.subr.mxu0 %v23166_v58  ;;  %v23171_v58 = vld [vmem:[#allocation16_spill] sm:$0xff] }
 0x969   :  { %10771 = vmatprep.subr.mxu1 %v22368_v42  ;;  %10442 = vmatpush1.msra.mxu0 %v23167_v24  ;;  %v23172_v24 = vld [vmem:[#allocation43_spill] sm:$0xff] }
 0x96a   :  { %10475 = vmatprep.mubr.f32.mxu0 %v21931_v9  ;;  %10773 = vmatpush1.msra.mxu1 %v22370_v2 }
 0x96b   :  { %10478 = vmatmul.mubr.f32.vlgmr.msra.gmra.mxu0 %v20394_v56  ;;  %10593 = vmatprep.subr.mxu0 %v23168_v51  ;;  %v23174_v51 = vld [vmem:[#allocation17_spill] sm:$0xff] }
 0x96c   :  { %10775 = vmatprep.subr.mxu1 %v22373_v31  ;;  %10597 = vmatpush1.msra.mxu0 %v23169_v39  ;;  %v23175_v39 = vld [vmem:[#allocation59_spill] sm:$0xff] }
 0x96d   :  { %10777 = vmatpush1.msra.mxu1 %v22376_v52  ;;  %10601 = vmatprep.subr.mxu0 %v23170_v3  ;;  %v23176_v3 = vld [vmem:[#allocation61_spill] sm:$0xff] }
 0x96e   :  { %10779 = vmatprep.subr.mxu1 %v22378_v8  ;;  %10605 = vmatpush1.msra.mxu0 %v23171_v58  ;;  %v23177_v58 = vld [vmem:[#allocation73_spill] sm:$0xff] }
 0x96f   :  { %10781 = vmatpush1.msra.mxu1 %v22380_v15  ;;  %10609 = vmatprep.subr.mxu0 %v23172_v24  ;;  %v23178_v24 = vld [vmem:[#allocation76_spill] sm:$0xff] }
 0x970   :  { %10783 = vmatprep.subr.mxu1 %v22384_v22  ;;  %10613 = vmatpush1.msra.mxu0 %v23173_v30  ;;  %v23179_v30 = vld [vmem:[#allocation77_spill] sm:$0xff] }
 0x971   :  { %10785 = vmatpush1.msra.mxu1 %v22386_v4  ;;  %10617 = vmatprep.subr.mxu0 %v23174_v51  ;;  %v23180_v51 = vld [vmem:[#allocation78_spill] sm:$0xff] }
 0x972   :  { %10787 = vmatprep.subr.mxu1 %v22388_v33  ;;  %10621 = vmatpush1.msra.mxu0 %v23175_v39  ;;  %v23181_v39 = vld [vmem:[#allocation93_spill] sm:$0xff] }
 0x973   :  { %10789 = vmatpush1.msra.mxu1 %v22391_v48  ;;  %10625 = vmatprep.subr.mxu0 %v23176_v3  ;;  %v23182_v3 = vld [vmem:[#allocation94_spill] sm:$0xff] }
 0x974   :  { %10791 = vmatprep.subr.mxu1 %v22393_v18  ;;  %10629 = vmatpush1.msra.mxu0 %v23177_v58  ;;  %v23183_v58 = vld [vmem:[#allocation95_spill] sm:$0xff] }
 0x975   :  { %10793 = vmatpush1.msra.mxu1 %v22395_v44  ;;  %10633 = vmatprep.subr.mxu0 %v23178_v24  ;;  %v23184_v24 = vld [vmem:[#allocation96_spill] sm:$0xff] }
 0x976   :  { %10795 = vmatprep.subr.mxu1 %v22397_v61  ;;  %10637 = vmatpush1.msra.mxu0 %v23179_v30  ;;  %v23185_v30 = vld [vmem:[#allocation98_spill] sm:$0xff] }
 0x977   :  { %10797 = vmatpush1.msra.mxu1 %v22399_v0  ;;  %10641 = vmatprep.subr.mxu0 %v23180_v51  ;;  %v23186_v51 = vld [vmem:[#allocation111_spill] sm:$0xff] }
 0x978   :  { %10799 = vmatprep.subr.mxu1 %v22614_v59  ;;  %10645 = vmatpush1.msra.mxu0 %v23181_v39  ;;  %v23187_v39 = vld [vmem:[#allocation112_spill] sm:$0xff] }
 0x979   :  { %10801 = vmatpush1.msra.mxu1 %v22616_v19  ;;  %10649 = vmatprep.subr.mxu0 %v23182_v3  ;;  %v23188_v3 = vld [vmem:[#allocation113_spill] sm:$0xff] }
 0x97a   :  { %10803 = vmatprep.subr.mxu1 %v22618_v25  ;;  %10653 = vmatpush1.msra.mxu0 %v23183_v58  ;;  %v23189_v58 = vld [vmem:[#allocation115_spill] sm:$0xff] }
 0x97b   :  { %10805 = vmatpush1.msra.mxu1 %v23142_v43  ;;  %10657 = vmatprep.subr.mxu0 %v23184_v24  ;;  %v23190_v24 = vld [vmem:[#allocation129_spill] sm:$0xff] }
 0x97c   :  { %10807 = vmatprep.subr.mxu1 %v23144_v20  ;;  %10661 = vmatpush1.msra.mxu0 %v23185_v30  ;;  %v23191_v30 = vld [vmem:[#allocation133_spill] sm:$0xff] }
 0x97d   :  { %10809 = vmatpush1.msra.mxu1 %v23146_v16  ;;  %10665 = vmatprep.subr.mxu0 %v23186_v51  ;;  %v23195_v51 = vld [vmem:[#allocation147_spill] sm:$0xff] }
 0x97e   :  { %10811 = vmatprep.subr.mxu1 %v23148_v36  ;;  %10669 = vmatpush1.msra.mxu0 %v23187_v39  ;;  %v23192_v39 = vld [vmem:[#allocation134_spill] sm:$0xff] }
 0x97f   :  { %10813 = vmatpush1.msra.mxu1 %v23150_v29  ;;  %10673 = vmatprep.subr.mxu0 %v23188_v3  ;;  %v23193_v3 = vld [vmem:[#allocation145_spill] sm:$0xff] }
 0x980   :  { %10815 = vmatprep.subr.mxu1 %v23152_v63  ;;  %10677 = vmatpush1.msra.mxu0 %v23189_v58  ;;  %v23194_v58 = vld [vmem:[#allocation210_spill] sm:$0xff] }
 0x981   :  { %10817 = vmatpush1.msra.mxu1 %v23154_v7  ;;  %10681 = vmatprep.subr.mxu0 %v23190_v24  ;;  %v23196_v24 = vld [vmem:[#allocation149_spill] sm:$0xff] }
 0x982   :  { %10819 = vmatprep.subr.mxu1 %v23156_v14  ;;  %10685 = vmatpush1.msra.mxu0 %v23191_v30  ;;  %v23197_v30 = vld [vmem:[#allocation215_spill] sm:$0xff] }
 0x983   :  { %10821 = vmatpush1.msra.mxu1 %v23158_v23  ;;  %10854 = vmatprep.mubr.f32.mxu1 %v21931_v9 }
 0x984   :  { %10689 = vmatprep.subr.mxu0 %v23192_v39  ;;  %10856 = vmatmul.mubr.f32.vlgmr.msra.gmra.mxu1 %v20389_v50  ;;  %v23199_v39 = vld [vmem:[#allocation155_spill] sm:$0xff] }
 0x985   :  { %15397 = vmatprep.subr.mxu1 %v21931_v9  ;;  %10693 = vmatpush1.msra.mxu0 %v23193_v3  ;;  %v23215_v3 = vld [vmem:[#allocation245_spill] sm:$0xff] }
 0x986   :  { %15398 = vmatpush3.msra.mxu1 %v23194_v58  ;;  %10697 = vmatprep.subr.mxu0 %v23195_v51  ;;  %v23202_v58 = vld [vmem:[#allocation159_spill] sm:$0xff]  ;;  %v23203_v51 = vld [vmem:[#allocation222_spill] sm:$0xff] }
 0x987   :  { %15399 = vmatprep.subr.mxu1 %v21931_v9  ;;  %10701 = vmatpush1.msra.mxu0 %v23196_v24  ;;  %v23213_v24 = vld [vmem:[#allocation242_spill] sm:$0xff] }
 0x988   :  { %15400 = vmatpush3.msra.mxu1 %v23197_v30  ;;  %10705 = vmatprep.subr.mxu0 %v23198_v62  ;;  %v23204_v62 = vld [vmem:[#allocation191_spill] sm:$0xff]  ;;  %v23211_v30 = vld [vmem:[#allocation238_spill] sm:$0xff] }
 0x989   :  { %15401 = vmatprep.subr.mxu1 %v21931_v9  ;;  %10709 = vmatpush1.msra.mxu0 %v23199_v39  ;;  %v23205_v39 = vld [vmem:[#allocation226_spill] sm:$0xff] }
 0x98a   :  { %15402 = vmatpush3.msra.mxu1 %v23200_v11  ;;  %10713 = vmatprep.subr.mxu0 %v23201_v49  ;;  %v23206_v49 = vld [vmem:[#allocation192_spill] sm:$0xff]  ;;  %v23209_v11 = vld [vmem:[#allocation234_spill] sm:$0xff] }
 0x98b   :  { %15403 = vmatprep.subr.mxu1 %v21931_v9  ;;  %10717 = vmatpush1.msra.mxu0 %v23202_v58  ;;  %v23207_v58 = vld [vmem:[#allocation230_spill] sm:$0xff] }
 0x98c   :  { %10750 = vmatprep.mubr.f32.mxu0 %v21931_v9  ;;  %15404 = vmatpush3.msra.mxu1 %v23203_v51  ;;  %v23208_v51 = vld [vmem:[#allocation193_spill] sm:$0xff] }
 0x98d   :  { %10752 = vmatmul.mubr.f32.vlgmr.msra.gmra.mxu0 %v20389_v50  ;;  %15362 = vmatprep.subr.mxu0 %v21931_v9 }
 0x98e   :  { %15405 = vmatprep.subr.mxu1 %v21931_v9  ;;  %15363 = vmatpush3.msra.mxu0 %v23204_v62 }
 0x98f   :  { %15406 = vmatpush3.msra.mxu1 %v23205_v39  ;;  %15364 = vmatprep.subr.mxu0 %v21931_v9  ;;  %v23210_v39 = vld [vmem:[#allocation196_spill] sm:$0xff] }
 0x990   :  { %15407 = vmatprep.subr.mxu1 %v21931_v9  ;;  %15365 = vmatpush3.msra.mxu0 %v23206_v49 }
 0x991   :  { %15408 = vmatpush3.msra.mxu1 %v23207_v58  ;;  %15366 = vmatprep.subr.mxu0 %v21931_v9  ;;  %v23212_v58 = vld [vmem:[#allocation200_spill] sm:$0xff] }
 0x992   :  { %15409 = vmatprep.subr.mxu1 %v21931_v9  ;;  %15367 = vmatpush3.msra.mxu0 %v23208_v51 }
 0x993   :  { %15410 = vmatpush3.msra.mxu1 %v23209_v11  ;;  %15368 = vmatprep.subr.mxu0 %v21931_v9  ;;  %v23214_v11 = vld [vmem:[#allocation201_spill] sm:$0xff] }
 0x994   :  { %15411 = vmatprep.subr.mxu1 %v21931_v9  ;;  %15369 = vmatpush3.msra.mxu0 %v23210_v39 }
 0x995   :  { %15412 = vmatpush3.msra.mxu1 %v23211_v30  ;;  %15370 = vmatprep.subr.mxu0 %v21931_v9  ;;  %v23216_v30 = vld [vmem:[#allocation205_spill] sm:$0xff] }
 0x996   :  { %15413 = vmatprep.subr.mxu1 %v21931_v9  ;;  %15371 = vmatpush3.msra.mxu0 %v23212_v58 }
 0x997   :  { %15414 = vmatpush3.msra.mxu1 %v23213_v24  ;;  %15372 = vmatprep.subr.mxu0 %v21931_v9  ;;  %v23218_v24 = vld [vmem:[#allocation209_spill] sm:$0xff] }
 0x998   :  { %15415 = vmatprep.subr.mxu1 %v21931_v9  ;;  %15373 = vmatpush3.msra.mxu0 %v23214_v11 }
 0x999   :  { %15416 = vmatpush3.msra.mxu1 %v23215_v3  ;;  %15374 = vmatprep.subr.mxu0 %v21931_v9  ;;  %v23220_v3 = vld [vmem:[#allocation211_spill] sm:$0xff] }
 0x99a   :  { %15417 = vmatprep.subr.mxu1 %v21931_v9  ;;  %15375 = vmatpush3.msra.mxu0 %v23216_v30 }
 0x99b   :  { %15418 = vmatpush3.msra.mxu1 %v23217_v38  ;;  %15376 = vmatprep.subr.mxu0 %v21931_v9  ;;  %v23222_v38 = vld [vmem:[#allocation216_spill] sm:$0xff] }
 0x99c   :  { %15419 = vmatprep.subr.mxu1 %v21931_v9  ;;  %15377 = vmatpush3.msra.mxu0 %v23218_v24 }
 0x99d   :  { %15420 = vmatpush3.msra.mxu1 %v23219_v46  ;;  %15378 = vmatprep.subr.mxu0 %v21931_v9  ;;  %v23224_v46 = vld [vmem:[#allocation219_spill] sm:$0xff] }
 0x99e   :  { %15421 = vmatprep.subr.mxu1 %v21931_v9  ;;  %15379 = vmatpush3.msra.mxu0 %v23220_v3 }
 0x99f   :  { %15422 = vmatpush3.msra.mxu1 %v23221_v6  ;;  %15380 = vmatprep.subr.mxu0 %v21931_v9  ;;  %v23226_v6 = vld [vmem:[#allocation223_spill] sm:$0xff] }
 0x9a0   :  { %15423 = vmatprep.subr.mxu1 %v21931_v9  ;;  %15381 = vmatpush3.msra.mxu0 %v23222_v38 }
 0x9a1   :  { %15424 = vmatpush3.msra.mxu1 %v23223_v54  ;;  %15382 = vmatprep.subr.mxu0 %v21931_v9  ;;  %v23228_v54 = vld [vmem:[#allocation229_spill] sm:$0xff] }
 0x9a2   :  { %15425 = vmatprep.subr.mxu1 %v21931_v9  ;;  %15383 = vmatpush3.msra.mxu0 %v23224_v46 }
 0x9a3   :  { %15426 = vmatpush3.msra.mxu1 %v23225_v40  ;;  %15384 = vmatprep.subr.mxu0 %v21931_v9  ;;  %v23229_v40 = vld [vmem:[#allocation233_spill] sm:$0xff] }
 0x9a4   :  { %15427 = vmatprep.subr.mxu1 %v21931_v9  ;;  %15385 = vmatpush3.msra.mxu0 %v23226_v6 }
 0x9a5   :  { %15428 = vmatpush3.msra.mxu1 %v23227_v28  ;;  %15429 = vmatprep.mubr.msk.f32.mxu1 %vm15962_vm0, %v21931_v9  ;;  %v23230_v28 = vld [vmem:[#allocation236_spill] sm:$0xff] }
 0x9a6   :  { %15386 = vmatprep.subr.mxu0 %v21931_v9  ;;  %15430 = vmatmul.mubr.f32.vlgmr.msra.gmra.mxu1 %v20389_v50 }
 0x9a7   :  { %15467 = vmatprep.subr.mxu1 %v21931_v9  ;;  %15387 = vmatpush3.msra.mxu0 %v23228_v54 }
 0x9a8   :  { %15468 = vmatpush3.msra.mxu1 %v23204_v62  ;;  %15388 = vmatprep.subr.mxu0 %v21931_v9 }
 0x9a9   :  { %15469 = vmatprep.subr.mxu1 %v21931_v9  ;;  %15389 = vmatpush3.msra.mxu0 %v23229_v40 }
 0x9aa   :  { %15470 = vmatpush3.msra.mxu1 %v23206_v49  ;;  %15390 = vmatprep.subr.mxu0 %v21931_v9 }
 0x9ab   :  { %15471 = vmatprep.subr.mxu1 %v21931_v9  ;;  %15391 = vmatpush3.msra.mxu0 %v23230_v28 }
 0x9ac   :  { %15472 = vmatpush3.msra.mxu1 %v23208_v51  ;;  %15392 = vmatprep.subr.mxu0 %v21931_v9 }
 0x9ad   :  { %15473 = vmatprep.subr.mxu1 %v21931_v9  ;;  %15393 = vmatpush3.msra.mxu0 %v23231_v35 }
 0x9ae   :  { %15394 = vmatprep.mubr.msk.f32.mxu0 %vm15962_vm0, %v21931_v9  ;;  %15474 = vmatpush3.msra.mxu1 %v23210_v39 }
 0x9af   :  { %15395 = vmatmul.mubr.f32.vlgmr.msra.gmra.mxu0 %v20408_v5  ;;  %15432 = vmatprep.subr.mxu0 %v21931_v9  ;;  %v23234_v5 = vld [vmem:[#allocation199_spill] sm:$0xff] }
 0x9b0   :  { %15475 = vmatprep.subr.mxu1 %v21931_v9  ;;  %15433 = vmatpush3.msra.mxu0 %v23232_v34  ;;  %v23235_v34 = vld [vmem:[#allocation202_spill] sm:$0xff] }
 0x9b1   :  { %15476 = vmatpush3.msra.mxu1 %v23212_v58  ;;  %15434 = vmatprep.subr.mxu0 %v21931_v9 }
 0x9b2   :  { %15477 = vmatprep.subr.mxu1 %v21931_v9  ;;  %15435 = vmatpush3.msra.mxu0 %v23233_v60  ;;  %v23236_v60 = vld [vmem:[#allocation206_spill] sm:$0xff] }
 0x9b3   :  { %15478 = vmatpush3.msra.mxu1 %v23214_v11  ;;  %15436 = vmatprep.subr.mxu0 %v21931_v9 }
 0x9b4   :  { %15479 = vmatprep.subr.mxu1 %v21931_v9  ;;  %15437 = vmatpush3.msra.mxu0 %v23234_v5  ;;  %v23237_v5 = vld [vmem:[#allocation208_spill] sm:$0xff] }
 0x9b5   :  { %15480 = vmatpush3.msra.mxu1 %v23216_v30  ;;  %15438 = vmatprep.subr.mxu0 %v21931_v9 }
 0x9b6   :  { %15481 = vmatprep.subr.mxu1 %v21931_v9  ;;  %15439 = vmatpush3.msra.mxu0 %v23235_v34  ;;  %v23238_v34 = vld [vmem:[#allocation213_spill] sm:$0xff] }
 0x9b7   :  { %15482 = vmatpush3.msra.mxu1 %v23218_v24  ;;  %15440 = vmatprep.subr.mxu0 %v21931_v9 }
 0x9b8   :  { %15483 = vmatprep.subr.mxu1 %v21931_v9  ;;  %15441 = vmatpush3.msra.mxu0 %v23236_v60  ;;  %v23239_v60 = vld [vmem:[#allocation217_spill] sm:$0xff] }
 0x9b9   :  { %15484 = vmatpush3.msra.mxu1 %v23220_v3  ;;  %15442 = vmatprep.subr.mxu0 %v21931_v9 }
 0x9ba   :  { %15485 = vmatprep.subr.mxu1 %v21931_v9  ;;  %15443 = vmatpush3.msra.mxu0 %v23237_v5  ;;  %v23240_v5 = vld [vmem:[#allocation221_spill] sm:$0xff] }
 0x9bb   :  { %15486 = vmatpush3.msra.mxu1 %v23222_v38  ;;  %15444 = vmatprep.subr.mxu0 %v21931_v9 }
 0x9bc   :  { %15487 = vmatprep.subr.mxu1 %v21931_v9  ;;  %15445 = vmatpush3.msra.mxu0 %v23238_v34  ;;  %v23241_v34 = vld [vmem:[#allocation225_spill] sm:$0xff] }
 0x9bd   :  { %15488 = vmatpush3.msra.mxu1 %v23224_v46  ;;  %15446 = vmatprep.subr.mxu0 %v21931_v9 }
 0x9be   :  { %15489 = vmatprep.subr.mxu1 %v21931_v9  ;;  %15447 = vmatpush3.msra.mxu0 %v23239_v60  ;;  %v23242_v60 = vld [vmem:[#allocation228_spill] sm:$0xff] }
 0x9bf   :  { %15490 = vmatpush3.msra.mxu1 %v23226_v6  ;;  %15448 = vmatprep.subr.mxu0 %v21931_v9 }
 0x9c0   :  { %15491 = vmatprep.subr.mxu1 %v21931_v9  ;;  %15449 = vmatpush3.msra.mxu0 %v23240_v5  ;;  %v23243_v5 = vld [vmem:[#allocation232_spill] sm:$0xff] }
 0x9c1   :  { %15492 = vmatpush3.msra.mxu1 %v23228_v54  ;;  %15450 = vmatprep.subr.mxu0 %v21931_v9 }
 0x9c2   :  { %15493 = vmatprep.subr.mxu1 %v21931_v9  ;;  %15451 = vmatpush3.msra.mxu0 %v23241_v34  ;;  %v23246_v34 = vld [vmem:[#allocation244_spill] sm:$0xff] }
 0x9c3   :  { %15494 = vmatpush3.msra.mxu1 %v23229_v40  ;;  %15452 = vmatprep.subr.mxu0 %v21931_v9 }
 0x9c4   :  { %15495 = vmatprep.subr.mxu1 %v21931_v9  ;;  %15453 = vmatpush3.msra.mxu0 %v23242_v60  ;;  %v23244_v60 = vld [vmem:[#allocation237_spill] sm:$0xff] }
 0x9c5   :  { %15496 = vmatpush3.msra.mxu1 %v23230_v28  ;;  %15454 = vmatprep.subr.mxu0 %v21931_v9 }
 0x9c6   :  { %15497 = vmatprep.subr.mxu1 %v21931_v9  ;;  %15455 = vmatpush3.msra.mxu0 %v23243_v5  ;;  %v23245_v5 = vld [vmem:[#allocation241_spill] sm:$0xff] }
 0x9c7   :  { %15498 = vmatpush3.msra.mxu1 %v23231_v35  ;;  %15499 = vmatprep.mubr.msk.f32.mxu1 %vm15962_vm0, %v21931_v9 }
 0x9c8   :  { %15456 = vmatprep.subr.mxu0 %v21931_v9  ;;  %15500 = vmatmul.mubr.f32.vlgmr.msra.gmra.mxu1 %v20400_v53  ;;  %v23247_v53 = vld [vmem:[#allocation247_spill] sm:$0xff] }
 0x9c9   :  { %15537 = vmatprep.subr.mxu1 %v21931_v9  ;;  %15457 = vmatpush3.msra.mxu0 %v23244_v60  ;;  %v23264_v60 = vld [vmem:[#allocation60_spill] sm:$0xff] }
 0x9ca   :  { %15538 = vmatpush3.msra.mxu1 %v23204_v62  ;;  %15458 = vmatprep.subr.mxu0 %v21931_v9 }
 0x9cb   :  { %15539 = vmatprep.subr.mxu1 %v21931_v9  ;;  %15459 = vmatpush3.msra.mxu0 %v23245_v5  ;;  %v23262_v5 = vld [vmem:[#allocation246_spill] sm:$0xff] }
 0x9cc   :  { %15540 = vmatpush3.msra.mxu1 %v23206_v49  ;;  %15460 = vmatprep.subr.mxu0 %v21931_v9 }
 0x9cd   :  { %15541 = vmatprep.subr.mxu1 %v21931_v9  ;;  %15461 = vmatpush3.msra.mxu0 %v23246_v34  ;;  %v23248_v34 = vld [vmem:[#allocation198_spill] sm:$0xff] }
 0x9ce   :  { %15542 = vmatpush3.msra.mxu1 %v23208_v51  ;;  %15462 = vmatprep.subr.mxu0 %v21931_v9 }
 0x9cf   :  { %15543 = vmatprep.subr.mxu1 %v21931_v9  ;;  %15463 = vmatpush3.msra.mxu0 %v23247_v53  ;;  %v23249_v53 = vld [vmem:[#allocation203_spill] sm:$0xff] }
 0x9d0   :  { %15464 = vmatprep.mubr.msk.f32.mxu0 %vm15962_vm0, %v21931_v9  ;;  %15544 = vmatpush3.msra.mxu1 %v23210_v39 }
 0x9d1   :  { %15465 = vmatmul.mubr.f32.vlgmr.msra.gmra.mxu0 %v20394_v56  ;;  %15502 = vmatprep.subr.mxu0 %v21931_v9  ;;  %v23250_v56 = vld [vmem:[#allocation204_spill] sm:$0xff] }
 0x9d2   :  { %15545 = vmatprep.subr.mxu1 %v21931_v9  ;;  %15503 = vmatpush3.msra.mxu0 %v23248_v34  ;;  %v23251_v34 = vld [vmem:[#allocation207_spill] sm:$0xff] }
 0x9d3   :  { %15546 = vmatpush3.msra.mxu1 %v23212_v58  ;;  %15504 = vmatprep.subr.mxu0 %v21931_v9 }
 0x9d4   :  { %15547 = vmatprep.subr.mxu1 %v21931_v9  ;;  %15505 = vmatpush3.msra.mxu0 %v23249_v53  ;;  %v23252_v53 = vld [vmem:[#allocation212_spill] sm:$0xff] }
 0x9d5   :  { %15548 = vmatpush3.msra.mxu1 %v23214_v11  ;;  %15506 = vmatprep.subr.mxu0 %v21931_v9 }
 0x9d6   :  { %15549 = vmatprep.subr.mxu1 %v21931_v9  ;;  %15507 = vmatpush3.msra.mxu0 %v23250_v56  ;;  %v23253_v56 = vld [vmem:[#allocation214_spill] sm:$0xff] }
 0x9d7   :  { %15550 = vmatpush3.msra.mxu1 %v23216_v30  ;;  %15508 = vmatprep.subr.mxu0 %v21931_v9 }
 0x9d8   :  { %15551 = vmatprep.subr.mxu1 %v21931_v9  ;;  %15509 = vmatpush3.msra.mxu0 %v23251_v34  ;;  %v23254_v34 = vld [vmem:[#allocation220_spill] sm:$0xff] }
 0x9d9   :  { %15552 = vmatpush3.msra.mxu1 %v23218_v24  ;;  %15510 = vmatprep.subr.mxu0 %v21931_v9 }
 0x9da   :  { %15553 = vmatprep.subr.mxu1 %v21931_v9  ;;  %15511 = vmatpush3.msra.mxu0 %v23252_v53  ;;  %v23255_v53 = vld [vmem:[#allocation224_spill] sm:$0xff] }
 0x9db   :  { %15554 = vmatpush3.msra.mxu1 %v23220_v3  ;;  %15512 = vmatprep.subr.mxu0 %v21931_v9 }
 0x9dc   :  { %15555 = vmatprep.subr.mxu1 %v21931_v9  ;;  %15513 = vmatpush3.msra.mxu0 %v23253_v56  ;;  %v23256_v56 = vld [vmem:[#allocation227_spill] sm:$0xff] }
 0x9dd   :  { %15556 = vmatpush3.msra.mxu1 %v23222_v38  ;;  %15514 = vmatprep.subr.mxu0 %v21931_v9 }
 0x9de   :  { %15557 = vmatprep.subr.mxu1 %v21931_v9  ;;  %15515 = vmatpush3.msra.mxu0 %v23254_v34  ;;  %v23257_v34 = vld [vmem:[#allocation231_spill] sm:$0xff] }
 0x9df   :  { %15558 = vmatpush3.msra.mxu1 %v23224_v46  ;;  %15516 = vmatprep.subr.mxu0 %v21931_v9 }
 0x9e0   :  { %15559 = vmatprep.subr.mxu1 %v21931_v9  ;;  %15517 = vmatpush3.msra.mxu0 %v23255_v53  ;;  %v23258_v53 = vld [vmem:[#allocation235_spill] sm:$0xff] }
 0x9e1   :  { %15560 = vmatpush3.msra.mxu1 %v23226_v6  ;;  %15518 = vmatprep.subr.mxu0 %v21931_v9 }
 0x9e2   :  { %15561 = vmatprep.subr.mxu1 %v21931_v9  ;;  %15519 = vmatpush3.msra.mxu0 %v23256_v56  ;;  %v23259_v56 = vld [vmem:[#allocation239_spill] sm:$0xff] }
 0x9e3   :  { %15562 = vmatpush3.msra.mxu1 %v23228_v54  ;;  %15520 = vmatprep.subr.mxu0 %v21931_v9  ;;  %v23269_v54 = vld [vmem:[#allocation75_spill] sm:$0xff] }
 0x9e4   :  { %15563 = vmatprep.subr.mxu1 %v21931_v9  ;;  %15521 = vmatpush3.msra.mxu0 %v23257_v34  ;;  %v23260_v34 = vld [vmem:[#allocation243_spill] sm:$0xff] }
 0x9e5   :  { %15564 = vmatpush3.msra.mxu1 %v23229_v40  ;;  %15522 = vmatprep.subr.mxu0 %v21931_v9  ;;  %v23268_v40 = vld [vmem:[#allocation251_spill] sm:$0xff] }
 0x9e6   :  { %15565 = vmatprep.subr.mxu1 %v21931_v9  ;;  %15523 = vmatpush3.msra.mxu0 %v23258_v53  ;;  %v23261_v53 = vld [vmem:[#allocation38_spill] sm:$0xff] }
 0x9e7   :  { %15566 = vmatpush3.msra.mxu1 %v23230_v28  ;;  %15524 = vmatprep.subr.mxu0 %v21931_v9  ;;  %v23266_v28 = vld [vmem:[#allocation63_spill] sm:$0xff] }
 0x9e8   :  { %15567 = vmatprep.subr.mxu1 %v21931_v9  ;;  %15525 = vmatpush3.msra.mxu0 %v23259_v56  ;;  %v23263_v56 = vld [vmem:[#allocation58_spill] sm:$0xff] }
 0x9e9   :  { %15568 = vmatpush3.msra.mxu1 %v23231_v35  ;;  %15569 = vmatprep.mubr.msk.f32.mxu1 %vm15962_vm0, %v21931_v9  ;;  %v23265_v35 = vld [vmem:[#allocation249_spill] sm:$0xff] }
 0x9ea   :  { %15526 = vmatprep.subr.mxu0 %v21931_v9  ;;  %15570 = vmatmul.mubr.f32.vlgmr.msra.gmra.mxu1 %v20389_v50 }
 0x9eb   :  { %15527 = vmatpush3.msra.mxu0 %v23260_v34  ;;  %15534 = vmatprep.mubr.msk.f32.mxu0 %vm15962_vm0, %v21931_v9  ;;  %v23267_v34 = vld [vmem:[#allocation74_spill] sm:$0xff] }
 0x9ec   :  { %15528 = vmatprep.subr.mxu0 %v21931_v9  ;;  %11664 = vmatprep.subr.mxu1 %v23261_v53  ;;  %v23270_v53 = vld [vmem:[#allocation82_spill] sm:$0xff] }
 0x9ed   :  { %15529 = vmatpush3.msra.mxu0 %v23262_v5  ;;  %11670 = vmatpush1.msra.mxu1 %v23263_v56  ;;  %v23271_v56 = vld [vmem:[#allocation83_spill] sm:$0xff] }
 0x9ee   :  { %15530 = vmatprep.subr.mxu0 %v21931_v9  ;;  %11676 = vmatprep.subr.mxu1 %v23264_v60  ;;  %v23272_v60 = vld [vmem:[#allocation87_spill] sm:$0xff] }
 0x9ef   :  { %15531 = vmatpush3.msra.mxu0 %v23265_v35  ;;  %11682 = vmatpush1.msra.mxu1 %v23266_v28  ;;  %v23273_v28 = vld [vmem:[#allocation97_spill] sm:$0xff] }
 0x9f0   :  { %15532 = vmatprep.subr.mxu0 %v21931_v9  ;;  %11688 = vmatprep.subr.mxu1 %v23267_v34  ;;  %v23274_v34 = vld [vmem:[#allocation102_spill] sm:$0xff] }
 0x9f1   :  { %15533 = vmatpush3.msra.mxu0 %v23268_v40  ;;  %11694 = vmatpush1.msra.mxu1 %v23269_v54  ;;  %v23275_v54 = vld [vmem:[#allocation105_spill] sm:$0xff] }
 0x9f2   :  { %15535 = vmatmul.mubr.f32.vlgmr.msra.gmra.mxu0 %v20389_v50  ;;  %11700 = vmatprep.subr.mxu1 %v23270_v53  ;;  %v23276_v50 = vld [vmem:[#allocation108_spill] sm:$0xff]  ;;  %v23277_v53 = vld [vmem:[#allocation114_spill] sm:$0xff] }
 0x9f3   :  { %11706 = vmatpush1.msra.mxu1 %v23271_v56  ;;  %11552 = vmatprep.subr.mxu0 %v23160_v47  ;;  %v23278_v56 = vld [vmem:[#allocation119_spill] sm:$0xff] }
 0x9f4   :  { %11712 = vmatprep.subr.mxu1 %v23272_v60  ;;  %11554 = vmatpush1.msra.mxu0 %v22355_v57  ;;  %v23279_v60 = vld [vmem:[#allocation120_spill] sm:$0xff] }
 0x9f5   :  { %11718 = vmatpush1.msra.mxu1 %v23273_v28  ;;  %11556 = vmatprep.subr.mxu0 %v22357_v1  ;;  %v23280_v28 = vld [vmem:[#allocation121_spill] sm:$0xff] }
 0x9f6   :  { %11724 = vmatprep.subr.mxu1 %v23274_v34  ;;  %11558 = vmatpush1.msra.mxu0 %v22361_v17  ;;  %v23281_v34 = vld [vmem:[#allocation126_spill] sm:$0xff] }
 0x9f7   :  { %11730 = vmatpush1.msra.mxu1 %v23275_v54  ;;  %11560 = vmatprep.subr.mxu0 %v22363_v37  ;;  %v23282_v54 = vld [vmem:[#allocation138_spill] sm:$0xff] }
 0x9f8   :  { %11736 = vmatprep.subr.mxu1 %v23276_v50  ;;  %11562 = vmatpush1.msra.mxu0 %v22365_v13  ;;  %v23283_v50 = vld [vmem:[#allocation141_spill] sm:$0xff] }
 0x9f9   :  { %11742 = vmatpush1.msra.mxu1 %v23277_v53  ;;  %11564 = vmatprep.subr.mxu0 %v22368_v42  ;;  %v23284_v53 = vld [vmem:[#allocation143_spill] sm:$0xff] }
 0x9fa   :  { %11748 = vmatprep.subr.mxu1 %v23278_v56  ;;  %11566 = vmatpush1.msra.mxu0 %v22370_v2  ;;  %v23285_v56 = vld [vmem:[#allocation144_spill] sm:$0xff] }
 0x9fb   :  { %11754 = vmatpush1.msra.mxu1 %v23279_v60  ;;  %11568 = vmatprep.subr.mxu0 %v22373_v31  ;;  %v23286_v60 = vld [vmem:[#allocation151_spill] sm:$0xff] }
 0x9fc   :  { %11760 = vmatprep.subr.mxu1 %v23280_v28  ;;  %11570 = vmatpush1.msra.mxu0 %v22376_v52  ;;  %v23287_v28 = vld [vmem:[#allocation156_spill] sm:$0xff] }
 0x9fd   :  { %11766 = vmatpush1.msra.mxu1 %v23281_v34  ;;  %11572 = vmatprep.subr.mxu0 %v22378_v8  ;;  %v23288_v34 = vld [vmem:[#allocation158_spill] sm:$0xff] }
 0x9fe   :  { %11772 = vmatprep.subr.mxu1 %v23282_v54  ;;  %11574 = vmatpush1.msra.mxu0 %v22380_v15  ;;  %v23289_v54 = vld [vmem:[#allocation160_spill] sm:$0xff] }
 0x9ff   :  { %11778 = vmatpush1.msra.mxu1 %v23283_v50  ;;  %11576 = vmatprep.subr.mxu0 %v22384_v22  ;;  %v23290_v50 = vld [vmem:[#allocation161_spill] sm:$0xff] }
 0xa00   :  { %11784 = vmatprep.subr.mxu1 %v23284_v53  ;;  %11578 = vmatpush1.msra.mxu0 %v22386_v4  ;;  %v23291_v53 = vld [vmem:[#allocation163_spill] sm:$0xff] }
 0xa01   :  { %11790 = vmatpush1.msra.mxu1 %v23285_v56  ;;  %11580 = vmatprep.subr.mxu0 %v22388_v33  ;;  %v23292_v56 = vld [vmem:[#allocation164_spill] sm:$0xff] }
 0xa02   :  { %11796 = vmatprep.subr.mxu1 %v23286_v60  ;;  %11582 = vmatpush1.msra.mxu0 %v22391_v48  ;;  %v23293_v60 = vld [vmem:[#allocation165_spill] sm:$0xff] }
 0xa03   :  { %11802 = vmatpush1.msra.mxu1 %v23287_v28  ;;  %11584 = vmatprep.subr.mxu0 %v22393_v18  ;;  %v23294_v28 = vld [vmem:[#allocation166_spill] sm:$0xff] }
 0xa04   :  { %11808 = vmatprep.subr.mxu1 %v23288_v34  ;;  %11586 = vmatpush1.msra.mxu0 %v22395_v44  ;;  %v23295_v34 = vld [vmem:[#allocation167_spill] sm:$0xff] }
 0xa05   :  { %11814 = vmatpush1.msra.mxu1 %v23289_v54  ;;  %11588 = vmatprep.subr.mxu0 %v22397_v61  ;;  %v23296_v54 = vld [vmem:[#allocation35_spill] sm:$0xff] }
 0xa06   :  { %11820 = vmatprep.subr.mxu1 %v23290_v50  ;;  %11590 = vmatpush1.msra.mxu0 %v22399_v0  ;;  %v10342_v50 = vpop.f32.mrf.mxu1 }
 0xa07   :  { %11826 = vmatpush1.msra.mxu1 %v23291_v53  ;;  %11592 = vmatprep.subr.mxu0 %v22614_v59 }
 0xa08   :  { %11832 = vmatprep.subr.mxu1 %v23292_v56  ;;  %11594 = vmatpush1.msra.mxu0 %v22616_v19  ;;  %v10344_v53 = vpop.f32.mrf.mxu1 }
 0xa09   :  { %11838 = vmatpush1.msra.mxu1 %v23293_v60  ;;  %11596 = vmatprep.subr.mxu0 %v22618_v25 }
 0xa0a   :  { %11844 = vmatprep.subr.mxu1 %v23294_v28  ;;  %11598 = vmatpush1.msra.mxu0 %v23142_v43  ;;  %v10110_v60 = vpop.f32.mrf.mxu0 }
 0xa0b   :  { %11850 = vmatpush1.msra.mxu1 %v23295_v34  ;;  %11600 = vmatprep.subr.mxu0 %v23144_v20  ;;  %v10111_v58 = vadd.f32 %v10110_v60, %v22598_v26  ;;  %v23299_v20 = vld [vmem:[#allocation18_spill] sm:$0xff] }
 0xa0c   :  { %11883 = vmatprep.mubr.f32.mxu1 %v21931_v9  ;;  %12029 = vmatprep.subr.mxu1 %v23160_v47  ;;  %v10112_v40 = vpop.f32.mrf.mxu0 }
 0xa0d   :  { %11602 = vmatpush1.msra.mxu0 %v23146_v16  ;;  %11647 = vmatprep.mubr.f32.mxu0 %v21931_v9  ;;  %v10343_v39 = vadd.f32 %v10342_v50, %v10111_v58  ;;  %v10113_v62 = vadd.f32 %v10112_v40, %v22599_v27  ;;  %v23301_v40 = vld [vmem:[#allocation168_spill] sm:$0xff] }
 0xa0e   :  { %11604 = vmatprep.subr.mxu0 %v23148_v36  ;;  %v23298_v36 = vld [vmem:[#allocation187_spill] sm:$0xff] }
 0xa0f   :  { %11606 = vmatpush1.msra.mxu0 %v23150_v29 }
 0xa10   :  { %11608 = vmatprep.subr.mxu0 %v23152_v63  ;;  %v23297_v63 = vld [vmem:[#allocation34_spill] sm:$0xff] }
 0xa11   :  { %11610 = vmatpush1.msra.mxu0 %v23154_v7  ;;  %v10345_v7 = vadd.f32 %v10344_v53, %v10113_v62  ;;  %v307_v29 = vadd.f32 %v23297_v63, %v22600_v32  ;;  %v23303_v53 = vld [vmem:[#allocation188_spill] sm:$0xff] }
 0xa12   :  { %11612 = vmatprep.subr.mxu0 %v23156_v14 }
 0xa13   :  { %11614 = vmatpush1.msra.mxu0 %v23158_v23 }
 0xa14   :  { %11893 = vmatprep.subr.mxu0 %v23296_v54 }
 0xa22   :  { %v10585_v56 = vpop.f32.mrf.mxu1 }
 0xa24   :  { %v10587_v28 = vpop.f32.mrf.mxu1 }
 0xa2b   :  { %v10479_v35 = vpop.f32.mrf.mxu0 }
 0xa2c   :  { %v10480_v54 = vadd.f32 %v10479_v35, %v10343_v39  ;;  %v23300_v35 = vld [vmem:[#allocation153_spill] sm:$0xff] }
 0xa2d   :  { %v10481_v46 = vpop.f32.mrf.mxu0 }
 0xa2e   :  { %v10586_v51 = vadd.f32 %v10585_v56, %v10480_v54 }
 0xa44   :  { %v10857_v34 = vpop.f32.mrf.mxu1 }
 0xa46   :  { %v10859_v5 = vpop.f32.mrf.mxu1 }
 0xa4d   :  { %v10753_v3 = vpop.f32.mrf.mxu0 }
 0xa4e   :  { %v10754_v49 = vadd.f32 %v10753_v3, %v10586_v51 }
 0xa4f   :  { %v10755_v24 = vpop.f32.mrf.mxu0 }
 0xa50   :  { %v10858_v23 = vadd.f32 %v10857_v34, %v10754_v49  ;;  %v23302_v49 = vld [vmem:[#allocation183_spill] sm:$0xff] }
 0xa52   :  { %v11503_v16 = vadd.f32 %v10858_v23, %v23298_v36 }
 0xa54   :  { %v13134_v43 = vmul.f32 -1.442695, %v11503_v16 }
 0xa56   :  { %15845 = vpow2.f32 %v13134_v43 }
 0xa63   :  { %v15846_v36 = vpop.eup %15845 }
 0xa66   :  { %v11100_v6 = vpop.f32.mrf.mxu1 }
 0xa68   :  { %v15431_v38 = vpop.f32.mrf.mxu1 }
 0xa69   :  { %v10482_v38 = vadd.f32 %v10481_v46, %v10345_v7 }
 0xa6b   :  { %v10588_v60 = vadd.f32 %v10587_v28, %v10482_v38 }
 0xa6d   :  { %v10756_v3 = vadd.f32 %v10755_v24, %v10588_v60 }
 0xa6f   :  { %v10949_v30 = vpop.f32.mrf.mxu0 }
 0xa70   :  { %v10950_v16 = vadd.f32 %v10949_v30, %v18603_v55 }
 0xa71   :  { %v15396_v11 = vpop.f32.mrf.mxu0 }
 0xa72   :  { %v585_v11 = vadd.f32 %v23299_v20, %v307_v29  ;;  %v11507_v20 = vadd.f32 1.0, %v15846_v36  ;;  %v11101_v23 = vadd.f32 %v11100_v6, %v10950_v16  ;;  %v23306_v16 = vld [vmem:[#allocation45_spill] sm:$0xff] }
 0xa74   :  { %v769_v39 = vadd.f32 %v23300_v35, %v585_v11 }
 0xa76   :  { %v928_v50 = vadd.f32 %v23301_v40, %v769_v39  ;;  %v23304_v39 = vld [vmem:[#allocation32_spill] sm:$0xff] }
 0xa78   :  { %v1140_v62 = vadd.f32 %v23302_v49, %v928_v50  ;;  %v11532_v49 = vpop.permute.xlu0 %11531 }
 0xa7a   :  { %v1286_v63 = vadd.f32 %v23303_v53, %v1140_v62 }
 0xa88   :  { %v11293_v47 = vpop.f32.mrf.mxu1 }
 0xa8a   :  { %v15501_v14 = vpop.f32.mrf.mxu1 }
 0xa8b   :  { %v10860_v14 = vadd.f32 %v10859_v5, %v10756_v3 }
 0xa8d   :  { %v11510_v46 = vadd.f32 %v10860_v14, %v1286_v63 }
 0xa8f   :  { %v13135_v7 = vmul.f32 -1.442695, %v11510_v46 }
 0xa91   :  { %v11204_v58 = vpop.f32.mrf.mxu0  ;;  %15847 = vpow2.f32 %v13135_v7 }
 0xa92   :  { %15849 = vrcp.f32 %v11507_v20  ;;  %v11205_v56 = vadd.f32 %v11204_v58, %v11101_v23  ;;  %v23305_v20 = vld [vmem:[#allocation37_spill] sm:$0xff] }
 0xa93   :  { %v15466_v51 = vpop.f32.mrf.mxu0  ;;  %v23312_v23 = vld [vmem:[#allocation69_spill] sm:$0xff] }
 0xa94   :  { %v11294_v34 = vadd.f32 %v11293_v47, %v11205_v56  ;;  %v11541_v47 = vpop.permute.xlu1 %11540  ;;  %v23314_v56 = vld [vmem:[#allocation80_spill] sm:$0xff] }
 0xa95   :  { %v11543_v14 = vmul.f32 %v11541_v47, %v20386_v21  ;;  %v23333_v47 = vld [vmem:[#allocation125_spill] sm:$0xff] }
 0xa9e   :  { %v15848_v28 = vpop.eup %15847 }
 0xa9f   :  { %v11514_v54 = vadd.f32 1.0, %v15848_v28  ;;  %v15850_v60 = vpop.eup %15849  ;;  %v23315_v28 = vld [vmem:[#allocation84_spill] sm:$0xff] }
 0xaa1   :  { %15851 = vrcp.f32 %v11514_v54  ;;  %v23318_v54 = vld [vmem:[#allocation110_spill] sm:$0xff] }
 0xaaa   :  { %v11499_v29 = vpop.f32.mrf.mxu1 }
 0xaac   :  { %v15571_v24 = vpop.f32.mrf.mxu1 }
 0xaad   :  { %v23313_v24 = vld [vmem:[#allocation79_spill] sm:$0xff] }
 0xaae   :  { %v15852_v51 = vpop.eup %15851 }
 0xaaf   :  { %v11520_v30 = vsub.f32 1.0, %v15852_v51  ;;  %v11522_v6 = vmul.f32 %v15852_v51, %v20386_v21  ;;  %v23326_v51 = vld [vmem:[#allocation128_spill] sm:$0xff] }
 0xab2   :  { %v11412_v43 = vpop.f32.mrf.mxu0 }
 0xab3   :  { %v11413_v38 = vadd.f32 %v11412_v43, %v11294_v34  ;;  %v23316_v34 = vld [vmem:[#allocation109_spill] sm:$0xff] }
 0xab4   :  { %v15536_v5 = vpop.f32.mrf.mxu0  ;;  %v23317_v43 = vld [vmem:[#allocation85_spill] sm:$0xff] }
 0xab5   :  { %v11500_v11 = vadd.f32 %v11499_v29, %v11413_v38  ;;  %v23311_v29 = vld [vmem:[#allocation65_spill] sm:$0xff]  ;;  %v23320_v5 = vld [vmem:[#allocation122_spill] sm:$0xff] }
 0xab6   :  { %v23319_v38 = vld [vmem:[#allocation89_spill] sm:$0xff] }
 0xab7   :  { %v11517_v35 = vmul.f32 %v15850_v60, %v11500_v11  ;;  %v23321_v11 = vld [vmem:[#allocation99_spill] sm:$0xff] }
 0xab8   :  { %v23322_v60 = vld [vmem:[#allocation123_spill] sm:$0xff] }
 0xab9   :  { %v11518_v3 = vadd.f32 %v11517_v35, %v23304_v39  ;;  %v23323_v35 = vld [vmem:[#allocation103_spill] sm:$0xff] }
 0xaba   :  { %v23324_v39 = vld [vmem:[#allocation127_spill] sm:$0xff] }
 0xabb   :  { %15853 = vtanh.f32 %v11518_v3  ;;  %v23325_v3 = vld [vmem:[#allocation104_spill] sm:$0xff] }
 0xac8   :  { %v15854_v40 = vpop.eup %15853 }
 0xac9   :  { %v11521_v50 = vmul.f32 %v15854_v40, %v11520_v30  ;;  %v23327_v30 = vld [vmem:[#allocation107_spill] sm:$0xff]  ;;  %v23328_v40 = vld [vmem:[#allocation130_spill] sm:$0xff] }
 0xacb   :  { %v11523_v58 = vadd.f32 %v11522_v6, %v11521_v50  ;;  %v23329_v6 = vld [vmem:[#allocation116_spill] sm:$0xff] }
 0xacc   :  { %v23330_v50 = vld [vmem:[#allocation132_spill] sm:$0xff] }
 0xacd   :  { %v11534_v62 = vmul.f32 %v11532_v49, %v11523_v58  ;;  %v23331_v58 = vld [vmem:[#allocation124_spill] sm:$0xff]  ;;  %v23332_v49 = vld [vmem:[#allocation139_spill] sm:$0xff] }
 0xacf   :  { %v20830_v53 = vadd.f32 %v11543_v14, %v11534_v62  ;;  %11536 = vst [vmem:[#allocation10 + $0x28] sm:$0xff] %v11534_v62  ;;  %v23334_v62 = vld [vmem:[#allocation29_spill] sm:$0xff]  ;;  %v23335_v14 = vld [vmem:[#allocation131_spill] sm:$0xff] }
 0xad1   :  { %v20833_v63 = vand.u32 4294901760, %v20830_v53 }
 0xad3   :  { %11885 = vmatmul.mubr.f32.vlgmr.msra.gmra.mxu1 %v20833_v63  ;;  %v20838_v46 = vsub.f32 %v20830_v53, %v20833_v63 }
 0xad4   :  { %12031 = vmatpush1.msra.mxu1 %v22355_v57  ;;  %12124 = vmatprep.mubr.f32.mxu1 %v21931_v9 }
 0xad5   :  { %12033 = vmatprep.subr.mxu1 %v22357_v1  ;;  %v20844_v21 = vand.u32 4294901760, %v20838_v46 }
 0xad6   :  { %12035 = vmatpush1.msra.mxu1 %v22361_v17 }
 0xad7   :  { %12037 = vmatprep.subr.mxu1 %v22363_v37  ;;  %v11651_v7 = vsub.f32 %v20838_v46, %v20844_v21 }
 0xad8   :  { %12039 = vmatpush1.msra.mxu1 %v22365_v13 }
 0xad9   :  { %12041 = vmatprep.subr.mxu1 %v22368_v42  ;;  %v20852_v36 = vand.u32 4294901760, %v11651_v7  ;;  %v23336_v7 = vld [vmem:[#allocation135_spill] sm:$0xff] }
 0xada   :  { %12043 = vmatpush1.msra.mxu1 %v22370_v2 }
 0xadb   :  { %12045 = vmatprep.subr.mxu1 %v22373_v31  ;;  %11653 = vmatmul.mubr.f32.vlgmr.msra.gmra.mxu0 %v20852_v36 }
 0xadc   :  { %11896 = vmatpush1.msra.mxu0 %v22435_v12  ;;  %12047 = vmatpush1.msra.mxu1 %v22376_v52  ;;  %v23307_v12 = vld [vmem:[#allocation48_spill] sm:$0xff] }
 0xadd   :  { %11899 = vmatprep.subr.mxu0 %v22436_v45  ;;  %12049 = vmatprep.subr.mxu1 %v22378_v8  ;;  %v23308_v45 = vld [vmem:[#allocation49_spill] sm:$0xff] }
 0xade   :  { %11902 = vmatpush1.msra.mxu0 %v22437_v10  ;;  %12051 = vmatpush1.msra.mxu1 %v22380_v15  ;;  %v23309_v10 = vld [vmem:[#allocation62_spill] sm:$0xff] }
 0xadf   :  { %11905 = vmatprep.subr.mxu0 %v22438_v41  ;;  %12053 = vmatprep.subr.mxu1 %v22384_v22  ;;  %v23310_v41 = vld [vmem:[#allocation64_spill] sm:$0xff] }
 0xae0   :  { %11908 = vmatpush1.msra.mxu0 %v23305_v20  ;;  %12055 = vmatpush1.msra.mxu1 %v22386_v4  ;;  %v23337_v20 = vld [vmem:[#allocation140_spill] sm:$0xff] }
 0xae1   :  { %11911 = vmatprep.subr.mxu0 %v23306_v16  ;;  %12057 = vmatprep.subr.mxu1 %v22388_v33  ;;  %v23338_v16 = vld [vmem:[#allocation142_spill] sm:$0xff] }
 0xae2   :  { %11914 = vmatpush1.msra.mxu0 %v23307_v12  ;;  %12059 = vmatpush1.msra.mxu1 %v22391_v48  ;;  %v23339_v12 = vld [vmem:[#allocation146_spill] sm:$0xff] }
 0xae3   :  { %11917 = vmatprep.subr.mxu0 %v23308_v45  ;;  %12061 = vmatprep.subr.mxu1 %v22393_v18  ;;  %v23340_v45 = vld [vmem:[#allocation148_spill] sm:$0xff] }
 0xae4   :  { %11920 = vmatpush1.msra.mxu0 %v23309_v10  ;;  %12063 = vmatpush1.msra.mxu1 %v22395_v44  ;;  %v23363_v10 = vld [vmem:[#allocation115_spill] sm:$0xff] }
 0xae5   :  { %11923 = vmatprep.subr.mxu0 %v23310_v41  ;;  %12065 = vmatprep.subr.mxu1 %v22397_v61  ;;  %v23364_v41 = vld [vmem:[#allocation129_spill] sm:$0xff] }
 0xae6   :  { %11926 = vmatpush1.msra.mxu0 %v23311_v29  ;;  %12067 = vmatpush1.msra.mxu1 %v22399_v0  ;;  %v23365_v29 = vld [vmem:[#allocation133_spill] sm:$0xff] }
 0xae7   :  { %11929 = vmatprep.subr.mxu0 %v23312_v23  ;;  %12069 = vmatprep.subr.mxu1 %v22614_v59  ;;  %v23366_v23 = vld [vmem:[#allocation134_spill] sm:$0xff] }
 0xae8   :  { %11932 = vmatpush1.msra.mxu0 %v23313_v24  ;;  %12071 = vmatpush1.msra.mxu1 %v22616_v19  ;;  %v23367_v24 = vld [vmem:[#allocation145_spill] sm:$0xff] }
 0xae9   :  { %11935 = vmatprep.subr.mxu0 %v23314_v56  ;;  %12073 = vmatprep.subr.mxu1 %v22618_v25  ;;  %v23368_v56 = vld [vmem:[#allocation210_spill] sm:$0xff] }
 0xaea   :  { %11938 = vmatpush1.msra.mxu0 %v23315_v28  ;;  %12075 = vmatpush1.msra.mxu1 %v23316_v34  ;;  %v23369_v28 = vld [vmem:[#allocation147_spill] sm:$0xff] }
 0xaeb   :  { %11941 = vmatprep.subr.mxu0 %v23317_v43  ;;  %12077 = vmatprep.subr.mxu1 %v23318_v54  ;;  %v23371_v43 = vld [vmem:[#allocation215_spill] sm:$0xff] }
 0xaec   :  { %11944 = vmatpush1.msra.mxu0 %v23319_v38  ;;  %12079 = vmatpush1.msra.mxu1 %v23320_v5  ;;  %v23373_v38 = vld [vmem:[#allocation155_spill] sm:$0xff] }
 0xaed   :  { %11947 = vmatprep.subr.mxu0 %v23321_v11  ;;  %12081 = vmatprep.subr.mxu1 %v23322_v60  ;;  %v23375_v11 = vld [vmem:[#allocation157_spill] sm:$0xff] }
 0xaee   :  { %11950 = vmatpush1.msra.mxu0 %v23323_v35  ;;  %12083 = vmatpush1.msra.mxu1 %v23324_v39  ;;  %v23377_v35 = vld [vmem:[#allocation222_spill] sm:$0xff] }
 0xaef   :  { %11953 = vmatprep.subr.mxu0 %v23325_v3  ;;  %12085 = vmatprep.subr.mxu1 %v23326_v51  ;;  %v23379_v3 = vld [vmem:[#allocation226_spill] sm:$0xff] }
 0xaf0   :  { %11956 = vmatpush1.msra.mxu0 %v23327_v30  ;;  %12087 = vmatpush1.msra.mxu1 %v23328_v40  ;;  %v23381_v30 = vld [vmem:[#allocation230_spill] sm:$0xff] }
 0xaf1   :  { %11959 = vmatprep.subr.mxu0 %v23329_v6  ;;  %12089 = vmatprep.subr.mxu1 %v23330_v50  ;;  %v23383_v6 = vld [vmem:[#allocation234_spill] sm:$0xff] }
 0xaf2   :  { %11962 = vmatpush1.msra.mxu0 %v23331_v58  ;;  %12091 = vmatpush1.msra.mxu1 %v23332_v49  ;;  %v23385_v58 = vld [vmem:[#allocation238_spill] sm:$0xff] }
 0xaf3   :  { %11965 = vmatprep.subr.mxu0 %v23333_v47  ;;  %12128 = vmatmul.mubr.f32.vlgmr.msra.gmra.mxu1 %v20844_v21  ;;  %v23387_v47 = vld [vmem:[#allocation242_spill] sm:$0xff] }
 0xaf4   :  { %12303 = vmatprep.subr.mxu1 %v23334_v62  ;;  %11968 = vmatpush1.msra.mxu0 %v23335_v14  ;;  %v23388_v62 = vld [vmem:[#allocation201_spill] sm:$0xff] }
 0xaf5   :  { %12305 = vmatpush1.msra.mxu1 %v22355_v57  ;;  %11971 = vmatprep.subr.mxu0 %v23336_v7  ;;  %v23341_v57 = vld [vmem:[#allocation150_spill] sm:$0xff]  ;;  %v23389_v14 = vld [vmem:[#allocation245_spill] sm:$0xff] }
 0xaf6   :  { %12307 = vmatprep.subr.mxu1 %v22357_v1  ;;  %11974 = vmatpush1.msra.mxu0 %v23337_v20  ;;  %v23342_v1 = vld [vmem:[#allocation23_spill] sm:$0xff]  ;;  %v23390_v7 = vld [vmem:[#allocation205_spill] sm:$0xff]  ;;  %v23391_v20 = vld [vmem:[#allocation248_spill] sm:$0xff] }
 0xaf7   :  { %12309 = vmatpush1.msra.mxu1 %v22361_v17  ;;  %11977 = vmatprep.subr.mxu0 %v23338_v16  ;;  %v23344_v17 = vld [vmem:[#allocation26_spill] sm:$0xff]  ;;  %v23392_v16 = vld [vmem:[#allocation209_spill] sm:$0xff] }
 0xaf8   :  { %12311 = vmatprep.subr.mxu1 %v22363_v37  ;;  %11980 = vmatpush1.msra.mxu0 %v23339_v12  ;;  %v23343_v37 = vld [vmem:[#allocation40_spill] sm:$0xff]  ;;  %v23393_v12 = vld [vmem:[#allocation250_spill] sm:$0xff] }
 0xaf9   :  { %12313 = vmatpush1.msra.mxu1 %v22365_v13  ;;  %11983 = vmatprep.subr.mxu0 %v23340_v45  ;;  %v23345_v13 = vld [vmem:[#allocation16_spill] sm:$0xff]  ;;  %v23394_v45 = vld [vmem:[#allocation211_spill] sm:$0xff] }
 0xafa   :  { %12315 = vmatprep.subr.mxu1 %v22368_v42  ;;  %11986 = vmatpush1.msra.mxu0 %v23341_v57  ;;  %v23346_v42 = vld [vmem:[#allocation43_spill] sm:$0xff]  ;;  %v23395_v57 = vld [vmem:[#allocation252_spill] sm:$0xff] }
 0xafb   :  { %12019 = vmatprep.mubr.f32.mxu0 %v21931_v9  ;;  %12317 = vmatpush1.msra.mxu1 %v22370_v2  ;;  %v23347_v2 = vld [vmem:[#allocation54_spill] sm:$0xff] }
 0xafc   :  { %12022 = vmatmul.mubr.f32.vlgmr.msra.gmra.mxu0 %v20838_v46  ;;  %12137 = vmatprep.subr.mxu0 %v23342_v1  ;;  %v23396_v1 = vld [vmem:[#allocation216_spill] sm:$0xff] }
 0xafd   :  { %12319 = vmatprep.subr.mxu1 %v22373_v31  ;;  %12141 = vmatpush1.msra.mxu0 %v23343_v37  ;;  %v23348_v31 = vld [vmem:[#allocation17_spill] sm:$0xff] }
 0xafe   :  { %12321 = vmatpush1.msra.mxu1 %v22376_v52  ;;  %12145 = vmatprep.subr.mxu0 %v23344_v17  ;;  %v23349_v52 = vld [vmem:[#allocation59_spill] sm:$0xff]  ;;  %v23397_v37 = vld [vmem:[#allocation253_spill] sm:$0xff] }
 0xaff   :  { %12323 = vmatprep.subr.mxu1 %v22378_v8  ;;  %12149 = vmatpush1.msra.mxu0 %v23345_v13  ;;  %v23350_v8 = vld [vmem:[#allocation61_spill] sm:$0xff]  ;;  %v23398_v17 = vld [vmem:[#allocation219_spill] sm:$0xff]  ;;  %v23399_v13 = vld [vmem:[#allocation254_spill] sm:$0xff] }
 0xb00   :  { %12325 = vmatpush1.msra.mxu1 %v22380_v15  ;;  %12153 = vmatprep.subr.mxu0 %v23346_v42  ;;  %v23351_v15 = vld [vmem:[#allocation73_spill] sm:$0xff]  ;;  %v23400_v42 = vld [vmem:[#allocation223_spill] sm:$0xff] }
 0xb01   :  { %12327 = vmatprep.subr.mxu1 %v22384_v22  ;;  %12157 = vmatpush1.msra.mxu0 %v23347_v2  ;;  %v23352_v22 = vld [vmem:[#allocation76_spill] sm:$0xff]  ;;  %v23401_v2 = vld [vmem:[#allocation255_spill] sm:$0xff] }
 0xb02   :  { %12329 = vmatpush1.msra.mxu1 %v22386_v4  ;;  %12161 = vmatprep.subr.mxu0 %v23348_v31  ;;  %v23353_v4 = vld [vmem:[#allocation77_spill] sm:$0xff] }
 0xb03   :  { %12331 = vmatprep.subr.mxu1 %v22388_v33  ;;  %12165 = vmatpush1.msra.mxu0 %v23349_v52  ;;  %v23354_v33 = vld [vmem:[#allocation78_spill] sm:$0xff]  ;;  %v23402_v31 = vld [vmem:[#allocation229_spill] sm:$0xff] }
 0xb04   :  { %12333 = vmatpush1.msra.mxu1 %v22391_v48  ;;  %12169 = vmatprep.subr.mxu0 %v23350_v8  ;;  %v23355_v48 = vld [vmem:[#allocation93_spill] sm:$0xff]  ;;  %v23404_v8 = vld [vmem:[#allocation236_spill] sm:$0xff] }
 0xb05   :  { %12335 = vmatprep.subr.mxu1 %v22393_v18  ;;  %12173 = vmatpush1.msra.mxu0 %v23351_v15  ;;  %v23356_v18 = vld [vmem:[#allocation94_spill] sm:$0xff]  ;;  %v23403_v52 = vld [vmem:[#allocation233_spill] sm:$0xff]  ;;  %v23405_v15 = vld [vmem:[#allocation240_spill] sm:$0xff] }
 0xb06   :  { %12337 = vmatpush1.msra.mxu1 %v22395_v44  ;;  %12177 = vmatprep.subr.mxu0 %v23352_v22  ;;  %v23357_v44 = vld [vmem:[#allocation95_spill] sm:$0xff]  ;;  %v23406_v22 = vld [vmem:[#allocation194_spill] sm:$0xff] }
 0xb07   :  { %12339 = vmatprep.subr.mxu1 %v22397_v61  ;;  %12181 = vmatpush1.msra.mxu0 %v23353_v4  ;;  %v23358_v61 = vld [vmem:[#allocation96_spill] sm:$0xff]  ;;  %v23407_v4 = vld [vmem:[#allocation197_spill] sm:$0xff] }
 0xb08   :  { %12341 = vmatpush1.msra.mxu1 %v22399_v0  ;;  %12185 = vmatprep.subr.mxu0 %v23354_v33  ;;  %v23359_v0 = vld [vmem:[#allocation98_spill] sm:$0xff] }
 0xb09   :  { %12343 = vmatprep.subr.mxu1 %v22614_v59  ;;  %12189 = vmatpush1.msra.mxu0 %v23355_v48  ;;  %v23360_v59 = vld [vmem:[#allocation111_spill] sm:$0xff]  ;;  %v23409_v33 = vld [vmem:[#allocation202_spill] sm:$0xff] }
 0xb0a   :  { %12345 = vmatpush1.msra.mxu1 %v22616_v19  ;;  %12193 = vmatprep.subr.mxu0 %v23356_v18  ;;  %v23361_v19 = vld [vmem:[#allocation112_spill] sm:$0xff]  ;;  %v23410_v48 = vld [vmem:[#allocation206_spill] sm:$0xff] }
 0xb0b   :  { %12347 = vmatprep.subr.mxu1 %v22618_v25  ;;  %12197 = vmatpush1.msra.mxu0 %v23357_v44  ;;  %v23362_v25 = vld [vmem:[#allocation113_spill] sm:$0xff]  ;;  %v23411_v18 = vld [vmem:[#allocation208_spill] sm:$0xff] }
 0xb0c   :  { %12349 = vmatpush1.msra.mxu1 %v23316_v34  ;;  %12201 = vmatprep.subr.mxu0 %v23358_v61  ;;  %v23370_v34 = vld [vmem:[#allocation149_spill] sm:$0xff] }
 0xb0d   :  { %12351 = vmatprep.subr.mxu1 %v23318_v54  ;;  %12205 = vmatpush1.msra.mxu0 %v23359_v0  ;;  %v23372_v54 = vld [vmem:[#allocation152_spill] sm:$0xff]  ;;  %v23412_v44 = vld [vmem:[#allocation213_spill] sm:$0xff] }
 0xb0e   :  { %12353 = vmatpush1.msra.mxu1 %v23320_v5  ;;  %12209 = vmatprep.subr.mxu0 %v23360_v59  ;;  %v23374_v5 = vld [vmem:[#allocation218_spill] sm:$0xff]  ;;  %v23413_v61 = vld [vmem:[#allocation217_spill] sm:$0xff] }
 0xb0f   :  { %12355 = vmatprep.subr.mxu1 %v23322_v60  ;;  %12213 = vmatpush1.msra.mxu0 %v23361_v19  ;;  %v23376_v60 = vld [vmem:[#allocation159_spill] sm:$0xff]  ;;  %v23414_v0 = vld [vmem:[#allocation221_spill] sm:$0xff]  ;;  %v23416_v19 = vld [vmem:[#allocation228_spill] sm:$0xff] }
 0xb10   :  { %12357 = vmatpush1.msra.mxu1 %v23324_v39  ;;  %12217 = vmatprep.subr.mxu0 %v23362_v25  ;;  %v23378_v39 = vld [vmem:[#allocation191_spill] sm:$0xff]  ;;  %v23415_v59 = vld [vmem:[#allocation225_spill] sm:$0xff]  ;;  %v23417_v25 = vld [vmem:[#allocation232_spill] sm:$0xff] }
 0xb11   :  { %12359 = vmatprep.subr.mxu1 %v23326_v51  ;;  %12221 = vmatpush1.msra.mxu0 %v23363_v10  ;;  %v23380_v51 = vld [vmem:[#allocation192_spill] sm:$0xff]  ;;  %v23418_v10 = vld [vmem:[#allocation237_spill] sm:$0xff] }
 0xb12   :  { %12361 = vmatpush1.msra.mxu1 %v23328_v40  ;;  %12225 = vmatprep.subr.mxu0 %v23364_v41  ;;  %v23382_v40 = vld [vmem:[#allocation193_spill] sm:$0xff] }
 0xb13   :  { %12363 = vmatprep.subr.mxu1 %v23330_v50  ;;  %12229 = vmatpush1.msra.mxu0 %v23365_v29  ;;  %v23384_v50 = vld [vmem:[#allocation196_spill] sm:$0xff]  ;;  %v23419_v41 = vld [vmem:[#allocation241_spill] sm:$0xff] }
 0xb14   :  { %12365 = vmatpush1.msra.mxu1 %v23332_v49  ;;  %12398 = vmatprep.mubr.f32.mxu1 %v21931_v9  ;;  %v23386_v49 = vld [vmem:[#allocation200_spill] sm:$0xff] }
 0xb15   :  { %12233 = vmatprep.subr.mxu0 %v23366_v23  ;;  %12400 = vmatmul.mubr.f32.vlgmr.msra.gmra.mxu1 %v20833_v63  ;;  %v23420_v29 = vld [vmem:[#allocation244_spill] sm:$0xff]  ;;  %v23422_v23 = vld [vmem:[#allocation198_spill] sm:$0xff] }
 0xb16   :  { %15607 = vmatprep.subr.mxu1 %v21931_v9  ;;  %12237 = vmatpush1.msra.mxu0 %v23367_v24  ;;  %v23423_v24 = vld [vmem:[#allocation203_spill] sm:$0xff] }
 0xb17   :  { %15608 = vmatpush3.msra.mxu1 %v23368_v56  ;;  %12241 = vmatprep.subr.mxu0 %v23369_v28  ;;  %v23425_v56 = vld [vmem:[#allocation207_spill] sm:$0xff]  ;;  %v23426_v28 = vld [vmem:[#allocation212_spill] sm:$0xff] }
 0xb18   :  { %15609 = vmatprep.subr.mxu1 %v21931_v9  ;;  %12245 = vmatpush1.msra.mxu0 %v23370_v34  ;;  %v23427_v34 = vld [vmem:[#allocation214_spill] sm:$0xff] }
 0xb19   :  { %15610 = vmatpush3.msra.mxu1 %v23371_v43  ;;  %12249 = vmatprep.subr.mxu0 %v23372_v54  ;;  %v23428_v43 = vld [vmem:[#allocation220_spill] sm:$0xff] }
 0xb1a   :  { %15611 = vmatprep.subr.mxu1 %v21931_v9  ;;  %12253 = vmatpush1.msra.mxu0 %v23373_v38  ;;  %v23429_v54 = vld [vmem:[#allocation224_spill] sm:$0xff]  ;;  %v23430_v38 = vld [vmem:[#allocation227_spill] sm:$0xff] }
 0xb1b   :  { %15612 = vmatpush3.msra.mxu1 %v23374_v5  ;;  %12257 = vmatprep.subr.mxu0 %v23375_v11  ;;  %v23431_v5 = vld [vmem:[#allocation231_spill] sm:$0xff] }
 0xb1c   :  { %15613 = vmatprep.subr.mxu1 %v21931_v9  ;;  %12261 = vmatpush1.msra.mxu0 %v23376_v60  ;;  %v23432_v11 = vld [vmem:[#allocation235_spill] sm:$0xff] }
 0xb1d   :  { %12294 = vmatprep.mubr.f32.mxu0 %v21931_v9  ;;  %15614 = vmatpush3.msra.mxu1 %v23377_v35  ;;  %v23433_v60 = vld [vmem:[#allocation239_spill] sm:$0xff] }
 0xb1e   :  { %12296 = vmatmul.mubr.f32.vlgmr.msra.gmra.mxu0 %v20833_v63  ;;  %15572 = vmatprep.subr.mxu0 %v21931_v9  ;;  %v23434_v35 = vld [vmem:[#allocation243_spill] sm:$0xff] }
 0xb1f   :  { %15615 = vmatprep.subr.mxu1 %v21931_v9  ;;  %15573 = vmatpush3.msra.mxu0 %v23378_v39 }
 0xb20   :  { %15616 = vmatpush3.msra.mxu1 %v23379_v3  ;;  %15574 = vmatprep.subr.mxu0 %v21931_v9  ;;  %v23436_v3 = vld [vmem:[#allocation249_spill] sm:$0xff] }
 0xb21   :  { %15617 = vmatprep.subr.mxu1 %v21931_v9  ;;  %15575 = vmatpush3.msra.mxu0 %v23380_v51 }
 0xb22   :  { %15618 = vmatpush3.msra.mxu1 %v23381_v30  ;;  %15576 = vmatprep.subr.mxu0 %v21931_v9 }
 0xb23   :  { %15619 = vmatprep.subr.mxu1 %v21931_v9  ;;  %15577 = vmatpush3.msra.mxu0 %v23382_v40 }
 0xb24   :  { %15620 = vmatpush3.msra.mxu1 %v23383_v6  ;;  %15578 = vmatprep.subr.mxu0 %v21931_v9 }
 0xb25   :  { %15621 = vmatprep.subr.mxu1 %v21931_v9  ;;  %15579 = vmatpush3.msra.mxu0 %v23384_v50 }
 0xb26   :  { %15622 = vmatpush3.msra.mxu1 %v23385_v58  ;;  %15580 = vmatprep.subr.mxu0 %v21931_v9 }
 0xb27   :  { %15623 = vmatprep.subr.mxu1 %v21931_v9  ;;  %15581 = vmatpush3.msra.mxu0 %v23386_v49 }
 0xb28   :  { %15624 = vmatpush3.msra.mxu1 %v23387_v47  ;;  %15582 = vmatprep.subr.mxu0 %v21931_v9 }
 0xb29   :  { %15625 = vmatprep.subr.mxu1 %v21931_v9  ;;  %15583 = vmatpush3.msra.mxu0 %v23388_v62 }
 0xb2a   :  { %15626 = vmatpush3.msra.mxu1 %v23389_v14  ;;  %15584 = vmatprep.subr.mxu0 %v21931_v9 }
 0xb2b   :  { %15627 = vmatprep.subr.mxu1 %v21931_v9  ;;  %15585 = vmatpush3.msra.mxu0 %v23390_v7 }
 0xb2c   :  { %15628 = vmatpush3.msra.mxu1 %v23391_v20  ;;  %15586 = vmatprep.subr.mxu0 %v21931_v9 }
 0xb2d   :  { %15629 = vmatprep.subr.mxu1 %v21931_v9  ;;  %15587 = vmatpush3.msra.mxu0 %v23392_v16 }
 0xb2e   :  { %15630 = vmatpush3.msra.mxu1 %v23393_v12  ;;  %15588 = vmatprep.subr.mxu0 %v21931_v9 }
 0xb2f   :  { %15631 = vmatprep.subr.mxu1 %v21931_v9  ;;  %15589 = vmatpush3.msra.mxu0 %v23394_v45 }
 0xb30   :  { %15632 = vmatpush3.msra.mxu1 %v23395_v57  ;;  %15590 = vmatprep.subr.mxu0 %v21931_v9 }
 0xb31   :  { %15633 = vmatprep.subr.mxu1 %v21931_v9  ;;  %15591 = vmatpush3.msra.mxu0 %v23396_v1 }
 0xb32   :  { %15634 = vmatpush3.msra.mxu1 %v23397_v37  ;;  %15592 = vmatprep.subr.mxu0 %v21931_v9 }
 0xb33   :  { %15635 = vmatprep.subr.mxu1 %v21931_v9  ;;  %15593 = vmatpush3.msra.mxu0 %v23398_v17 }
 0xb34   :  { %15636 = vmatpush3.msra.mxu1 %v23399_v13  ;;  %15594 = vmatprep.subr.mxu0 %v21931_v9 }
 0xb35   :  { %15637 = vmatprep.subr.mxu1 %v21931_v9  ;;  %15595 = vmatpush3.msra.mxu0 %v23400_v42 }
 0xb36   :  { %15638 = vmatpush3.msra.mxu1 %v23401_v2  ;;  %15639 = vmatprep.mubr.msk.f32.mxu1 %vm15962_vm0, %v21931_v9 }
 0xb37   :  { %15596 = vmatprep.subr.mxu0 %v21931_v9  ;;  %15640 = vmatmul.mubr.f32.vlgmr.msra.gmra.mxu1 %v20833_v63 }
 0xb38   :  { %15677 = vmatprep.subr.mxu1 %v21931_v9  ;;  %15597 = vmatpush3.msra.mxu0 %v23402_v31 }
 0xb39   :  { %15678 = vmatpush3.msra.mxu1 %v23378_v39  ;;  %15598 = vmatprep.subr.mxu0 %v21931_v9 }
 0xb3a   :  { %15679 = vmatprep.subr.mxu1 %v21931_v9  ;;  %15599 = vmatpush3.msra.mxu0 %v23403_v52 }
 0xb3b   :  { %15680 = vmatpush3.msra.mxu1 %v23380_v51  ;;  %15600 = vmatprep.subr.mxu0 %v21931_v9 }
 0xb3c   :  { %15681 = vmatprep.subr.mxu1 %v21931_v9  ;;  %15601 = vmatpush3.msra.mxu0 %v23404_v8 }
 0xb3d   :  { %15682 = vmatpush3.msra.mxu1 %v23382_v40  ;;  %15602 = vmatprep.subr.mxu0 %v21931_v9 }
 0xb3e   :  { %15683 = vmatprep.subr.mxu1 %v21931_v9  ;;  %15603 = vmatpush3.msra.mxu0 %v23405_v15 }
 0xb3f   :  { %15604 = vmatprep.mubr.msk.f32.mxu0 %vm15962_vm0, %v21931_v9  ;;  %15684 = vmatpush3.msra.mxu1 %v23384_v50 }
 0xb40   :  { %15605 = vmatmul.mubr.f32.vlgmr.msra.gmra.mxu0 %v20852_v36  ;;  %15642 = vmatprep.subr.mxu0 %v21931_v9  ;;  %v23408_v36 = vld [vmem:[#allocation199_spill] sm:$0xff] }
 0xb41   :  { %15685 = vmatprep.subr.mxu1 %v21931_v9  ;;  %15643 = vmatpush3.msra.mxu0 %v23406_v22 }
 0xb42   :  { %15686 = vmatpush3.msra.mxu1 %v23386_v49  ;;  %15644 = vmatprep.subr.mxu0 %v21931_v9 }
 0xb43   :  { %15687 = vmatprep.subr.mxu1 %v21931_v9  ;;  %15645 = vmatpush3.msra.mxu0 %v23407_v4 }
 0xb44   :  { %15688 = vmatpush3.msra.mxu1 %v23388_v62  ;;  %15646 = vmatprep.subr.mxu0 %v21931_v9 }
 0xb45   :  { %15689 = vmatprep.subr.mxu1 %v21931_v9  ;;  %15647 = vmatpush3.msra.mxu0 %v23408_v36  ;;  %v23439_v36 = vld [vmem:[#allocation190_spill] sm:$0xff] }
 0xb46   :  { %15690 = vmatpush3.msra.mxu1 %v23390_v7  ;;  %15648 = vmatprep.subr.mxu0 %v21931_v9 }
 0xb47   :  { %15691 = vmatprep.subr.mxu1 %v21931_v9  ;;  %15649 = vmatpush3.msra.mxu0 %v23409_v33 }
 0xb48   :  { %15692 = vmatpush3.msra.mxu1 %v23392_v16  ;;  %15650 = vmatprep.subr.mxu0 %v21931_v9 }
 0xb49   :  { %15693 = vmatprep.subr.mxu1 %v21931_v9  ;;  %15651 = vmatpush3.msra.mxu0 %v23410_v48  ;;  %v23440_v48 = vld [vmem:[#allocation81_spill] sm:$0xff] }
 0xb4a   :  { %15694 = vmatpush3.msra.mxu1 %v23394_v45  ;;  %15652 = vmatprep.subr.mxu0 %v21931_v9 }
 0xb4b   :  { %15695 = vmatprep.subr.mxu1 %v21931_v9  ;;  %15653 = vmatpush3.msra.mxu0 %v23411_v18 }
 0xb4c   :  { %15696 = vmatpush3.msra.mxu1 %v23396_v1  ;;  %15654 = vmatprep.subr.mxu0 %v21931_v9 }
 0xb4d   :  { %15697 = vmatprep.subr.mxu1 %v21931_v9  ;;  %15655 = vmatpush3.msra.mxu0 %v23412_v44 }
 0xb4e   :  { %15698 = vmatpush3.msra.mxu1 %v23398_v17  ;;  %15656 = vmatprep.subr.mxu0 %v21931_v9 }
 0xb4f   :  { %15699 = vmatprep.subr.mxu1 %v21931_v9  ;;  %15657 = vmatpush3.msra.mxu0 %v23413_v61 }
 0xb50   :  { %15700 = vmatpush3.msra.mxu1 %v23400_v42  ;;  %15658 = vmatprep.subr.mxu0 %v21931_v9 }
 0xb51   :  { %15701 = vmatprep.subr.mxu1 %v21931_v9  ;;  %15659 = vmatpush3.msra.mxu0 %v23414_v0  ;;  %v23441_v0 = vld [vmem:[#allocation169_spill] sm:$0xff] }
 0xb52   :  { %15702 = vmatpush3.msra.mxu1 %v23402_v31  ;;  %15660 = vmatprep.subr.mxu0 %v21931_v9 }
 0xb53   :  { %15703 = vmatprep.subr.mxu1 %v21931_v9  ;;  %15661 = vmatpush3.msra.mxu0 %v23415_v59 }
 0xb54   :  { %15704 = vmatpush3.msra.mxu1 %v23403_v52  ;;  %15662 = vmatprep.subr.mxu0 %v21931_v9 }
 0xb55   :  { %15705 = vmatprep.subr.mxu1 %v21931_v9  ;;  %15663 = vmatpush3.msra.mxu0 %v23416_v19 }
 0xb56   :  { %15706 = vmatpush3.msra.mxu1 %v23404_v8  ;;  %15664 = vmatprep.subr.mxu0 %v21931_v9 }
 0xb57   :  { %15707 = vmatprep.subr.mxu1 %v21931_v9  ;;  %15665 = vmatpush3.msra.mxu0 %v23417_v25 }
 0xb58   :  { %15708 = vmatpush3.msra.mxu1 %v23405_v15  ;;  %15709 = vmatprep.mubr.msk.f32.mxu1 %vm15962_vm0, %v21931_v9 }
 0xb59   :  { %15666 = vmatprep.subr.mxu0 %v21931_v9  ;;  %15710 = vmatmul.mubr.f32.vlgmr.msra.gmra.mxu1 %v20844_v21  ;;  %v23421_v21 = vld [vmem:[#allocation247_spill] sm:$0xff] }
 0xb5a   :  { %15747 = vmatprep.subr.mxu1 %v21931_v9  ;;  %15667 = vmatpush3.msra.mxu0 %v23418_v10 }
 0xb5b   :  { %15748 = vmatpush3.msra.mxu1 %v23378_v39  ;;  %15668 = vmatprep.subr.mxu0 %v21931_v9  ;;  %v23435_v39 = vld [vmem:[#allocation246_spill] sm:$0xff] }
 0xb5c   :  { %15749 = vmatprep.subr.mxu1 %v21931_v9  ;;  %15669 = vmatpush3.msra.mxu0 %v23419_v41  ;;  %v23443_v41 = vld [vmem:[#allocation189_spill] sm:$0xff] }
 0xb5d   :  { %15750 = vmatpush3.msra.mxu1 %v23380_v51  ;;  %15670 = vmatprep.subr.mxu0 %v21931_v9  ;;  %v23437_v51 = vld [vmem:[#allocation251_spill] sm:$0xff] }
 0xb5e   :  { %15751 = vmatprep.subr.mxu1 %v21931_v9  ;;  %15671 = vmatpush3.msra.mxu0 %v23420_v29 }
 0xb5f   :  { %15752 = vmatpush3.msra.mxu1 %v23382_v40  ;;  %15672 = vmatprep.subr.mxu0 %v21931_v9 }
 0xb60   :  { %15753 = vmatprep.subr.mxu1 %v21931_v9  ;;  %15673 = vmatpush3.msra.mxu0 %v23421_v21 }
 0xb61   :  { %15674 = vmatprep.mubr.msk.f32.mxu0 %vm15962_vm0, %v21931_v9  ;;  %15754 = vmatpush3.msra.mxu1 %v23384_v50 }
 0xb62   :  { %15675 = vmatmul.mubr.f32.vlgmr.msra.gmra.mxu0 %v20838_v46  ;;  %15712 = vmatprep.subr.mxu0 %v21931_v9  ;;  %v23424_v46 = vld [vmem:[#allocation204_spill] sm:$0xff] }
 0xb63   :  { %15755 = vmatprep.subr.mxu1 %v21931_v9  ;;  %15713 = vmatpush3.msra.mxu0 %v23422_v23  ;;  %v23444_v23 = vld [vmem:[#allocation195_spill] sm:$0xff] }
 0xb64   :  { %15756 = vmatpush3.msra.mxu1 %v23386_v49  ;;  %15714 = vmatprep.subr.mxu0 %v21931_v9 }
 0xb65   :  { %15757 = vmatprep.subr.mxu1 %v21931_v9  ;;  %15715 = vmatpush3.msra.mxu0 %v23423_v24 }
 0xb66   :  { %15758 = vmatpush3.msra.mxu1 %v23388_v62  ;;  %15716 = vmatprep.subr.mxu0 %v21931_v9 }
 0xb67   :  { %15759 = vmatprep.subr.mxu1 %v21931_v9  ;;  %15717 = vmatpush3.msra.mxu0 %v23424_v46 }
 0xb68   :  { %15760 = vmatpush3.msra.mxu1 %v23390_v7  ;;  %15718 = vmatprep.subr.mxu0 %v21931_v9 }
 0xb69   :  { %15761 = vmatprep.subr.mxu1 %v21931_v9  ;;  %15719 = vmatpush3.msra.mxu0 %v23425_v56 }
 0xb6a   :  { %15762 = vmatpush3.msra.mxu1 %v23392_v16  ;;  %15720 = vmatprep.subr.mxu0 %v21931_v9 }
 0xb6b   :  { %15763 = vmatprep.subr.mxu1 %v21931_v9  ;;  %15721 = vmatpush3.msra.mxu0 %v23426_v28 }
 0xb6c   :  { %15764 = vmatpush3.msra.mxu1 %v23394_v45  ;;  %15722 = vmatprep.subr.mxu0 %v21931_v9 }
 0xb6d   :  { %15765 = vmatprep.subr.mxu1 %v21931_v9  ;;  %15723 = vmatpush3.msra.mxu0 %v23427_v34 }
 0xb6e   :  { %15766 = vmatpush3.msra.mxu1 %v23396_v1  ;;  %15724 = vmatprep.subr.mxu0 %v21931_v9 }
 0xb6f   :  { %15767 = vmatprep.subr.mxu1 %v21931_v9  ;;  %15725 = vmatpush3.msra.mxu0 %v23428_v43 }
 0xb70   :  { %15768 = vmatpush3.msra.mxu1 %v23398_v17  ;;  %15726 = vmatprep.subr.mxu0 %v21931_v9 }
 0xb71   :  { %15769 = vmatprep.subr.mxu1 %v21931_v9  ;;  %15727 = vmatpush3.msra.mxu0 %v23429_v54 }
 0xb72   :  { %15770 = vmatpush3.msra.mxu1 %v23400_v42  ;;  %15728 = vmatprep.subr.mxu0 %v21931_v9 }
 0xb73   :  { %15771 = vmatprep.subr.mxu1 %v21931_v9  ;;  %15729 = vmatpush3.msra.mxu0 %v23430_v38 }
 0xb74   :  { %15772 = vmatpush3.msra.mxu1 %v23402_v31  ;;  %15730 = vmatprep.subr.mxu0 %v21931_v9 }
 0xb75   :  { %15773 = vmatprep.subr.mxu1 %v21931_v9  ;;  %15731 = vmatpush3.msra.mxu0 %v23431_v5 }
 0xb76   :  { %15774 = vmatpush3.msra.mxu1 %v23403_v52  ;;  %15732 = vmatprep.subr.mxu0 %v21931_v9 }
 0xb77   :  { %15775 = vmatprep.subr.mxu1 %v21931_v9  ;;  %15733 = vmatpush3.msra.mxu0 %v23432_v11 }
 0xb78   :  { %15776 = vmatpush3.msra.mxu1 %v23404_v8  ;;  %15734 = vmatprep.subr.mxu0 %v21931_v9 }
 0xb79   :  { %15777 = vmatprep.subr.mxu1 %v21931_v9  ;;  %15735 = vmatpush3.msra.mxu0 %v23433_v60 }
 0xb7a   :  { %15778 = vmatpush3.msra.mxu1 %v23405_v15  ;;  %15779 = vmatprep.mubr.msk.f32.mxu1 %vm15962_vm0, %v21931_v9  ;;  %v23438_v15 = vld [vmem:[#allocation46_spill] sm:$0xff] }
 0xb7b   :  { %15736 = vmatprep.subr.mxu0 %v21931_v9  ;;  %15780 = vmatmul.mubr.f32.vlgmr.msra.gmra.mxu1 %v20833_v63  ;;  %v318_v22 = vadd.f32 %v23438_v15, %v22600_v32 }
 0xb7c   :  { %15737 = vmatpush3.msra.mxu0 %v23434_v35  ;;  %15744 = vmatprep.mubr.msk.f32.mxu0 %vm15962_vm0, %v21931_v9 }
 0xb7d   :  { %15738 = vmatprep.subr.mxu0 %v21931_v9  ;;  %v592_v18 = vadd.f32 %v23440_v48, %v318_v22 }
 0xb7e   :  { %15739 = vmatpush3.msra.mxu0 %v23435_v39 }
 0xb7f   :  { %15740 = vmatprep.subr.mxu0 %v21931_v9  ;;  %v777_v59 = vadd.f32 %v23441_v0, %v592_v18 }
 0xb80   :  { %15741 = vmatpush3.msra.mxu0 %v23436_v3 }
 0xb81   :  { %15742 = vmatprep.subr.mxu0 %v21931_v9 }
 0xb82   :  { %15743 = vmatpush3.msra.mxu0 %v23437_v51 }
 0xb83   :  { %15745 = vmatmul.mubr.f32.vlgmr.msra.gmra.mxu0 %v20833_v63 }
 0xb93   :  { %v11886_v30 = vpop.f32.mrf.mxu1 }
 0xb95   :  { %v11888_v40 = vpop.f32.mrf.mxu1 }
 0xb9b   :  { %v11654_v50 = vpop.f32.mrf.mxu0 }
 0xb9c   :  { %v11655_v1 = vadd.f32 %v11654_v50, %v22598_v26  ;;  %v23445_v50 = vld [vmem:[#allocation33_spill] sm:$0xff] }
 0xb9d   :  { %v11656_v47 = vpop.f32.mrf.mxu0 }
 0xb9e   :  { %v11887_v37 = vadd.f32 %v11886_v30, %v11655_v1  ;;  %v11657_v42 = vadd.f32 %v11656_v47, %v22599_v27  ;;  %v23442_v27 = vld [vmem:[#allocation172_spill] sm:$0xff] }
 0xb9f   :  { %v937_v10 = vadd.f32 %v23442_v27, %v777_v59 }
 0xba0   :  { %v11889_v8 = vadd.f32 %v11888_v40, %v11657_v42 }
 0xba1   :  { %v1147_v29 = vadd.f32 %v23443_v41, %v937_v10 }
 0xba3   :  { %v1293_v32 = vadd.f32 %v23444_v23, %v1147_v29 }
 0xbb3   :  { %v12129_v6 = vpop.f32.mrf.mxu1 }
 0xbb5   :  { %v12131_v58 = vpop.f32.mrf.mxu1 }
 0xbbc   :  { %v12023_v62 = vpop.f32.mrf.mxu0 }
 0xbbd   :  { %v12024_v63 = vadd.f32 %v12023_v62, %v11887_v37 }
 0xbbe   :  { %v12025_v20 = vpop.f32.mrf.mxu0 }
 0xbbf   :  { %v12130_v17 = vadd.f32 %v12129_v6, %v12024_v63  ;;  %v12026_v4 = vadd.f32 %v12025_v20, %v11889_v8  ;;  %v13076_v20 = vpop.permute.xlu0 %13075 }
 0xbc1   :  { %v12132_v26 = vadd.f32 %v12131_v58, %v12026_v4 }
 0xbd5   :  { %v12401_v49 = vpop.f32.mrf.mxu1 }
 0xbd7   :  { %v12403_v14 = vpop.f32.mrf.mxu1 }
 0xbde   :  { %v12297_v12 = vpop.f32.mrf.mxu0 }
 0xbdf   :  { %v12298_v13 = vadd.f32 %v12297_v12, %v12130_v17 }
 0xbe0   :  { %v12299_v45 = vpop.f32.mrf.mxu0 }
 0xbe1   :  { %v12402_v31 = vadd.f32 %v12401_v49, %v12298_v13  ;;  %v12300_v19 = vadd.f32 %v12299_v45, %v12132_v26 }
 0xbe3   :  { %v13047_v33 = vadd.f32 %v12402_v31, %v23439_v36  ;;  %v12404_v21 = vadd.f32 %v12403_v14, %v12300_v19 }
 0xbe5   :  { %v13138_v44 = vmul.f32 -1.442695, %v13047_v33  ;;  %v13054_v24 = vadd.f32 %v12404_v21, %v1293_v32 }
 0xbe7   :  { %15855 = vpow2.f32 %v13138_v44  ;;  %v13139_v46 = vmul.f32 -1.442695, %v13054_v24 }
 0xbe9   :  { %15857 = vpow2.f32 %v13139_v46 }
 0xbf4   :  { %v15856_v56 = vpop.eup %15855 }
 0xbf5   :  { %v13051_v28 = vadd.f32 1.0, %v15856_v56 }
 0xbf6   :  { %v15858_v11 = vpop.eup %15857 }
 0xbf7   :  { %v12644_v7 = vpop.f32.mrf.mxu1  ;;  %15859 = vrcp.f32 %v13051_v28  ;;  %v13058_v39 = vadd.f32 1.0, %v15858_v11 }
 0xbf9   :  { %v15641_v16 = vpop.f32.mrf.mxu1  ;;  %15861 = vrcp.f32 %v13058_v39 }
 0xc00   :  { %v12493_v57 = vpop.f32.mrf.mxu0 }
 0xc01   :  { %v12494_v34 = vadd.f32 %v12493_v57, %v18603_v55 }
 0xc02   :  { %v15606_v9 = vpop.f32.mrf.mxu0 }
 0xc03   :  { %v12645_v54 = vadd.f32 %v12644_v7, %v12494_v34 }
 0xc04   :  { %v15860_v40 = vpop.eup %15859 }
 0xc06   :  { %v15862_v49 = vpop.eup %15861 }
 0xc07   :  { %v13064_v55 = vsub.f32 1.0, %v15862_v49  ;;  %v13066_v62 = vmul.f32 %v15862_v49, %v20830_v53 }
 0xc19   :  { %v12837_v2 = vpop.f32.mrf.mxu1 }
 0xc1b   :  { %v15711_v52 = vpop.f32.mrf.mxu1 }
 0xc22   :  { %v12748_v61 = vpop.f32.mrf.mxu0 }
 0xc23   :  { %v12749_v5 = vadd.f32 %v12748_v61, %v12645_v54 }
 0xc24   :  { %v15676_v25 = vpop.f32.mrf.mxu0 }
 0xc25   :  { %v12838_v60 = vadd.f32 %v12837_v2, %v12749_v5 }
 0xc3b   :  { %v13043_v43 = vpop.f32.mrf.mxu1 }
 0xc3d   :  { %v15781_v38 = vpop.f32.mrf.mxu1 }
 0xc43   :  { %v12956_v35 = vpop.f32.mrf.mxu0 }
 0xc44   :  { %v12957_v3 = vadd.f32 %v12956_v35, %v12838_v60 }
 0xc45   :  { %v15746_v51 = vpop.f32.mrf.mxu0 }
 0xc46   :  { %v13044_v30 = vadd.f32 %v13043_v43, %v12957_v3 }
 0xc48   :  { %v13061_v6 = vmul.f32 %v15860_v40, %v13044_v30 }
 0xc4a   :  { %v13062_v58 = vadd.f32 %v13061_v6, %v23445_v50 }
 0xc4c   :  { %15863 = vtanh.f32 %v13062_v58 }
 0xc59   :  { %v15864_v47 = vpop.eup %15863 }
 0xc5a   :  { %v13065_v14 = vmul.f32 %v15864_v47, %v13064_v55 }
 0xc5c   :  { %v13067_v7 = vadd.f32 %v13066_v62, %v13065_v14 }
 0xc5e   :  { %v13078_v16 = vmul.f32 %v13076_v20, %v13067_v7 }
 0xc60   :  { %13080 = vst [vmem:[#allocation10 + $0x30] sm:$0xff] %v13078_v16 }
 0xc61   :  { %15939 = shalt.err (!%p15936_p5)
}
 0xc62   :  { %13101 = dma.vmem_to_hbm [thread:$0]  %s13096_s28, 896, %s21218_s7, [#allocation6], %s15958_s11, %s15958_s11, %s15959_s12  }
 0xc63   :  { %15952 = dma.done.wait [#allocation6], 896  }
 0xc64   :  { %15953 = vsyncadd [#allocation6], 4294966400 }
 0xc65   :  { %13105 = vsyncpa [#allocation5], 1 }
 0xc66   :  { %13106 = vsyncpa [#allocation8], 1 }
 0xc67   :  { %13107 = vsyncpa [#allocation6], 1 }

</bundles_post_ra>
